<compile_context>
chip_gen: v7x
topology: tpu7x:2x2x1
jax: 0.10.0
libtpu: 0.0.40
codegen_flags: <defaults>
</compile_context>

<pallas_src>
import functools

import jax
import jax.numpy as jnp
from jax.experimental import pallas as pl
from jax.experimental.pallas import tpu as pltpu

jax.config.update("jax_default_matmul_precision", "highest")


def _gelu_tanh(v):
    # tanh-approximate GELU (same formula used in kernel and reference).
    return 0.5 * v * (1.0 + jnp.tanh(0.7978845608028654 * (v + 0.044715 * v * v * v)))


# ---------------------------------------------------------------------------
# Kernel 1: fused SpatialGate
#   channel-pool (max, mean over C) -> 7x7 conv (2->1, BN folded) -> sigmoid
#   -> multiply with the input.  One grid step per batch element.
# ---------------------------------------------------------------------------
def _spatial_gate_kernel(x_ref, w_ref, b_ref, o_ref, buf_ref, *, ksize, pad):
    hh, ww = x_ref.shape[2], x_ref.shape[3]
    x = x_ref[0]                                        # (C, H, W), f32

    # ChannelPool: torch.cat([max over C, mean over C], dim=1)
    ch_max = jnp.max(x, axis=0)                         # (H, W)
    ch_mean = jnp.mean(x, axis=0)                       # (H, W)

    # Zero-padded pooled maps built in VMEM scratch (conv padding done here).
    buf_ref[...] = jnp.zeros(buf_ref.shape, buf_ref.dtype)
    buf_ref[0, pad:pad + hh, pad:pad + ww] = ch_max
    buf_ref[1, pad:pad + hh, pad:pad + ww] = ch_mean

    # 7x7 conv, Cout=1: shifted-window scalar FMAs (weights have BN scale
    # folded in, bias is the folded BN shift).  relu=False in this BasicConv.
    acc = jnp.zeros((hh, ww), jnp.float32) + b_ref[0]
    for ci in range(2):
        for i in range(ksize):
            for j in range(ksize):
                wij = w_ref[ci * ksize * ksize + i * ksize + j]
                acc = acc + wij * buf_ref[ci, i:i + hh, j:j + ww]

    scale = 1.0 / (1.0 + jnp.exp(-acc))                 # sigmoid, (H, W)
    o_ref[0] = (x * scale[None, :, :]).astype(o_ref.dtype)


def spatial_gate(x4, conv_w, bn_gamma, bn_beta, bn_mean, bn_var, *, eps=1e-5):
    """x4: (B, C, H, W) -> x4 * sigmoid(BN(conv7x7(ChannelPool(x4))))."""
    b, c, h, w = x4.shape
    cout, cin, kh, kw = conv_w.shape
    assert cout == 1 and cin == 2 and kh == kw
    pad = (kh - 1) // 2

    inv_std = 1.0 / jnp.sqrt(bn_var.astype(jnp.float32) + eps)
    bn_scale = bn_gamma.astype(jnp.float32) * inv_std                      # (1,)
    w_folded = (conv_w.astype(jnp.float32)
                * bn_scale[:, None, None, None]).reshape(-1)               # (2*kh*kw,)
    bias = bn_beta.astype(jnp.float32) - bn_mean.astype(jnp.float32) * bn_scale

    kernel = functools.partial(_spatial_gate_kernel, ksize=kh, pad=pad)
    return pl.pallas_call(
        kernel,
        out_shape=jax.ShapeDtypeStruct(x4.shape, x4.dtype),
        grid=(b,),
        in_specs=[
            pl.BlockSpec((1, c, h, w), lambda i: (i, 0, 0, 0)),
            pl.BlockSpec(memory_space=pltpu.MemorySpace.SMEM),   # folded conv weight
            pl.BlockSpec(memory_space=pltpu.MemorySpace.SMEM),   # folded BN bias
        ],
        out_specs=pl.BlockSpec((1, c, h, w), lambda i: (i, 0, 0, 0)),
        scratch_shapes=[pltpu.VMEM((2, h + 2 * pad, w + 2 * pad), jnp.float32)],
        compiler_params=pltpu.CompilerParams(dimension_semantics=("parallel",)),
    )(x4.astype(jnp.float32), w_folded, bias)


# ---------------------------------------------------------------------------
# Kernel 2: row-blocked LayerNorm over the last (feature) axis.
# ---------------------------------------------------------------------------
def _layernorm_kernel(x_ref, g_ref, b_ref, o_ref, *, eps):
    x = x_ref[...].astype(jnp.float32)                  # (bm, F)
    mu = jnp.mean(x, axis=1, keepdims=True)
    xc = x - mu
    var = jnp.mean(xc * xc, axis=1, keepdims=True)
    y = xc * jax.lax.rsqrt(var + eps)
    o_ref[...] = (y * g_ref[...] + b_ref[...]).astype(o_ref.dtype)


def _row_block(rows, cap=512):
    bm = min(cap, ((rows + 7) // 8) * 8)                # sublane-aligned row block
    rows_p = ((rows + bm - 1) // bm) * bm
    return bm, rows_p


def layer_norm(x2, gamma, beta, *, eps=1e-5):
    rows, feat = x2.shape
    bm, rows_p = _row_block(rows)
    xp = jnp.pad(x2, ((0, rows_p - rows), (0, 0))) if rows_p != rows else x2
    out = pl.pallas_call(
        functools.partial(_layernorm_kernel, eps=eps),
        out_shape=jax.ShapeDtypeStruct((rows_p, feat), x2.dtype),
        grid=(rows_p // bm,),
        in_specs=[
            pl.BlockSpec((bm, feat), lambda i: (i, 0)),
            pl.BlockSpec((1, feat), lambda i: (0, 0)),
            pl.BlockSpec((1, feat), lambda i: (0, 0)),
        ],
        out_specs=pl.BlockSpec((bm, feat), lambda i: (i, 0)),
        compiler_params=pltpu.CompilerParams(dimension_semantics=("parallel",)),
    )(xp, gamma.reshape(1, feat), beta.reshape(1, feat))
    return out[:rows]


# ---------------------------------------------------------------------------
# Kernel 3: fused MLP block  y = fc2(gelu(fc1(x)))  (weights stationary).
# ---------------------------------------------------------------------------
def _mlp_kernel(x_ref, w1_ref, b1_ref, w2_ref, b2_ref, o_ref):
    x = x_ref[...]                                                     # (bm, F)
    h = jnp.dot(x, w1_ref[...], preferred_element_type=jnp.float32) + b1_ref[...]
    h = _gelu_tanh(h)
    y = jnp.dot(h, w2_ref[...], preferred_element_type=jnp.float32) + b2_ref[...]
    o_ref[...] = y.astype(o_ref.dtype)


def mlp(x2, w1, b1, w2, b2):
    rows, feat = x2.shape
    hid = w1.shape[1]
    bm, rows_p = _row_block(rows)
    xp = jnp.pad(x2, ((0, rows_p - rows), (0, 0))) if rows_p != rows else x2
    flops = 2 * rows_p * feat * hid * 2
    bytes_acc = 4 * (2 * rows_p * feat + 2 * feat * hid + hid + feat)
    out = pl.pallas_call(
        _mlp_kernel,
        out_shape=jax.ShapeDtypeStruct((rows_p, feat), x2.dtype),
        grid=(rows_p // bm,),
        in_specs=[
            pl.BlockSpec((bm, feat), lambda i: (i, 0)),
            pl.BlockSpec((feat, hid), lambda i: (0, 0)),
            pl.BlockSpec((1, hid), lambda i: (0, 0)),
            pl.BlockSpec((hid, feat), lambda i: (0, 0)),
            pl.BlockSpec((1, feat), lambda i: (0, 0)),
        ],
        out_specs=pl.BlockSpec((bm, feat), lambda i: (i, 0)),
        compiler_params=pltpu.CompilerParams(dimension_semantics=("parallel",)),
        cost_estimate=pl.CostEstimate(flops=flops, transcendentals=rows_p * hid,
                                      bytes_accessed=bytes_acc),
    )(xp, w1, b1.reshape(1, hid), w2, b2.reshape(1, feat))
    return out[:rows]


# ---------------------------------------------------------------------------
# ChannelGate (tiny; plain-JAX glue).  TODO(synk): fuse into a Pallas kernel.
# ---------------------------------------------------------------------------
def channel_gate(x4, w1, b1, w2, b2):
    avg = jnp.mean(x4, axis=(2, 3))                     # (B, C)
    mx = jnp.max(x4, axis=(2, 3))                       # (B, C)

    def _m(v):
        return jnp.maximum(v @ w1 + b1, 0.0) @ w2 + b2

    scale = jax.nn.sigmoid(_m(avg) + _m(mx))            # (B, C)
    return x4 * scale[:, :, None, None]


# ---------------------------------------------------------------------------
# Full ARM_Mixer forward (att_type='None').
# ---------------------------------------------------------------------------
def arm_mixer_forward(x, p, *, eps=1e-5):
    b, c, h, w = x.shape
    hw = h * w
    residual0 = x

    patches = jnp.transpose(x, (0, 2, 3, 1)).reshape(b, hw, c)        # (B, HW, C)

    # -------------------- TokenMixer --------------------
    t_res = patches
    xr = patches.reshape(b, c, h, w)                    # torch uses a raw reshape here
    xg = spatial_gate(xr, p['sg_conv_w'], p['sg_bn_gamma'], p['sg_bn_beta'],
                      p['sg_bn_mean'], p['sg_bn_var'], eps=eps)
    xg = jnp.transpose(xg, (0, 2, 3, 1)).reshape(b, hw, c)
    x_pre = patches + xg
    xn = layer_norm(x_pre.reshape(b * hw, c), p['tok_ln_g'], p['tok_ln_b'],
                    eps=eps).reshape(b, hw, c)
    xt = jnp.transpose(xn, (0, 2, 1)).reshape(b * c, hw)               # MLP over tokens
    xm = mlp(xt, p['tok_w1'], p['tok_b1'], p['tok_w2'], p['tok_b2'])
    xm = jnp.transpose(xm.reshape(b, c, hw), (0, 2, 1))
    tok = xm + t_res

    # -------------------- ChannelMixer --------------------
    c_res = tok
    yr = tok.reshape(b, c, h, w)
    yg = channel_gate(yr, p['cg_w1'], p['cg_b1'], p['cg_w2'], p['cg_b2'])
    yg = jnp.transpose(yg, (0, 2, 3, 1)).reshape(b, hw, c)
    y_pre = tok + yg
    yn = layer_norm(y_pre.reshape(b * hw, c), p['ch_ln_g'], p['ch_ln_b'],
                    eps=eps).reshape(b, hw, c)
    ym = mlp(yn.reshape(b * hw, c), p['ch_w1'], p['ch_b1'], p['ch_w2'],
             p['ch_b2']).reshape(b, hw, c)
    ch = ym + c_res

    emb = ch.reshape(b, c, h, w)
    return emb + residual0                              # att_type='None'


# ---------------------------------------------------------------------------
# Parameters and pure-JAX reference
# ---------------------------------------------------------------------------
def init_params(key, *, channels, image_size, expansion_factor=3, reduction_ratio=16):
    c, hw = channels, image_size * image_size
    cr = max(1, channels // reduction_ratio)
    ks = jax.random.split(key, 21)
    n = lambda k, shape, s=1.0: s * jax.random.normal(k, shape, dtype=jnp.float32)
    return dict(
        sg_conv_w=n(ks[0], (1, 2, 7, 7), 0.1),
        sg_bn_gamma=1.0 + n(ks[1], (1,), 0.1),
        sg_bn_beta=n(ks[2], (1,), 0.1),
        sg_bn_mean=n(ks[3], (1,), 0.05),
        sg_bn_var=jnp.abs(1.0 + n(ks[4], (1,), 0.1)),
        tok_ln_g=1.0 + n(ks[5], (c,), 0.1),
        tok_ln_b=n(ks[6], (c,), 0.1),
        tok_w1=n(ks[7], (hw, expansion_factor * hw), hw ** -0.5),
        tok_b1=n(ks[8], (expansion_factor * hw,), 0.1),
        tok_w2=n(ks[9], (expansion_factor * hw, hw), (expansion_factor * hw) ** -0.5),
        tok_b2=n(ks[10], (hw,), 0.1),
        cg_w1=n(ks[11], (c, cr), c ** -0.5),
        cg_b1=n(ks[12], (cr,), 0.1),
        cg_w2=n(ks[13], (cr, c), cr ** -0.5),
        cg_b2=n(ks[14], (c,), 0.1),
        ch_ln_g=1.0 + n(ks[15], (c,), 0.1),
        ch_ln_b=n(ks[16], (c,), 0.1),
        ch_w1=n(ks[17], (c, expansion_factor * c), c ** -0.5),
        ch_b1=n(ks[18], (expansion_factor * c,), 0.1),
        ch_w2=n(ks[19], (expansion_factor * c, c), (expansion_factor * c) ** -0.5),
        ch_b2=n(ks[20], (c,), 0.1),
    )


def _reference(x, p, *, eps=1e-5):
    b, c, h, w = x.shape
    hw = h * w

    def ln(v, g, bb):
        mu = jnp.mean(v, axis=-1, keepdims=True)
        var = jnp.mean((v - mu) ** 2, axis=-1, keepdims=True)
        return (v - mu) * jax.lax.rsqrt(var + eps) * g + bb

    def mlp_ref(v, w1, b1, w2, b2):
        return _gelu_tanh(v @ w1 + b1) @ w2 + b2

    patches = jnp.transpose(x, (0, 2, 3, 1)).reshape(b, hw, c)

    # TokenMixer
    xr = patches.reshape(b, c, h, w)
    pooled = jnp.concatenate([jnp.max(xr, axis=1, keepdims=True),
                              jnp.mean(xr, axis=1, keepdims=True)], axis=1)
    conv = jax.lax.conv_general_dilated(
        pooled, p['sg_conv_w'], (1, 1), [(3, 3), (3, 3)],
        dimension_numbers=("NCHW", "OIHW", "NCHW"),
        precision=jax.lax.Precision.HIGHEST)
    inv_std = 1.0 / jnp.sqrt(p['sg_bn_var'] + eps)
    conv = (conv * (p['sg_bn_gamma'] * inv_std)[None, :, None, None]
            + (p['sg_bn_beta'] - p['sg_bn_mean'] * p['sg_bn_gamma'] * inv_std
               )[None, :, None, None])
    xg = xr * jax.nn.sigmoid(conv)
    xg = jnp.transpose(xg, (0, 2, 3, 1)).reshape(b, hw, c)
    x_pre = patches + xg
    xn = ln(x_pre, p['tok_ln_g'], p['tok_ln_b'])
    xm = mlp_ref(jnp.transpose(xn, (0, 2, 1)),
                 p['tok_w1'], p['tok_b1'], p['tok_w2'], p['tok_b2'])
    tok = jnp.transpose(xm, (0, 2, 1)) + patches

    # ChannelMixer
    yr = tok.reshape(b, c, h, w)
    avg = jnp.mean(yr, axis=(2, 3))
    mxv = jnp.max(yr, axis=(2, 3))

    def gmlp(v):
        return jnp.maximum(v @ p['cg_w1'] + p['cg_b1'], 0.0) @ p['cg_w2'] + p['cg_b2']

    yg = yr * jax.nn.sigmoid(gmlp(avg) + gmlp(mxv))[:, :, None, None]
    yg = jnp.transpose(yg, (0, 2, 3, 1)).reshape(b, hw, c)
    y_pre = tok + yg
    yn = ln(y_pre, p['ch_ln_g'], p['ch_ln_b'])
    ym = mlp_ref(yn, p['ch_w1'], p['ch_b1'], p['ch_w2'], p['ch_b2'])
    ch = ym + tok

    return ch.reshape(b, c, h, w) + x


if __name__ == "__main__":
    # ARM_Mixer(image_size=8, num_features=32) on a (2, 32, 8, 8) input.
    B, C, IMG = 2, 32, 8
    key = jax.random.PRNGKey(0)
    kx, kp = jax.random.split(key)
    x = jax.random.normal(kx, (B, C, IMG, IMG), dtype=jnp.float32)
    params = init_params(kp, channels=C, image_size=IMG)

    fwd = jax.jit(arm_mixer_forward)
    out = jax.block_until_ready(fwd(x, params))
    assert out.shape == (B, C, IMG, IMG)

    ref = _reference(x, params)
    err = float(jnp.max(jnp.abs(out - ref)))
    assert jnp.allclose(out, ref, atol=2e-3, rtol=2e-3), f"mismatch vs reference: {err}"

    print("KERNEL_OK")
</pallas_src>

<mosaic_0001>
module attributes {stable_mosaic.version = 11 : i64} {
  func.func @_layernorm_kernel(%arg0: i32, %arg1: memref<128x32xf32, #tpu.memory_space<vmem>>, %arg2: memref<1x32xf32, #tpu.memory_space<vmem>>, %arg3: memref<1x32xf32, #tpu.memory_space<vmem>>, %arg4: memref<128x32xf32, #tpu.memory_space<vmem>>) attributes {dimension_semantics = [#tpu.dimension_semantics<parallel>], iteration_bounds = array<i64: 1>, scalar_prefetch = 0 : i64, scratch_operands = 0 : i64, tpu.core_type = #tpu.core_type<tc>, window_params = [{transform_indices = @transform_0, window_bounds = array<i64: 128, 32>}, {pipeline_mode = #tpu.pipeline_mode<synchronous>, transform_indices = @transform_1, window_bounds = array<i64: 1, 32>}, {pipeline_mode = #tpu.pipeline_mode<synchronous>, transform_indices = @transform_2, window_bounds = array<i64: 1, 32>}, {transform_indices = @transform_3, window_bounds = array<i64: 128, 32>}]} {
    %c0 = arith.constant 0 : index
    %c0_0 = arith.constant 0 : index
    %0 = vector.load %arg1[%c0, %c0_0] : memref<128x32xf32, #tpu.memory_space<vmem>>, vector<128x32xf32>
    %cst = arith.constant dense<0.000000e+00> : vector<128xf32>
    %1 = vector.multi_reduction <add>, %0, %cst [1] : vector<128x32xf32> to vector<128xf32>
    %2 = vector.shape_cast %1 : vector<128xf32> to vector<128x1xf32>
    %cst_1 = arith.constant 3.200000e+01 : f32
    %3 = vector.broadcast %cst_1 : f32 to vector<128x1xf32>
    %4 = arith.divf %2, %3 : vector<128x1xf32>
    %5 = vector.broadcast %4 : vector<128x1xf32> to vector<128x32xf32>
    %6 = arith.subf %0, %5 : vector<128x32xf32>
    %7 = arith.mulf %6, %6 : vector<128x32xf32>
    %cst_2 = arith.constant dense<0.000000e+00> : vector<128xf32>
    %8 = vector.multi_reduction <add>, %7, %cst_2 [1] : vector<128x32xf32> to vector<128xf32>
    %9 = vector.shape_cast %8 : vector<128xf32> to vector<128x1xf32>
    %cst_3 = arith.constant 3.200000e+01 : f32
    %10 = vector.broadcast %cst_3 : f32 to vector<128x1xf32>
    %11 = arith.divf %9, %10 : vector<128x1xf32>
    %cst_4 = arith.constant 9.99999974E-6 : f32
    %12 = vector.broadcast %cst_4 : f32 to vector<128x1xf32>
    %13 = arith.addf %11, %12 : vector<128x1xf32>
    %14 = math.rsqrt %13 : vector<128x1xf32>
    %15 = vector.broadcast %14 : vector<128x1xf32> to vector<128x32xf32>
    %16 = arith.mulf %6, %15 : vector<128x32xf32>
    %c0_5 = arith.constant 0 : index
    %c0_6 = arith.constant 0 : index
    %17 = vector.load %arg2[%c0_5, %c0_6] : memref<1x32xf32, #tpu.memory_space<vmem>>, vector<1x32xf32>
    %18 = vector.broadcast %17 : vector<1x32xf32> to vector<128x32xf32>
    %19 = arith.mulf %16, %18 : vector<128x32xf32>
    %c0_7 = arith.constant 0 : index
    %c0_8 = arith.constant 0 : index
    %20 = vector.load %arg3[%c0_7, %c0_8] : memref<1x32xf32, #tpu.memory_space<vmem>>, vector<1x32xf32>
    %21 = vector.broadcast %20 : vector<1x32xf32> to vector<128x32xf32>
    %22 = arith.addf %19, %21 : vector<128x32xf32>
    %c0_9 = arith.constant 0 : index
    %c0_10 = arith.constant 0 : index
    %23 = vector.load %arg4[%c0_9, %c0_10] : memref<128x32xf32, #tpu.memory_space<vmem>>, vector<128x32xf32>
    tpu.vector_store %arg4[%c0_9, %c0_10], %22 {strides = array<i32>} : memref<128x32xf32, #tpu.memory_space<vmem>>, vector<128x32xf32>,
    return
  }
  func.func @transform_0(%arg0: i32) -> (i32, i32) {
    %c0_i32 = arith.constant 0 : i32
    %c0_i32_0 = arith.constant 0 : i32
    return %arg0, %c0_i32 : i32, i32
  }
  func.func @transform_1(%arg0: i32) -> (i32, i32) {
    %c0_i32 = arith.constant 0 : i32
    %c0_i32_0 = arith.constant 0 : i32
    %c0_i32_1 = arith.constant 0 : i32
    return %c0_i32, %c0_i32_0 : i32, i32
  }
  func.func @transform_2(%arg0: i32) -> (i32, i32) {
    %c0_i32 = arith.constant 0 : i32
    %c0_i32_0 = arith.constant 0 : i32
    %c0_i32_1 = arith.constant 0 : i32
    return %c0_i32, %c0_i32_0 : i32, i32
  }
  func.func @transform_3(%arg0: i32) -> (i32, i32) {
    %c0_i32 = arith.constant 0 : i32
    %c0_i32_0 = arith.constant 0 : i32
    return %arg0, %c0_i32 : i32, i32
  }
}

module attributes {stable_mosaic.version = 11 : i64} {
  func.func @_spatial_gate_kernel(%arg0: i32, %arg1: memref<1x32x8x8xf32, #tpu.memory_space<vmem>>, %arg2: memref<98xf32, #tpu.memory_space<smem>>, %arg3: memref<1xf32, #tpu.memory_space<smem>>, %arg4: memref<1x32x8x8xf32, #tpu.memory_space<vmem>>, %arg5: memref<2x14x14xf32, #tpu.memory_space<vmem>>) attributes {dimension_semantics = [#tpu.dimension_semantics<parallel>], iteration_bounds = array<i64: 2>, scalar_prefetch = 0 : i64, scratch_operands = 1 : i64, tpu.core_type = #tpu.core_type<tc>, window_params = [{transform_indices = @transform_0, window_bounds = array<i64: 1, 32, 8, 8>}, {transform_indices = @transform_1, window_bounds = array<i64: 98>}, {transform_indices = @transform_2, window_bounds = array<i64: 1>}, {transform_indices = @transform_3, window_bounds = array<i64: 1, 32, 8, 8>}]} {
    %c0 = arith.constant 0 : index
    %c0_0 = arith.constant 0 : index
    %c0_1 = arith.constant 0 : index
    %c0_2 = arith.constant 0 : index
    %0 = vector.load %arg1[%c0, %c0_0, %c0_1, %c0_2] : memref<1x32x8x8xf32, #tpu.memory_space<vmem>>, vector<1x32x8x8xf32>
    %1 = vector.shape_cast %0 : vector<1x32x8x8xf32> to vector<32x8x8xf32>
    %cst = arith.constant dense<0xFF800000> : vector<8x8xf32>
    %2 = vector.multi_reduction <maximumf>, %1, %cst [0] : vector<32x8x8xf32> to vector<8x8xf32>
    %cst_3 = arith.constant dense<0.000000e+00> : vector<8x8xf32>
    %3 = vector.multi_reduction <add>, %1, %cst_3 [0] : vector<32x8x8xf32> to vector<8x8xf32>
    %cst_4 = arith.constant 3.200000e+01 : f32
    %4 = vector.broadcast %cst_4 : f32 to vector<8x8xf32>
    %5 = arith.divf %3, %4 : vector<8x8xf32>
    %cst_5 = arith.constant 0.000000e+00 : f32
    %6 = vector.broadcast %cst_5 : f32 to vector<2x14x14xf32>
    %c0_6 = arith.constant 0 : index
    %c0_7 = arith.constant 0 : index
    %c0_8 = arith.constant 0 : index
    %7 = vector.load %arg5[%c0_6, %c0_7, %c0_8] : memref<2x14x14xf32, #tpu.memory_space<vmem>>, vector<2x14x14xf32>
    tpu.vector_store %arg5[%c0_6, %c0_7, %c0_8], %6 {strides = array<i32>} : memref<2x14x14xf32, #tpu.memory_space<vmem>>, vector<2x14x14xf32>,
    %c0_9 = arith.constant 0 : index
    %c3 = arith.constant 3 : index
    %c3_10 = arith.constant 3 : index
    %8 = vector.load %arg5[%c0_9, %c3, %c3_10] : memref<2x14x14xf32, #tpu.memory_space<vmem>>, vector<1x8x8xf32>
    %9 = vector.shape_cast %8 : vector<1x8x8xf32> to vector<8x8xf32>
    %10 = vector.shape_cast %2 : vector<8x8xf32> to vector<1x8x8xf32>
    tpu.vector_store %arg5[%c0_9, %c3, %c3_10], %10 {strides = array<i32>} : memref<2x14x14xf32, #tpu.memory_space<vmem>>, vector<1x8x8xf32>,
    %c1 = arith.constant 1 : index
    %c3_11 = arith.constant 3 : index
    %c3_12 = arith.constant 3 : index
    %11 = vector.load %arg5[%c1, %c3_11, %c3_12] : memref<2x14x14xf32, #tpu.memory_space<vmem>>, vector<1x8x8xf32>
    %12 = vector.shape_cast %11 : vector<1x8x8xf32> to vector<8x8xf32>
    %13 = vector.shape_cast %5 : vector<8x8xf32> to vector<1x8x8xf32>
    tpu.vector_store %arg5[%c1, %c3_11, %c3_12], %13 {strides = array<i32>} : memref<2x14x14xf32, #tpu.memory_space<vmem>>, vector<1x8x8xf32>,
    %cst_13 = arith.constant 0.000000e+00 : f32
    %14 = vector.broadcast %cst_13 : f32 to vector<8x8xf32>
    %c0_14 = arith.constant 0 : index
    %15 = memref.load %arg3[%c0_14] : memref<1xf32, #tpu.memory_space<smem>>
    %16 = vector.broadcast %15 : f32 to vector<8x8xf32>
    %17 = arith.addf %14, %16 : vector<8x8xf32>
    %c0_15 = arith.constant 0 : index
    %18 = memref.load %arg2[%c0_15] : memref<98xf32, #tpu.memory_space<smem>>
    %c0_16 = arith.constant 0 : index
    %c0_17 = arith.constant 0 : index
    %c0_18 = arith.constant 0 : index
    %19 = vector.load %arg5[%c0_16, %c0_17, %c0_18] : memref<2x14x14xf32, #tpu.memory_space<vmem>>, vector<1x8x8xf32>
    %20 = vector.shape_cast %19 : vector<1x8x8xf32> to vector<8x8xf32>
    %21 = vector.broadcast %18 : f32 to vector<8x8xf32>
    %22 = arith.mulf %21, %20 : vector<8x8xf32>
    %23 = arith.addf %17, %22 : vector<8x8xf32>
    %c1_19 = arith.constant 1 : index
    %24 = memref.load %arg2[%c1_19] : memref<98xf32, #tpu.memory_space<smem>>
    %c0_20 = arith.constant 0 : index
    %c0_21 = arith.constant 0 : index
    %c1_22 = arith.constant 1 : index
    %25 = vector.load %arg5[%c0_20, %c0_21, %c1_22] : memref<2x14x14xf32, #tpu.memory_space<vmem>>, vector<1x8x8xf32>
    %26 = vector.shape_cast %25 : vector<1x8x8xf32> to vector<8x8xf32>
    %27 = vector.broadcast %24 : f32 to vector<8x8xf32>
    %28 = arith.mulf %27, %26 : vector<8x8xf32>
    %29 = arith.addf %23, %28 : vector<8x8xf32>
    %c2 = arith.constant 2 : index
    %30 = memref.load %arg2[%c2] : memref<98xf32, #tpu.memory_space<smem>>
    %c0_23 = arith.constant 0 : index
    %c0_24 = arith.constant 0 : index
    %c2_25 = arith.constant 2 : index
    %31 = vector.load %arg5[%c0_23, %c0_24, %c2_25] : memref<2x14x14xf32, #tpu.memory_space<vmem>>, vector<1x8x8xf32>
    %32 = vector.shape_cast %31 : vector<1x8x8xf32> to vector<8x8xf32>
    %33 = vector.broadcast %30 : f32 to vector<8x8xf32>
    %34 = arith.mulf %33, %32 : vector<8x8xf32>
    %35 = arith.addf %29, %34 : vector<8x8xf32>
    %c3_26 = arith.constant 3 : index
    %36 = memref.load %arg2[%c3_26] : memref<98xf32, #tpu.memory_space<smem>>
    %c0_27 = arith.constant 0 : index
    %c0_28 = arith.constant 0 : index
    %c3_29 = arith.constant 3 : index
    %37 = vector.load %arg5[%c0_27, %c0_28, %c3_29] : memref<2x14x14xf32, #tpu.memory_space<vmem>>, vector<1x8x8xf32>
    %38 = vector.shape_cast %37 : vector<1x8x8xf32> to vector<8x8xf32>
    %39 = vector.broadcast %36 : f32 to vector<8x8xf32>
    %40 = arith.mulf %39, %38 : vector<8x8xf32>
    %41 = arith.addf %35, %40 : vector<8x8xf32>
    %c4 = arith.constant 4 : index
    %42 = memref.load %arg2[%c4] : memref<98xf32, #tpu.memory_space<smem>>
    %c0_30 = arith.constant 0 : index
    %c0_31 = arith.constant 0 : index
    %c4_32 = arith.constant 4 : index
    %43 = vector.load %arg5[%c0_30, %c0_31, %c4_32] : memref<2x14x14xf32, #tpu.memory_space<vmem>>, vector<1x8x8xf32>
    %44 = vector.shape_cast %43 : vector<1x8x8xf32> to vector<8x8xf32>
    %45 = vector.broadcast %42 : f32 to vector<8x8xf32>
    %46 = arith.mulf %45, %44 : vector<8x8xf32>
    %47 = arith.addf %41, %46 : vector<8x8xf32>
    %c5 = arith.constant 5 : index
    %48 = memref.load %arg2[%c5] : memref<98xf32, #tpu.memory_space<smem>>
    %c0_33 = arith.constant 0 : index
    %c0_34 = arith.constant 0 : index
    %c5_35 = arith.constant 5 : index
    %49 = vector.load %arg5[%c0_33, %c0_34, %c5_35] : memref<2x14x14xf32, #tpu.memory_space<vmem>>, vector<1x8x8xf32>
    %50 = vector.shape_cast %49 : vector<1x8x8xf32> to vector<8x8xf32>
    %51 = vector.broadcast %48 : f32 to vector<8x8xf32>
    %52 = arith.mulf %51, %50 : vector<8x8xf32>
    %53 = arith.addf %47, %52 : vector<8x8xf32>
    %c6 = arith.constant 6 : index
    %54 = memref.load %arg2[%c6] : memref<98xf32, #tpu.memory_space<smem>>
    %c0_36 = arith.constant 0 : index
    %c0_37 = arith.constant 0 : index
    %c6_38 = arith.constant 6 : index
    %55 = vector.load %arg5[%c0_36, %c0_37, %c6_38] : memref<2x14x14xf32, #tpu.memory_space<vmem>>, vector<1x8x8xf32>
    %56 = vector.shape_cast %55 : vector<1x8x8xf32> to vector<8x8xf32>
    %57 = vector.broadcast %54 : f32 to vector<8x8xf32>
    %58 = arith.mulf %57, %56 : vector<8x8xf32>
    %59 = arith.addf %53, %58 : vector<8x8xf32>
    %c7 = arith.constant 7 : index
    %60 = memref.load %arg2[%c7] : memref<98xf32, #tpu.memory_space<smem>>
    %c0_39 = arith.constant 0 : index
    %c1_40 = arith.constant 1 : index
    %c0_41 = arith.constant 0 : index
    %61 = vector.load %arg5[%c0_39, %c1_40, %c0_41] : memref<2x14x14xf32, #tpu.memory_space<vmem>>, vector<1x8x8xf32>
    %62 = vector.shape_cast %61 : vector<1x8x8xf32> to vector<8x8xf32>
    %63 = vector.broadcast %60 : f32 to vector<8x8xf32>
    %64 = arith.mulf %63, %62 : vector<8x8xf32>
    %65 = arith.addf %59, %64 : vector<8x8xf32>
    %c8 = arith.constant 8 : index
    %66 = memref.load %arg2[%c8] : memref<98xf32, #tpu.memory_space<smem>>
    %c0_42 = arith.constant 0 : index
    %c1_43 = arith.constant 1 : index
    %c1_44 = arith.constant 1 : index
    %67 = vector.load %arg5[%c0_42, %c1_43, %c1_44] : memref<2x14x14xf32, #tpu.memory_space<vmem>>, vector<1x8x8xf32>
    %68 = vector.shape_cast %67 : vector<1x8x8xf32> to vector<8x8xf32>
    %69 = vector.broadcast %66 : f32 to vector<8x8xf32>
    %70 = arith.mulf %69, %68 : vector<8x8xf32>
    %71 = arith.addf %65, %70 : vector<8x8xf32>
    %c9 = arith.constant 9 : index
    %72 = memref.load %arg2[%c9] : memref<98xf32, #tpu.memory_space<smem>>
    %c0_45 = arith.constant 0 : index
    %c1_46 = arith.constant 1 : index
    %c2_47 = arith.constant 2 : index
    %73 = vector.load %arg5[%c0_45, %c1_46, %c2_47] : memref<2x14x14xf32, #tpu.memory_space<vmem>>, vector<1x8x8xf32>
    %74 = vector.shape_cast %73 : vector<1x8x8xf32> to vector<8x8xf32>
    %75 = vector.broadcast %72 : f32 to vector<8x8xf32>
    %76 = arith.mulf %75, %74 : vector<8x8xf32>
    %77 = arith.addf %71, %76 : vector<8x8xf32>
    %c10 = arith.constant 10 : index
    %78 = memref.load %arg2[%c10] : memref<98xf32, #tpu.memory_space<smem>>
    %c0_48 = arith.constant 0 : index
    %c1_49 = arith.constant 1 : index
    %c3_50 = arith.constant 3 : index
    %79 = vector.load %arg5[%c0_48, %c1_49, %c3_50] : memref<2x14x14xf32, #tpu.memory_space<vmem>>, vector<1x8x8xf32>
    %80 = vector.shape_cast %79 : vector<1x8x8xf32> to vector<8x8xf32>
    %81 = vector.broadcast %78 : f32 to vector<8x8xf32>
    %82 = arith.mulf %81, %80 : vector<8x8xf32>
    %83 = arith.addf %77, %82 : vector<8x8xf32>
    %c11 = arith.constant 11 : index
    %84 = memref.load %arg2[%c11] : memref<98xf32, #tpu.memory_space<smem>>
    %c0_51 = arith.constant 0 : index
    %c1_52 = arith.constant 1 : index
    %c4_53 = arith.constant 4 : index
    %85 = vector.load %arg5[%c0_51, %c1_52, %c4_53] : memref<2x14x14xf32, #tpu.memory_space<vmem>>, vector<1x8x8xf32>
    %86 = vector.shape_cast %85 : vector<1x8x8xf32> to vector<8x8xf32>
    %87 = vector.broadcast %84 : f32 to vector<8x8xf32>
    %88 = arith.mulf %87, %86 : vector<8x8xf32>
    %89 = arith.addf %83, %88 : vector<8x8xf32>
    %c12 = arith.constant 12 : index
    %90 = memref.load %arg2[%c12] : memref<98xf32, #tpu.memory_space<smem>>
    %c0_54 = arith.constant 0 : index
    %c1_55 = arith.constant 1 : index
    %c5_56 = arith.constant 5 : index
    %91 = vector.load %arg5[%c0_54, %c1_55, %c5_56] : memref<2x14x14xf32, #tpu.memory_space<vmem>>, vector<1x8x8xf32>
    %92 = vector.shape_cast %91 : vector<1x8x8xf32> to vector<8x8xf32>
    %93 = vector.broadcast %90 : f32 to vector<8x8xf32>
    %94 = arith.mulf %93, %92 : vector<8x8xf32>
    %95 = arith.addf %89, %94 : vector<8x8xf32>
    %c13 = arith.constant 13 : index
    %96 = memref.load %arg2[%c13] : memref<98xf32, #tpu.memory_space<smem>>
    %c0_57 = arith.constant 0 : index
    %c1_58 = arith.constant 1 : index
    %c6_59 = arith.constant 6 : index
    %97 = vector.load %arg5[%c0_57, %c1_58, %c6_59] : memref<2x14x14xf32, #tpu.memory_space<vmem>>, vector<1x8x8xf32>
    %98 = vector.shape_cast %97 : vector<1x8x8xf32> to vector<8x8xf32>
    %99 = vector.broadcast %96 : f32 to vector<8x8xf32>
    %100 = arith.mulf %99, %98 : vector<8x8xf32>
    %101 = arith.addf %95, %100 : vector<8x8xf32>
    %c14 = arith.constant 14 : index
    %102 = memref.load %arg2[%c14] : memref<98xf32, #tpu.memory_space<smem>>
    %c0_60 = arith.constant 0 : index
    %c2_61 = arith.constant 2 : index
    %c0_62 = arith.constant 0 : index
    %103 = vector.load %arg5[%c0_60, %c2_61, %c0_62] : memref<2x14x14xf32, #tpu.memory_space<vmem>>, vector<1x8x8xf32>
    %104 = vector.shape_cast %103 : vector<1x8x8xf32> to vector<8x8xf32>
    %105 = vector.broadcast %102 : f32 to vector<8x8xf32>
    %106 = arith.mulf %105, %104 : vector<8x8xf32>
    %107 = arith.addf %101, %106 : vector<8x8xf32>
    %c15 = arith.constant 15 : index
    %108 = memref.load %arg2[%c15] : memref<98xf32, #tpu.memory_space<smem>>
    %c0_63 = arith.constant 0 : index
    %c2_64 = arith.constant 2 : index
    %c1_65 = arith.constant 1 : index
    %109 = vector.load %arg5[%c0_63, %c2_64, %c1_65] : memref<2x14x14xf32, #tpu.memory_space<vmem>>, vector<1x8x8xf32>
    %110 = vector.shape_cast %109 : vector<1x8x8xf32> to vector<8x8xf32>
    %111 = vector.broadcast %108 : f32 to vector<8x8xf32>
    %112 = arith.mulf %111, %110 : vector<8x8xf32>
    %113 = arith.addf %107, %112 : vector<8x8xf32>
    %c16 = arith.constant 16 : index
    %114 = memref.load %arg2[%c16] : memref<98xf32, #tpu.memory_space<smem>>
    %c0_66 = arith.constant 0 : index
    %c2_67 = arith.constant 2 : index
    %c2_68 = arith.constant 2 : index
    %115 = vector.load %arg5[%c0_66, %c2_67, %c2_68] : memref<2x14x14xf32, #tpu.memory_space<vmem>>, vector<1x8x8xf32>
    %116 = vector.shape_cast %115 : vector<1x8x8xf32> to vector<8x8xf32>
    %117 = vector.broadcast %114 : f32 to vector<8x8xf32>
    %118 = arith.mulf %117, %116 : vector<8x8xf32>
    %119 = arith.addf %113, %118 : vector<8x8xf32>
    %c17 = arith.constant 17 : index
    %120 = memref.load %arg2[%c17] : memref<98xf32, #tpu.memory_space<smem>>
    %c0_69 = arith.constant 0 : index
    %c2_70 = arith.constant 2 : index
    %c3_71 = arith.constant 3 : index
    %121 = vector.load %arg5[%c0_69, %c2_70, %c3_71] : memref<2x14x14xf32, #tpu.memory_space<vmem>>, vector<1x8x8xf32>
    %122 = vector.shape_cast %121 : vector<1x8x8xf32> to vector<8x8xf32>
    %123 = vector.broadcast %120 : f32 to vector<8x8xf32>
    %124 = arith.mulf %123, %122 : vector<8x8xf32>
    %125 = arith.addf %119, %124 : vector<8x8xf32>
    %c18 = arith.constant 18 : index
    %126 = memref.load %arg2[%c18] : memref<98xf32, #tpu.memory_space<smem>>
    %c0_72 = arith.constant 0 : index
    %c2_73 = arith.constant 2 : index
    %c4_74 = arith.constant 4 : index
    %127 = vector.load %arg5[%c0_72, %c2_73, %c4_74] : memref<2x14x14xf32, #tpu.memory_space<vmem>>, vector<1x8x8xf32>
    %128 = vector.shape_cast %127 : vector<1x8x8xf32> to vector<8x8xf32>
    %129 = vector.broadcast %126 : f32 to vector<8x8xf32>
    %130 = arith.mulf %129, %128 : vector<8x8xf32>
    %131 = arith.addf %125, %130 : vector<8x8xf32>
    %c19 = arith.constant 19 : index
    %132 = memref.load %arg2[%c19] : memref<98xf32, #tpu.memory_space<smem>>
    %c0_75 = arith.constant 0 : index
    %c2_76 = arith.constant 2 : index
    %c5_77 = arith.constant 5 : index
    %133 = vector.load %arg5[%c0_75, %c2_76, %c5_77] : memref<2x14x14xf32, #tpu.memory_space<vmem>>, vector<1x8x8xf32>
    %134 = vector.shape_cast %133 : vector<1x8x8xf32> to vector<8x8xf32>
    %135 = vector.broadcast %132 : f32 to vector<8x8xf32>
    %136 = arith.mulf %135, %134 : vector<8x8xf32>
    %137 = arith.addf %131, %136 : vector<8x8xf32>
    %c20 = arith.constant 20 : index
    %138 = memref.load %arg2[%c20] : memref<98xf32, #tpu.memory_space<smem>>
    %c0_78 = arith.constant 0 : index
    %c2_79 = arith.constant 2 : index
    %c6_80 = arith.constant 6 : index
    %139 = vector.load %arg5[%c0_78, %c2_79, %c6_80] : memref<2x14x14xf32, #tpu.memory_space<vmem>>, vector<1x8x8xf32>
    %140 = vector.shape_cast %139 : vector<1x8x8xf32> to vector<8x8xf32>
    %141 = vector.broadcast %138 : f32 to vector<8x8xf32>
    %142 = arith.mulf %141, %140 : vector<8x8xf32>
    %143 = arith.addf %137, %142 : vector<8x8xf32>
    %c21 = arith.constant 21 : index
    %144 = memref.load %arg2[%c21] : memref<98xf32, #tpu.memory_space<smem>>
    %c0_81 = arith.constant 0 : index
    %c3_82 = arith.constant 3 : index
    %c0_83 = arith.constant 0 : index
    %145 = vector.load %arg5[%c0_81, %c3_82, %c0_83] : memref<2x14x14xf32, #tpu.memory_space<vmem>>, vector<1x8x8xf32>
    %146 = vector.shape_cast %145 : vector<1x8x8xf32> to vector<8x8xf32>
    %147 = vector.broadcast %144 : f32 to vector<8x8xf32>
    %148 = arith.mulf %147, %146 : vector<8x8xf32>
    %149 = arith.addf %143, %148 : vector<8x8xf32>
    %c22 = arith.constant 22 : index
    %150 = memref.load %arg2[%c22] : memref<98xf32, #tpu.memory_space<smem>>
    %c0_84 = arith.constant 0 : index
    %c3_85 = arith.constant 3 : index
    %c1_86 = arith.constant 1 : index
    %151 = vector.load %arg5[%c0_84, %c3_85, %c1_86] : memref<2x14x14xf32, #tpu.memory_space<vmem>>, vector<1x8x8xf32>
    %152 = vector.shape_cast %151 : vector<1x8x8xf32> to vector<8x8xf32>
    %153 = vector.broadcast %150 : f32 to vector<8x8xf32>
    %154 = arith.mulf %153, %152 : vector<8x8xf32>
    %155 = arith.addf %149, %154 : vector<8x8xf32>
    %c23 = arith.constant 23 : index
    %156 = memref.load %arg2[%c23] : memref<98xf32, #tpu.memory_space<smem>>
    %c0_87 = arith.constant 0 : index
    %c3_88 = arith.constant 3 : index
    %c2_89 = arith.constant 2 : index
    %157 = vector.load %arg5[%c0_87, %c3_88, %c2_89] : memref<2x14x14xf32, #tpu.memory_space<vmem>>, vector<1x8x8xf32>
    %158 = vector.shape_cast %157 : vector<1x8x8xf32> to vector<8x8xf32>
    %159 = vector.broadcast %156 : f32 to vector<8x8xf32>
    %160 = arith.mulf %159, %158 : vector<8x8xf32>
    %161 = arith.addf %155, %160 : vector<8x8xf32>
    %c24 = arith.constant 24 : index
    %162 = memref.load %arg2[%c24] : memref<98xf32, #tpu.memory_space<smem>>
    %c0_90 = arith.constant 0 : index
    %c3_91 = arith.constant 3 : index
    %c3_92 = arith.constant 3 : index
    %163 = vector.load %arg5[%c0_90, %c3_91, %c3_92] : memref<2x14x14xf32, #tpu.memory_space<vmem>>, vector<1x8x8xf32>
    %164 = vector.shape_cast %163 : vector<1x8x8xf32> to vector<8x8xf32>
    %165 = vector.broadcast %162 : f32 to vector<8x8xf32>
    %166 = arith.mulf %165, %164 : vector<8x8xf32>
    %167 = arith.addf %161, %166 : vector<8x8xf32>
    %c25 = arith.constant 25 : index
    %168 = memref.load %arg2[%c25] : memref<98xf32, #tpu.memory_space<smem>>
    %c0_93 = arith.constant 0 : index
    %c3_94 = arith.constant 3 : index
    %c4_95 = arith.constant 4 : index
    %169 = vector.load %arg5[%c0_93, %c3_94, %c4_95] : memref<2x14x14xf32, #tpu.memory_space<vmem>>, vector<1x8x8xf32>
    %170 = vector.shape_cast %169 : vector<1x8x8xf32> to vector<8x8xf32>
    %171 = vector.broadcast %168 : f32 to vector<8x8xf32>
    %172 = arith.mulf %171, %170 : vector<8x8xf32>
    %173 = arith.addf %167, %172 : vector<8x8xf32>
    %c26 = arith.constant 26 : index
    %174 = memref.load %arg2[%c26] : memref<98xf32, #tpu.memory_space<smem>>
    %c0_96 = arith.constant 0 : index
    %c3_97 = arith.constant 3 : index
    %c5_98 = arith.constant 5 : index
    %175 = vector.load %arg5[%c0_96, %c3_97, %c5_98] : memref<2x14x14xf32, #tpu.memory_space<vmem>>, vector<1x8x8xf32>
    %176 = vector.shape_cast %175 : vector<1x8x8xf32> to vector<8x8xf32>
    %177 = vector.broadcast %174 : f32 to vector<8x8xf32>
    %178 = arith.mulf %177, %176 : vector<8x8xf32>
    %179 = arith.addf %173, %178 : vector<8x8xf32>
    %c27 = arith.constant 27 : index
    %180 = memref.load %arg2[%c27] : memref<98xf32, #tpu.memory_space<smem>>
    %c0_99 = arith.constant 0 : index
    %c3_100 = arith.constant 3 : index
    %c6_101 = arith.constant 6 : index
    %181 = vector.load %arg5[%c0_99, %c3_100, %c6_101] : memref<2x14x14xf32, #tpu.memory_space<vmem>>, vector<1x8x8xf32>
    %182 = vector.shape_cast %181 : vector<1x8x8xf32> to vector<8x8xf32>
    %183 = vector.broadcast %180 : f32 to vector<8x8xf32>
    %184 = arith.mulf %183, %182 : vector<8x8xf32>
    %185 = arith.addf %179, %184 : vector<8x8xf32>
    %c28 = arith.constant 28 : index
    %186 = memref.load %arg2[%c28] : memref<98xf32, #tpu.memory_space<smem>>
    %c0_102 = arith.constant 0 : index
    %c4_103 = arith.constant 4 : index
    %c0_104 = arith.constant 0 : index
    %187 = vector.load %arg5[%c0_102, %c4_103, %c0_104] : memref<2x14x14xf32, #tpu.memory_space<vmem>>, vector<1x8x8xf32>
    %188 = vector.shape_cast %187 : vector<1x8x8xf32> to vector<8x8xf32>
    %189 = vector.broadcast %186 : f32 to vector<8x8xf32>
    %190 = arith.mulf %189, %188 : vector<8x8xf32>
    %191 = arith.addf %185, %190 : vector<8x8xf32>
    %c29 = arith.constant 29 : index
    %192 = memref.load %arg2[%c29] : memref<98xf32, #tpu.memory_space<smem>>
    %c0_105 = arith.constant 0 : index
    %c4_106 = arith.constant 4 : index
    %c1_107 = arith.constant 1 : index
    %193 = vector.load %arg5[%c0_105, %c4_106, %c1_107] : memref<2x14x14xf32, #tpu.memory_space<vmem>>, vector<1x8x8xf32>
    %194 = vector.shape_cast %193 : vector<1x8x8xf32> to vector<8x8xf32>
    %195 = vector.broadcast %192 : f32 to vector<8x8xf32>
    %196 = arith.mulf %195, %194 : vector<8x8xf32>
    %197 = arith.addf %191, %196 : vector<8x8xf32>
    %c30 = arith.constant 30 : index
    %198 = memref.load %arg2[%c30] : memref<98xf32, #tpu.memory_space<smem>>
    %c0_108 = arith.constant 0 : index
    %c4_109 = arith.constant 4 : index
    %c2_110 = arith.constant 2 : index
    %199 = vector.load %arg5[%c0_108, %c4_109, %c2_110] : memref<2x14x14xf32, #tpu.memory_space<vmem>>, vector<1x8x8xf32>
    %200 = vector.shape_cast %199 : vector<1x8x8xf32> to vector<8x8xf32>
    %201 = vector.broadcast %198 : f32 to vector<8x8xf32>
    %202 = arith.mulf %201, %200 : vector<8x8xf32>
    %203 = arith.addf %197, %202 : vector<8x8xf32>
    %c31 = arith.constant 31 : index
    %204 = memref.load %arg2[%c31] : memref<98xf32, #tpu.memory_space<smem>>
    %c0_111 = arith.constant 0 : index
    %c4_112 = arith.constant 4 : index
    %c3_113 = arith.constant 3 : index
    %205 = vector.load %arg5[%c0_111, %c4_112, %c3_113] : memref<2x14x14xf32, #tpu.memory_space<vmem>>, vector<1x8x8xf32>
    %206 = vector.shape_cast %205 : vector<1x8x8xf32> to vector<8x8xf32>
    %207 = vector.broadcast %204 : f32 to vector<8x8xf32>
    %208 = arith.mulf %207, %206 : vector<8x8xf32>
    %209 = arith.addf %203, %208 : vector<8x8xf32>
    %c32 = arith.constant 32 : index
    %210 = memref.load %arg2[%c32] : memref<98xf32, #tpu.memory_space<smem>>
    %c0_114 = arith.constant 0 : index
    %c4_115 = arith.constant 4 : index
    %c4_116 = arith.constant 4 : index
    %211 = vector.load %arg5[%c0_114, %c4_115, %c4_116] : memref<2x14x14xf32, #tpu.memory_space<vmem>>, vector<1x8x8xf32>
    %212 = vector.shape_cast %211 : vector<1x8x8xf32> to vector<8x8xf32>
    %213 = vector.broadcast %210 : f32 to vector<8x8xf32>
    %214 = arith.mulf %213, %212 : vector<8x8xf32>
    %215 = arith.addf %209, %214 : vector<8x8xf32>
    %c33 = arith.constant 33 : index
    %216 = memref.load %arg2[%c33] : memref<98xf32, #tpu.memory_space<smem>>
    %c0_117 = arith.constant 0 : index
    %c4_118 = arith.constant 4 : index
    %c5_119 = arith.constant 5 : index
    %217 = vector.load %arg5[%c0_117, %c4_118, %c5_119] : memref<2x14x14xf32, #tpu.memory_space<vmem>>, vector<1x8x8xf32>
    %218 = vector.shape_cast %217 : vector<1x8x8xf32> to vector<8x8xf32>
    %219 = vector.broadcast %216 : f32 to vector<8x8xf32>
    %220 = arith.mulf %219, %218 : vector<8x8xf32>
    %221 = arith.addf %215, %220 : vector<8x8xf32>
    %c34 = arith.constant 34 : index
    %222 = memref.load %arg2[%c34] : memref<98xf32, #tpu.memory_space<smem>>
    %c0_120 = arith.constant 0 : index
    %c4_121 = arith.constant 4 : index
    %c6_122 = arith.constant 6 : index
    %223 = vector.load %arg5[%c0_120, %c4_121, %c6_122] : memref<2x14x14xf32, #tpu.memory_space<vmem>>, vector<1x8x8xf32>
    %224 = vector.shape_cast %223 : vector<1x8x8xf32> to vector<8x8xf32>
    %225 = vector.broadcast %222 : f32 to vector<8x8xf32>
    %226 = arith.mulf %225, %224 : vector<8x8xf32>
    %227 = arith.addf %221, %226 : vector<8x8xf32>
    %c35 = arith.constant 35 : index
    %228 = memref.load %arg2[%c35] : memref<98xf32, #tpu.memory_space<smem>>
    %c0_123 = arith.constant 0 : index
    %c5_124 = arith.constant 5 : index
    %c0_125 = arith.constant 0 : index
    %229 = vector.load %arg5[%c0_123, %c5_124, %c0_125] : memref<2x14x14xf32, #tpu.memory_space<vmem>>, vector<1x8x8xf32>
    %230 = vector.shape_cast %229 : vector<1x8x8xf32> to vector<8x8xf32>
    %231 = vector.broadcast %228 : f32 to vector<8x8xf32>
    %232 = arith.mulf %231, %230 : vector<8x8xf32>
    %233 = arith.addf %227, %232 : vector<8x8xf32>
    %c36 = arith.constant 36 : index
    %234 = memref.load %arg2[%c36] : memref<98xf32, #tpu.memory_space<smem>>
    %c0_126 = arith.constant 0 : index
    %c5_127 = arith.constant 5 : index
    %c1_128 = arith.constant 1 : index
    %235 = vector.load %arg5[%c0_126, %c5_127, %c1_128] : memref<2x14x14xf32, #tpu.memory_space<vmem>>, vector<1x8x8xf32>
    %236 = vector.shape_cast %235 : vector<1x8x8xf32> to vector<8x8xf32>
    %237 = vector.broadcast %234 : f32 to vector<8x8xf32>
    %238 = arith.mulf %237, %236 : vector<8x8xf32>
    %239 = arith.addf %233, %238 : vector<8x8xf32>
    %c37 = arith.constant 37 : index
    %240 = memref.load %arg2[%c37] : memref<98xf32, #tpu.memory_space<smem>>
    %c0_129 = arith.constant 0 : index
    %c5_130 = arith.constant 5 : index
    %c2_131 = arith.constant 2 : index
    %241 = vector.load %arg5[%c0_129, %c5_130, %c2_131] : memref<2x14x14xf32, #tpu.memory_space<vmem>>, vector<1x8x8xf32>
    %242 = vector.shape_cast %241 : vector<1x8x8xf32> to vector<8x8xf32>
    %243 = vector.broadcast %240 : f32 to vector<8x8xf32>
    %244 = arith.mulf %243, %242 : vector<8x8xf32>
    %245 = arith.addf %239, %244 : vector<8x8xf32>
    %c38 = arith.constant 38 : index
    %246 = memref.load %arg2[%c38] : memref<98xf32, #tpu.memory_space<smem>>
    %c0_132 = arith.constant 0 : index
    %c5_133 = arith.constant 5 : index
    %c3_134 = arith.constant 3 : index
    %247 = vector.load %arg5[%c0_132, %c5_133, %c3_134] : memref<2x14x14xf32, #tpu.memory_space<vmem>>, vector<1x8x8xf32>
    %248 = vector.shape_cast %247 : vector<1x8x8xf32> to vector<8x8xf32>
    %249 = vector.broadcast %246 : f32 to vector<8x8xf32>
    %250 = arith.mulf %249, %248 : vector<8x8xf32>
    %251 = arith.addf %245, %250 : vector<8x8xf32>
    %c39 = arith.constant 39 : index
    %252 = memref.load %arg2[%c39] : memref<98xf32, #tpu.memory_space<smem>>
    %c0_135 = arith.constant 0 : index
    %c5_136 = arith.constant 5 : index
    %c4_137 = arith.constant 4 : index
    %253 = vector.load %arg5[%c0_135, %c5_136, %c4_137] : memref<2x14x14xf32, #tpu.memory_space<vmem>>, vector<1x8x8xf32>
    %254 = vector.shape_cast %253 : vector<1x8x8xf32> to vector<8x8xf32>
    %255 = vector.broadcast %252 : f32 to vector<8x8xf32>
    %256 = arith.mulf %255, %254 : vector<8x8xf32>
    %257 = arith.addf %251, %256 : vector<8x8xf32>
    %c40 = arith.constant 40 : index
    %258 = memref.load %arg2[%c40] : memref<98xf32, #tpu.memory_space<smem>>
    %c0_138 = arith.constant 0 : index
    %c5_139 = arith.constant 5 : index
    %c5_140 = arith.constant 5 : index
    %259 = vector.load %arg5[%c0_138, %c5_139, %c5_140] : memref<2x14x14xf32, #tpu.memory_space<vmem>>, vector<1x8x8xf32>
    %260 = vector.shape_cast %259 : vector<1x8x8xf32> to vector<8x8xf32>
    %261 = vector.broadcast %258 : f32 to vector<8x8xf32>
    %262 = arith.mulf %261, %260 : vector<8x8xf32>
    %263 = arith.addf %257, %262 : vector<8x8xf32>
    %c41 = arith.constant 41 : index
    %264 = memref.load %arg2[%c41] : memref<98xf32, #tpu.memory_space<smem>>
    %c0_141 = arith.constant 0 : index
    %c5_142 = arith.constant 5 : index
    %c6_143 = arith.constant 6 : index
    %265 = vector.load %arg5[%c0_141, %c5_142, %c6_143] : memref<2x14x14xf32, #tpu.memory_space<vmem>>, vector<1x8x8xf32>
    %266 = vector.shape_cast %265 : vector<1x8x8xf32> to vector<8x8xf32>
    %267 = vector.broadcast %264 : f32 to vector<8x8xf32>
    %268 = arith.mulf %267, %266 : vector<8x8xf32>
    %269 = arith.addf %263, %268 : vector<8x8xf32>
    %c42 = arith.constant 42 : index
    %270 = memref.load %arg2[%c42] : memref<98xf32, #tpu.memory_space<smem>>
    %c0_144 = arith.constant 0 : index
    %c6_145 = arith.constant 6 : index
    %c0_146 = arith.constant 0 : index
    %271 = vector.load %arg5[%c0_144, %c6_145, %c0_146] : memref<2x14x14xf32, #tpu.memory_space<vmem>>, vector<1x8x8xf32>
    %272 = vector.shape_cast %271 : vector<1x8x8xf32> to vector<8x8xf32>
    %273 = vector.broadcast %270 : f32 to vector<8x8xf32>
    %274 = arith.mulf %273, %272 : vector<8x8xf32>
    %275 = arith.addf %269, %274 : vector<8x8xf32>
    %c43 = arith.constant 43 : index
    %276 = memref.load %arg2[%c43] : memref<98xf32, #tpu.memory_space<smem>>
    %c0_147 = arith.constant 0 : index
    %c6_148 = arith.constant 6 : index
    %c1_149 = arith.constant 1 : index
    %277 = vector.load %arg5[%c0_147, %c6_148, %c1_149] : memref<2x14x14xf32, #tpu.memory_space<vmem>>, vector<1x8x8xf32>
    %278 = vector.shape_cast %277 : vector<1x8x8xf32> to vector<8x8xf32>
    %279 = vector.broadcast %276 : f32 to vector<8x8xf32>
    %280 = arith.mulf %279, %278 : vector<8x8xf32>
    %281 = arith.addf %275, %280 : vector<8x8xf32>
    %c44 = arith.constant 44 : index
    %282 = memref.load %arg2[%c44] : memref<98xf32, #tpu.memory_space<smem>>
    %c0_150 = arith.constant 0 : index
    %c6_151 = arith.constant 6 : index
    %c2_152 = arith.constant 2 : index
    %283 = vector.load %arg5[%c0_150, %c6_151, %c2_152] : memref<2x14x14xf32, #tpu.memory_space<vmem>>, vector<1x8x8xf32>
    %284 = vector.shape_cast %283 : vector<1x8x8xf32> to vector<8x8xf32>
    %285 = vector.broadcast %282 : f32 to vector<8x8xf32>
    %286 = arith.mulf %285, %284 : vector<8x8xf32>
    %287 = arith.addf %281, %286 : vector<8x8xf32>
    %c45 = arith.constant 45 : index
    %288 = memref.load %arg2[%c45] : memref<98xf32, #tpu.memory_space<smem>>
    %c0_153 = arith.constant 0 : index
    %c6_154 = arith.constant 6 : index
    %c3_155 = arith.constant 3 : index
    %289 = vector.load %arg5[%c0_153, %c6_154, %c3_155] : memref<2x14x14xf32, #tpu.memory_space<vmem>>, vector<1x8x8xf32>
    %290 = vector.shape_cast %289 : vector<1x8x8xf32> to vector<8x8xf32>
    %291 = vector.broadcast %288 : f32 to vector<8x8xf32>
    %292 = arith.mulf %291, %290 : vector<8x8xf32>
    %293 = arith.addf %287, %292 : vector<8x8xf32>
    %c46 = arith.constant 46 : index
    %294 = memref.load %arg2[%c46] : memref<98xf32, #tpu.memory_space<smem>>
    %c0_156 = arith.constant 0 : index
    %c6_157 = arith.constant 6 : index
    %c4_158 = arith.constant 4 : index
    %295 = vector.load %arg5[%c0_156, %c6_157, %c4_158] : memref<2x14x14xf32, #tpu.memory_space<vmem>>, vector<1x8x8xf32>
    %296 = vector.shape_cast %295 : vector<1x8x8xf32> to vector<8x8xf32>
    %297 = vector.broadcast %294 : f32 to vector<8x8xf32>
    %298 = arith.mulf %297, %296 : vector<8x8xf32>
    %299 = arith.addf %293, %298 : vector<8x8xf32>
    %c47 = arith.constant 47 : index
    %300 = memref.load %arg2[%c47] : memref<98xf32, #tpu.memory_space<smem>>
    %c0_159 = arith.constant 0 : index
    %c6_160 = arith.constant 6 : index
    %c5_161 = arith.constant 5 : index
    %301 = vector.load %arg5[%c0_159, %c6_160, %c5_161] : memref<2x14x14xf32, #tpu.memory_space<vmem>>, vector<1x8x8xf32>
    %302 = vector.shape_cast %301 : vector<1x8x8xf32> to vector<8x8xf32>
    %303 = vector.broadcast %300 : f32 to vector<8x8xf32>
    %304 = arith.mulf %303, %302 : vector<8x8xf32>
    %305 = arith.addf %299, %304 : vector<8x8xf32>
    %c48 = arith.constant 48 : index
    %306 = memref.load %arg2[%c48] : memref<98xf32, #tpu.memory_space<smem>>
    %c0_162 = arith.constant 0 : index
    %c6_163 = arith.constant 6 : index
    %c6_164 = arith.constant 6 : index
    %307 = vector.load %arg5[%c0_162, %c6_163, %c6_164] : memref<2x14x14xf32, #tpu.memory_space<vmem>>, vector<1x8x8xf32>
    %308 = vector.shape_cast %307 : vector<1x8x8xf32> to vector<8x8xf32>
    %309 = vector.broadcast %306 : f32 to vector<8x8xf32>
    %310 = arith.mulf %309, %308 : vector<8x8xf32>
    %311 = arith.addf %305, %310 : vector<8x8xf32>
    %c49 = arith.constant 49 : index
    %312 = memref.load %arg2[%c49] : memref<98xf32, #tpu.memory_space<smem>>
    %c1_165 = arith.constant 1 : index
    %c0_166 = arith.constant 0 : index
    %c0_167 = arith.constant 0 : index
    %313 = vector.load %arg5[%c1_165, %c0_166, %c0_167] : memref<2x14x14xf32, #tpu.memory_space<vmem>>, vector<1x8x8xf32>
    %314 = vector.shape_cast %313 : vector<1x8x8xf32> to vector<8x8xf32>
    %315 = vector.broadcast %312 : f32 to vector<8x8xf32>
    %316 = arith.mulf %315, %314 : vector<8x8xf32>
    %317 = arith.addf %311, %316 : vector<8x8xf32>
    %c50 = arith.constant 50 : index
    %318 = memref.load %arg2[%c50] : memref<98xf32, #tpu.memory_space<smem>>
    %c1_168 = arith.constant 1 : index
    %c0_169 = arith.constant 0 : index
    %c1_170 = arith.constant 1 : index
    %319 = vector.load %arg5[%c1_168, %c0_169, %c1_170] : memref<2x14x14xf32, #tpu.memory_space<vmem>>, vector<1x8x8xf32>
    %320 = vector.shape_cast %319 : vector<1x8x8xf32> to vector<8x8xf32>
    %321 = vector.broadcast %318 : f32 to vector<8x8xf32>
    %322 = arith.mulf %321, %320 : vector<8x8xf32>
    %323 = arith.addf %317, %322 : vector<8x8xf32>
    %c51 = arith.constant 51 : index
    %324 = memref.load %arg2[%c51] : memref<98xf32, #tpu.memory_space<smem>>
    %c1_171 = arith.constant 1 : index
    %c0_172 = arith.constant 0 : index
    %c2_173 = arith.constant 2 : index
    %325 = vector.load %arg5[%c1_171, %c0_172, %c2_173] : memref<2x14x14xf32, #tpu.memory_space<vmem>>, vector<1x8x8xf32>
    %326 = vector.shape_cast %325 : vector<1x8x8xf32> to vector<8x8xf32>
    %327 = vector.broadcast %324 : f32 to vector<8x8xf32>
    %328 = arith.mulf %327, %326 : vector<8x8xf32>
    %329 = arith.addf %323, %328 : vector<8x8xf32>
    %c52 = arith.constant 52 : index
    %330 = memref.load %arg2[%c52] : memref<98xf32, #tpu.memory_space<smem>>
    %c1_174 = arith.constant 1 : index
    %c0_175 = arith.constant 0 : index
    %c3_176 = arith.constant 3 : index
    %331 = vector.load %arg5[%c1_174, %c0_175, %c3_176] : memref<2x14x14xf32, #tpu.memory_space<vmem>>, vector<1x8x8xf32>
    %332 = vector.shape_cast %331 : vector<1x8x8xf32> to vector<8x8xf32>
    %333 = vector.broadcast %330 : f32 to vector<8x8xf32>
    %334 = arith.mulf %333, %332 : vector<8x8xf32>
    %335 = arith.addf %329, %334 : vector<8x8xf32>
    %c53 = arith.constant 53 : index
    %336 = memref.load %arg2[%c53] : memref<98xf32, #tpu.memory_space<smem>>
    %c1_177 = arith.constant 1 : index
    %c0_178 = arith.constant 0 : index
    %c4_179 = arith.constant 4 : index
    %337 = vector.load %arg5[%c1_177, %c0_178, %c4_179] : memref<2x14x14xf32, #tpu.memory_space<vmem>>, vector<1x8x8xf32>
    %338 = vector.shape_cast %337 : vector<1x8x8xf32> to vector<8x8xf32>
    %339 = vector.broadcast %336 : f32 to vector<8x8xf32>
    %340 = arith.mulf %339, %338 : vector<8x8xf32>
    %341 = arith.addf %335, %340 : vector<8x8xf32>
    %c54 = arith.constant 54 : index
    %342 = memref.load %arg2[%c54] : memref<98xf32, #tpu.memory_space<smem>>
    %c1_180 = arith.constant 1 : index
    %c0_181 = arith.constant 0 : index
    %c5_182 = arith.constant 5 : index
    %343 = vector.load %arg5[%c1_180, %c0_181, %c5_182] : memref<2x14x14xf32, #tpu.memory_space<vmem>>, vector<1x8x8xf32>
    %344 = vector.shape_cast %343 : vector<1x8x8xf32> to vector<8x8xf32>
    %345 = vector.broadcast %342 : f32 to vector<8x8xf32>
    %346 = arith.mulf %345, %344 : vector<8x8xf32>
    %347 = arith.addf %341, %346 : vector<8x8xf32>
    %c55 = arith.constant 55 : index
    %348 = memref.load %arg2[%c55] : memref<98xf32, #tpu.memory_space<smem>>
    %c1_183 = arith.constant 1 : index
    %c0_184 = arith.constant 0 : index
    %c6_185 = arith.constant 6 : index
    %349 = vector.load %arg5[%c1_183, %c0_184, %c6_185] : memref<2x14x14xf32, #tpu.memory_space<vmem>>, vector<1x8x8xf32>
    %350 = vector.shape_cast %349 : vector<1x8x8xf32> to vector<8x8xf32>
    %351 = vector.broadcast %348 : f32 to vector<8x8xf32>
    %352 = arith.mulf %351, %350 : vector<8x8xf32>
    %353 = arith.addf %347, %352 : vector<8x8xf32>
    %c56 = arith.constant 56 : index
    %354 = memref.load %arg2[%c56] : memref<98xf32, #tpu.memory_space<smem>>
    %c1_186 = arith.constant 1 : index
    %c1_187 = arith.constant 1 : index
    %c0_188 = arith.constant 0 : index
    %355 = vector.load %arg5[%c1_186, %c1_187, %c0_188] : memref<2x14x14xf32, #tpu.memory_space<vmem>>, vector<1x8x8xf32>
    %356 = vector.shape_cast %355 : vector<1x8x8xf32> to vector<8x8xf32>
    %357 = vector.broadcast %354 : f32 to vector<8x8xf32>
    %358 = arith.mulf %357, %356 : vector<8x8xf32>
    %359 = arith.addf %353, %358 : vector<8x8xf32>
    %c57 = arith.constant 57 : index
    %360 = memref.load %arg2[%c57] : memref<98xf32, #tpu.memory_space<smem>>
    %c1_189 = arith.constant 1 : index
    %c1_190 = arith.constant 1 : index
    %c1_191 = arith.constant 1 : index
    %361 = vector.load %arg5[%c1_189, %c1_190, %c1_191] : memref<2x14x14xf32, #tpu.memory_space<vmem>>, vector<1x8x8xf32>
    %362 = vector.shape_cast %361 : vector<1x8x8xf32> to vector<8x8xf32>
    %363 = vector.broadcast %360 : f32 to vector<8x8xf32>
    %364 = arith.mulf %363, %362 : vector<8x8xf32>
    %365 = arith.addf %359, %364 : vector<8x8xf32>
    %c58 = arith.constant 58 : index
    %366 = memref.load %arg2[%c58] : memref<98xf32, #tpu.memory_space<smem>>
    %c1_192 = arith.constant 1 : index
    %c1_193 = arith.constant 1 : index
    %c2_194 = arith.constant 2 : index
    %367 = vector.load %arg5[%c1_192, %c1_193, %c2_194] : memref<2x14x14xf32, #tpu.memory_space<vmem>>, vector<1x8x8xf32>
    %368 = vector.shape_cast %367 : vector<1x8x8xf32> to vector<8x8xf32>
    %369 = vector.broadcast %366 : f32 to vector<8x8xf32>
    %370 = arith.mulf %369, %368 : vector<8x8xf32>
    %371 = arith.addf %365, %370 : vector<8x8xf32>
    %c59 = arith.constant 59 : index
    %372 = memref.load %arg2[%c59] : memref<98xf32, #tpu.memory_space<smem>>
    %c1_195 = arith.constant 1 : index
    %c1_196 = arith.constant 1 : index
    %c3_197 = arith.constant 3 : index
    %373 = vector.load %arg5[%c1_195, %c1_196, %c3_197] : memref<2x14x14xf32, #tpu.memory_space<vmem>>, vector<1x8x8xf32>
    %374 = vector.shape_cast %373 : vector<1x8x8xf32> to vector<8x8xf32>
    %375 = vector.broadcast %372 : f32 to vector<8x8xf32>
    %376 = arith.mulf %375, %374 : vector<8x8xf32>
    %377 = arith.addf %371, %376 : vector<8x8xf32>
    %c60 = arith.constant 60 : index
    %378 = memref.load %arg2[%c60] : memref<98xf32, #tpu.memory_space<smem>>
    %c1_198 = arith.constant 1 : index
    %c1_199 = arith.constant 1 : index
    %c4_200 = arith.constant 4 : index
    %379 = vector.load %arg5[%c1_198, %c1_199, %c4_200] : memref<2x14x14xf32, #tpu.memory_space<vmem>>, vector<1x8x8xf32>
    %380 = vector.shape_cast %379 : vector<1x8x8xf32> to vector<8x8xf32>
    %381 = vector.broadcast %378 : f32 to vector<8x8xf32>
    %382 = arith.mulf %381, %380 : vector<8x8xf32>
    %383 = arith.addf %377, %382 : vector<8x8xf32>
    %c61 = arith.constant 61 : index
    %384 = memref.load %arg2[%c61] : memref<98xf32, #tpu.memory_space<smem>>
    %c1_201 = arith.constant 1 : index
    %c1_202 = arith.constant 1 : index
    %c5_203 = arith.constant 5 : index
    %385 = vector.load %arg5[%c1_201, %c1_202, %c5_203] : memref<2x14x14xf32, #tpu.memory_space<vmem>>, vector<1x8x8xf32>
    %386 = vector.shape_cast %385 : vector<1x8x8xf32> to vector<8x8xf32>
    %387 = vector.broadcast %384 : f32 to vector<8x8xf32>
    %388 = arith.mulf %387, %386 : vector<8x8xf32>
    %389 = arith.addf %383, %388 : vector<8x8xf32>
    %c62 = arith.constant 62 : index
    %390 = memref.load %arg2[%c62] : memref<98xf32, #tpu.memory_space<smem>>
    %c1_204 = arith.constant 1 : index
    %c1_205 = arith.constant 1 : index
    %c6_206 = arith.constant 6 : index
    %391 = vector.load %arg5[%c1_204, %c1_205, %c6_206] : memref<2x14x14xf32, #tpu.memory_space<vmem>>, vector<1x8x8xf32>
    %392 = vector.shape_cast %391 : vector<1x8x8xf32> to vector<8x8xf32>
    %393 = vector.broadcast %390 : f32 to vector<8x8xf32>
    %394 = arith.mulf %393, %392 : vector<8x8xf32>
    %395 = arith.addf %389, %394 : vector<8x8xf32>
    %c63 = arith.constant 63 : index
    %396 = memref.load %arg2[%c63] : memref<98xf32, #tpu.memory_space<smem>>
    %c1_207 = arith.constant 1 : index
    %c2_208 = arith.constant 2 : index
    %c0_209 = arith.constant 0 : index
    %397 = vector.load %arg5[%c1_207, %c2_208, %c0_209] : memref<2x14x14xf32, #tpu.memory_space<vmem>>, vector<1x8x8xf32>
    %398 = vector.shape_cast %397 : vector<1x8x8xf32> to vector<8x8xf32>
    %399 = vector.broadcast %396 : f32 to vector<8x8xf32>
    %400 = arith.mulf %399, %398 : vector<8x8xf32>
    %401 = arith.addf %395, %400 : vector<8x8xf32>
    %c64 = arith.constant 64 : index
    %402 = memref.load %arg2[%c64] : memref<98xf32, #tpu.memory_space<smem>>
    %c1_210 = arith.constant 1 : index
    %c2_211 = arith.constant 2 : index
    %c1_212 = arith.constant 1 : index
    %403 = vector.load %arg5[%c1_210, %c2_211, %c1_212] : memref<2x14x14xf32, #tpu.memory_space<vmem>>, vector<1x8x8xf32>
    %404 = vector.shape_cast %403 : vector<1x8x8xf32> to vector<8x8xf32>
    %405 = vector.broadcast %402 : f32 to vector<8x8xf32>
    %406 = arith.mulf %405, %404 : vector<8x8xf32>
    %407 = arith.addf %401, %406 : vector<8x8xf32>
    %c65 = arith.constant 65 : index
    %408 = memref.load %arg2[%c65] : memref<98xf32, #tpu.memory_space<smem>>
    %c1_213 = arith.constant 1 : index
    %c2_214 = arith.constant 2 : index
    %c2_215 = arith.constant 2 : index
    %409 = vector.load %arg5[%c1_213, %c2_214, %c2_215] : memref<2x14x14xf32, #tpu.memory_space<vmem>>, vector<1x8x8xf32>
    %410 = vector.shape_cast %409 : vector<1x8x8xf32> to vector<8x8xf32>
    %411 = vector.broadcast %408 : f32 to vector<8x8xf32>
    %412 = arith.mulf %411, %410 : vector<8x8xf32>
    %413 = arith.addf %407, %412 : vector<8x8xf32>
    %c66 = arith.constant 66 : index
    %414 = memref.load %arg2[%c66] : memref<98xf32, #tpu.memory_space<smem>>
    %c1_216 = arith.constant 1 : index
    %c2_217 = arith.constant 2 : index
    %c3_218 = arith.constant 3 : index
    %415 = vector.load %arg5[%c1_216, %c2_217, %c3_218] : memref<2x14x14xf32, #tpu.memory_space<vmem>>, vector<1x8x8xf32>
    %416 = vector.shape_cast %415 : vector<1x8x8xf32> to vector<8x8xf32>
    %417 = vector.broadcast %414 : f32 to vector<8x8xf32>
    %418 = arith.mulf %417, %416 : vector<8x8xf32>
    %419 = arith.addf %413, %418 : vector<8x8xf32>
    %c67 = arith.constant 67 : index
    %420 = memref.load %arg2[%c67] : memref<98xf32, #tpu.memory_space<smem>>
    %c1_219 = arith.constant 1 : index
    %c2_220 = arith.constant 2 : index
    %c4_221 = arith.constant 4 : index
    %421 = vector.load %arg5[%c1_219, %c2_220, %c4_221] : memref<2x14x14xf32, #tpu.memory_space<vmem>>, vector<1x8x8xf32>
    %422 = vector.shape_cast %421 : vector<1x8x8xf32> to vector<8x8xf32>
    %423 = vector.broadcast %420 : f32 to vector<8x8xf32>
    %424 = arith.mulf %423, %422 : vector<8x8xf32>
    %425 = arith.addf %419, %424 : vector<8x8xf32>
    %c68 = arith.constant 68 : index
    %426 = memref.load %arg2[%c68] : memref<98xf32, #tpu.memory_space<smem>>
    %c1_222 = arith.constant 1 : index
    %c2_223 = arith.constant 2 : index
    %c5_224 = arith.constant 5 : index
    %427 = vector.load %arg5[%c1_222, %c2_223, %c5_224] : memref<2x14x14xf32, #tpu.memory_space<vmem>>, vector<1x8x8xf32>
    %428 = vector.shape_cast %427 : vector<1x8x8xf32> to vector<8x8xf32>
    %429 = vector.broadcast %426 : f32 to vector<8x8xf32>
    %430 = arith.mulf %429, %428 : vector<8x8xf32>
    %431 = arith.addf %425, %430 : vector<8x8xf32>
    %c69 = arith.constant 69 : index
    %432 = memref.load %arg2[%c69] : memref<98xf32, #tpu.memory_space<smem>>
    %c1_225 = arith.constant 1 : index
    %c2_226 = arith.constant 2 : index
    %c6_227 = arith.constant 6 : index
    %433 = vector.load %arg5[%c1_225, %c2_226, %c6_227] : memref<2x14x14xf32, #tpu.memory_space<vmem>>, vector<1x8x8xf32>
    %434 = vector.shape_cast %433 : vector<1x8x8xf32> to vector<8x8xf32>
    %435 = vector.broadcast %432 : f32 to vector<8x8xf32>
    %436 = arith.mulf %435, %434 : vector<8x8xf32>
    %437 = arith.addf %431, %436 : vector<8x8xf32>
    %c70 = arith.constant 70 : index
    %438 = memref.load %arg2[%c70] : memref<98xf32, #tpu.memory_space<smem>>
    %c1_228 = arith.constant 1 : index
    %c3_229 = arith.constant 3 : index
    %c0_230 = arith.constant 0 : index
    %439 = vector.load %arg5[%c1_228, %c3_229, %c0_230] : memref<2x14x14xf32, #tpu.memory_space<vmem>>, vector<1x8x8xf32>
    %440 = vector.shape_cast %439 : vector<1x8x8xf32> to vector<8x8xf32>
    %441 = vector.broadcast %438 : f32 to vector<8x8xf32>
    %442 = arith.mulf %441, %440 : vector<8x8xf32>
    %443 = arith.addf %437, %442 : vector<8x8xf32>
    %c71 = arith.constant 71 : index
    %444 = memref.load %arg2[%c71] : memref<98xf32, #tpu.memory_space<smem>>
    %c1_231 = arith.constant 1 : index
    %c3_232 = arith.constant 3 : index
    %c1_233 = arith.constant 1 : index
    %445 = vector.load %arg5[%c1_231, %c3_232, %c1_233] : memref<2x14x14xf32, #tpu.memory_space<vmem>>, vector<1x8x8xf32>
    %446 = vector.shape_cast %445 : vector<1x8x8xf32> to vector<8x8xf32>
    %447 = vector.broadcast %444 : f32 to vector<8x8xf32>
    %448 = arith.mulf %447, %446 : vector<8x8xf32>
    %449 = arith.addf %443, %448 : vector<8x8xf32>
    %c72 = arith.constant 72 : index
    %450 = memref.load %arg2[%c72] : memref<98xf32, #tpu.memory_space<smem>>
    %c1_234 = arith.constant 1 : index
    %c3_235 = arith.constant 3 : index
    %c2_236 = arith.constant 2 : index
    %451 = vector.load %arg5[%c1_234, %c3_235, %c2_236] : memref<2x14x14xf32, #tpu.memory_space<vmem>>, vector<1x8x8xf32>
    %452 = vector.shape_cast %451 : vector<1x8x8xf32> to vector<8x8xf32>
    %453 = vector.broadcast %450 : f32 to vector<8x8xf32>
    %454 = arith.mulf %453, %452 : vector<8x8xf32>
    %455 = arith.addf %449, %454 : vector<8x8xf32>
    %c73 = arith.constant 73 : index
    %456 = memref.load %arg2[%c73] : memref<98xf32, #tpu.memory_space<smem>>
    %c1_237 = arith.constant 1 : index
    %c3_238 = arith.constant 3 : index
    %c3_239 = arith.constant 3 : index
    %457 = vector.load %arg5[%c1_237, %c3_238, %c3_239] : memref<2x14x14xf32, #tpu.memory_space<vmem>>, vector<1x8x8xf32>
    %458 = vector.shape_cast %457 : vector<1x8x8xf32> to vector<8x8xf32>
    %459 = vector.broadcast %456 : f32 to vector<8x8xf32>
    %460 = arith.mulf %459, %458 : vector<8x8xf32>
    %461 = arith.addf %455, %460 : vector<8x8xf32>
    %c74 = arith.constant 74 : index
    %462 = memref.load %arg2[%c74] : memref<98xf32, #tpu.memory_space<smem>>
    %c1_240 = arith.constant 1 : index
    %c3_241 = arith.constant 3 : index
    %c4_242 = arith.constant 4 : index
    %463 = vector.load %arg5[%c1_240, %c3_241, %c4_242] : memref<2x14x14xf32, #tpu.memory_space<vmem>>, vector<1x8x8xf32>
    %464 = vector.shape_cast %463 : vector<1x8x8xf32> to vector<8x8xf32>
    %465 = vector.broadcast %462 : f32 to vector<8x8xf32>
    %466 = arith.mulf %465, %464 : vector<8x8xf32>
    %467 = arith.addf %461, %466 : vector<8x8xf32>
    %c75 = arith.constant 75 : index
    %468 = memref.load %arg2[%c75] : memref<98xf32, #tpu.memory_space<smem>>
    %c1_243 = arith.constant 1 : index
    %c3_244 = arith.constant 3 : index
    %c5_245 = arith.constant 5 : index
    %469 = vector.load %arg5[%c1_243, %c3_244, %c5_245] : memref<2x14x14xf32, #tpu.memory_space<vmem>>, vector<1x8x8xf32>
    %470 = vector.shape_cast %469 : vector<1x8x8xf32> to vector<8x8xf32>
    %471 = vector.broadcast %468 : f32 to vector<8x8xf32>
    %472 = arith.mulf %471, %470 : vector<8x8xf32>
    %473 = arith.addf %467, %472 : vector<8x8xf32>
    %c76 = arith.constant 76 : index
    %474 = memref.load %arg2[%c76] : memref<98xf32, #tpu.memory_space<smem>>
    %c1_246 = arith.constant 1 : index
    %c3_247 = arith.constant 3 : index
    %c6_248 = arith.constant 6 : index
    %475 = vector.load %arg5[%c1_246, %c3_247, %c6_248] : memref<2x14x14xf32, #tpu.memory_space<vmem>>, vector<1x8x8xf32>
    %476 = vector.shape_cast %475 : vector<1x8x8xf32> to vector<8x8xf32>
    %477 = vector.broadcast %474 : f32 to vector<8x8xf32>
    %478 = arith.mulf %477, %476 : vector<8x8xf32>
    %479 = arith.addf %473, %478 : vector<8x8xf32>
    %c77 = arith.constant 77 : index
    %480 = memref.load %arg2[%c77] : memref<98xf32, #tpu.memory_space<smem>>
    %c1_249 = arith.constant 1 : index
    %c4_250 = arith.constant 4 : index
    %c0_251 = arith.constant 0 : index
    %481 = vector.load %arg5[%c1_249, %c4_250, %c0_251] : memref<2x14x14xf32, #tpu.memory_space<vmem>>, vector<1x8x8xf32>
    %482 = vector.shape_cast %481 : vector<1x8x8xf32> to vector<8x8xf32>
    %483 = vector.broadcast %480 : f32 to vector<8x8xf32>
    %484 = arith.mulf %483, %482 : vector<8x8xf32>
    %485 = arith.addf %479, %484 : vector<8x8xf32>
    %c78 = arith.constant 78 : index
    %486 = memref.load %arg2[%c78] : memref<98xf32, #tpu.memory_space<smem>>
    %c1_252 = arith.constant 1 : index
    %c4_253 = arith.constant 4 : index
    %c1_254 = arith.constant 1 : index
    %487 = vector.load %arg5[%c1_252, %c4_253, %c1_254] : memref<2x14x14xf32, #tpu.memory_space<vmem>>, vector<1x8x8xf32>
    %488 = vector.shape_cast %487 : vector<1x8x8xf32> to vector<8x8xf32>
    %489 = vector.broadcast %486 : f32 to vector<8x8xf32>
    %490 = arith.mulf %489, %488 : vector<8x8xf32>
    %491 = arith.addf %485, %490 : vector<8x8xf32>
    %c79 = arith.constant 79 : index
    %492 = memref.load %arg2[%c79] : memref<98xf32, #tpu.memory_space<smem>>
    %c1_255 = arith.constant 1 : index
    %c4_256 = arith.constant 4 : index
    %c2_257 = arith.constant 2 : index
    %493 = vector.load %arg5[%c1_255, %c4_256, %c2_257] : memref<2x14x14xf32, #tpu.memory_space<vmem>>, vector<1x8x8xf32>
    %494 = vector.shape_cast %493 : vector<1x8x8xf32> to vector<8x8xf32>
    %495 = vector.broadcast %492 : f32 to vector<8x8xf32>
    %496 = arith.mulf %495, %494 : vector<8x8xf32>
    %497 = arith.addf %491, %496 : vector<8x8xf32>
    %c80 = arith.constant 80 : index
    %498 = memref.load %arg2[%c80] : memref<98xf32, #tpu.memory_space<smem>>
    %c1_258 = arith.constant 1 : index
    %c4_259 = arith.constant 4 : index
    %c3_260 = arith.constant 3 : index
    %499 = vector.load %arg5[%c1_258, %c4_259, %c3_260] : memref<2x14x14xf32, #tpu.memory_space<vmem>>, vector<1x8x8xf32>
    %500 = vector.shape_cast %499 : vector<1x8x8xf32> to vector<8x8xf32>
    %501 = vector.broadcast %498 : f32 to vector<8x8xf32>
    %502 = arith.mulf %501, %500 : vector<8x8xf32>
    %503 = arith.addf %497, %502 : vector<8x8xf32>
    %c81 = arith.constant 81 : index
    %504 = memref.load %arg2[%c81] : memref<98xf32, #tpu.memory_space<smem>>
    %c1_261 = arith.constant 1 : index
    %c4_262 = arith.constant 4 : index
    %c4_263 = arith.constant 4 : index
    %505 = vector.load %arg5[%c1_261, %c4_262, %c4_263] : memref<2x14x14xf32, #tpu.memory_space<vmem>>, vector<1x8x8xf32>
    %506 = vector.shape_cast %505 : vector<1x8x8xf32> to vector<8x8xf32>
    %507 = vector.broadcast %504 : f32 to vector<8x8xf32>
    %508 = arith.mulf %507, %506 : vector<8x8xf32>
    %509 = arith.addf %503, %508 : vector<8x8xf32>
    %c82 = arith.constant 82 : index
    %510 = memref.load %arg2[%c82] : memref<98xf32, #tpu.memory_space<smem>>
    %c1_264 = arith.constant 1 : index
    %c4_265 = arith.constant 4 : index
    %c5_266 = arith.constant 5 : index
    %511 = vector.load %arg5[%c1_264, %c4_265, %c5_266] : memref<2x14x14xf32, #tpu.memory_space<vmem>>, vector<1x8x8xf32>
    %512 = vector.shape_cast %511 : vector<1x8x8xf32> to vector<8x8xf32>
    %513 = vector.broadcast %510 : f32 to vector<8x8xf32>
    %514 = arith.mulf %513, %512 : vector<8x8xf32>
    %515 = arith.addf %509, %514 : vector<8x8xf32>
    %c83 = arith.constant 83 : index
    %516 = memref.load %arg2[%c83] : memref<98xf32, #tpu.memory_space<smem>>
    %c1_267 = arith.constant 1 : index
    %c4_268 = arith.constant 4 : index
    %c6_269 = arith.constant 6 : index
    %517 = vector.load %arg5[%c1_267, %c4_268, %c6_269] : memref<2x14x14xf32, #tpu.memory_space<vmem>>, vector<1x8x8xf32>
    %518 = vector.shape_cast %517 : vector<1x8x8xf32> to vector<8x8xf32>
    %519 = vector.broadcast %516 : f32 to vector<8x8xf32>
    %520 = arith.mulf %519, %518 : vector<8x8xf32>
    %521 = arith.addf %515, %520 : vector<8x8xf32>
    %c84 = arith.constant 84 : index
    %522 = memref.load %arg2[%c84] : memref<98xf32, #tpu.memory_space<smem>>
    %c1_270 = arith.constant 1 : index
    %c5_271 = arith.constant 5 : index
    %c0_272 = arith.constant 0 : index
    %523 = vector.load %arg5[%c1_270, %c5_271, %c0_272] : memref<2x14x14xf32, #tpu.memory_space<vmem>>, vector<1x8x8xf32>
    %524 = vector.shape_cast %523 : vector<1x8x8xf32> to vector<8x8xf32>
    %525 = vector.broadcast %522 : f32 to vector<8x8xf32>
    %526 = arith.mulf %525, %524 : vector<8x8xf32>
    %527 = arith.addf %521, %526 : vector<8x8xf32>
    %c85 = arith.constant 85 : index
    %528 = memref.load %arg2[%c85] : memref<98xf32, #tpu.memory_space<smem>>
    %c1_273 = arith.constant 1 : index
    %c5_274 = arith.constant 5 : index
    %c1_275 = arith.constant 1 : index
    %529 = vector.load %arg5[%c1_273, %c5_274, %c1_275] : memref<2x14x14xf32, #tpu.memory_space<vmem>>, vector<1x8x8xf32>
    %530 = vector.shape_cast %529 : vector<1x8x8xf32> to vector<8x8xf32>
    %531 = vector.broadcast %528 : f32 to vector<8x8xf32>
    %532 = arith.mulf %531, %530 : vector<8x8xf32>
    %533 = arith.addf %527, %532 : vector<8x8xf32>
    %c86 = arith.constant 86 : index
    %534 = memref.load %arg2[%c86] : memref<98xf32, #tpu.memory_space<smem>>
    %c1_276 = arith.constant 1 : index
    %c5_277 = arith.constant 5 : index
    %c2_278 = arith.constant 2 : index
    %535 = vector.load %arg5[%c1_276, %c5_277, %c2_278] : memref<2x14x14xf32, #tpu.memory_space<vmem>>, vector<1x8x8xf32>
    %536 = vector.shape_cast %535 : vector<1x8x8xf32> to vector<8x8xf32>
    %537 = vector.broadcast %534 : f32 to vector<8x8xf32>
    %538 = arith.mulf %537, %536 : vector<8x8xf32>
    %539 = arith.addf %533, %538 : vector<8x8xf32>
    %c87 = arith.constant 87 : index
    %540 = memref.load %arg2[%c87] : memref<98xf32, #tpu.memory_space<smem>>
    %c1_279 = arith.constant 1 : index
    %c5_280 = arith.constant 5 : index
    %c3_281 = arith.constant 3 : index
    %541 = vector.load %arg5[%c1_279, %c5_280, %c3_281] : memref<2x14x14xf32, #tpu.memory_space<vmem>>, vector<1x8x8xf32>
    %542 = vector.shape_cast %541 : vector<1x8x8xf32> to vector<8x8xf32>
    %543 = vector.broadcast %540 : f32 to vector<8x8xf32>
    %544 = arith.mulf %543, %542 : vector<8x8xf32>
    %545 = arith.addf %539, %544 : vector<8x8xf32>
    %c88 = arith.constant 88 : index
    %546 = memref.load %arg2[%c88] : memref<98xf32, #tpu.memory_space<smem>>
    %c1_282 = arith.constant 1 : index
    %c5_283 = arith.constant 5 : index
    %c4_284 = arith.constant 4 : index
    %547 = vector.load %arg5[%c1_282, %c5_283, %c4_284] : memref<2x14x14xf32, #tpu.memory_space<vmem>>, vector<1x8x8xf32>
    %548 = vector.shape_cast %547 : vector<1x8x8xf32> to vector<8x8xf32>
    %549 = vector.broadcast %546 : f32 to vector<8x8xf32>
    %550 = arith.mulf %549, %548 : vector<8x8xf32>
    %551 = arith.addf %545, %550 : vector<8x8xf32>
    %c89 = arith.constant 89 : index
    %552 = memref.load %arg2[%c89] : memref<98xf32, #tpu.memory_space<smem>>
    %c1_285 = arith.constant 1 : index
    %c5_286 = arith.constant 5 : index
    %c5_287 = arith.constant 5 : index
    %553 = vector.load %arg5[%c1_285, %c5_286, %c5_287] : memref<2x14x14xf32, #tpu.memory_space<vmem>>, vector<1x8x8xf32>
    %554 = vector.shape_cast %553 : vector<1x8x8xf32> to vector<8x8xf32>
    %555 = vector.broadcast %552 : f32 to vector<8x8xf32>
    %556 = arith.mulf %555, %554 : vector<8x8xf32>
    %557 = arith.addf %551, %556 : vector<8x8xf32>
    %c90 = arith.constant 90 : index
    %558 = memref.load %arg2[%c90] : memref<98xf32, #tpu.memory_space<smem>>
    %c1_288 = arith.constant 1 : index
    %c5_289 = arith.constant 5 : index
    %c6_290 = arith.constant 6 : index
    %559 = vector.load %arg5[%c1_288, %c5_289, %c6_290] : memref<2x14x14xf32, #tpu.memory_space<vmem>>, vector<1x8x8xf32>
    %560 = vector.shape_cast %559 : vector<1x8x8xf32> to vector<8x8xf32>
    %561 = vector.broadcast %558 : f32 to vector<8x8xf32>
    %562 = arith.mulf %561, %560 : vector<8x8xf32>
    %563 = arith.addf %557, %562 : vector<8x8xf32>
    %c91 = arith.constant 91 : index
    %564 = memref.load %arg2[%c91] : memref<98xf32, #tpu.memory_space<smem>>
    %c1_291 = arith.constant 1 : index
    %c6_292 = arith.constant 6 : index
    %c0_293 = arith.constant 0 : index
    %565 = vector.load %arg5[%c1_291, %c6_292, %c0_293] : memref<2x14x14xf32, #tpu.memory_space<vmem>>, vector<1x8x8xf32>
    %566 = vector.shape_cast %565 : vector<1x8x8xf32> to vector<8x8xf32>
    %567 = vector.broadcast %564 : f32 to vector<8x8xf32>
    %568 = arith.mulf %567, %566 : vector<8x8xf32>
    %569 = arith.addf %563, %568 : vector<8x8xf32>
    %c92 = arith.constant 92 : index
    %570 = memref.load %arg2[%c92] : memref<98xf32, #tpu.memory_space<smem>>
    %c1_294 = arith.constant 1 : index
    %c6_295 = arith.constant 6 : index
    %c1_296 = arith.constant 1 : index
    %571 = vector.load %arg5[%c1_294, %c6_295, %c1_296] : memref<2x14x14xf32, #tpu.memory_space<vmem>>, vector<1x8x8xf32>
    %572 = vector.shape_cast %571 : vector<1x8x8xf32> to vector<8x8xf32>
    %573 = vector.broadcast %570 : f32 to vector<8x8xf32>
    %574 = arith.mulf %573, %572 : vector<8x8xf32>
    %575 = arith.addf %569, %574 : vector<8x8xf32>
    %c93 = arith.constant 93 : index
    %576 = memref.load %arg2[%c93] : memref<98xf32, #tpu.memory_space<smem>>
    %c1_297 = arith.constant 1 : index
    %c6_298 = arith.constant 6 : index
    %c2_299 = arith.constant 2 : index
    %577 = vector.load %arg5[%c1_297, %c6_298, %c2_299] : memref<2x14x14xf32, #tpu.memory_space<vmem>>, vector<1x8x8xf32>
    %578 = vector.shape_cast %577 : vector<1x8x8xf32> to vector<8x8xf32>
    %579 = vector.broadcast %576 : f32 to vector<8x8xf32>
    %580 = arith.mulf %579, %578 : vector<8x8xf32>
    %581 = arith.addf %575, %580 : vector<8x8xf32>
    %c94 = arith.constant 94 : index
    %582 = memref.load %arg2[%c94] : memref<98xf32, #tpu.memory_space<smem>>
    %c1_300 = arith.constant 1 : index
    %c6_301 = arith.constant 6 : index
    %c3_302 = arith.constant 3 : index
    %583 = vector.load %arg5[%c1_300, %c6_301, %c3_302] : memref<2x14x14xf32, #tpu.memory_space<vmem>>, vector<1x8x8xf32>
    %584 = vector.shape_cast %583 : vector<1x8x8xf32> to vector<8x8xf32>
    %585 = vector.broadcast %582 : f32 to vector<8x8xf32>
    %586 = arith.mulf %585, %584 : vector<8x8xf32>
    %587 = arith.addf %581, %586 : vector<8x8xf32>
    %c95 = arith.constant 95 : index
    %588 = memref.load %arg2[%c95] : memref<98xf32, #tpu.memory_space<smem>>
    %c1_303 = arith.constant 1 : index
    %c6_304 = arith.constant 6 : index
    %c4_305 = arith.constant 4 : index
    %589 = vector.load %arg5[%c1_303, %c6_304, %c4_305] : memref<2x14x14xf32, #tpu.memory_space<vmem>>, vector<1x8x8xf32>
    %590 = vector.shape_cast %589 : vector<1x8x8xf32> to vector<8x8xf32>
    %591 = vector.broadcast %588 : f32 to vector<8x8xf32>
    %592 = arith.mulf %591, %590 : vector<8x8xf32>
    %593 = arith.addf %587, %592 : vector<8x8xf32>
    %c96 = arith.constant 96 : index
    %594 = memref.load %arg2[%c96] : memref<98xf32, #tpu.memory_space<smem>>
    %c1_306 = arith.constant 1 : index
    %c6_307 = arith.constant 6 : index
    %c5_308 = arith.constant 5 : index
    %595 = vector.load %arg5[%c1_306, %c6_307, %c5_308] : memref<2x14x14xf32, #tpu.memory_space<vmem>>, vector<1x8x8xf32>
    %596 = vector.shape_cast %595 : vector<1x8x8xf32> to vector<8x8xf32>
    %597 = vector.broadcast %594 : f32 to vector<8x8xf32>
    %598 = arith.mulf %597, %596 : vector<8x8xf32>
    %599 = arith.addf %593, %598 : vector<8x8xf32>
    %c97 = arith.constant 97 : index
    %600 = memref.load %arg2[%c97] : memref<98xf32, #tpu.memory_space<smem>>
    %c1_309 = arith.constant 1 : index
    %c6_310 = arith.constant 6 : index
    %c6_311 = arith.constant 6 : index
    %601 = vector.load %arg5[%c1_309, %c6_310, %c6_311] : memref<2x14x14xf32, #tpu.memory_space<vmem>>, vector<1x8x8xf32>
    %602 = vector.shape_cast %601 : vector<1x8x8xf32> to vector<8x8xf32>
    %603 = vector.broadcast %600 : f32 to vector<8x8xf32>
    %604 = arith.mulf %603, %602 : vector<8x8xf32>
    %605 = arith.addf %599, %604 : vector<8x8xf32>
    %cst_312 = arith.constant 0.000000e+00 : f32
    %606 = vector.broadcast %cst_312 : f32 to vector<8x8xf32>
    %607 = arith.subf %606, %605 : vector<8x8xf32>
    %608 = math.exp %607 : vector<8x8xf32>
    %cst_313 = arith.constant 1.000000e+00 : f32
    %609 = vector.broadcast %cst_313 : f32 to vector<8x8xf32>
    %610 = arith.addf %609, %608 : vector<8x8xf32>
    %cst_314 = arith.constant 1.000000e+00 : f32
    %611 = vector.broadcast %cst_314 : f32 to vector<8x8xf32>
    %612 = arith.divf %611, %610 : vector<8x8xf32>
    %613 = vector.shape_cast %612 : vector<8x8xf32> to vector<1x8x8xf32>
    %614 = vector.broadcast %613 : vector<1x8x8xf32> to vector<32x8x8xf32>
    %615 = arith.mulf %1, %614 : vector<32x8x8xf32>
    %c0_315 = arith.constant 0 : index
    %c0_316 = arith.constant 0 : index
    %c0_317 = arith.constant 0 : index
    %c0_318 = arith.constant 0 : index
    %616 = vector.load %arg4[%c0_315, %c0_316, %c0_317, %c0_318] : memref<1x32x8x8xf32, #tpu.memory_space<vmem>>, vector<1x32x8x8xf32>
    %617 = vector.shape_cast %616 : vector<1x32x8x8xf32> to vector<32x8x8xf32>
    %618 = vector.shape_cast %615 : vector<32x8x8xf32> to vector<1x32x8x8xf32>
    tpu.vector_store %arg4[%c0_315, %c0_316, %c0_317, %c0_318], %618 {strides = array<i32>} : memref<1x32x8x8xf32, #tpu.memory_space<vmem>>, vector<1x32x8x8xf32>,
    return
  }
  func.func @transform_0(%arg0: i32) -> (i32, i32, i32, i32) {
    %c0_i32 = arith.constant 0 : i32
    %c0_i32_0 = arith.constant 0 : i32
    %c0_i32_1 = arith.constant 0 : i32
    %c0_i32_2 = arith.constant 0 : i32
    return %arg0, %c0_i32, %c0_i32_0, %c0_i32_1 : i32, i32, i32, i32
  }
  func.func @transform_1(%arg0: i32) -> i32 {
    %c0_i32 = arith.constant 0 : i32
    %c0_i32_0 = arith.constant 0 : i32
    return %c0_i32 : i32
  }
  func.func @transform_2(%arg0: i32) -> i32 {
    %c0_i32 = arith.constant 0 : i32
    %c0_i32_0 = arith.constant 0 : i32
    return %c0_i32 : i32
  }
  func.func @transform_3(%arg0: i32) -> (i32, i32, i32, i32) {
    %c0_i32 = arith.constant 0 : i32
    %c0_i32_0 = arith.constant 0 : i32
    %c0_i32_1 = arith.constant 0 : i32
    %c0_i32_2 = arith.constant 0 : i32
    return %arg0, %c0_i32, %c0_i32_0, %c0_i32_1 : i32, i32, i32, i32
  }
}

module attributes {stable_mosaic.version = 11 : i64} {
  func.func @_mlp_kernel(%arg0: i32, %arg1: memref<64x64xf32, #tpu.memory_space<vmem>>, %arg2: memref<64x192xf32, #tpu.memory_space<vmem>>, %arg3: memref<1x192xf32, #tpu.memory_space<vmem>>, %arg4: memref<192x64xf32, #tpu.memory_space<vmem>>, %arg5: memref<1x64xf32, #tpu.memory_space<vmem>>, %arg6: memref<64x64xf32, #tpu.memory_space<vmem>>) attributes {dimension_semantics = [#tpu.dimension_semantics<parallel>], iteration_bounds = array<i64: 1>, scalar_prefetch = 0 : i64, scratch_operands = 0 : i64, tpu.core_type = #tpu.core_type<tc>, window_params = [{transform_indices = @transform_0, window_bounds = array<i64: 64, 64>}, {pipeline_mode = #tpu.pipeline_mode<synchronous>, transform_indices = @transform_1, window_bounds = array<i64: 64, 192>}, {pipeline_mode = #tpu.pipeline_mode<synchronous>, transform_indices = @transform_2, window_bounds = array<i64: 1, 192>}, {pipeline_mode = #tpu.pipeline_mode<synchronous>, transform_indices = @transform_3, window_bounds = array<i64: 192, 64>}, {pipeline_mode = #tpu.pipeline_mode<synchronous>, transform_indices = @transform_4, window_bounds = array<i64: 1, 64>}, {transform_indices = @transform_5, window_bounds = array<i64: 64, 64>}]} {
    %c0 = arith.constant 0 : index
    %c0_0 = arith.constant 0 : index
    %0 = vector.load %arg1[%c0, %c0_0] : memref<64x64xf32, #tpu.memory_space<vmem>>, vector<64x64xf32>
    %c0_1 = arith.constant 0 : index
    %c0_2 = arith.constant 0 : index
    %1 = vector.load %arg2[%c0_1, %c0_2] : memref<64x192xf32, #tpu.memory_space<vmem>>, vector<64x192xf32>
    %cst = arith.constant dense<0.000000e+00> : vector<64x192xf32>
    %2 = tpu.matmul %0, %1, %cst {dimension_numbers = #tpu.dot_dimension_numbers<[1], [0], [0], [1], [0, 0, 1, 1], [], []>, precision = #tpu.contract_precision<fp32>} : vector<64x64xf32>, vector<64x192xf32>, vector<64x192xf32> -> vector<64x192xf32>
    %c0_3 = arith.constant 0 : index
    %c0_4 = arith.constant 0 : index
    %3 = vector.load %arg3[%c0_3, %c0_4] : memref<1x192xf32, #tpu.memory_space<vmem>>, vector<1x192xf32>
    %4 = vector.broadcast %3 : vector<1x192xf32> to vector<64x192xf32>
    %5 = arith.addf %2, %4 : vector<64x192xf32>
    %cst_5 = arith.constant 5.000000e-01 : f32
    %6 = vector.broadcast %cst_5 : f32 to vector<64x192xf32>
    %7 = arith.mulf %6, %5 : vector<64x192xf32>
    %cst_6 = arith.constant 4.471500e-02 : f32
    %8 = vector.broadcast %cst_6 : f32 to vector<64x192xf32>
    %9 = arith.mulf %8, %5 : vector<64x192xf32>
    %10 = arith.mulf %9, %5 : vector<64x192xf32>
    %11 = arith.mulf %10, %5 : vector<64x192xf32>
    %12 = arith.addf %5, %11 : vector<64x192xf32>
    %cst_7 = arith.constant 0.797884583 : f32
    %13 = vector.broadcast %cst_7 : f32 to vector<64x192xf32>
    %14 = arith.mulf %13, %12 : vector<64x192xf32>
    %15 = math.tanh %14 : vector<64x192xf32>
    %cst_8 = arith.constant 1.000000e+00 : f32
    %16 = vector.broadcast %cst_8 : f32 to vector<64x192xf32>
    %17 = arith.addf %16, %15 : vector<64x192xf32>
    %18 = arith.mulf %7, %17 : vector<64x192xf32>
    %c0_9 = arith.constant 0 : index
    %c0_10 = arith.constant 0 : index
    %19 = vector.load %arg4[%c0_9, %c0_10] : memref<192x64xf32, #tpu.memory_space<vmem>>, vector<192x64xf32>
    %cst_11 = arith.constant dense<0.000000e+00> : vector<64x64xf32>
    %20 = tpu.matmul %18, %19, %cst_11 {dimension_numbers = #tpu.dot_dimension_numbers<[1], [0], [0], [1], [0, 0, 1, 1], [], []>, precision = #tpu.contract_precision<fp32>} : vector<64x192xf32>, vector<192x64xf32>, vector<64x64xf32> -> vector<64x64xf32>
    %c0_12 = arith.constant 0 : index
    %c0_13 = arith.constant 0 : index
    %21 = vector.load %arg5[%c0_12, %c0_13] : memref<1x64xf32, #tpu.memory_space<vmem>>, vector<1x64xf32>
    %22 = vector.broadcast %21 : vector<1x64xf32> to vector<64x64xf32>
    %23 = arith.addf %20, %22 : vector<64x64xf32>
    %c0_14 = arith.constant 0 : index
    %c0_15 = arith.constant 0 : index
    %24 = vector.load %arg6[%c0_14, %c0_15] : memref<64x64xf32, #tpu.memory_space<vmem>>, vector<64x64xf32>
    tpu.vector_store %arg6[%c0_14, %c0_15], %23 {strides = array<i32>} : memref<64x64xf32, #tpu.memory_space<vmem>>, vector<64x64xf32>,
    return
  }
  func.func @transform_0(%arg0: i32) -> (i32, i32) {
    %c0_i32 = arith.constant 0 : i32
    %c0_i32_0 = arith.constant 0 : i32
    return %arg0, %c0_i32 : i32, i32
  }
  func.func @transform_1(%arg0: i32) -> (i32, i32) {
    %c0_i32 = arith.constant 0 : i32
    %c0_i32_0 = arith.constant 0 : i32
    %c0_i32_1 = arith.constant 0 : i32
    return %c0_i32, %c0_i32_0 : i32, i32
  }
  func.func @transform_2(%arg0: i32) -> (i32, i32) {
    %c0_i32 = arith.constant 0 : i32
    %c0_i32_0 = arith.constant 0 : i32
    %c0_i32_1 = arith.constant 0 : i32
    return %c0_i32, %c0_i32_0 : i32, i32
  }
  func.func @transform_3(%arg0: i32) -> (i32, i32) {
    %c0_i32 = arith.constant 0 : i32
    %c0_i32_0 = arith.constant 0 : i32
    %c0_i32_1 = arith.constant 0 : i32
    return %c0_i32, %c0_i32_0 : i32, i32
  }
  func.func @transform_4(%arg0: i32) -> (i32, i32) {
    %c0_i32 = arith.constant 0 : i32
    %c0_i32_0 = arith.constant 0 : i32
    %c0_i32_1 = arith.constant 0 : i32
    return %c0_i32, %c0_i32_0 : i32, i32
  }
  func.func @transform_5(%arg0: i32) -> (i32, i32) {
    %c0_i32 = arith.constant 0 : i32
    %c0_i32_0 = arith.constant 0 : i32
    return %arg0, %c0_i32 : i32, i32
  }
}

module attributes {stable_mosaic.version = 11 : i64} {
  func.func @_mlp_kernel(%arg0: i32, %arg1: memref<128x32xf32, #tpu.memory_space<vmem>>, %arg2: memref<32x96xf32, #tpu.memory_space<vmem>>, %arg3: memref<1x96xf32, #tpu.memory_space<vmem>>, %arg4: memref<96x32xf32, #tpu.memory_space<vmem>>, %arg5: memref<1x32xf32, #tpu.memory_space<vmem>>, %arg6: memref<128x32xf32, #tpu.memory_space<vmem>>) attributes {dimension_semantics = [#tpu.dimension_semantics<parallel>], iteration_bounds = array<i64: 1>, scalar_prefetch = 0 : i64, scratch_operands = 0 : i64, tpu.core_type = #tpu.core_type<tc>, window_params = [{transform_indices = @transform_0, window_bounds = array<i64: 128, 32>}, {pipeline_mode = #tpu.pipeline_mode<synchronous>, transform_indices = @transform_1, window_bounds = array<i64: 32, 96>}, {pipeline_mode = #tpu.pipeline_mode<synchronous>, transform_indices = @transform_2, window_bounds = array<i64: 1, 96>}, {pipeline_mode = #tpu.pipeline_mode<synchronous>, transform_indices = @transform_3, window_bounds = array<i64: 96, 32>}, {pipeline_mode = #tpu.pipeline_mode<synchronous>, transform_indices = @transform_4, window_bounds = array<i64: 1, 32>}, {transform_indices = @transform_5, window_bounds = array<i64: 128, 32>}]} {
    %c0 = arith.constant 0 : index
    %c0_0 = arith.constant 0 : index
    %0 = vector.load %arg1[%c0, %c0_0] : memref<128x32xf32, #tpu.memory_space<vmem>>, vector<128x32xf32>
    %c0_1 = arith.constant 0 : index
    %c0_2 = arith.constant 0 : index
    %1 = vector.load %arg2[%c0_1, %c0_2] : memref<32x96xf32, #tpu.memory_space<vmem>>, vector<32x96xf32>
    %cst = arith.constant dense<0.000000e+00> : vector<128x96xf32>
    %2 = tpu.matmul %0, %1, %cst {dimension_numbers = #tpu.dot_dimension_numbers<[1], [0], [0], [1], [0, 0, 1, 1], [], []>, precision = #tpu.contract_precision<fp32>} : vector<128x32xf32>, vector<32x96xf32>, vector<128x96xf32> -> vector<128x96xf32>
    %c0_3 = arith.constant 0 : index
    %c0_4 = arith.constant 0 : index
    %3 = vector.load %arg3[%c0_3, %c0_4] : memref<1x96xf32, #tpu.memory_space<vmem>>, vector<1x96xf32>
    %4 = vector.broadcast %3 : vector<1x96xf32> to vector<128x96xf32>
    %5 = arith.addf %2, %4 : vector<128x96xf32>
    %cst_5 = arith.constant 5.000000e-01 : f32
    %6 = vector.broadcast %cst_5 : f32 to vector<128x96xf32>
    %7 = arith.mulf %6, %5 : vector<128x96xf32>
    %cst_6 = arith.constant 4.471500e-02 : f32
    %8 = vector.broadcast %cst_6 : f32 to vector<128x96xf32>
    %9 = arith.mulf %8, %5 : vector<128x96xf32>
    %10 = arith.mulf %9, %5 : vector<128x96xf32>
    %11 = arith.mulf %10, %5 : vector<128x96xf32>
    %12 = arith.addf %5, %11 : vector<128x96xf32>
    %cst_7 = arith.constant 0.797884583 : f32
    %13 = vector.broadcast %cst_7 : f32 to vector<128x96xf32>
    %14 = arith.mulf %13, %12 : vector<128x96xf32>
    %15 = math.tanh %14 : vector<128x96xf32>
    %cst_8 = arith.constant 1.000000e+00 : f32
    %16 = vector.broadcast %cst_8 : f32 to vector<128x96xf32>
    %17 = arith.addf %16, %15 : vector<128x96xf32>
    %18 = arith.mulf %7, %17 : vector<128x96xf32>
    %c0_9 = arith.constant 0 : index
    %c0_10 = arith.constant 0 : index
    %19 = vector.load %arg4[%c0_9, %c0_10] : memref<96x32xf32, #tpu.memory_space<vmem>>, vector<96x32xf32>
    %cst_11 = arith.constant dense<0.000000e+00> : vector<128x32xf32>
    %20 = tpu.matmul %18, %19, %cst_11 {dimension_numbers = #tpu.dot_dimension_numbers<[1], [0], [0], [1], [0, 0, 1, 1], [], []>, precision = #tpu.contract_precision<fp32>} : vector<128x96xf32>, vector<96x32xf32>, vector<128x32xf32> -> vector<128x32xf32>
    %c0_12 = arith.constant 0 : index
    %c0_13 = arith.constant 0 : index
    %21 = vector.load %arg5[%c0_12, %c0_13] : memref<1x32xf32, #tpu.memory_space<vmem>>, vector<1x32xf32>
    %22 = vector.broadcast %21 : vector<1x32xf32> to vector<128x32xf32>
    %23 = arith.addf %20, %22 : vector<128x32xf32>
    %c0_14 = arith.constant 0 : index
    %c0_15 = arith.constant 0 : index
    %24 = vector.load %arg6[%c0_14, %c0_15] : memref<128x32xf32, #tpu.memory_space<vmem>>, vector<128x32xf32>
    tpu.vector_store %arg6[%c0_14, %c0_15], %23 {strides = array<i32>} : memref<128x32xf32, #tpu.memory_space<vmem>>, vector<128x32xf32>,
    return
  }
  func.func @transform_0(%arg0: i32) -> (i32, i32) {
    %c0_i32 = arith.constant 0 : i32
    %c0_i32_0 = arith.constant 0 : i32
    return %arg0, %c0_i32 : i32, i32
  }
  func.func @transform_1(%arg0: i32) -> (i32, i32) {
    %c0_i32 = arith.constant 0 : i32
    %c0_i32_0 = arith.constant 0 : i32
    %c0_i32_1 = arith.constant 0 : i32
    return %c0_i32, %c0_i32_0 : i32, i32
  }
  func.func @transform_2(%arg0: i32) -> (i32, i32) {
    %c0_i32 = arith.constant 0 : i32
    %c0_i32_0 = arith.constant 0 : i32
    %c0_i32_1 = arith.constant 0 : i32
    return %c0_i32, %c0_i32_0 : i32, i32
  }
  func.func @transform_3(%arg0: i32) -> (i32, i32) {
    %c0_i32 = arith.constant 0 : i32
    %c0_i32_0 = arith.constant 0 : i32
    %c0_i32_1 = arith.constant 0 : i32
    return %c0_i32, %c0_i32_0 : i32, i32
  }
  func.func @transform_4(%arg0: i32) -> (i32, i32) {
    %c0_i32 = arith.constant 0 : i32
    %c0_i32_0 = arith.constant 0 : i32
    %c0_i32_1 = arith.constant 0 : i32
    return %c0_i32, %c0_i32_0 : i32, i32
  }
  func.func @transform_5(%arg0: i32) -> (i32, i32) {
    %c0_i32 = arith.constant 0 : i32
    %c0_i32_0 = arith.constant 0 : i32
    return %arg0, %c0_i32 : i32, i32
  }
}

</mosaic_0001>

<bundles_post_ra>
// kernel: arm_mixer_forward.6
= control target key start
LH: loop header
LB: loop body
LE: loop exit
PB: predicated region body
PF: predicated region fallthrough
CT: control target
= control target key end

     0   :  { %vm30_vm0 = vcmask 261120   ;;  %s666_s0 = inlined_call_operand.vmem [shape: f32[128,32], index: 0, kind: input, shape index: {}]   ;;  %s667_s1 = inlined_call_operand.vmem [shape: f32[1,32], index: 1, kind: input, shape index: {}]   ;;  %s668_s2 = inlined_call_operand.vmem [shape: f32[1,32], index: 2, kind: input, shape index: {}]   ;;  %s669_s3 = inlined_call_operand.vmem [shape: f32[128,32], index: 3, kind: output, shape index: {}]  }
   0x1   :  { %v14_v0 = vld [vmem:[%s666_s0] sm:$0xff]  ;;  %v16_v1 = vld [vmem:[%s666_s0 + $0x10] sm:$0xff]  ;;  %v15_v2 = vld [vmem:[%s666_s0 + $0x8] sm:$0xff] }
   0x2   :  { %v31_v3 = vsel %vm30_vm0, %v14_v0, 0.0  ;;  %v37_v4 = vsel %vm30_vm0, %v16_v1, 0.0  ;;  %v17_v5 = vld [vmem:[%s666_s0 + $0x18] sm:$0xff]  ;;  %v34_v6 = vsel %vm30_vm0, %v15_v2, 0.0  ;;  %v18_v8 = vld [vmem:[%s666_s0 + $0x20] sm:$0xff]  ;;  %v19_v9 = vld [vmem:[%s666_s0 + $0x28] sm:$0xff] }
   0x3   :  { %32 = vadd.xlane.f32.xlu0 %v31_v3  ;;  %38 = vadd.xlane.f32.xlu1 %v37_v4  ;;  %v40_v7 = vsel %vm30_vm0, %v17_v5, 0.0  ;;  %v43_v10 = vsel %vm30_vm0, %v18_v8, 0.0  ;;  %v46_v11 = vsel %vm30_vm0, %v19_v9, 0.0  ;;  %v387_v12 = vld [vmem:[%s666_s0 + $0x30] sm:$0xff]  ;;  %v392_v13 = vld [vmem:[%s666_s0 + $0x38] sm:$0xff]  ;;  %v401_v16 = vld [vmem:[%s666_s0 + $0x40] sm:$0xff] }
   0x4   :  { %v49_v14 = vsel %vm30_vm0, %v387_v12, 0.0  ;;  %v52_v15 = vsel %vm30_vm0, %v392_v13, 0.0  ;;  %v406_v17 = vld [vmem:[%s666_s0 + $0x48] sm:$0xff]  ;;  %v55_v18 = vsel %vm30_vm0, %v401_v16, 0.0  ;;  %v415_v20 = vld [vmem:[%s666_s0 + $0x50] sm:$0xff]  ;;  %v420_v21 = vld [vmem:[%s666_s0 + $0x58] sm:$0xff] }
   0x5   :  { %v58_v19 = vsel %vm30_vm0, %v406_v17, 0.0  ;;  %v61_v22 = vsel %vm30_vm0, %v415_v20, 0.0  ;;  %v64_v23 = vsel %vm30_vm0, %v420_v21, 0.0  ;;  %v429_v24 = vld [vmem:[%s666_s0 + $0x60] sm:$0xff]  ;;  %v434_v25 = vld [vmem:[%s666_s0 + $0x68] sm:$0xff]  ;;  %v443_v28 = vld [vmem:[%s666_s0 + $0x70] sm:$0xff] }
   0x6   :  { %v67_v26 = vsel %vm30_vm0, %v429_v24, 0.0  ;;  %v70_v27 = vsel %vm30_vm0, %v434_v25, 0.0  ;;  %v448_v29 = vld [vmem:[%s666_s0 + $0x78] sm:$0xff]  ;;  %v73_v30 = vsel %vm30_vm0, %v443_v28, 0.0 }
   0x7   :  { %35 = vadd.xlane.f32.xlu0 %v34_v6  ;;  %41 = vadd.xlane.f32.xlu1 %v40_v7  ;;  %v76_v31 = vsel %vm30_vm0, %v448_v29, 0.0 }
   0xb   :  { %44 = vadd.xlane.f32.xlu0 %v43_v10  ;;  %47 = vadd.xlane.f32.xlu1 %v46_v11 }
   0xf   :  { %50 = vadd.xlane.f32.xlu0 %v49_v14  ;;  %53 = vadd.xlane.f32.xlu1 %v52_v15 }
  0x13   :  { %56 = vadd.xlane.f32.xlu0 %v55_v18  ;;  %59 = vadd.xlane.f32.xlu1 %v58_v19 }
  0x17   :  { %62 = vadd.xlane.f32.xlu0 %v61_v22  ;;  %65 = vadd.xlane.f32.xlu1 %v64_v23 }
  0x1b   :  { %68 = vadd.xlane.f32.xlu0 %v67_v26  ;;  %71 = vadd.xlane.f32.xlu1 %v70_v27 }
  0x1f   :  { %74 = vadd.xlane.f32.xlu0 %v73_v30  ;;  %77 = vadd.xlane.f32.xlu1 %v76_v31 }
  0x90   :  { %v33_v32 = vpop.xlane.xlu0 %32  ;;  %v39_v33 = vpop.xlane.xlu1 %38 }
  0x91   :  { %v80_v34 = vmul.f32 0.03125, %v33_v32  ;;  %v82_v35 = vmul.f32 0.03125, %v39_v33 }
  0x93   :  { %v454_v36 = vsub.f32 %v14_v0, %v80_v34  ;;  %v456_v37 = vsub.f32 %v16_v1, %v82_v35 }
  0x94   :  { %v36_v38 = vpop.xlane.xlu0 %35  ;;  %v42_v39 = vpop.xlane.xlu1 %41 }
  0x95   :  { %v81_v40 = vmul.f32 0.03125, %v36_v38  ;;  %v83_v41 = vmul.f32 0.03125, %v42_v39  ;;  %v112_v42 = vmul.f32 %v454_v36, %v454_v36  ;;  %v114_v43 = vmul.f32 %v456_v37, %v456_v37 }
  0x97   :  { %v462_v44 = vsub.f32 %v15_v2, %v81_v40  ;;  %v464_v45 = vsub.f32 %v17_v5, %v83_v41  ;;  %v128_v46 = vsel %vm30_vm0, %v112_v42, 0.0  ;;  %v134_v49 = vsel %vm30_vm0, %v114_v43, 0.0 }
  0x98   :  { %129 = vadd.xlane.f32.xlu0 %v128_v46  ;;  %v45_v47 = vpop.xlane.xlu0 %44  ;;  %v48_v48 = vpop.xlane.xlu1 %47 }
  0x99   :  { %v84_v50 = vmul.f32 0.03125, %v45_v47  ;;  %v85_v51 = vmul.f32 0.03125, %v48_v48  ;;  %v113_v52 = vmul.f32 %v462_v44, %v462_v44  ;;  %v115_v53 = vmul.f32 %v464_v45, %v464_v45 }
  0x9b   :  { %v472_v54 = vsub.f32 %v18_v8, %v84_v50  ;;  %v474_v55 = vsub.f32 %v19_v9, %v85_v51  ;;  %v131_v56 = vsel %vm30_vm0, %v113_v52, 0.0  ;;  %v137_v59 = vsel %vm30_vm0, %v115_v53, 0.0 }
  0x9c   :  { %135 = vadd.xlane.f32.xlu0 %v134_v49  ;;  %132 = vadd.xlane.f32.xlu1 %v131_v56  ;;  %v51_v57 = vpop.xlane.xlu0 %50  ;;  %v54_v58 = vpop.xlane.xlu1 %53 }
  0x9d   :  { %v86_v60 = vmul.f32 0.03125, %v51_v57  ;;  %v87_v61 = vmul.f32 0.03125, %v54_v58  ;;  %v116_v62 = vmul.f32 %v472_v54, %v472_v54  ;;  %v117_v63 = vmul.f32 %v474_v55, %v474_v55 }
  0x9f   :  { %v483_v0 = vsub.f32 %v387_v12, %v86_v60  ;;  %v486_v1 = vsub.f32 %v392_v13, %v87_v61  ;;  %v140_v2 = vsel %vm30_vm0, %v116_v62, 0.0  ;;  %v143_v5 = vsel %vm30_vm0, %v117_v63, 0.0 }
  0xa0   :  { %138 = vadd.xlane.f32.xlu1 %v137_v59  ;;  %141 = vadd.xlane.f32.xlu0 %v140_v2  ;;  %v57_v3 = vpop.xlane.xlu0 %56  ;;  %v60_v4 = vpop.xlane.xlu1 %59 }
  0xa1   :  { %v88_v6 = vmul.f32 0.03125, %v57_v3  ;;  %v89_v7 = vmul.f32 0.03125, %v60_v4  ;;  %v118_v8 = vmul.f32 %v483_v0, %v483_v0  ;;  %v119_v9 = vmul.f32 %v486_v1, %v486_v1 }
  0xa3   :  { %v495_v10 = vsub.f32 %v401_v16, %v88_v6  ;;  %v498_v11 = vsub.f32 %v406_v17, %v89_v7  ;;  %v146_v12 = vsel %vm30_vm0, %v118_v8, 0.0  ;;  %v149_v15 = vsel %vm30_vm0, %v119_v9, 0.0 }
  0xa4   :  { %144 = vadd.xlane.f32.xlu1 %v143_v5  ;;  %147 = vadd.xlane.f32.xlu0 %v146_v12  ;;  %v63_v13 = vpop.xlane.xlu0 %62  ;;  %v66_v14 = vpop.xlane.xlu1 %65 }
  0xa5   :  { %v90_v18 = vmul.f32 0.03125, %v63_v13  ;;  %v91_v19 = vmul.f32 0.03125, %v66_v14  ;;  %v120_v22 = vmul.f32 %v495_v10, %v495_v10  ;;  %v121_v16 = vmul.f32 %v498_v11, %v498_v11  ;;  %v547_v14 = vld [vmem:[%s667_s1] ss:$0 sm:$0xff] }
  0xa7   :  { %v507_v23 = vsub.f32 %v415_v20, %v90_v18  ;;  %v510_v17 = vsub.f32 %v420_v21, %v91_v19  ;;  %v152_v26 = vsel %vm30_vm0, %v120_v22, 0.0  ;;  %v155_v31 = vsel %vm30_vm0, %v121_v16, 0.0 }
  0xa8   :  { %150 = vadd.xlane.f32.xlu1 %v149_v15  ;;  %153 = vadd.xlane.f32.xlu0 %v152_v26  ;;  %v69_v27 = vpop.xlane.xlu0 %68  ;;  %v72_v30 = vpop.xlane.xlu1 %71  ;;  %v553_v26 = vld [vmem:[%s668_s2] ss:$0 sm:$0xff] }
  0xa9   :  { %v92_v32 = vmul.f32 0.03125, %v69_v27  ;;  %v93_v33 = vmul.f32 0.03125, %v72_v30  ;;  %v122_v34 = vmul.f32 %v507_v23, %v507_v23  ;;  %v123_v20 = vmul.f32 %v510_v17, %v510_v17 }
  0xab   :  { %v519_v35 = vsub.f32 %v429_v24, %v92_v32  ;;  %v522_v21 = vsub.f32 %v434_v25, %v93_v33  ;;  %v158_v38 = vsel %vm30_vm0, %v122_v34, 0.0  ;;  %v161_v41 = vsel %vm30_vm0, %v123_v20, 0.0 }
  0xac   :  { %156 = vadd.xlane.f32.xlu1 %v155_v31  ;;  %159 = vadd.xlane.f32.xlu0 %v158_v38  ;;  %v75_v39 = vpop.xlane.xlu0 %74  ;;  %v78_v40 = vpop.xlane.xlu1 %77 }
  0xad   :  { %v94_v42 = vmul.f32 0.03125, %v75_v39  ;;  %v95_v43 = vmul.f32 0.03125, %v78_v40  ;;  %v124_v46 = vmul.f32 %v519_v35, %v519_v35  ;;  %v125_v24 = vmul.f32 %v522_v21, %v522_v21 }
  0xaf   :  { %v531_v47 = vsub.f32 %v443_v28, %v94_v42  ;;  %v534_v25 = vsub.f32 %v448_v29, %v95_v43  ;;  %v164_v48 = vsel %vm30_vm0, %v124_v46, 0.0  ;;  %v167_v49 = vsel %vm30_vm0, %v125_v24, 0.0 }
  0xb0   :  { %162 = vadd.xlane.f32.xlu1 %v161_v41  ;;  %165 = vadd.xlane.f32.xlu0 %v164_v48 }
  0xb1   :  { %v126_v50 = vmul.f32 %v531_v47, %v531_v47  ;;  %v127_v51 = vmul.f32 %v534_v25, %v534_v25 }
  0xb3   :  { %v170_v52 = vsel %vm30_vm0, %v126_v50, 0.0  ;;  %v173_v28 = vsel %vm30_vm0, %v127_v51, 0.0 }
  0xb4   :  { %168 = vadd.xlane.f32.xlu1 %v167_v49  ;;  %171 = vadd.xlane.f32.xlu0 %v170_v52 }
  0xb8   :  { %174 = vadd.xlane.f32.xlu1 %v173_v28 }
 0x125   :  { %v130_v29 = vpop.xlane.xlu0 %129 }
 0x126   :  { %v176_v53 = vmul.f32 0.03125, %v130_v29 }
 0x128   :  { %v192_v56 = vadd.f32 1e-05, %v176_v53 }
 0x129   :  { %v133_v57 = vpop.xlane.xlu1 %132  ;;  %v136_v58 = vpop.xlane.xlu0 %135 }
 0x12a   :  { %308 = vrsqrt.f32 %v192_v56  ;;  %v177_v59 = vmul.f32 0.03125, %v133_v57  ;;  %v178_v60 = vmul.f32 0.03125, %v136_v58 }
 0x12c   :  { %v193_v61 = vadd.f32 1e-05, %v177_v59  ;;  %v194_v62 = vadd.f32 1e-05, %v178_v60 }
 0x12d   :  { %v139_v63 = vpop.xlane.xlu1 %138  ;;  %v142_v2 = vpop.xlane.xlu0 %141 }
 0x12e   :  { %310 = vrsqrt.f32 %v193_v61  ;;  %v179_v3 = vmul.f32 0.03125, %v139_v63  ;;  %v180_v4 = vmul.f32 0.03125, %v142_v2 }
 0x12f   :  { %312 = vrsqrt.f32 %v194_v62 }
 0x130   :  { %v195_v5 = vadd.f32 1e-05, %v179_v3  ;;  %v196_v6 = vadd.f32 1e-05, %v180_v4 }
 0x131   :  { %v145_v7 = vpop.xlane.xlu1 %144  ;;  %v148_v8 = vpop.xlane.xlu0 %147 }
 0x132   :  { %314 = vrsqrt.f32 %v195_v5  ;;  %v181_v9 = vmul.f32 0.03125, %v145_v7  ;;  %v182_v12 = vmul.f32 0.03125, %v148_v8 }
 0x133   :  { %316 = vrsqrt.f32 %v196_v6 }
 0x134   :  { %v309_v13 = vpop.eup %308  ;;  %v197_v15 = vadd.f32 1e-05, %v181_v9  ;;  %v198_v18 = vadd.f32 1e-05, %v182_v12 }
 0x135   :  { %v224_v19 = vmul.f32 %v309_v13, %v454_v36  ;;  %v151_v22 = vpop.xlane.xlu1 %150  ;;  %v154_v16 = vpop.xlane.xlu0 %153 }
 0x136   :  { %318 = vrsqrt.f32 %v197_v15  ;;  %v183_v27 = vmul.f32 0.03125, %v151_v22  ;;  %v184_v30 = vmul.f32 0.03125, %v154_v16 }
 0x137   :  { %v247_v31 = vmul.f32 %v547_v14, %v224_v19  ;;  %320 = vrsqrt.f32 %v198_v18 }
 0x138   :  { %v311_v32 = vpop.eup %310  ;;  %v199_v33 = vadd.f32 1e-05, %v183_v27  ;;  %v200_v34 = vadd.f32 1e-05, %v184_v30 }
 0x139   :  { %v313_v20 = vpop.eup %312  ;;  %v270_v38 = vadd.f32 %v553_v26, %v247_v31  ;;  %v225_v36 = vmul.f32 %v311_v32, %v462_v44  ;;  %v157_v39 = vpop.xlane.xlu1 %156 }
 0x13a   :  { %v160_v40 = vpop.xlane.xlu0 %159  ;;  %v226_v41 = vmul.f32 %v313_v20, %v456_v37  ;;  %322 = vrsqrt.f32 %v199_v33  ;;  %v185_v42 = vmul.f32 0.03125, %v157_v39 }
 0x13b   :  { %v186_v43 = vmul.f32 0.03125, %v160_v40  ;;  %286 = vst.msk [vmem:[%s669_s3] sm:$0xff] %vm30_vm0, %v270_v38  ;;  %v248_v46 = vmul.f32 %v547_v14, %v225_v36  ;;  %324 = vrsqrt.f32 %v200_v34 }
 0x13c   :  { %v315_v24 = vpop.eup %314  ;;  %v249_v48 = vmul.f32 %v547_v14, %v226_v41  ;;  %v201_v49 = vadd.f32 1e-05, %v185_v42 }
 0x13d   :  { %v202_v44 = vadd.f32 1e-05, %v186_v43  ;;  %v317_v50 = vpop.eup %316  ;;  %v271_v51 = vadd.f32 %v553_v26, %v248_v46  ;;  %v227_v37 = vmul.f32 %v315_v24, %v464_v45  ;;  %v163_v52 = vpop.xlane.xlu1 %162 }
 0x13e   :  { %v166_v28 = vpop.xlane.xlu0 %165  ;;  %v272_v29 = vadd.f32 %v553_v26, %v249_v48  ;;  %v228_v53 = vmul.f32 %v317_v50, %v472_v54  ;;  %326 = vrsqrt.f32 %v201_v49  ;;  %v187_v56 = vmul.f32 0.03125, %v163_v52 }
 0x13f   :  { %287 = vst.msk [vmem:[%s669_s3 + $0x8] sm:$0xff] %vm30_vm0, %v271_v51  ;;  %v250_v57 = vmul.f32 %v547_v14, %v227_v37  ;;  %328 = vrsqrt.f32 %v202_v44  ;;  %v188_v58 = vmul.f32 0.03125, %v166_v28 }
 0x140   :  { %v319_v59 = vpop.eup %318  ;;  %288 = vst.msk [vmem:[%s669_s3 + $0x10] sm:$0xff] %vm30_vm0, %v272_v29  ;;  %v251_v45 = vmul.f32 %v547_v14, %v228_v53  ;;  %v203_v54 = vadd.f32 1e-05, %v187_v56 }
 0x141   :  { %v321_v60 = vpop.eup %320  ;;  %v273_v61 = vadd.f32 %v553_v26, %v250_v57  ;;  %v229_v62 = vmul.f32 %v319_v59, %v474_v55  ;;  %v204_v63 = vadd.f32 1e-05, %v188_v58  ;;  %v169_v2 = vpop.xlane.xlu1 %168 }
 0x142   :  { %v172_v3 = vpop.xlane.xlu0 %171  ;;  %v274_v4 = vadd.f32 %v553_v26, %v251_v45  ;;  %v230_v5 = vmul.f32 %v321_v60, %v483_v0  ;;  %330 = vrsqrt.f32 %v203_v54  ;;  %v189_v6 = vmul.f32 0.03125, %v169_v2 }
 0x143   :  { %289 = vst.msk [vmem:[%s669_s3 + $0x18] sm:$0xff] %vm30_vm0, %v273_v61  ;;  %v252_v7 = vmul.f32 %v547_v14, %v229_v62  ;;  %332 = vrsqrt.f32 %v204_v63  ;;  %v190_v8 = vmul.f32 0.03125, %v172_v3 }
 0x144   :  { %v323_v9 = vpop.eup %322  ;;  %290 = vst.msk [vmem:[%s669_s3 + $0x20] sm:$0xff] %vm30_vm0, %v274_v4  ;;  %v253_v55 = vmul.f32 %v547_v14, %v230_v5  ;;  %v205_v0 = vadd.f32 1e-05, %v189_v6 }
 0x145   :  { %v325_v12 = vpop.eup %324  ;;  %v275_v13 = vadd.f32 %v553_v26, %v252_v7  ;;  %v231_v15 = vmul.f32 %v323_v9, %v486_v1  ;;  %v206_v18 = vadd.f32 1e-05, %v190_v8  ;;  %v175_v19 = vpop.xlane.xlu1 %174 }
 0x146   :  { %v276_v22 = vadd.f32 %v553_v26, %v253_v55  ;;  %v232_v16 = vmul.f32 %v325_v12, %v495_v10  ;;  %334 = vrsqrt.f32 %v205_v0  ;;  %v191_v27 = vmul.f32 0.03125, %v175_v19 }
 0x147   :  { %291 = vst.msk [vmem:[%s669_s3 + $0x28] sm:$0xff] %vm30_vm0, %v275_v13  ;;  %v254_v30 = vmul.f32 %v547_v14, %v231_v15  ;;  %336 = vrsqrt.f32 %v206_v18 }
 0x148   :  { %v327_v31 = vpop.eup %326  ;;  %292 = vst.msk [vmem:[%s669_s3 + $0x30] sm:$0xff] %vm30_vm0, %v276_v22  ;;  %v255_v1 = vmul.f32 %v547_v14, %v232_v16  ;;  %v207_v32 = vadd.f32 1e-05, %v191_v27 }
 0x149   :  { %v329_v10 = vpop.eup %328  ;;  %v277_v33 = vadd.f32 %v553_v26, %v254_v30  ;;  %v233_v34 = vmul.f32 %v327_v31, %v498_v11 }
 0x14a   :  { %v278_v20 = vadd.f32 %v553_v26, %v255_v1  ;;  %v234_v38 = vmul.f32 %v329_v10, %v507_v23  ;;  %338 = vrsqrt.f32 %v207_v32 }
 0x14b   :  { %293 = vst.msk [vmem:[%s669_s3 + $0x38] sm:$0xff] %vm30_vm0, %v277_v33  ;;  %v256_v36 = vmul.f32 %v547_v14, %v233_v34 }
 0x14c   :  { %v331_v39 = vpop.eup %330  ;;  %294 = vst.msk [vmem:[%s669_s3 + $0x40] sm:$0xff] %vm30_vm0, %v278_v20  ;;  %v257_v11 = vmul.f32 %v547_v14, %v234_v38 }
 0x14d   :  { %v333_v40 = vpop.eup %332  ;;  %v279_v41 = vadd.f32 %v553_v26, %v256_v36  ;;  %v235_v23 = vmul.f32 %v331_v39, %v510_v17 }
 0x14e   :  { %v280_v42 = vadd.f32 %v553_v26, %v257_v11  ;;  %v236_v43 = vmul.f32 %v333_v40, %v519_v35 }
 0x14f   :  { %295 = vst.msk [vmem:[%s669_s3 + $0x48] sm:$0xff] %vm30_vm0, %v279_v41  ;;  %v258_v46 = vmul.f32 %v547_v14, %v235_v23 }
 0x150   :  { %v335_v24 = vpop.eup %334  ;;  %296 = vst.msk [vmem:[%s669_s3 + $0x50] sm:$0xff] %vm30_vm0, %v280_v42  ;;  %v259_v48 = vmul.f32 %v547_v14, %v236_v43 }
 0x151   :  { %v337_v17 = vpop.eup %336  ;;  %v281_v49 = vadd.f32 %v553_v26, %v258_v46  ;;  %v237_v35 = vmul.f32 %v335_v24, %v522_v21 }
 0x152   :  { %v282_v44 = vadd.f32 %v553_v26, %v259_v48  ;;  %v238_v50 = vmul.f32 %v337_v17, %v531_v47 }
 0x153   :  { %297 = vst.msk [vmem:[%s669_s3 + $0x58] sm:$0xff] %vm30_vm0, %v281_v49  ;;  %v260_v51 = vmul.f32 %v547_v14, %v237_v35 }
 0x154   :  { %v339_v37 = vpop.eup %338  ;;  %298 = vst.msk [vmem:[%s669_s3 + $0x60] sm:$0xff] %vm30_vm0, %v282_v44  ;;  %v261_v52 = vmul.f32 %v547_v14, %v238_v50 }
 0x155   :  { %v283_v21 = vadd.f32 %v553_v26, %v260_v51  ;;  %v239_v28 = vmul.f32 %v339_v37, %v534_v25 }
 0x156   :  { %v284_v47 = vadd.f32 %v553_v26, %v261_v52 }
 0x157   :  { %299 = vst.msk [vmem:[%s669_s3 + $0x68] sm:$0xff] %vm30_vm0, %v283_v21  ;;  %v262_v29 = vmul.f32 %v547_v14, %v239_v28 }
 0x158   :  { %300 = vst.msk [vmem:[%s669_s3 + $0x70] sm:$0xff] %vm30_vm0, %v284_v47 }
 0x159   :  { %v285_v53 = vadd.f32 %v553_v26, %v262_v29 }
 0x15b   :  { %301 = vst.msk [vmem:[%s669_s3 + $0x78] sm:$0xff] %vm30_vm0, %v285_v53 }

// kernel: arm_mixer_forward.7
= control target key start
LH: loop header
LB: loop body
LE: loop exit
PB: predicated region body
PF: predicated region fallthrough
CT: control target
= control target key end

     0   :  { %v2955_v3 = vmov 0.0   ;;  %vm56_vm0 = vcmask 523264   ;;  %s4381_s1 = inlined_call_operand.vmem [shape: f32[64,192], index: 1, kind: input, shape index: {}]   ;;  %s4382_s0 = inlined_call_operand.vmem [shape: f32[64,64], index: 0, kind: input, shape index: {}]   ;;  %s4383_s3 = inlined_call_operand.vmem [shape: f32[192,64], index: 3, kind: input, shape index: {}]   ;;  %s4384_s2 = inlined_call_operand.vmem [shape: f32[1,192], index: 2, kind: input, shape index: {}]   ;;  %s4385_s4 = inlined_call_operand.vmem [shape: f32[1,64], index: 4, kind: input, shape index: {}]   ;;  %s4386_s5 = inlined_call_operand.vmem [shape: f32[64,64], index: 5, kind: output, shape index: {}]  }
   0x1   :  { %v29_v0 = vld [vmem:[%s4381_s1 + $0x8] sm:$0xff]  ;;  %v31_v1 = vld [vmem:[%s4381_s1 + $0x18] sm:$0xff]  ;;  %v28_v2 = vld [vmem:[%s4381_s1] sm:$0xff]  ;;  %161 = vmatprep.mubr.f32.mxu0 %v2955_v3 }
   0x2   :  { %v81_v4 = vand.u32 4294901760, %v29_v0  ;;  %v85_v5 = vand.u32 4294901760, %v31_v1  ;;  %v30_v6 = vld [vmem:[%s4381_s1 + $0x10] sm:$0xff]  ;;  %v83_v7 = vand.u32 4294901760, %v28_v2  ;;  %v33_v8 = vld [vmem:[%s4381_s1 + $0x28] sm:$0xff]  ;;  %v35_v9 = vld [vmem:[%s4381_s1 + $0x38] sm:$0xff] }
   0x3   :  { %v87_v10 = vand.u32 4294901760, %v30_v6  ;;  %v89_v11 = vand.u32 4294901760, %v33_v8  ;;  %v93_v12 = vand.u32 4294901760, %v35_v9  ;;  %v32_v13 = vld [vmem:[%s4381_s1 + $0x20] sm:$0xff]  ;;  %v34_v14 = vld [vmem:[%s4381_s1 + $0x30] sm:$0xff]  ;;  %v37_v15 = vld [vmem:[%s4381_s1 + $0x48] sm:$0xff] }
   0x4   :  { %v3015_v16 = vpack.c.bf16 %v85_v5, %v81_v4  ;;  %v3017_v17 = vsub.f32 %v29_v0, %v81_v4  ;;  %v3019_v18 = vsub.f32 %v31_v1, %v85_v5  ;;  %v3021_v19 = vsub.f32 %v28_v2, %v83_v7  ;;  %v39_v20 = vld [vmem:[%s4381_s1 + $0x58] sm:$0xff]  ;;  %v36_v21 = vld [vmem:[%s4381_s1 + $0x40] sm:$0xff]  ;;  %v38_v22 = vld [vmem:[%s4381_s1 + $0x50] sm:$0xff] }
   0x5   :  { %v3032_v23 = vpack.c.bf16 %v87_v10, %v83_v7  ;;  %v3034_v24 = vsub.f32 %v30_v6, %v87_v10  ;;  %v3036_v25 = vpack.c.bf16 %v93_v12, %v89_v11  ;;  %v3038_v26 = vsub.f32 %v33_v8, %v89_v11  ;;  %v41_v27 = vld [vmem:[%s4381_s1 + $0x68] sm:$0xff]  ;;  %v43_v35 = vld [vmem:[%s4381_s1 + $0x78] sm:$0xff]  ;;  %v40_v37 = vld [vmem:[%s4381_s1 + $0x60] sm:$0xff] }
   0x6   :  { %2434 = vmatprep.subr.bf16.mxu0 %v3015_v16  ;;  %v3044_v28 = vsub.f32 %v35_v9, %v93_v12  ;;  %v91_v29 = vand.u32 4294901760, %v32_v13  ;;  %v95_v30 = vand.u32 4294901760, %v34_v14  ;;  %v97_v31 = vand.u32 4294901760, %v37_v15  ;;  %v42_v42 = vld [vmem:[%s4381_s1 + $0x70] sm:$0xff]  ;;  %v20_v43 = vld [vmem:[%s4382_s0] sm:$0xff]  ;;  %v21_v56 = vld [vmem:[%s4382_s0 + $0x8] sm:$0xff] }
   0x7   :  { %2436 = vmatpush1.bf16.msra.mxu0 %v3032_v23  ;;  %v101_v32 = vand.u32 4294901760, %v39_v20  ;;  %v99_v33 = vand.u32 4294901760, %v36_v21  ;;  %v103_v34 = vand.u32 4294901760, %v38_v22  ;;  %v105_v36 = vand.u32 4294901760, %v41_v27  ;;  %v22_v61 = vld [vmem:[%s4382_s0 + $0x10] sm:$0xff] }
   0x8   :  { %2438 = vmatprep.subr.bf16.mxu0 %v3036_v25  ;;  %v3054_v38 = vpack.c.bf16 %v95_v30, %v91_v29  ;;  %v3056_v39 = vsub.f32 %v32_v13, %v91_v29  ;;  %v3058_v40 = vsub.f32 %v34_v14, %v95_v30  ;;  %v3060_v41 = vsub.f32 %v37_v15, %v97_v31 }
   0x9   :  { %v3068_v44 = vpack.c.bf16 %v101_v32, %v97_v31  ;;  %v3070_v45 = vsub.f32 %v39_v20, %v101_v32  ;;  %v3072_v46 = vpack.c.bf16 %v103_v34, %v99_v33  ;;  %v3074_v47 = vsub.f32 %v36_v21, %v99_v33 }
   0xa   :  { %v3076_v48 = vsub.f32 %v38_v22, %v103_v34  ;;  %v109_v49 = vand.u32 4294901760, %v43_v35  ;;  %v3078_v50 = vsub.f32 %v41_v27, %v105_v36  ;;  %v107_v51 = vand.u32 4294901760, %v40_v37 }
   0xb   :  { %2440 = vmatpush1.bf16.msra.mxu0 %v3054_v38  ;;  %v111_v52 = vand.u32 4294901760, %v42_v42  ;;  %v58_v53 = vsel %vm56_vm0, %v20_v43, 0  ;;  %v252_v54 = vand.u32 4294901760, %v3017_v17  ;;  %v264_v55 = vand.u32 4294901760, %v3019_v18 }
   0xc   :  { %2442 = vmatprep.subr.bf16.mxu0 %v3068_v44  ;;  %v3088_v57 = vpack.c.bf16 %v109_v49, %v105_v36  ;;  %v3090_v58 = vsub.f32 %v43_v35, %v109_v49  ;;  %v3092_v59 = vsub.f32 %v40_v37, %v107_v51  ;;  %v3094_v60 = vand.u32 4294901760, %v58_v53  ;;  %v23_v36 = vld [vmem:[%s4382_s0 + $0x18] sm:$0xff]  ;;  %v24_v37 = vld [vmem:[%s4382_s0 + $0x20] sm:$0xff] }
   0xd   :  { %v3099_v62 = vpack.c.bf16 %v111_v52, %v107_v51  ;;  %v3101_v63 = vsub.f32 %v42_v42, %v111_v52  ;;  %v253_v0 = vsub.f32 %v3017_v17, %v252_v54  ;;  %v265_v1 = vsub.f32 %v3019_v18, %v264_v55 }
   0xe   :  { %v3110_v2 = vsub.f32 %v58_v53, %v3094_v60  ;;  %v258_v4 = vand.u32 4294901760, %v3021_v19  ;;  %v4401_v5 = vand.u32 4294901760, %v3034_v24  ;;  %v61_v6 = vsel %vm56_vm0, %v21_v56, 0 }
   0xf   :  { %2444 = vmatpush1.bf16.msra.mxu0 %v3072_v46  ;;  %v254_v7 = vand.u32 4294901760, %v253_v0  ;;  %v266_v8 = vand.u32 4294901760, %v265_v1  ;;  %v3116_v9 = vand.u32 4294901760, %v61_v6  ;;  %v64_v10 = vsel %vm56_vm0, %v22_v61, 0 }
  0x10   :  { %2446 = vmatprep.subr.bf16.mxu0 %v3088_v57  ;;  %v4389_v11 = vand.u32 4294901760, %v3110_v2  ;;  %v259_v12 = vsub.f32 %v3021_v19, %v258_v4  ;;  %v271_v13 = vsub.f32 %v3034_v24, %v4401_v5  ;;  %v3127_v14 = vand.u32 4294901760, %v64_v10 }
  0x11   :  { %v2449_v15 = vpack.c.bf16 %v266_v8, %v254_v7  ;;  %v3130_v20 = vsub.f32 %v61_v6, %v3116_v9  ;;  %v4399_v21 = vand.u32 4294901760, %v3038_v26  ;;  %v4398_v22 = vand.u32 4294901760, %v3044_v28 }
  0x12   :  { %v165_v27 = vsub.f32 %v3110_v2, %v4389_v11  ;;  %v260_v29 = vand.u32 4294901760, %v259_v12  ;;  %v272_v30 = vand.u32 4294901760, %v271_v13  ;;  %v3138_v31 = vsub.f32 %v64_v10, %v3127_v14 }
  0x13   :  { %2448 = vmatpush1.bf16.msra.mxu0 %v3099_v62  ;;  %v4388_v32 = vand.u32 4294901760, %v3130_v20  ;;  %v277_v33 = vsub.f32 %v3038_v26, %v4399_v21  ;;  %v289_v34 = vsub.f32 %v3044_v28, %v4398_v22  ;;  %v4397_v35 = vand.u32 4294901760, %v3056_v39 }
  0x14   :  { %v166_v42 = vand.u32 4294901760, %v165_v27  ;;  %2450 = vmatprep.subr.bf16.mxu0 %v2449_v15  ;;  %v2451_v43 = vpack.c.bf16 %v272_v30, %v260_v29  ;;  %v4387_v49 = vand.u32 4294901760, %v3138_v31  ;;  %v4396_v51 = vand.u32 4294901760, %v3058_v40  ;;  %v25_v15 = vld [vmem:[%s4382_s0 + $0x28] sm:$0xff] }
  0x15   :  { %v176_v52 = vsub.f32 %v3130_v20, %v4388_v32  ;;  %v278_v53 = vand.u32 4294901760, %v277_v33  ;;  %v290_v56 = vand.u32 4294901760, %v289_v34  ;;  %v283_v61 = vsub.f32 %v3056_v39, %v4397_v35 }
  0x16   :  { %167 = vmatmul.mubr.f32.vlgmr.msra.gmra.mrb[0].mxu0 %v166_v42  ;;  %v187_v0 = vsub.f32 %v3138_v31, %v4387_v49  ;;  %v295_v1 = vsub.f32 %v3058_v40, %v4396_v51  ;;  %v67_v6 = vsel %vm56_vm0, %v23_v36, 0  ;;  %v70_v7 = vsel %vm56_vm0, %v24_v37, 0 }
  0x17   :  { %2452 = vmatpush1.bf16.msra.mxu0 %v2451_v43  ;;  %172 = vmatprep.mubr.f32.mxu0 %v2955_v3  ;;  %v177_v8 = vand.u32 4294901760, %v176_v52  ;;  %v2453_v10 = vpack.c.bf16 %v290_v56, %v278_v53  ;;  %v284_v12 = vand.u32 4294901760, %v283_v61  ;;  %v3172_v13 = vand.u32 4294901760, %v67_v6  ;;  %v26_v43 = vld [vmem:[%s4382_s0 + $0x30] sm:$0xff] }
  0x18   :  { %v188_v27 = vand.u32 4294901760, %v187_v0  ;;  %v296_v29 = vand.u32 4294901760, %v295_v1  ;;  %v3177_v30 = vand.u32 4294901760, %v70_v7  ;;  %v4395_v33 = vand.u32 4294901760, %v3060_v41 }
  0x19   :  { %2454 = vmatprep.subr.bf16.mxu0 %v2453_v10  ;;  %v3181_v34 = vsub.f32 %v67_v6, %v3172_v13  ;;  %v4394_v36 = vand.u32 4294901760, %v3070_v45  ;;  %v4391_v37 = vand.u32 4294901760, %v3074_v47  ;;  %v4390_v42 = vand.u32 4294901760, %v3076_v48 }
  0x1a   :  { %178 = vmatmul.mubr.f32.gmra.mrb[2].mxu0 %v177_v8  ;;  %v2455_v52 = vpack.c.bf16 %v296_v29, %v284_v12  ;;  %v3190_v53 = vsub.f32 %v70_v7, %v3177_v30  ;;  %v301_v56 = vsub.f32 %v3060_v41, %v4395_v33  ;;  %v73_v61 = vsel %vm56_vm0, %v25_v15, 0 }
  0x1b   :  { %183 = vmatprep.mubr.f32.mxu0 %v2955_v3  ;;  %v4392_v0 = vand.u32 4294901760, %v3181_v34  ;;  %v313_v1 = vsub.f32 %v3070_v45, %v4394_v36  ;;  %v307_v6 = vsub.f32 %v3074_v47, %v4391_v37  ;;  %v319_v7 = vsub.f32 %v3076_v48, %v4390_v42 }
  0x1c   :  { %2456 = vmatpush1.bf16.msra.mxu0 %v2455_v52  ;;  %v4393_v8 = vand.u32 4294901760, %v3190_v53  ;;  %v302_v10 = vand.u32 4294901760, %v301_v56  ;;  %v3208_v12 = vand.u32 4294901760, %v73_v61  ;;  %v76_v15 = vsel %vm56_vm0, %v26_v43, 0  ;;  %v27_v43 = vld [vmem:[%s4382_s0 + $0x38] sm:$0xff] }
  0x1d   :  { %v198_v29 = vsub.f32 %v3181_v34, %v4392_v0  ;;  %v314_v49 = vand.u32 4294901760, %v313_v1  ;;  %v308_v32 = vand.u32 4294901760, %v307_v6  ;;  %v320_v11 = vand.u32 4294901760, %v319_v7 }
  0x1e   :  { %189 = vmatmul.mubr.f32.gmra.mrb[4].mxu0 %v188_v27  ;;  %v209_v42 = vsub.f32 %v3190_v53, %v4393_v8  ;;  %v3218_v52 = vsub.f32 %v73_v61, %v3208_v12  ;;  %v3220_v56 = vand.u32 4294901760, %v76_v15  ;;  %v324_v37 = vand.u32 4294901760, %v3078_v50 }
  0x1f   :  { %194 = vmatprep.mubr.f32.mxu0 %v2955_v3  ;;  %v199_v1 = vand.u32 4294901760, %v198_v29  ;;  %v2457_v6 = vpack.c.bf16 %v314_v49, %v302_v10  ;;  %v2459_v27 = vpack.c.bf16 %v320_v11, %v308_v32  ;;  %v336_v7 = vand.u32 4294901760, %v3090_v58 }
  0x20   :  { %v210_v0 = vand.u32 4294901760, %v209_v42  ;;  %v4400_v8 = vand.u32 4294901760, %v3218_v52  ;;  %v3230_v61 = vsub.f32 %v76_v15, %v3220_v56  ;;  %v325_v36 = vsub.f32 %v3078_v50, %v324_v37 }
  0x21   :  { %2458 = vmatprep.subr.bf16.mxu0 %v2457_v6  ;;  %v337_v33 = vsub.f32 %v3090_v58, %v336_v7  ;;  %v330_v51 = vand.u32 4294901760, %v3092_v59  ;;  %v342_v35 = vand.u32 4294901760, %v3101_v63  ;;  %v79_v49 = vsel %vm56_vm0, %v27_v43, 0 }
  0x22   :  { %200 = vmatmul.mubr.f32.gmra.mrb[6].mxu0 %v199_v1  ;;  %v220_v11 = vsub.f32 %v3218_v52, %v4400_v8  ;;  %v4410_v32 = vand.u32 4294901760, %v3230_v61  ;;  %v326_v42 = vand.u32 4294901760, %v325_v36  ;;  %v3241_v10 = vand.u32 4294901760, %v79_v49 }
  0x23   :  { %205 = vmatprep.mubr.f32.mxu0 %v2955_v3  ;;  %2460 = vmatpush1.bf16.msra.mxu0 %v2459_v27  ;;  %v338_v15 = vand.u32 4294901760, %v337_v33  ;;  %v331_v29 = vsub.f32 %v3092_v59, %v330_v51  ;;  %v343_v6 = vsub.f32 %v3101_v63, %v342_v35  ;;  %v2465_v33 = vpack.c.bf16 %v3019_v18, %v3017_v17 }
  0x24   :  { %v3247_v43 = vsub.f32 %v79_v49, %v3241_v10  ;;  %v221_v8 = vand.u32 4294901760, %v220_v11  ;;  %v231_v36 = vsub.f32 %v3230_v61, %v4410_v32  ;;  %v3260_v49 = vpack.c.bf16 %v264_v55, %v252_v54 }
  0x25   :  { %v2461_v1 = vpack.c.bf16 %v338_v15, %v326_v42  ;;  %v332_v22 = vand.u32 4294901760, %v331_v29  ;;  %v344_v21 = vand.u32 4294901760, %v343_v6  ;;  %v4487_v42 = vand.u32 4294901760, %v3038_v26 }
  0x26   :  { %211 = vmatmul.mubr.f32.gmra.mrb[8].mxu0 %v210_v0  ;;  %v4409_v5 = vand.u32 4294901760, %v3247_v43  ;;  %v4486_v0 = vand.u32 4294901760, %v3034_v24  ;;  %v4488_v15 = vand.u32 4294901760, %v3044_v28  ;;  %v4490_v17 = vand.u32 4294901760, %v3058_v40 }
  0x27   :  { %216 = vmatprep.mubr.f32.mxu0 %v2955_v3  ;;  %2462 = vmatprep.subr.bf16.mxu0 %v2461_v1  ;;  %v2463_v27 = vpack.c.bf16 %v344_v21, %v332_v22  ;;  %v4489_v21 = vand.u32 4294901760, %v3056_v39  ;;  %v4491_v54 = vand.u32 4294901760, %v3060_v41  ;;  %v4492_v55 = vand.u32 4294901760, %v3070_v45 }
  0x28   :  { %v3266_v11 = vpack.c.bf16 %v4486_v0, %v258_v4  ;;  %v3272_v29 = vpack.c.bf16 %v4488_v15, %v4487_v42  ;;  %v4493_v4 = vand.u32 4294901760, %v3074_v47  ;;  %v4494_v6 = vand.u32 4294901760, %v3076_v48 }
  0x29   :  { %2464 = vmatpush1.bf16.msra.mxu0 %v2463_v27  ;;  %v3278_v18 = vpack.c.bf16 %v4490_v17, %v4489_v21  ;;  %v3284_v22 = vpack.c.bf16 %v4492_v55, %v4491_v54  ;;  %v232_v27 = vand.u32 4294901760, %v231_v36  ;;  %v242_v0 = vsub.f32 %v3247_v43, %v4409_v5  ;;  %v3366_v17 = vld [vmem:[%s4383_s3 + $0x38] sm:$0xff] }
  0x2a   :  { %v3290_v1 = vpack.c.bf16 %v4494_v6, %v4493_v4  ;;  %222 = vmatmul.mubr.f32.gmra.mrb[10].mxu0 %v221_v8  ;;  %2466 = vmatprep.subr.bf16.mxu0 %v2465_v33  ;;  %v3295_v42 = vpack.c.bf16 %v336_v7, %v324_v37  ;;  %v3297_v15 = vpack.c.bf16 %v342_v35, %v330_v51  ;;  %v3361_v33 = vld [vmem:[%s4383_s3 + $0x30] sm:$0xff] }
  0x2b   :  { %227 = vmatprep.mubr.f32.mxu0 %v2955_v3  ;;  %v243_v21 = vand.u32 4294901760, %v242_v0  ;;  %v2467_v8 = vpack.c.bf16 %v3034_v24, %v3021_v19  ;;  %v2469_v36 = vpack.c.bf16 %v3044_v28, %v3038_v26  ;;  %v2471_v35 = vpack.c.bf16 %v3058_v40, %v3056_v39  ;;  %v1215_v39 = vld [vmem:[%s4383_s3] sm:$0xff]  ;;  %v1216_v40 = vld [vmem:[%s4383_s3 + $0x8] sm:$0xff] }
  0x2c   :  { %v2473_v51 = vpack.c.bf16 %v3070_v45, %v3060_v41  ;;  %v2475_v19 = vpack.c.bf16 %v3076_v48, %v3074_v47  ;;  %v2477_v24 = vpack.c.bf16 %v3090_v58, %v3078_v50  ;;  %v2479_v26 = vpack.c.bf16 %v3101_v63, %v3092_v59  ;;  %v1217_v41 = vld [vmem:[%s4383_s3 + $0x10] sm:$0xff]  ;;  %v1218_v48 = vld [vmem:[%s4383_s3 + $0x18] sm:$0xff]  ;;  %v3349_v58 = vld [vmem:[%s4383_s3 + $0x20] sm:$0xff] }
  0x2d   :  { %v4412_v28 = vmov 0.0|0.0   ;;  %v1271_v45 = vand.u32 4294901760, %v1215_v39  ;;  %v1274_v47 = vand.u32 4294901760, %v1216_v40  ;;  %v1277_v50 = vand.u32 4294901760, %v1217_v41  ;;  %v3354_v59 = vld [vmem:[%s4383_s3 + $0x28] sm:$0xff] }
  0x2e   :  { %233 = vmatmul.mubr.f32.gmra.mrb[12].mxu0 %v232_v27  ;;  %2565 = vmatprep.subr.bf16.mxu1 %v4412_v28  ;;  %v1280_v63 = vand.u32 4294901760, %v1218_v48  ;;  %v4408_v37 = vand.u32 4294901760, %v3349_v58  ;;  %v4407_v7 = vand.u32 4294901760, %v3354_v59 }
  0x2f   :  { %238 = vmatprep.mubr.f32.mxu0 %v2955_v3  ;;  %v3369_v54 = vsub.f32 %v1215_v39, %v1271_v45  ;;  %v3371_v55 = vsub.f32 %v1216_v40, %v1274_v47  ;;  %v3373_v4 = vsub.f32 %v1217_v41, %v1277_v50  ;;  %v3375_v6 = vpack.c.bf16 %v1274_v47, %v1271_v45 }
  0x30   :  { %v3379_v27 = vsub.f32 %v1218_v48, %v1280_v63  ;;  %v3384_v0 = vsub.f32 %v3349_v58, %v4408_v37  ;;  %v3435_v28 = vpack.c.bf16 %v1280_v63, %v1277_v50  ;;  %v4496_v50 = vmov 0.0|0.0  }
  0x32   :  { %244 = vmatmul.mubr.f32.gmra.mrb[14].mxu0 %v243_v21  ;;  %v3389_v21 = vsub.f32 %v3354_v59, %v4407_v7  ;;  %4495 = vst [vmem:[#allocation2_spill] sm:$0xff] %v3435_v28 }
  0x33   :  { %394 = vmatprep.mubr.f32.mxu0 %v2955_v3 }
  0x34   :  { %v4414_v39 = vand.u32 4294901760, %v3389_v21 }
  0x36   :  { %396 = vmatmul.mubr.f32.vlgmr.msra.gmra.mrb[0].mxu0 %v3094_v60 }
  0x37   :  { %2468 = vmatpush1.bf16.msra.mxu0 %v2467_v8  ;;  %401 = vmatprep.mubr.f32.mxu0 %v2955_v3  ;;  %v4405_v8 = vand.u32 4294901760, %v3361_v33 }
  0x38   :  { %2470 = vmatprep.subr.bf16.mxu0 %v2469_v36  ;;  %v4402_v36 = vand.u32 4294901760, %v3369_v54 }
  0x39   :  { %v3403_v40 = vsub.f32 %v3361_v33, %v4405_v8 }
  0x3a   :  { %403 = vmatmul.mubr.f32.gmra.mrb[2].mxu0 %v3116_v9  ;;  %v1483_v41 = vsub.f32 %v3369_v54, %v4402_v36 }
  0x3b   :  { %408 = vmatprep.mubr.f32.mxu0 %v2955_v3  ;;  %2472 = vmatpush1.bf16.msra.mxu0 %v2471_v35  ;;  %v4403_v35 = vand.u32 4294901760, %v3371_v55  ;;  %v4433_v8 = vand.u32 4294901760, %v3403_v40 }
  0x3c   :  { %2474 = vmatprep.subr.bf16.mxu0 %v2473_v51  ;;  %v4404_v51 = vand.u32 4294901760, %v3373_v4 }
  0x3d   :  { %v1490_v45 = vsub.f32 %v3371_v55, %v4403_v35 }
  0x3e   :  { %410 = vmatmul.mubr.f32.gmra.mrb[4].mxu0 %v3127_v14  ;;  %v1497_v47 = vsub.f32 %v3373_v4, %v4404_v51  ;;  %v1518_v51 = vsub.f32 %v3389_v21, %v4414_v39 }
  0x3f   :  { %415 = vmatprep.mubr.f32.mxu0 %v2955_v3  ;;  %2476 = vmatpush1.bf16.msra.mxu0 %v2475_v19  ;;  %v4406_v19 = vand.u32 4294901760, %v3366_v17  ;;  %v1491_v7 = vand.u32 4294901760, %v1490_v45  ;;  %v1525_v45 = vsub.f32 %v3403_v40, %v4433_v8 }
  0x40   :  { %2478 = vmatprep.subr.bf16.mxu0 %v2477_v24  ;;  %v4411_v24 = vand.u32 4294901760, %v3379_v27  ;;  %v1498_v37 = vand.u32 4294901760, %v1497_v47 }
  0x41   :  { %v3418_v48 = vsub.f32 %v3366_v17, %v4406_v19  ;;  %v1484_v19 = vand.u32 4294901760, %v1483_v41  ;;  %v1519_v41 = vand.u32 4294901760, %v1518_v51  ;;  %v1526_v63 = vand.u32 4294901760, %v1525_v45 }
  0x42   :  { %417 = vmatmul.mubr.f32.gmra.mrb[6].mxu0 %v3172_v13  ;;  %v1504_v36 = vsub.f32 %v3379_v27, %v4411_v24  ;;  %v4499_v51 = vand.u32 4294901760, %v3138_v31 }
  0x43   :  { %422 = vmatprep.mubr.f32.mxu0 %v2955_v3  ;;  %2480 = vmatpush1.bf16.msra.mxu0 %v2479_v26  ;;  %v4415_v26 = vand.u32 4294901760, %v3384_v0  ;;  %v4432_v5 = vand.u32 4294901760, %v3418_v48  ;;  %v2566_v24 = vpack.c.bf16 %v1491_v7, %v1484_v19  ;;  %v4505_v19 = vand.u32 4294901760, %v3349_v58  ;;  %v3631_v58 = vld [vmem:[%s4383_s3 + $0x78] sm:$0xff] }
  0x44   :  { %2482 = vmatprep.subr.bf16.mxu0 %v3015_v16  ;;  %v1505_v32 = vand.u32 4294901760, %v1504_v36 }
  0x45   :  { %v1511_v35 = vsub.f32 %v3384_v0, %v4415_v26  ;;  %2567 = vmatpush1.bf16.msra.mxu1 %v2566_v24  ;;  %v1532_v7 = vsub.f32 %v3418_v48, %v4432_v5  ;;  %v4506_v24 = vand.u32 4294901760, %v3354_v59 }
  0x46   :  { %424 = vmatmul.mubr.f32.gmra.mrb[8].mxu0 %v3177_v30  ;;  %v2569_v26 = vpack.c.bf16 %v1505_v32, %v1498_v37  ;;  %2568 = vmatprep.subr.bf16.mxu1 %v4496_v50 }
  0x47   :  { %429 = vmatprep.mubr.f32.mxu0 %v2955_v3  ;;  %v1512_v39 = vand.u32 4294901760, %v1511_v35  ;;  %v1533_v37 = vand.u32 4294901760, %v1532_v7  ;;  %v4498_v35 = vand.u32 4294901760, %v3130_v20 }
  0x49   :  { %2570 = vmatpush1.bf16.msra.mxu1 %v2569_v26  ;;  %v2572_v32 = vpack.c.bf16 %v1519_v41, %v1512_v39  ;;  %v2575_v36 = vpack.c.bf16 %v1533_v37, %v1526_v63  ;;  %v3611_v26 = vpack.c.bf16 %v4506_v24, %v4505_v19  ;;  %v3626_v41 = vld [vmem:[%s4383_s3 + $0x70] sm:$0xff] }
  0x4a   :  { %431 = vmatmul.mubr.f32.gmra.mrb[10].mxu0 %v3208_v12  ;;  %2571 = vmatprep.subr.bf16.mxu1 %v4496_v50  ;;  %v1313_v7 = vand.u32 4294901760, %v3626_v41 }
  0x4b   :  { %436 = vmatprep.mubr.f32.mxu0 %v2955_v3  ;;  %4507 = vst [vmem:[#allocation3_spill] sm:$0xff] %v3611_v26 }
  0x4d   :  { %2573 = vmatpush1.bf16.msra.mxu1 %v2572_v32  ;;  %v1316_v32 = vand.u32 4294901760, %v3631_v58 }
  0x4e   :  { %438 = vmatmul.mubr.f32.gmra.mrb[12].mxu0 %v3220_v56  ;;  %2574 = vmatprep.subr.bf16.mxu1 %v4496_v50 }
  0x4f   :  { %443 = vmatprep.mubr.f32.mxu0 %v2955_v3 }
  0x51   :  { %2576 = vmatpush1.bf16.msra.mxu1 %v2575_v36 }
  0x52   :  { %445 = vmatmul.mubr.f32.gmra.mrb[14].mxu0 %v3241_v10  ;;  %2577 = vmatprep.subr.bf16.mxu1 %v4496_v50 }
  0x53   :  { %547 = vmatprep.mubr.f32.mxu0 %v2955_v3 }
  0x56   :  { %550 = vmatmul.mubr.f32.vlgmr.msra.gmra.mrb[0].mxu0 %v3110_v2 }
  0x57   :  { %2484 = vmatpush1.bf16.msra.mxu0 %v3032_v23  ;;  %555 = vmatprep.mubr.f32.mxu0 %v2955_v3 }
  0x58   :  { %2486 = vmatprep.subr.bf16.mxu0 %v3036_v25 }
  0x5a   :  { %558 = vmatmul.mubr.f32.gmra.mrb[2].mxu0 %v3130_v20  ;;  %v4501_v20 = vand.u32 4294901760, %v3190_v53 }
  0x5b   :  { %563 = vmatprep.mubr.f32.mxu0 %v2955_v3  ;;  %2488 = vmatpush1.bf16.msra.mxu0 %v3054_v38 }
  0x5c   :  { %2490 = vmatprep.subr.bf16.mxu0 %v3068_v44 }
  0x5e   :  { %566 = vmatmul.mubr.f32.gmra.mrb[4].mxu0 %v3138_v31  ;;  %v4502_v31 = vand.u32 4294901760, %v3218_v52 }
  0x5f   :  { %571 = vmatprep.mubr.f32.mxu0 %v2955_v3  ;;  %2492 = vmatpush1.bf16.msra.mxu0 %v3072_v46 }
  0x60   :  { %2494 = vmatprep.subr.bf16.mxu0 %v3088_v57 }
  0x62   :  { %574 = vmatmul.mubr.f32.gmra.mrb[6].mxu0 %v3181_v34 }
  0x63   :  { %579 = vmatprep.mubr.f32.mxu0 %v2955_v3  ;;  %2496 = vmatpush1.bf16.msra.mxu0 %v3099_v62 }
  0x64   :  { %2498 = vmatprep.subr.bf16.mxu0 %v3260_v49  ;;  %v4497_v49 = vand.u32 4294901760, %v3110_v2  ;;  %v4500_v2 = vand.u32 4294901760, %v3181_v34  ;;  %v4504_v34 = vand.u32 4294901760, %v3247_v43 }
  0x66   :  { %582 = vmatmul.mubr.f32.gmra.mrb[8].mxu0 %v3190_v53 }
  0x67   :  { %587 = vmatprep.mubr.f32.mxu0 %v2955_v3 }
  0x6a   :  { %590 = vmatmul.mubr.f32.gmra.mrb[10].mxu0 %v3218_v52  ;;  %v3590_v52 = vld [vmem:[%s4383_s3 + $0x60] sm:$0xff] }
  0x6b   :  { %595 = vmatprep.mubr.f32.mxu0 %v2955_v3 }
  0x6e   :  { %598 = vmatmul.mubr.f32.gmra.mrb[12].mxu0 %v3230_v61 }
  0x6f   :  { %603 = vmatprep.mubr.f32.mxu0 %v2955_v3 }
  0x72   :  { %606 = vmatmul.mubr.f32.gmra.mrb[14].mxu0 %v3247_v43 }
  0x73   :  { %692 = vmatprep.mubr.f32.mxu0 %v2955_v3 }
  0x76   :  { %696 = vmatmul.mubr.f32.vlgmr.msra.gmra.mrb[0].mxu0 %v4497_v49  ;;  %v3643_v49 = vsub.f32 %v3626_v41, %v1313_v7 }
  0x77   :  { %2500 = vmatpush1.bf16.msra.mxu0 %v3266_v11  ;;  %701 = vmatprep.mubr.f32.mxu0 %v2955_v3  ;;  %v4503_v11 = vand.u32 4294901760, %v3230_v61 }
  0x78   :  { %2502 = vmatprep.subr.bf16.mxu0 %v3272_v29 }
  0x7a   :  { %705 = vmatmul.mubr.f32.gmra.mrb[2].mxu0 %v4498_v35  ;;  %v3648_v35 = vsub.f32 %v3631_v58, %v1316_v32 }
  0x7b   :  { %710 = vmatprep.mubr.f32.mxu0 %v2955_v3  ;;  %2504 = vmatpush1.bf16.msra.mxu0 %v3278_v18  ;;  %v1307_v18 = vand.u32 4294901760, %v3590_v52 }
  0x7c   :  { %2506 = vmatprep.subr.bf16.mxu0 %v3284_v22 }
  0x7d   :  { %v3616_v39 = vsub.f32 %v3590_v52, %v1307_v18  ;;  %v1238_v52 = vld [vmem:[%s4383_s3 + $0xb8] sm:$0xff] }
  0x7e   :  { %714 = vmatmul.mubr.f32.gmra.mrb[4].mxu0 %v4499_v51  ;;  %v4508_v51 = vand.u32 4294901760, %v3361_v33  ;;  %v3670_v33 = vld [vmem:[%s4383_s3 + $0x88] sm:$0xff] }
  0x7f   :  { %719 = vmatprep.mubr.f32.mxu0 %v2955_v3  ;;  %2508 = vmatpush1.bf16.msra.mxu0 %v3290_v1  ;;  %v4423_v63 = vand.u32 4294901760, %v3616_v39 }
  0x80   :  { %2510 = vmatprep.subr.bf16.mxu0 %v3295_v42 }
  0x82   :  { %723 = vmatmul.mubr.f32.gmra.mrb[6].mxu0 %v4500_v2  ;;  %v4509_v2 = vand.u32 4294901760, %v3366_v17  ;;  %v4419_v17 = vand.u32 4294901760, %v3643_v49 }
  0x83   :  { %728 = vmatprep.mubr.f32.mxu0 %v2955_v3  ;;  %2512 = vmatpush1.bf16.msra.mxu0 %v3297_v15 }
  0x84   :  { %2514 = vmatprep.subr.bf16.mxu0 %v3015_v16  ;;  %v3540_v16 = vld [vmem:[%s4383_s3 + $0x40] sm:$0xff] }
  0x86   :  { %732 = vmatmul.mubr.f32.gmra.mrb[8].mxu0 %v4501_v20  ;;  %v3654_v20 = vpack.c.bf16 %v4509_v2, %v4508_v51 }
  0x87   :  { %737 = vmatprep.mubr.f32.mxu0 %v2955_v3 }
  0x88   :  { %4510 = vst [vmem:[#allocation4_spill] sm:$0xff] %v3654_v20 }
  0x8a   :  { %741 = vmatmul.mubr.f32.gmra.mrb[10].mxu0 %v4502_v31  ;;  %v1567_v31 = vsub.f32 %v3616_v39, %v4423_v63 }
  0x8b   :  { %746 = vmatprep.mubr.f32.mxu0 %v2955_v3 }
  0x8e   :  { %750 = vmatmul.mubr.f32.gmra.mrb[12].mxu0 %v4503_v11 }
  0x8f   :  { %755 = vmatprep.mubr.f32.mxu0 %v2955_v3 }
  0x92   :  { %759 = vmatmul.mubr.f32.gmra.mrb[14].mxu0 %v4504_v34  ;;  %v3665_v34 = vld [vmem:[%s4383_s3 + $0x80] sm:$0xff] }
  0x93   :  { %877 = vmatprep.mubr.f32.mxu0 %v2955_v3 }
  0x96   :  { %879 = vmatmul.mubr.f32.vlgmr.msra.gmra.mrb[0].mxu0 %v3094_v60 }
  0x97   :  { %2516 = vmatpush1.bf16.msra.mxu0 %v3032_v23  ;;  %884 = vmatprep.mubr.f32.mxu0 %v2955_v3  ;;  %v3545_v23 = vld [vmem:[%s4383_s3 + $0x48] sm:$0xff] }
  0x98   :  { %2518 = vmatprep.subr.bf16.mxu0 %v3036_v25  ;;  %v1295_v25 = vand.u32 4294901760, %v3540_v16 }
  0x9a   :  { %886 = vmatmul.mubr.f32.gmra.mrb[2].mxu0 %v3116_v9 }
  0x9b   :  { %891 = vmatprep.mubr.f32.mxu0 %v2955_v3  ;;  %2520 = vmatpush1.bf16.msra.mxu0 %v3054_v38  ;;  %v1298_v38 = vand.u32 4294901760, %v3545_v23 }
  0x9c   :  { %2522 = vmatprep.subr.bf16.mxu0 %v3068_v44 }
  0x9d   :  { %v3555_v44 = vsub.f32 %v3545_v23, %v1298_v38  ;;  %v4418_v23 = vand.u32 4294901760, %v3648_v35 }
  0x9e   :  { %893 = vmatmul.mubr.f32.gmra.mrb[4].mxu0 %v3127_v14 }
  0x9f   :  { %898 = vmatprep.mubr.f32.mxu0 %v2955_v3  ;;  %2524 = vmatpush1.bf16.msra.mxu0 %v3072_v46  ;;  %v3560_v46 = vld [vmem:[%s4383_s3 + $0x50] sm:$0xff] }
  0xa0   :  { %2526 = vmatprep.subr.bf16.mxu0 %v3088_v57  ;;  %v3565_v57 = vld [vmem:[%s4383_s3 + $0x58] sm:$0xff] }
  0xa2   :  { %900 = vmatmul.mubr.f32.gmra.mrb[6].mxu0 %v3172_v13 }
  0xa3   :  { %905 = vmatprep.mubr.f32.mxu0 %v2955_v3  ;;  %2528 = vmatpush1.bf16.msra.mxu0 %v3099_v62  ;;  %v4426_v62 = vand.u32 4294901760, %v3555_v44 }
  0xa4   :  { %2529 = vmatprep.subr.bf16.mxu0 %v4496_v50 }
  0xa6   :  { %907 = vmatmul.mubr.f32.gmra.mrb[8].mxu0 %v3177_v30 }
  0xa7   :  { %912 = vmatprep.mubr.f32.mxu0 %v2955_v3 }
  0xaa   :  { %914 = vmatmul.mubr.f32.gmra.mrb[10].mxu0 %v3208_v12 }
  0xab   :  { %919 = vmatprep.mubr.f32.mxu0 %v2955_v3 }
  0xae   :  { %921 = vmatmul.mubr.f32.gmra.mrb[12].mxu0 %v3220_v56 }
  0xaf   :  { %926 = vmatprep.mubr.f32.mxu0 %v2955_v3 }
  0xb2   :  { %928 = vmatmul.mubr.f32.gmra.mrb[14].mxu0 %v3241_v10 }
  0xb3   :  { %1014 = vmatprep.mubr.f32.mxu0 %v2955_v3 }
  0xb6   :  { %1016 = vmatmul.mubr.f32.vlgmr.msra.gmra.mrb[0].mxu0 %v3094_v60 }
  0xb7   :  { %1021 = vmatprep.mubr.f32.mxu0 %v2955_v3  ;;  %2531 = vmatpush1.bf16.msra.mxu0 %v3375_v6 }
  0xb8   :  { %2532 = vmatprep.subr.bf16.mxu0 %v4496_v50 }
  0xba   :  { %1023 = vmatmul.mubr.f32.gmra.mrb[2].mxu0 %v3116_v9  ;;  %v1301_v9 = vand.u32 4294901760, %v3560_v46 }
  0xbb   :  { %1028 = vmatprep.mubr.f32.mxu0 %v2955_v3  ;;  %2534 = vmatpush1.bf16.msra.mxu0 %v3435_v28 }
  0xbc   :  { %2535 = vmatprep.subr.bf16.mxu0 %v4496_v50  ;;  %v3580_v53 = vsub.f32 %v3560_v46, %v1301_v9  ;;  %v1236_v46 = vld [vmem:[%s4383_s3 + $0xa8] sm:$0xff] }
  0xbe   :  { %1030 = vmatmul.mubr.f32.gmra.mrb[4].mxu0 %v3127_v14  ;;  %v1304_v14 = vand.u32 4294901760, %v3565_v57  ;;  %v4425_v43 = vand.u32 4294901760, %v3580_v53 }
  0xbf   :  { %1035 = vmatprep.mubr.f32.mxu0 %v2955_v3  ;;  %2537 = vmatpush1.bf16.msra.mxu0 %v3611_v26 }
  0xc0   :  { %v1553_v42 = vsub.f32 %v3580_v53, %v4425_v43  ;;  %2538 = vmatprep.subr.bf16.mxu0 %v4496_v50 }
  0xc2   :  { %1037 = vmatmul.mubr.f32.gmra.mrb[6].mxu0 %v3172_v13  ;;  %v1554_v59 = vand.u32 4294901760, %v1553_v42  ;;  %v1588_v42 = vsub.f32 %v3648_v35, %v4418_v23 }
  0xc3   :  { %1042 = vmatprep.mubr.f32.mxu0 %v2955_v3  ;;  %2540 = vmatpush1.bf16.msra.mxu0 %v3654_v20 }
  0xc4   :  { %2541 = vmatprep.subr.bf16.mxu0 %v4496_v50  ;;  %v1589_v2 = vand.u32 4294901760, %v1588_v42 }
  0xc6   :  { %1044 = vmatmul.mubr.f32.gmra.mrb[8].mxu0 %v3177_v30  ;;  %v1546_v30 = vsub.f32 %v3555_v44, %v4426_v62 }
  0xc7   :  { %1049 = vmatprep.mubr.f32.mxu0 %v2955_v3 }
  0xca   :  { %1051 = vmatmul.mubr.f32.gmra.mrb[10].mxu0 %v3208_v12  ;;  %v3585_v12 = vsub.f32 %v3565_v57, %v1304_v14 }
  0xcb   :  { %1056 = vmatprep.mubr.f32.mxu0 %v2955_v3 }
  0xcc   :  { %v4424_v29 = vand.u32 4294901760, %v3585_v12 }
  0xce   :  { %1058 = vmatmul.mubr.f32.gmra.mrb[12].mxu0 %v3220_v56  ;;  %v3595_v56 = vld [vmem:[%s4383_s3 + $0x68] sm:$0xff]  ;;  %v1560_v15 = vsub.f32 %v3585_v12, %v4424_v29 }
  0xcf   :  { %1063 = vmatprep.mubr.f32.mxu0 %v2955_v3  ;;  %v3552_v3 = vsub.f32 %v3540_v16, %v1295_v25  ;;  %v1310_v22 = vand.u32 4294901760, %v3595_v56 }
  0xd0   :  { %v1561_v45 = vand.u32 4294901760, %v1560_v15 }
  0xd1   :  { %v4431_v60 = vand.u32 4294901760, %v3552_v3  ;;  %v3621_v47 = vsub.f32 %v3595_v56, %v1310_v22 }
  0xd2   :  { %1065 = vmatmul.mubr.f32.gmra.mrb[14].mxu0 %v3241_v10  ;;  %v1547_v10 = vand.u32 4294901760, %v1546_v30  ;;  %v2581_v36 = vpack.c.bf16 %v1561_v45, %v1554_v59  ;;  %v1322_v30 = vand.u32 4294901760, %v3670_v33  ;;  %v3697_v59 = vpack.c.bf16 %v1298_v38, %v1295_v25  ;;  %v3702_v45 = vld [vmem:[%s4383_s3 + $0x90] sm:$0xff] }
  0xd3   :  { %v1539_v13 = vsub.f32 %v3552_v3, %v4431_v60  ;;  %v4420_v37 = vand.u32 4294901760, %v3621_v47  ;;  %v1325_v16 = vand.u32 4294901760, %v3702_v45 }
  0xd4   :  { %v3693_v19 = vsub.f32 %v3670_v33, %v1322_v30  ;;  %4511 = vst [vmem:[#allocation5_spill] sm:$0xff] %v3697_v59  ;;  %2543 = vmatpush1.bf16.msra.mxu0 %v3697_v59 }
  0xd5   :  { %v1540_v61 = vand.u32 4294901760, %v1539_v13  ;;  %v1574_v11 = vsub.f32 %v3621_v47, %v4420_v37  ;;  %v1319_v13 = vand.u32 4294901760, %v3665_v34  ;;  %2544 = vmatprep.subr.bf16.mxu0 %v4496_v50  ;;  %v3731_v42 = vsub.f32 %v3702_v45, %v1325_v16 }
  0xd7   :  { %v2578_v1 = vpack.c.bf16 %v1547_v10, %v1540_v61  ;;  %v1568_v61 = vand.u32 4294901760, %v1567_v31  ;;  %v1575_v10 = vand.u32 4294901760, %v1574_v11  ;;  %v3688_v15 = vsub.f32 %v3665_v34, %v1319_v13 }
  0xd8   :  { %v4416_v11 = vand.u32 4294901760, %v3693_v19 }
  0xd9   :  { %2579 = vmatpush1.bf16.msra.mxu1 %v2578_v1  ;;  %v1581_v1 = vsub.f32 %v3643_v49, %v4419_v17  ;;  %v2584_v24 = vpack.c.bf16 %v1575_v10, %v1568_v61  ;;  %v4417_v31 = vand.u32 4294901760, %v3688_v15 }
  0xda   :  { %2580 = vmatprep.subr.bf16.mxu1 %v4496_v50  ;;  %v1602_v10 = vsub.f32 %v3693_v19, %v4416_v11  ;;  %v4422_v11 = vand.u32 4294901760, %v3731_v42 }
  0xdb   :  { %v1582_v51 = vand.u32 4294901760, %v1581_v1  ;;  %v1595_v61 = vsub.f32 %v3688_v15, %v4417_v31  ;;  %v3726_v1 = vpack.c.bf16 %v1304_v14, %v1301_v9 }
  0xdc   :  { %v1603_v9 = vand.u32 4294901760, %v1602_v10 }
  0xdd   :  { %2582 = vmatpush1.bf16.msra.mxu1 %v2581_v36  ;;  %v3707_v36 = vld [vmem:[%s4383_s3 + $0x98] sm:$0xff]  ;;  %v2587_v38 = vpack.c.bf16 %v1589_v2, %v1582_v51  ;;  %4512 = vst [vmem:[#allocation6_spill] sm:$0xff] %v3726_v1  ;;  %v1235_v51 = vld [vmem:[%s4383_s3 + $0xa0] sm:$0xff]  ;;  %v1596_v57 = vand.u32 4294901760, %v1595_v61  ;;  %v1334_v2 = vand.u32 4294901760, %v1236_v46  ;;  %2546 = vmatpush1.bf16.msra.mxu0 %v3726_v1  ;;  %v1609_v61 = vsub.f32 %v3731_v42, %v4422_v11 }
  0xde   :  { %2583 = vmatprep.subr.bf16.mxu1 %v4496_v50  ;;  %v1328_v25 = vand.u32 4294901760, %v3707_v36  ;;  %v1331_v14 = vand.u32 4294901760, %v1235_v51  ;;  %2547 = vmatprep.subr.bf16.mxu0 %v4496_v50 }
  0xdf   :  { %v2590_v23 = vpack.c.bf16 %v1603_v9, %v1596_v57  ;;  %v3751_v37 = vsub.f32 %v1236_v46, %v1334_v2  ;;  %v1340_v46 = vand.u32 4294901760, %v1238_v52  ;;  %v1610_v57 = vand.u32 4294901760, %v1609_v61 }
  0xe0   :  { %v3749_v17 = vsub.f32 %v1235_v51, %v1331_v14  ;;  %v1237_v51 = vld [vmem:[%s4383_s3 + $0xb0] sm:$0xff]  ;;  %v3816_v34 = vpack.c.bf16 %v1328_v25, %v1325_v16  ;;  %v3821_v33 = vpack.c.bf16 %v1334_v2, %v1331_v14 }
  0xe1   :  { %2585 = vmatpush1.bf16.msra.mxu1 %v2584_v24  ;;  %v3736_v24 = vsub.f32 %v3707_v36, %v1328_v25  ;;  %v3790_v61 = vsub.f32 %v1238_v52, %v1340_v46 }
  0xe2   :  { %2586 = vmatprep.subr.bf16.mxu1 %v4496_v50  ;;  %v4430_v56 = vand.u32 4294901760, %v3749_v17  ;;  %4516 = vst [vmem:[#allocation10_spill] sm:$0xff] %v3816_v34  ;;  %4517 = vst [vmem:[#allocation11_spill] sm:$0xff] %v3821_v33 }
  0xe3   :  { %v4421_v31 = vand.u32 4294901760, %v3736_v24 }
  0xe5   :  { %2588 = vmatpush1.bf16.msra.mxu1 %v2587_v38  ;;  %v3757_v38 = vpack.c.bf16 %v1310_v22, %v1307_v18  ;;  %v1616_v10 = vsub.f32 %v3736_v24, %v4421_v31  ;;  %v4427_v18 = vand.u32 4294901760, %v3751_v37  ;;  %v1337_v22 = vand.u32 4294901760, %v1237_v51 }
  0xe6   :  { %2589 = vmatprep.subr.bf16.mxu1 %v4496_v50  ;;  %v1623_v31 = vsub.f32 %v3749_v17, %v4430_v56 }
  0xe7   :  { %4513 = vst [vmem:[#allocation7_spill] sm:$0xff] %v3757_v38  ;;  %2549 = vmatpush1.bf16.msra.mxu0 %v3757_v38  ;;  %v1617_v9 = vand.u32 4294901760, %v1616_v10  ;;  %v1630_v11 = vsub.f32 %v3751_v37, %v4427_v18  ;;  %v3782_v63 = vsub.f32 %v1237_v51, %v1337_v22  ;;  %v4428_v18 = vand.u32 4294901760, %v3790_v61 }
  0xe8   :  { %2550 = vmatprep.subr.bf16.mxu0 %v4496_v50  ;;  %v1624_v10 = vand.u32 4294901760, %v1623_v31  ;;  %v46_v51 = vlaneseq }
  0xe9   :  { %2591 = vmatpush1.bf16.msra.mxu1 %v2590_v23  ;;  %v2593_v29 = vpack.c.bf16 %v1617_v9, %v1610_v57  ;;  %v3788_v23 = vpack.c.bf16 %v1316_v32, %v1313_v7  ;;  %v1631_v43 = vand.u32 4294901760, %v1630_v11  ;;  %v4429_v62 = vand.u32 4294901760, %v3782_v63 }
  0xea   :  { %2592 = vmatprep.subr.bf16.mxu1 %v4496_v50  ;;  %v3804_v7 = vpack.c.bf16 %v1322_v30, %v1319_v13  ;;  %v3825_v13 = vpack.c.bf16 %v1340_v46, %v1337_v22  ;;  %v47_v52 = vshrl.u32 %v46_v51, 7  ;;  %v44_v46 = vld [vmem:[%s4384_s2] sm:$0x3] }
  0xeb   :  { %4514 = vst [vmem:[#allocation8_spill] sm:$0xff] %v3788_v23  ;;  %2552 = vmatpush1.bf16.msra.mxu0 %v3788_v23  ;;  %v2596_v41 = vpack.c.bf16 %v1631_v43, %v1624_v10  ;;  %v1637_v58 = vsub.f32 %v3782_v63, %v4429_v62 }
  0xec   :  { %2553 = vmatprep.subr.bf16.mxu0 %v4496_v50  ;;  %4515 = vst [vmem:[#allocation9_spill] sm:$0xff] %v3804_v7  ;;  %4518 = vst [vmem:[#allocation12_spill] sm:$0xff] %v3825_v13  ;;  %v48_v22 = vsub.s32 0, %v47_v52  ;;  %v52_v57 = vsub.s32 1, %v47_v52 }
  0xed   :  { %2594 = vmatpush1.bf16.msra.mxu1 %v2593_v29  ;;  %v1644_v29 = vsub.f32 %v3790_v61, %v4428_v18  ;;  %v1638_v32 = vand.u32 4294901760, %v1637_v58 }
  0xee   :  { %2595 = vmatprep.subr.bf16.mxu1 %v4496_v50  ;;  %v3847_v9 = vrot.slane %v44_v46, %v48_v22  ;;  %v3849_v10 = vrot.slane %v44_v46, %v52_v57 }
  0xef   :  { %2555 = vmatpush1.bf16.msra.mxu0 %v3804_v7  ;;  %v1645_v31 = vand.u32 4294901760, %v1644_v29 }
  0xf0   :  { %2556 = vmatprep.subr.bf16.mxu0 %v4496_v50 }
  0xf1   :  { %2597 = vmatpush1.bf16.msra.mxu1 %v2596_v41  ;;  %v2599_v43 = vpack.c.bf16 %v1645_v31, %v1638_v32 }
  0xf2   :  { %2598 = vmatprep.subr.bf16.mxu1 %v4496_v50 }
  0xf3   :  { %2558 = vmatpush1.bf16.msra.mxu0 %v3816_v34 }
  0xf4   :  { %2559 = vmatprep.subr.bf16.mxu0 %v4496_v50 }
  0xf5   :  { %2600 = vmatpush1.bf16.msra.mxu1 %v2599_v43 }
  0xf6   :  { %2601 = vmatprep.subr.bf16.mxu1 %v4496_v50 }
  0xf7   :  { %2561 = vmatpush1.bf16.msra.mxu0 %v3821_v33 }
  0xf8   :  { %2562 = vmatprep.subr.bf16.mxu0 %v4496_v50 }
  0xfb   :  { %2564 = vmatpush1.bf16.msra.mxu0 %v3825_v13 }
 0x189   :  { %v1017_v41 = vpop.f32.mrb[0].mxu0 }
 0x18a   :  { %v2745_v58 = vadd.f32 %v1017_v41, %v3847_v9  ;;  %v1019_v29 = vpop.f32.mrb[1].mxu0 }
 0x18b   :  { %v2746_v32 = vadd.f32 %v1019_v29, %v3849_v10 }
 0x18c   :  { %v1087_v31 = vmul.f32 0.044715, %v2745_v58 }
 0x18d   :  { %v1088_v43 = vmul.f32 0.044715, %v2746_v32  ;;  %v1024_v18 = vpop.f32.mrb[2].mxu0 }
 0x18e   :  { %v1103_v51 = vmul.f32 %v2745_v58, %v1087_v31  ;;  %v2747_v62 = vadd.f32 %v1024_v18, %v3847_v9  ;;  %v1026_v56 = vpop.f32.mrb[3].mxu0 }
 0x18f   :  { %v1104_v60 = vmul.f32 %v2746_v32, %v1088_v43  ;;  %v2748_v52 = vadd.f32 %v1026_v56, %v3849_v10  ;;  %v3863_v43 = vmul.f32 0.5, %v2746_v32  ;;  %v3865_v56 = vmul.f32 0.5, %v2745_v58 }
 0x190   :  { %v1119_v57 = vmul.f32 %v2745_v58, %v1103_v51  ;;  %v1089_v41 = vmul.f32 0.044715, %v2747_v62  ;;  %v3868_v51 = vmul.f32 0.5, %v2747_v62 }
 0x191   :  { %v1120_v5 = vmul.f32 %v2746_v32, %v1104_v60  ;;  %v1090_v18 = vmul.f32 0.044715, %v2748_v52  ;;  %v1031_v8 = vpop.f32.mrb[4].mxu0  ;;  %v3871_v30 = vmul.f32 0.5, %v2748_v52 }
 0x192   :  { %v1135_v2 = vadd.f32 %v2745_v58, %v1119_v57  ;;  %v1105_v14 = vmul.f32 %v2747_v62, %v1089_v41  ;;  %v2749_v25 = vadd.f32 %v1031_v8, %v3847_v9  ;;  %v1033_v16 = vpop.f32.mrb[5].mxu0 }
 0x193   :  { %v1136_v11 = vadd.f32 %v2746_v32, %v1120_v5  ;;  %v1106_v36 = vmul.f32 %v2748_v52, %v1090_v18  ;;  %v2750_v45 = vadd.f32 %v1033_v16, %v3849_v10 }
 0x194   :  { %v1151_v60 = vmul.f32 0.7978846, %v1135_v2  ;;  %v1121_v31 = vmul.f32 %v2747_v62, %v1105_v14  ;;  %v1091_v29 = vmul.f32 0.044715, %v2749_v25  ;;  %v3873_v46 = vmul.f32 0.5, %v2749_v25 }
 0x195   :  { %v1152_v22 = vmul.f32 0.7978846, %v1136_v11  ;;  %v1122_v13 = vmul.f32 %v2748_v52, %v1106_v36  ;;  %v1092_v58 = vmul.f32 0.044715, %v2750_v45  ;;  %v1038_v57 = vpop.f32.mrb[6].mxu0  ;;  %v3875_v41 = vmul.f32 0.5, %v2750_v45 }
 0x196   :  { %2923 = vtanh.f32 %v1151_v60  ;;  %v1137_v8 = vadd.f32 %v2747_v62, %v1121_v31  ;;  %v1107_v33 = vmul.f32 %v2749_v25, %v1091_v29  ;;  %v2751_v5 = vadd.f32 %v1038_v57, %v3847_v9  ;;  %v1040_v32 = vpop.f32.mrb[7].mxu0 }
 0x197   :  { %2925 = vtanh.f32 %v1152_v22  ;;  %v1138_v16 = vadd.f32 %v2748_v52, %v1122_v13  ;;  %v1108_v18 = vmul.f32 %v2750_v45, %v1092_v58  ;;  %v2752_v14 = vadd.f32 %v1040_v32, %v3849_v10 }
 0x198   :  { %v1153_v2 = vmul.f32 0.7978846, %v1137_v8  ;;  %v1123_v34 = vmul.f32 %v2749_v25, %v1107_v33  ;;  %v1093_v7 = vmul.f32 0.044715, %v2751_v5  ;;  %v3879_v11 = vmul.f32 0.5, %v2751_v5 }
 0x199   :  { %v1154_v36 = vmul.f32 0.7978846, %v1138_v16  ;;  %v1124_v23 = vmul.f32 %v2750_v45, %v1108_v18  ;;  %v1094_v38 = vmul.f32 0.044715, %v2752_v14  ;;  %v1045_v1 = vpop.f32.mrb[8].mxu0  ;;  %v3881_v60 = vmul.f32 0.5, %v2752_v14 }
 0x19a   :  { %2927 = vtanh.f32 %v1153_v2  ;;  %v1139_v62 = vadd.f32 %v2749_v25, %v1123_v34  ;;  %v1109_v29 = vmul.f32 %v2751_v5, %v1093_v7  ;;  %v2753_v22 = vadd.f32 %v1045_v1, %v3847_v9  ;;  %v1047_v13 = vpop.f32.mrb[9].mxu0 }
 0x19b   :  { %2929 = vtanh.f32 %v1154_v36  ;;  %v1140_v52 = vadd.f32 %v2750_v45, %v1124_v23  ;;  %v1110_v31 = vmul.f32 %v2752_v14, %v1094_v38  ;;  %v2754_v33 = vadd.f32 %v1047_v13, %v3849_v10 }
 0x19c   :  { %v1155_v58 = vmul.f32 0.7978846, %v1139_v62  ;;  %v1125_v57 = vmul.f32 %v2751_v5, %v1109_v29  ;;  %v1095_v8 = vmul.f32 0.044715, %v2753_v22  ;;  %v3885_v32 = vmul.f32 0.5, %v2753_v22 }
 0x19d   :  { %v1156_v16 = vmul.f32 0.7978846, %v1140_v52  ;;  %v1126_v18 = vmul.f32 %v2752_v14, %v1110_v31  ;;  %v1096_v59 = vmul.f32 0.044715, %v2754_v33  ;;  %v1052_v20 = vpop.f32.mrb[10].mxu0  ;;  %v3887_v2 = vmul.f32 0.5, %v2754_v33 }
 0x19e   :  { %2931 = vtanh.f32 %v1155_v58  ;;  %v1141_v7 = vadd.f32 %v2751_v5, %v1125_v57  ;;  %v1111_v1 = vmul.f32 %v2753_v22, %v1095_v8  ;;  %v2755_v34 = vadd.f32 %v1052_v20, %v3847_v9  ;;  %v1054_v23 = vpop.f32.mrb[11].mxu0 }
 0x19f   :  { %2933 = vtanh.f32 %v1156_v16  ;;  %v1142_v38 = vadd.f32 %v2752_v14, %v1126_v18  ;;  %v1112_v45 = vmul.f32 %v2754_v33, %v1096_v59  ;;  %v3891_v25 = vadd.f32 %v1054_v23, %v3849_v10 }
 0x1a0   :  { %v2924_v36 = vpop.eup %2923  ;;  %v1157_v62 = vmul.f32 0.7978846, %v1141_v7  ;;  %v1127_v29 = vmul.f32 %v2753_v22, %v1111_v1  ;;  %v1097_v13 = vmul.f32 0.044715, %v2755_v34  ;;  %v3893_v52 = vmul.f32 0.5, %v2755_v34 }
 0x1a1   :  { %v2926_v31 = vpop.eup %2925  ;;  %v1158_v26 = vmul.f32 0.7978846, %v1142_v38  ;;  %v1128_v58 = vmul.f32 %v2754_v33, %v1112_v45  ;;  %v1098_v5 = vmul.f32 0.044715, %v3891_v25  ;;  %v1059_v57 = vpop.f32.mrb[12].mxu0  ;;  %v1183_v20 = vadd.f32 1.0, %v2924_v36 }
 0x1a2   :  { %2935 = vtanh.f32 %v1157_v62  ;;  %v1143_v8 = vadd.f32 %v2753_v22, %v1127_v29  ;;  %v1113_v14 = vmul.f32 %v2755_v34, %v1097_v13  ;;  %v3897_v59 = vadd.f32 %v1059_v57, %v3847_v9  ;;  %v1061_v16 = vpop.f32.mrb[13].mxu0 }
 0x1a3   :  { %2937 = vtanh.f32 %v1158_v26  ;;  %v1144_v18 = vadd.f32 %v2754_v33, %v1128_v58  ;;  %v1114_v7 = vmul.f32 %v3891_v25, %v1098_v5  ;;  %v3901_v1 = vadd.f32 %v1061_v16, %v3849_v10 }
 0x1a4   :  { %v2928_v23 = vpop.eup %2927  ;;  %v1159_v38 = vmul.f32 0.7978846, %v1143_v8  ;;  %v1129_v45 = vmul.f32 %v2755_v34, %v1113_v14  ;;  %v1099_v28 = vmul.f32 0.044715, %v3897_v59  ;;  %v1184_v36 = vadd.f32 1.0, %v2926_v31 }
 0x1a5   :  { %v2930_v62 = vpop.eup %2929  ;;  %v1160_v22 = vmul.f32 0.7978846, %v1144_v18  ;;  %v1130_v29 = vmul.f32 %v3891_v25, %v1114_v7  ;;  %v1100_v13 = vmul.f32 0.044715, %v3901_v1  ;;  %v1066_v57 = vpop.f32.mrb[14].mxu0  ;;  %v1199_v26 = vmul.f32 %v1183_v20, %v3865_v56 }
 0x1a6   :  { %2939 = vtanh.f32 %v1159_v38  ;;  %v1145_v33 = vadd.f32 %v2755_v34, %v1129_v45  ;;  %v1115_v58 = vmul.f32 %v3897_v59, %v1099_v28  ;;  %v3909_v5 = vadd.f32 %v1066_v57, %v3847_v9  ;;  %v1068_v8 = vpop.f32.mrb[15].mxu0 }
 0x1a7   :  { %2941 = vtanh.f32 %v1160_v22  ;;  %v1146_v31 = vadd.f32 %v3891_v25, %v1130_v29  ;;  %v1116_v14 = vmul.f32 %v3901_v1, %v1100_v13  ;;  %v3914_v16 = vadd.f32 %v1068_v8, %v3849_v10 }
 0x1a8   :  { %v2932_v18 = vpop.eup %2931  ;;  %v1161_v7 = vmul.f32 0.7978846, %v1145_v33  ;;  %v1131_v56 = vmul.f32 %v3897_v59, %v1115_v58  ;;  %v1101_v34 = vmul.f32 0.044715, %v3909_v5  ;;  %v1200_v28 = vmul.f32 %v1184_v36, %v3863_v43 }
 0x1a9   :  { %v2934_v20 = vpop.eup %2933  ;;  %v1162_v9 = vmul.f32 0.7978846, %v1146_v31  ;;  %v1132_v38 = vmul.f32 %v3901_v1, %v1116_v14  ;;  %v1102_v45 = vmul.f32 0.044715, %v3914_v16  ;;  %v3921_v22 = vand.u32 4294901760, %v1199_v26 }
 0x1aa   :  { %2943 = vtanh.f32 %v1161_v7  ;;  %v1147_v10 = vadd.f32 %v3897_v59, %v1131_v56  ;;  %v1117_v29 = vmul.f32 %v3909_v5, %v1101_v34  ;;  %v1247_v13 = vsel %vm56_vm0, %v1200_v28, 0 }
 0x1ab   :  { %2945 = vtanh.f32 %v1162_v9  ;;  %v1148_v57 = vadd.f32 %v3901_v1, %v1132_v38  ;;  %v1118_v43 = vmul.f32 %v3914_v16, %v1102_v45  ;;  %v3928_v36 = vand.u32 4294901760, %v1247_v13 }
 0x1ac   :  { %v2936_v33 = vpop.eup %2935  ;;  %v1163_v58 = vmul.f32 0.7978846, %v1147_v10  ;;  %v1133_v8 = vmul.f32 %v3909_v5, %v1117_v29  ;;  %v3932_v31 = vsub.f32 %v1199_v26, %v3921_v22  ;;  %v1186_v14 = vadd.f32 1.0, %v2930_v62 }
 0x1ad   :  { %v2938_v7 = vpop.eup %2937  ;;  %v1164_v56 = vmul.f32 0.7978846, %v1148_v57  ;;  %v1134_v34 = vmul.f32 %v3914_v16, %v1118_v43  ;;  %1664 = vmatprep.mubr.f32.mxu1 %v3928_v36  ;;  %v1185_v28 = vadd.f32 1.0, %v2928_v23  ;;  %v3937_v9 = vsub.f32 %v1247_v13, %v3928_v36 }
 0x1ae   :  { %2947 = vtanh.f32 %v1163_v58  ;;  %v1149_v38 = vadd.f32 %v3909_v5, %v1133_v8  ;;  %1666 = vmatmul.mubr.f32.vlgmr.msra.gmra.mrb[0].mxu1 %v3921_v22  ;;  %v1202_v45 = vmul.f32 %v1186_v14, %v3871_v30  ;;  %v1188_v26 = vadd.f32 1.0, %v2934_v20 }
 0x1af   :  { %2949 = vtanh.f32 %v1164_v56  ;;  %v1150_v62 = vadd.f32 %v3914_v16, %v1134_v34  ;;  %v4519_v10 = vpack.c.bf16 %v3371_v55, %v3369_v54  ;;  %v1201_v23 = vmul.f32 %v1185_v28, %v3868_v51 }
 0x1b0   :  { %v4457_v29 = vand.u32 4294901760, %v3937_v9  ;;  %v2940_v13 = vpop.eup %2939  ;;  %v1165_v57 = vmul.f32 0.7978846, %v1149_v38  ;;  %v1250_v43 = vsel %vm56_vm0, %v1202_v45, 0  ;;  %v1204_v30 = vmul.f32 %v1188_v26, %v3875_v41 }
 0x1b1   :  { %2603 = vmatpush1.bf16.msra.mxu1 %v4519_v10  ;;  %v4456_v20 = vand.u32 4294901760, %v3932_v31  ;;  %v2942_v58 = vpop.eup %2941  ;;  %v1166_v8 = vmul.f32 0.7978846, %v1150_v62  ;;  %v3952_v14 = vand.u32 4294901760, %v1250_v43  ;;  %v3954_v56 = vand.u32 4294901760, %v1201_v23 }
 0x1b2   :  { %2604 = vmatprep.subr.bf16.mxu1 %v4496_v50  ;;  %v1361_v51 = vsub.f32 %v3937_v9, %v4457_v29  ;;  %2951 = vtanh.f32 %v1165_v57  ;;  %v1253_v34 = vsel %vm56_vm0, %v1204_v30, 0  ;;  %v1187_v41 = vadd.f32 1.0, %v2932_v18 }
 0x1b3   :  { %4520 = vst [vmem:[#allocation13_spill] sm:$0xff] %v3952_v14  ;;  %4521 = vst [vmem:[#allocation14_spill] sm:$0xff] %v3954_v56  ;;  %v1367_v28 = vsub.f32 %v3932_v31, %v4456_v20  ;;  %2953 = vtanh.f32 %v1166_v8  ;;  %1671 = vmatprep.mubr.f32.mxu1 %v3952_v14  ;;  %v4522_v38 = vpack.c.bf16 %v3379_v27, %v3373_v4  ;;  %v3967_v26 = vand.u32 4294901760, %v1253_v34 }
 0x1b4   :  { %v1362_v45 = vand.u32 4294901760, %v1361_v51  ;;  %v3970_v62 = vsub.f32 %v1250_v43, %v3952_v14  ;;  %v2944_v10 = vpop.eup %2943  ;;  %1673 = vmatmul.mubr.f32.gmra.mrb[2].mxu1 %v3954_v56  ;;  %v1203_v18 = vmul.f32 %v1187_v41, %v3873_v46  ;;  %v1190_v30 = vadd.f32 1.0, %v2938_v7 }
 0x1b5   :  { %2606 = vmatpush1.bf16.msra.mxu1 %v4522_v38  ;;  %4523 = vst [vmem:[#allocation15_spill] sm:$0xff] %v3967_v26  ;;  %v1368_v57 = vand.u32 4294901760, %v1367_v28  ;;  %v3976_v8 = vsub.f32 %v1201_v23, %v3954_v56  ;;  %v2946_v20 = vpop.eup %2945  ;;  %1678 = vmatprep.mubr.f32.mxu1 %v3967_v26  ;;  %v1189_v43 = vadd.f32 1.0, %v2936_v33  ;;  %v3981_v38 = vsub.f32 %v1253_v34, %v3967_v26 }
 0x1b6   :  { %2607 = vmatprep.subr.bf16.mxu1 %v4496_v50  ;;  %1363 = vmatprep.mubr.f32.mxu0 %v1362_v45  ;;  %v4460_v51 = vand.u32 4294901760, %v3970_v62  ;;  %v1192_v29 = vadd.f32 1.0, %v2942_v58  ;;  %v3983_v14 = vand.u32 4294901760, %v1203_v18  ;;  %v1206_v46 = vmul.f32 %v1190_v30, %v3881_v60 }
 0x1b7   :  { %1369 = vmatmul.mubr.f32.vlgmr.msra.gmra.mrb[16].mxu0 %v1368_v57  ;;  %v4461_v7 = vand.u32 4294901760, %v3976_v8  ;;  %v1191_v23 = vadd.f32 1.0, %v2940_v13  ;;  %v4525_v28 = vpack.c.bf16 %v3389_v21, %v3384_v0  ;;  %v1205_v34 = vmul.f32 %v1189_v43, %v3879_v11 }
 0x1b8   :  { %4524 = vst [vmem:[#allocation16_spill] sm:$0xff] %v3983_v14  ;;  %v1376_v33 = vsub.f32 %v3970_v62, %v4460_v51  ;;  %v4466_v58 = vand.u32 4294901760, %v3981_v38  ;;  %v1208_v41 = vmul.f32 %v1192_v29, %v3887_v2  ;;  %v2948_v45 = vpop.eup %2947  ;;  %1680 = vmatmul.mubr.f32.gmra.mrb[4].mxu1 %v3983_v14  ;;  %v1256_v60 = vsel %vm56_vm0, %v1206_v46, 0 }
 0x1b9   :  { %2609 = vmatpush1.bf16.msra.mxu1 %v4525_v28  ;;  %v1382_v13 = vsub.f32 %v3976_v8, %v4461_v7  ;;  %v4003_v57 = vsub.f32 %v1203_v18, %v3983_v14  ;;  %v1207_v11 = vmul.f32 %v1191_v23, %v3885_v32  ;;  %v2950_v30 = vpop.eup %2949  ;;  %v4006_v28 = vand.u32 4294901760, %v1256_v60 }
 0x1ba   :  { %2610 = vmatprep.subr.bf16.mxu1 %v4496_v50  ;;  %v1377_v43 = vand.u32 4294901760, %v1376_v33  ;;  %v4008_v2 = vand.u32 4294901760, %v1205_v34  ;;  %v1391_v29 = vsub.f32 %v3981_v38, %v4466_v58  ;;  %v1259_v51 = vsel %vm56_vm0, %v1208_v41, 0 }
 0x1bb   :  { %4526 = vst [vmem:[#allocation17_spill] sm:$0xff] %v4006_v28  ;;  %v1383_v46 = vand.u32 4294901760, %v1382_v13  ;;  %v4471_v7 = vand.u32 4294901760, %v4003_v57  ;;  %v4015_v26 = vand.u32 4294901760, %v1207_v11  ;;  %1685 = vmatprep.mubr.f32.mxu1 %v4006_v28  ;;  %v4018_v18 = vand.u32 4294901760, %v1259_v51 }
 0x1bc   :  { %1378 = vmatprep.mubr.f32.mxu0 %v1377_v43  ;;  %v1392_v32 = vand.u32 4294901760, %v1391_v29  ;;  %v4021_v23 = vsub.f32 %v1256_v60, %v4006_v28  ;;  %v1082_v33 = vmul.f32 0.5, %v3891_v25  ;;  %v2952_v14 = vpop.eup %2951  ;;  %1687 = vmatmul.mubr.f32.gmra.mrb[6].mxu1 %v4008_v2  ;;  %v1194_v13 = vadd.f32 1.0, %v2946_v20 }
 0x1bd   :  { %1384 = vmatmul.mubr.f32.gmra.mrb[18].mxu0 %v1383_v46  ;;  %v1397_v41 = vsub.f32 %v4003_v57, %v4471_v7  ;;  %v4029_v43 = vsub.f32 %v1205_v34, %v4008_v2  ;;  %v1193_v29 = vadd.f32 1.0, %v2944_v10  ;;  %v2954_v58 = vpop.eup %2953  ;;  %v4527_v60 = vpack.c.bf16 %v3418_v48, %v3403_v40  ;;  %1692 = vmatprep.mubr.f32.mxu1 %v4018_v18 }
 0x1be   :  { %1393 = vmatprep.mubr.f32.mxu0 %v1392_v32  ;;  %v4473_v25 = vand.u32 4294901760, %v4021_v23  ;;  %v4036_v46 = vsub.f32 %v1259_v51, %v4018_v18  ;;  %v1084_v28 = vmul.f32 0.5, %v3901_v1  ;;  %v1196_v56 = vadd.f32 1.0, %v2950_v30 }
 0x1bf   :  { %2612 = vmatpush1.bf16.msra.mxu1 %v4527_v60  ;;  %v1398_v20 = vand.u32 4294901760, %v1397_v41  ;;  %v1210_v10 = vmul.f32 %v1194_v13, %v1082_v33  ;;  %v4472_v34 = vand.u32 4294901760, %v4029_v43  ;;  %v1209_v7 = vmul.f32 %v1193_v29, %v3893_v52 }
 0x1c0   :  { %2613 = vmatprep.subr.bf16.mxu1 %v4496_v50  ;;  %v1406_v32 = vsub.f32 %v4021_v23, %v4473_v25  ;;  %v4474_v51 = vand.u32 4294901760, %v4036_v46  ;;  %v1212_v60 = vmul.f32 %v1196_v56, %v1084_v28  ;;  %v4048_v1 = vsub.f32 %v1207_v11, %v4015_v26  ;;  %1694 = vmatmul.mubr.f32.gmra.mrb[8].mxu1 %v4015_v26 }
 0x1c1   :  { %1399 = vmatmul.mubr.f32.gmra.mrb[20].mxu0 %v1398_v20  ;;  %v1262_v30 = vsel %vm56_vm0, %v1210_v10, 0  ;;  %v1412_v33 = vsub.f32 %v4029_v43, %v4472_v34  ;;  %v4055_v52 = vand.u32 4294901760, %v1209_v7  ;;  %v1083_v41 = vmul.f32 0.5, %v3897_v59 }
 0x1c2   :  { %v4528_v13 = vpack.c.bf16 %v3555_v44, %v3552_v3  ;;  %v1407_v56 = vand.u32 4294901760, %v1406_v32  ;;  %v4061_v11 = vand.u32 4294901760, %v1262_v30  ;;  %v1421_v28 = vsub.f32 %v4036_v46, %v4474_v51 }
 0x1c3   :  { %v1265_v29 = vsel %vm56_vm0, %v1212_v60, 0  ;;  %v1413_v20 = vand.u32 4294901760, %v1412_v33  ;;  %v4481_v59 = vand.u32 4294901760, %v4048_v1  ;;  %v1195_v34 = vadd.f32 1.0, %v2948_v45 }
 0x1c4   :  { %2615 = vmatpush1.bf16.msra.mxu1 %v4528_v13  ;;  %v4068_v10 = vand.u32 4294901760, %v1265_v29  ;;  %1408 = vmatprep.mubr.f32.mxu0 %v1407_v56  ;;  %v1422_v32 = vand.u32 4294901760, %v1421_v28  ;;  %v4073_v13 = vsub.f32 %v1262_v30, %v4061_v11  ;;  %v1086_v25 = vmul.f32 0.5, %v3914_v16 }
 0x1c5   :  { %2616 = vmatprep.subr.bf16.mxu1 %v4496_v50  ;;  %1699 = vmatprep.mubr.f32.mxu1 %v4061_v11  ;;  %v1198_v51 = vadd.f32 1.0, %v2954_v58  ;;  %v1427_v60 = vsub.f32 %v4048_v1, %v4481_v59  ;;  %v1211_v33 = vmul.f32 %v1195_v34, %v1083_v41  ;;  %v4081_v45 = vsub.f32 %v1209_v7, %v4055_v52  ;;  %v4548_v59 = vld [vmem:[#allocation11_spill] sm:$0xff] }
 0x1c6   :  { %1414 = vmatmul.mubr.f32.gmra.mrb[22].mxu0 %v1413_v20  ;;  %1701 = vmatmul.mubr.f32.gmra.mrb[10].mxu1 %v4055_v52  ;;  %v1085_v56 = vmul.f32 0.5, %v3909_v5  ;;  %v4529_v30 = vpack.c.bf16 %v3585_v12, %v3580_v53  ;;  %v4476_v16 = vand.u32 4294901760, %v4073_v13  ;;  %v1197_v28 = vadd.f32 1.0, %v2952_v14 }
 0x1c7   :  { %1423 = vmatprep.mubr.f32.mxu0 %v1422_v32  ;;  %v1214_v58 = vmul.f32 %v1198_v51, %v1086_v25  ;;  %v4089_v20 = vsub.f32 %v1265_v29, %v4068_v10  ;;  %1706 = vmatprep.mubr.f32.mxu1 %v4068_v10  ;;  %v1428_v7 = vand.u32 4294901760, %v1427_v60  ;;  %v4093_v34 = vand.u32 4294901760, %v1211_v33 }
 0x1c8   :  { %2618 = vmatpush1.bf16.msra.mxu1 %v4529_v30  ;;  %v4475_v5 = vand.u32 4294901760, %v4081_v45  ;;  %v1436_v41 = vsub.f32 %v4073_v13, %v4476_v16  ;;  %v1213_v25 = vmul.f32 %v1197_v28, %v1085_v56  ;;  %v4531_v30 = vpack.c.bf16 %v3621_v47, %v3616_v39 }
 0x1c9   :  { %2619 = vmatprep.subr.bf16.mxu1 %v4496_v50  ;;  %v1268_v32 = vsel %vm56_vm0, %v1214_v58, 0  ;;  %v4477_v14 = vand.u32 4294901760, %v4089_v20  ;;  %v4108_v60 = vsub.f32 %v1211_v33, %v4093_v34 }
 0x1ca   :  { %1429 = vmatmul.mubr.f32.gmra.mrb[24].mxu0 %v1428_v7  ;;  %1708 = vmatmul.mubr.f32.gmra.mrb[12].mxu1 %v4093_v34  ;;  %v4102_v51 = vand.u32 4294901760, %v1268_v32  ;;  %v1442_v29 = vsub.f32 %v4081_v45, %v4475_v5  ;;  %v1437_v58 = vand.u32 4294901760, %v1436_v41  ;;  %v4113_v56 = vand.u32 4294901760, %v1213_v25 }
 0x1cb   :  { %v1451_v28 = vsub.f32 %v4089_v20, %v4477_v14  ;;  %v4480_v5 = vand.u32 4294901760, %v4108_v60 }
 0x1cc   :  { %4530 = vst [vmem:[#allocation18_spill] sm:$0xff] %v4102_v51  ;;  %2621 = vmatpush1.bf16.msra.mxu1 %v4531_v30  ;;  %4532 = vst [vmem:[#allocation19_spill] sm:$0xff] %v4113_v56  ;;  %1713 = vmatprep.mubr.f32.mxu1 %v4102_v51  ;;  %v1443_v7 = vand.u32 4294901760, %v1442_v29  ;;  %v4122_v33 = vsub.f32 %v1268_v32, %v4102_v51  ;;  %v4125_v41 = vsub.f32 %v1213_v25, %v4113_v56 }
 0x1cd   :  { %2622 = vmatprep.subr.bf16.mxu1 %v4496_v50  ;;  %1438 = vmatprep.mubr.f32.mxu0 %v1437_v58  ;;  %v1452_v16 = vand.u32 4294901760, %v1451_v28  ;;  %v1457_v30 = vsub.f32 %v4108_v60, %v4480_v5  ;;  %v4533_v29 = vpack.c.bf16 %v3648_v35, %v3643_v49  ;;  %v4547_v5 = vld [vmem:[#allocation10_spill] sm:$0xff] }
 0x1ce   :  { %1444 = vmatmul.mubr.f32.gmra.mrb[26].mxu0 %v1443_v7  ;;  %1715 = vmatmul.mubr.f32.gmra.mrb[14].mxu1 %v4113_v56  ;;  %v4479_v14 = vand.u32 4294901760, %v4122_v33  ;;  %v4478_v32 = vand.u32 4294901760, %v4125_v41  ;;  %v4549_v56 = vld [vmem:[#allocation12_spill] sm:$0xff] }
 0x1cf   :  { %1834 = vmatprep.mubr.f32.mxu1 %v3937_v9  ;;  %1453 = vmatprep.mubr.f32.mxu0 %v1452_v16  ;;  %v1458_v25 = vand.u32 4294901760, %v1457_v30  ;;  %v4535_v30 = vpack.c.bf16 %v3736_v24, %v3731_v42 }
 0x1d0   :  { %2624 = vmatpush1.bf16.msra.mxu1 %v4533_v29  ;;  %v1466_v58 = vsub.f32 %v4122_v33, %v4479_v14  ;;  %v1472_v28 = vsub.f32 %v4125_v41, %v4478_v32  ;;  %v4534_v29 = vpack.c.bf16 %v3693_v19, %v3688_v15  ;;  %v4536_v32 = vpack.c.bf16 %v3751_v37, %v3749_v17  ;;  %v4546_v14 = vld [vmem:[#allocation9_spill] sm:$0xff] }
 0x1d1   :  { %2625 = vmatprep.subr.bf16.mxu1 %v4496_v50 }
 0x1d2   :  { %1459 = vmatmul.mubr.f32.gmra.mrb[28].mxu0 %v1458_v25  ;;  %v1467_v7 = vand.u32 4294901760, %v1466_v58  ;;  %v1473_v16 = vand.u32 4294901760, %v1472_v28  ;;  %v4537_v25 = vpack.c.bf16 %v3790_v61, %v3782_v63  ;;  %v4539_v58 = vld [vmem:[#allocation3_spill] sm:$0xff]  ;;  %v4540_v28 = vld [vmem:[#allocation4_spill] sm:$0xff] }
 0x1d4   :  { %2627 = vmatpush1.bf16.msra.mxu1 %v4534_v29  ;;  %1468 = vmatprep.mubr.f32.mxu0 %v1467_v7  ;;  %v4541_v7 = vld [vmem:[#allocation5_spill] sm:$0xff]  ;;  %v4542_v29 = vld [vmem:[#allocation6_spill] sm:$0xff] }
 0x1d5   :  { %2628 = vmatprep.subr.bf16.mxu1 %v4496_v50 }
 0x1d6   :  { %1474 = vmatmul.mubr.f32.gmra.mrb[30].mxu0 %v1473_v16  ;;  %v4543_v16 = vld [vmem:[#allocation7_spill] sm:$0xff] }
 0x1d8   :  { %2630 = vmatpush1.bf16.msra.mxu1 %v4535_v30  ;;  %v4544_v30 = vld [vmem:[#allocation8_spill] sm:$0xff] }
 0x1d9   :  { %2631 = vmatprep.subr.bf16.mxu1 %v4496_v50 }
 0x1dc   :  { %2633 = vmatpush1.bf16.msra.mxu1 %v4536_v32  ;;  %v4538_v32 = vld [vmem:[#allocation2_spill] sm:$0xff] }
 0x1dd   :  { %2634 = vmatprep.subr.bf16.mxu1 %v4496_v50 }
 0x1e0   :  { %2636 = vmatpush1.bf16.msra.mxu1 %v4537_v25  ;;  %v4545_v25 = vand.u32 4294901760, %v3937_v9  ;;  %v4551_v9 = vand.u32 4294901760, %v3371_v55  ;;  %v4557_v55 = vand.u32 4294901760, %v3981_v38 }
 0x1e1   :  { %2637 = vmatprep.subr.bf16.mxu1 %v4496_v50 }
 0x1e3   :  { %1837 = vmatmul.mubr.f32.vlgmr.msra.gmra.mrb[0].mxu1 %v3932_v31 }
 0x1e4   :  { %1843 = vmatprep.mubr.f32.mxu1 %v3970_v62  ;;  %2639 = vmatpush1.bf16.msra.mxu1 %v3375_v6 }
 0x1e5   :  { %2640 = vmatprep.subr.bf16.mxu1 %v4496_v50 }
 0x1e7   :  { %1846 = vmatmul.mubr.f32.gmra.mrb[2].mxu1 %v3976_v8 }
 0x1e8   :  { %1852 = vmatprep.mubr.f32.mxu1 %v3981_v38  ;;  %2642 = vmatpush1.bf16.msra.mxu1 %v4538_v32  ;;  %v4563_v38 = vand.u32 4294901760, %v3418_v48  ;;  %v4569_v48 = vand.u32 4294901760, %v4073_v13 }
 0x1e9   :  { %2643 = vmatprep.subr.bf16.mxu1 %v4496_v50 }
 0x1eb   :  { %1855 = vmatmul.mubr.f32.gmra.mrb[4].mxu1 %v4003_v57 }
 0x1ec   :  { %1861 = vmatprep.mubr.f32.mxu1 %v4021_v23  ;;  %2645 = vmatpush1.bf16.msra.mxu1 %v4539_v58 }
 0x1ed   :  { %2646 = vmatprep.subr.bf16.mxu1 %v4496_v50 }
 0x1ef   :  { %1864 = vmatmul.mubr.f32.gmra.mrb[6].mxu1 %v4029_v43 }
 0x1f0   :  { %1870 = vmatprep.mubr.f32.mxu1 %v4036_v46  ;;  %2648 = vmatpush1.bf16.msra.mxu1 %v4540_v28 }
 0x1f1   :  { %2649 = vmatprep.subr.bf16.mxu1 %v4496_v50 }
 0x1f3   :  { %1873 = vmatmul.mubr.f32.gmra.mrb[8].mxu1 %v4048_v1 }
 0x1f4   :  { %1879 = vmatprep.mubr.f32.mxu1 %v4073_v13  ;;  %2651 = vmatpush1.bf16.msra.mxu1 %v4541_v7  ;;  %v4575_v13 = vand.u32 4294901760, %v3621_v47  ;;  %v4581_v47 = vand.u32 4294901760, %v3688_v15  ;;  %v4587_v15 = vand.u32 4294901760, %v3782_v63  ;;  %v4592_v63 = vld [vmem:[#allocation16_spill] sm:$0xff] }
 0x1f5   :  { %2652 = vmatprep.subr.bf16.mxu1 %v4496_v50 }
 0x1f7   :  { %1882 = vmatmul.mubr.f32.gmra.mrb[10].mxu1 %v4081_v45 }
 0x1f8   :  { %1888 = vmatprep.mubr.f32.mxu1 %v4089_v20  ;;  %2654 = vmatpush1.bf16.msra.mxu1 %v4542_v29 }
 0x1f9   :  { %2655 = vmatprep.subr.bf16.mxu1 %v4496_v50 }
 0x1fb   :  { %1891 = vmatmul.mubr.f32.gmra.mrb[12].mxu1 %v4108_v60 }
 0x1fc   :  { %1897 = vmatprep.mubr.f32.mxu1 %v4122_v33  ;;  %2657 = vmatpush1.bf16.msra.mxu1 %v4543_v16  ;;  %v4555_v16 = vand.u32 4294901760, %v3379_v27  ;;  %v4561_v27 = vand.u32 4294901760, %v4021_v23  ;;  %v4567_v23 = vand.u32 4294901760, %v3555_v44  ;;  %v4573_v44 = vand.u32 4294901760, %v4089_v20 }
 0x1fd   :  { %2658 = vmatprep.subr.bf16.mxu1 %v4496_v50  ;;  %v4579_v20 = vand.u32 4294901760, %v3648_v35  ;;  %v4584_v35 = vand.u32 4294901760, %v3736_v24  ;;  %v4593_v24 = vld [vmem:[#allocation17_spill] sm:$0xff] }
 0x1ff   :  { %1900 = vmatmul.mubr.f32.gmra.mrb[14].mxu1 %v4125_v41 }
 0x200   :  { %2660 = vmatpush1.bf16.msra.mxu1 %v4544_v30  ;;  %1996 = vmatprep.mubr.f32.mxu1 %v4545_v25  ;;  %v4550_v30 = vand.u32 4294901760, %v3369_v54  ;;  %v4556_v54 = vand.u32 4294901760, %v3976_v8  ;;  %v4562_v8 = vand.u32 4294901760, %v3403_v40  ;;  %v4568_v40 = vand.u32 4294901760, %v4048_v1 }
 0x201   :  { %2661 = vmatprep.subr.bf16.mxu1 %v4496_v50  ;;  %v4574_v1 = vand.u32 4294901760, %v3616_v39  ;;  %v4580_v39 = vand.u32 4294901760, %v4125_v41  ;;  %v4585_v41 = vand.u32 4294901760, %v3749_v17  ;;  %v4591_v17 = vld [vmem:[#allocation15_spill] sm:$0xff] }
 0x202   :  { %v2674_v25 = vpack.c.bf16 %v4551_v9, %v4550_v30 }
 0x204   :  { %2663 = vmatpush1.bf16.msra.mxu1 %v4546_v14  ;;  %v4552_v14 = vand.u32 4294901760, %v3932_v31  ;;  %v4558_v31 = vand.u32 4294901760, %v3384_v0  ;;  %v4564_v0 = vand.u32 4294901760, %v4029_v43  ;;  %v4570_v43 = vand.u32 4294901760, %v3580_v53 }
 0x205   :  { %2664 = vmatprep.subr.bf16.mxu1 %v4496_v50  ;;  %v4576_v53 = vand.u32 4294901760, %v4108_v60  ;;  %v4582_v60 = vand.u32 4294901760, %v3693_v19  ;;  %v4588_v19 = vand.u32 4294901760, %v3790_v61  ;;  %v4595_v61 = vld [vmem:[#allocation7_spill] sm:$0xff] }
 0x208   :  { %2666 = vmatpush1.bf16.msra.mxu1 %v4547_v5  ;;  %v4553_v5 = vand.u32 4294901760, %v3970_v62  ;;  %v4559_v62 = vand.u32 4294901760, %v3389_v21  ;;  %v4565_v21 = vand.u32 4294901760, %v4036_v46  ;;  %v4571_v46 = vand.u32 4294901760, %v3585_v12 }
 0x209   :  { %2667 = vmatprep.subr.bf16.mxu1 %v4496_v50  ;;  %v4577_v12 = vand.u32 4294901760, %v4122_v33  ;;  %v2698_v33 = vpack.c.bf16 %v4582_v60, %v4581_v47 }
 0x20c   :  { %2669 = vmatpush1.bf16.msra.mxu1 %v4548_v59  ;;  %v4554_v59 = vand.u32 4294901760, %v3373_v4  ;;  %v4560_v4 = vand.u32 4294901760, %v4003_v57  ;;  %v4566_v57 = vand.u32 4294901760, %v3552_v3  ;;  %v4572_v3 = vand.u32 4294901760, %v4081_v45 }
 0x20d   :  { %2670 = vmatprep.subr.bf16.mxu1 %v4496_v50  ;;  %v4578_v45 = vand.u32 4294901760, %v3643_v49  ;;  %v4583_v49 = vand.u32 4294901760, %v3731_v42  ;;  %v4589_v42 = vld [vmem:[#allocation13_spill] sm:$0xff] }
 0x20e   :  { %v2677_v51 = vpack.c.bf16 %v4555_v16, %v4554_v59  ;;  %v2683_v59 = vpack.c.bf16 %v4563_v38, %v4562_v8  ;;  %v2692_v16 = vpack.c.bf16 %v4575_v13, %v4574_v1  ;;  %v2432_v8 = vld [vmem:[%s4385_s4] ss:$0 sm:$0xff] }
 0x20f   :  { %v2695_v30 = vpack.c.bf16 %v4579_v20, %v4578_v45  ;;  %v2701_v9 = vpack.c.bf16 %v4584_v35, %v4583_v49 }
 0x210   :  { %2672 = vmatpush1.bf16.msra.mxu1 %v4549_v56 }
 0x211   :  { %2673 = vmatprep.subr.bf16.mxu1 %v4496_v50 }
 0x213   :  { %2000 = vmatmul.mubr.f32.vlgmr.msra.gmra.mrb[0].mxu1 %v4552_v14  ;;  %v2686_v14 = vpack.c.bf16 %v4567_v23, %v4566_v57 }
 0x214   :  { %2007 = vmatprep.mubr.f32.mxu1 %v4553_v5  ;;  %2675 = vmatpush1.bf16.msra.mxu1 %v2674_v25  ;;  %v2680_v5 = vpack.c.bf16 %v4559_v62, %v4558_v31  ;;  %v4586_v25 = vand.u32 4294901760, %v3751_v37  ;;  %v4590_v37 = vld [vmem:[#allocation14_spill] sm:$0xff] }
 0x215   :  { %2676 = vmatprep.subr.bf16.mxu1 %v4496_v50 }
 0x217   :  { %2011 = vmatmul.mubr.f32.gmra.mrb[2].mxu1 %v4556_v54  ;;  %v2704_v54 = vpack.c.bf16 %v4586_v25, %v4585_v41 }
 0x218   :  { %2018 = vmatprep.mubr.f32.mxu1 %v4557_v55  ;;  %2678 = vmatpush1.bf16.msra.mxu1 %v2677_v51  ;;  %v2689_v51 = vpack.c.bf16 %v4571_v46, %v4570_v43  ;;  %v2707_v55 = vpack.c.bf16 %v4588_v19, %v4587_v15 }
 0x219   :  { %2679 = vmatprep.subr.bf16.mxu1 %v4496_v50 }
 0x21b   :  { %2022 = vmatmul.mubr.f32.gmra.mrb[4].mxu1 %v4560_v4 }
 0x21c   :  { %2029 = vmatprep.mubr.f32.mxu1 %v4561_v27  ;;  %2681 = vmatpush1.bf16.msra.mxu1 %v2680_v5 }
 0x21d   :  { %2682 = vmatprep.subr.bf16.mxu1 %v4496_v50 }
 0x21f   :  { %2033 = vmatmul.mubr.f32.gmra.mrb[6].mxu1 %v4564_v0 }
 0x220   :  { %2040 = vmatprep.mubr.f32.mxu1 %v4565_v21  ;;  %2684 = vmatpush1.bf16.msra.mxu1 %v2683_v59 }
 0x221   :  { %2685 = vmatprep.subr.bf16.mxu1 %v4496_v50 }
 0x223   :  { %2044 = vmatmul.mubr.f32.gmra.mrb[8].mxu1 %v4568_v40 }
 0x224   :  { %2051 = vmatprep.mubr.f32.mxu1 %v4569_v48  ;;  %2687 = vmatpush1.bf16.msra.mxu1 %v2686_v14 }
 0x225   :  { %2688 = vmatprep.subr.bf16.mxu1 %v4496_v50 }
 0x227   :  { %2055 = vmatmul.mubr.f32.gmra.mrb[10].mxu1 %v4572_v3 }
 0x228   :  { %2062 = vmatprep.mubr.f32.mxu1 %v4573_v44  ;;  %2690 = vmatpush1.bf16.msra.mxu1 %v2689_v51 }
 0x229   :  { %2691 = vmatprep.subr.bf16.mxu1 %v4496_v50 }
 0x22b   :  { %2066 = vmatmul.mubr.f32.gmra.mrb[12].mxu1 %v4576_v53 }
 0x22c   :  { %2073 = vmatprep.mubr.f32.mxu1 %v4577_v12  ;;  %2693 = vmatpush1.bf16.msra.mxu1 %v2692_v16 }
 0x22d   :  { %2694 = vmatprep.subr.bf16.mxu1 %v4496_v50 }
 0x22f   :  { %2077 = vmatmul.mubr.f32.gmra.mrb[14].mxu1 %v4580_v39 }
 0x230   :  { %2696 = vmatpush1.bf16.msra.mxu1 %v2695_v30  ;;  %2219 = vmatprep.mubr.f32.mxu1 %v3928_v36 }
 0x231   :  { %2697 = vmatprep.subr.bf16.mxu1 %v4496_v50 }
 0x234   :  { %2699 = vmatpush1.bf16.msra.mxu1 %v2698_v33 }
 0x235   :  { %2700 = vmatprep.subr.bf16.mxu1 %v4496_v50 }
 0x238   :  { %2702 = vmatpush1.bf16.msra.mxu1 %v2701_v9 }
 0x239   :  { %2703 = vmatprep.subr.bf16.mxu1 %v4496_v50 }
 0x23c   :  { %2705 = vmatpush1.bf16.msra.mxu1 %v2704_v54 }
 0x23d   :  { %2706 = vmatprep.subr.bf16.mxu1 %v4496_v50 }
 0x240   :  { %2708 = vmatpush1.bf16.msra.mxu1 %v2707_v55 }
 0x241   :  { %2709 = vmatprep.subr.bf16.mxu1 %v4496_v50 }
 0x243   :  { %2221 = vmatmul.mubr.f32.vlgmr.msra.gmra.mrb[0].mxu1 %v3921_v22 }
 0x244   :  { %2226 = vmatprep.mubr.f32.mxu1 %v4589_v42  ;;  %2711 = vmatpush1.bf16.msra.mxu1 %v3375_v6  ;;  %v4594_v6 = vld [vmem:[#allocation18_spill] sm:$0xff] }
 0x245   :  { %2712 = vmatprep.subr.bf16.mxu1 %v4496_v50 }
 0x247   :  { %2228 = vmatmul.mubr.f32.gmra.mrb[2].mxu1 %v4590_v37 }
 0x248   :  { %2233 = vmatprep.mubr.f32.mxu1 %v4591_v17  ;;  %2714 = vmatpush1.bf16.msra.mxu1 %v4538_v32  ;;  %v4596_v32 = vld [vmem:[#allocation19_spill] sm:$0xff] }
 0x249   :  { %2715 = vmatprep.subr.bf16.mxu1 %v4496_v50 }
 0x24b   :  { %2235 = vmatmul.mubr.f32.gmra.mrb[4].mxu1 %v4592_v63 }
 0x24c   :  { %2240 = vmatprep.mubr.f32.mxu1 %v4593_v24  ;;  %2717 = vmatpush1.bf16.msra.mxu1 %v4539_v58  ;;  %v4597_v58 = vld [vmem:[#allocation8_spill] sm:$0xff] }
 0x24d   :  { %2718 = vmatprep.subr.bf16.mxu1 %v4496_v50 }
 0x24f   :  { %2242 = vmatmul.mubr.f32.gmra.mrb[6].mxu1 %v4008_v2 }
 0x250   :  { %2247 = vmatprep.mubr.f32.mxu1 %v4018_v18  ;;  %2720 = vmatpush1.bf16.msra.mxu1 %v4540_v28  ;;  %v4598_v28 = vld [vmem:[#allocation9_spill] sm:$0xff] }
 0x251   :  { %2721 = vmatprep.subr.bf16.mxu1 %v4496_v50 }
 0x253   :  { %2249 = vmatmul.mubr.f32.gmra.mrb[8].mxu1 %v4015_v26 }
 0x254   :  { %2254 = vmatprep.mubr.f32.mxu1 %v4061_v11  ;;  %2723 = vmatpush1.bf16.msra.mxu1 %v4541_v7  ;;  %v4599_v7 = vld [vmem:[#allocation10_spill] sm:$0xff] }
 0x255   :  { %2724 = vmatprep.subr.bf16.mxu1 %v4496_v50 }
 0x257   :  { %2256 = vmatmul.mubr.f32.gmra.mrb[10].mxu1 %v4055_v52 }
 0x258   :  { %2261 = vmatprep.mubr.f32.mxu1 %v4068_v10  ;;  %2726 = vmatpush1.bf16.msra.mxu1 %v4542_v29  ;;  %v4600_v29 = vld [vmem:[#allocation11_spill] sm:$0xff] }
 0x259   :  { %2727 = vmatprep.subr.bf16.mxu1 %v4496_v50 }
 0x25b   :  { %2263 = vmatmul.mubr.f32.gmra.mrb[12].mxu1 %v4093_v34 }
 0x25c   :  { %2268 = vmatprep.mubr.f32.mxu1 %v4594_v6  ;;  %2729 = vmatpush1.bf16.msra.mxu1 %v4595_v61 }
 0x25d   :  { %2730 = vmatprep.subr.bf16.mxu1 %v4496_v50 }
 0x25f   :  { %2270 = vmatmul.mubr.f32.gmra.mrb[14].mxu1 %v4596_v32 }
 0x260   :  { %2732 = vmatpush1.bf16.msra.mxu1 %v4597_v58  ;;  %2364 = vmatprep.mubr.f32.mxu1 %v3928_v36 }
 0x261   :  { %2733 = vmatprep.subr.bf16.mxu1 %v4496_v50 }
 0x264   :  { %2735 = vmatpush1.bf16.msra.mxu1 %v4598_v28 }
 0x265   :  { %2736 = vmatprep.subr.bf16.mxu1 %v4496_v50 }
 0x268   :  { %2738 = vmatpush1.bf16.msra.mxu1 %v4599_v7 }
 0x269   :  { %2739 = vmatprep.subr.bf16.mxu1 %v4496_v50 }
 0x26c   :  { %2741 = vmatpush1.bf16.msra.mxu1 %v4600_v29 }
 0x26d   :  { %2742 = vmatprep.subr.bf16.mxu1 %v4496_v50 }
 0x270   :  { %2744 = vmatpush1.bf16.msra.mxu1 %v4549_v56 }
 0x273   :  { %2366 = vmatmul.mubr.f32.vlgmr.msra.gmra.mrb[0].mxu1 %v3921_v22 }
 0x274   :  { %2371 = vmatprep.mubr.f32.mxu1 %v4589_v42 }
 0x277   :  { %2373 = vmatmul.mubr.f32.gmra.mrb[2].mxu1 %v4590_v37 }
 0x278   :  { %2378 = vmatprep.mubr.f32.mxu1 %v4591_v17 }
 0x27b   :  { %2380 = vmatmul.mubr.f32.gmra.mrb[4].mxu1 %v4592_v63 }
 0x27c   :  { %2385 = vmatprep.mubr.f32.mxu1 %v4593_v24 }
 0x27f   :  { %2387 = vmatmul.mubr.f32.gmra.mrb[6].mxu1 %v4008_v2 }
 0x280   :  { %2392 = vmatprep.mubr.f32.mxu1 %v4018_v18 }
 0x283   :  { %2394 = vmatmul.mubr.f32.gmra.mrb[8].mxu1 %v4015_v26 }
 0x284   :  { %2399 = vmatprep.mubr.f32.mxu1 %v4061_v11 }
 0x287   :  { %2401 = vmatmul.mubr.f32.gmra.mrb[10].mxu1 %v4055_v52 }
 0x288   :  { %2406 = vmatprep.mubr.f32.mxu1 %v4068_v10 }
 0x28a   :  { %v1370_v50 = vpop.f32.mrb[16].mxu0 }
 0x28b   :  { %2408 = vmatmul.mubr.f32.gmra.mrb[12].mxu1 %v4093_v34  ;;  %v1372_v22 = vpop.f32.mrb[17].mxu0  ;;  %v1371_v38 = vadd.f32 %v2432_v8, %v1370_v50 }
 0x28c   :  { %2413 = vmatprep.mubr.f32.mxu1 %v4594_v6 }
 0x28f   :  { %2415 = vmatmul.mubr.f32.gmra.mrb[14].mxu1 %v4596_v32 }
 0x290   :  { %v1385_v36 = vpop.f32.mrb[18].mxu0 }
 0x291   :  { %v1387_v2 = vpop.f32.mrb[19].mxu0  ;;  %v1386_v57 = vadd.f32 %v2432_v8, %v1385_v36 }
 0x294   :  { %v1400_v56 = vpop.f32.mrb[20].mxu0 }
 0x295   :  { %v1402_v18 = vpop.f32.mrb[21].mxu0  ;;  %v1401_v48 = vadd.f32 %v2432_v8, %v1400_v56 }
 0x299   :  { %v1415_v31 = vpop.f32.mrb[22].mxu0 }
 0x29a   :  { %v1417_v26 = vpop.f32.mrb[23].mxu0  ;;  %v1416_v3 = vadd.f32 %v2432_v8, %v1415_v31 }
 0x29d   :  { %v1430_v62 = vpop.f32.mrb[24].mxu0 }
 0x29e   :  { %v1432_v11 = vpop.f32.mrb[25].mxu0  ;;  %v1431_v16 = vadd.f32 %v2432_v8, %v1430_v62 }
 0x2a1   :  { %v1445_v5 = vpop.f32.mrb[26].mxu0 }
 0x2a2   :  { %v1447_v52 = vpop.f32.mrb[27].mxu0  ;;  %v1446_v20 = vadd.f32 %v2432_v8, %v1445_v5 }
 0x2a5   :  { %v1460_v4 = vpop.f32.mrb[28].mxu0 }
 0x2a6   :  { %v1462_v10 = vpop.f32.mrb[29].mxu0  ;;  %v1461_v60 = vadd.f32 %v2432_v8, %v1460_v4 }
 0x2a9   :  { %v1475_v27 = vpop.f32.mrb[30].mxu0 }
 0x2aa   :  { %v1477_v34 = vpop.f32.mrb[31].mxu0  ;;  %v1476_v9 = vadd.f32 %v2432_v8, %v1475_v27 }
 0x346   :  { %v2367_v59 = vpop.f32.mrb[0].mxu1 }
 0x347   :  { %v2762_v0 = vadd.f32 %v2367_v59, %v1371_v38  ;;  %v2369_v21 = vpop.f32.mrb[1].mxu1 }
 0x349   :  { %2420 = vst.msk [vmem:[%s4386_s5] sm:$0xff] %vm56_vm0, %v2762_v0 }
 0x34a   :  { %v2374_v23 = vpop.f32.mrb[2].mxu1 }
 0x34b   :  { %v2764_v14 = vadd.f32 %v2374_v23, %v1386_v57  ;;  %v2376_v40 = vpop.f32.mrb[3].mxu1 }
 0x34d   :  { %2421 = vst.msk [vmem:[%s4386_s5 + $0x8] sm:$0xff] %vm56_vm0, %v2764_v14 }
 0x34e   :  { %v2381_v43 = vpop.f32.mrb[4].mxu1 }
 0x34f   :  { %v2766_v46 = vadd.f32 %v2381_v43, %v1401_v48  ;;  %v2383_v51 = vpop.f32.mrb[5].mxu1 }
 0x351   :  { %2422 = vst.msk [vmem:[%s4386_s5 + $0x10] sm:$0xff] %vm56_vm0, %v2766_v46 }
 0x352   :  { %v2388_v44 = vpop.f32.mrb[6].mxu1 }
 0x353   :  { %v2768_v1 = vadd.f32 %v2388_v44, %v1416_v3  ;;  %v2390_v13 = vpop.f32.mrb[7].mxu1 }
 0x355   :  { %2423 = vst.msk [vmem:[%s4386_s5 + $0x18] sm:$0xff] %vm56_vm0, %v2768_v1 }
 0x356   :  { %v2395_v53 = vpop.f32.mrb[8].mxu1 }
 0x357   :  { %v2770_v12 = vadd.f32 %v2395_v53, %v1431_v16  ;;  %v2397_v45 = vpop.f32.mrb[9].mxu1 }
 0x359   :  { %2424 = vst.msk [vmem:[%s4386_s5 + $0x20] sm:$0xff] %vm56_vm0, %v2770_v12 }
 0x35a   :  { %v2402_v30 = vpop.f32.mrb[10].mxu1 }
 0x35b   :  { %v2772_v39 = vadd.f32 %v2402_v30, %v1446_v20  ;;  %v2404_v47 = vpop.f32.mrb[11].mxu1 }
 0x35d   :  { %2425 = vst.msk [vmem:[%s4386_s5 + $0x28] sm:$0xff] %vm56_vm0, %v2772_v39 }
 0x35e   :  { %v2409_v33 = vpop.f32.mrb[12].mxu1 }
 0x35f   :  { %v2774_v49 = vadd.f32 %v2409_v33, %v1461_v60  ;;  %v2411_v35 = vpop.f32.mrb[13].mxu1 }
 0x361   :  { %2426 = vst.msk [vmem:[%s4386_s5 + $0x30] sm:$0xff] %vm56_vm0, %v2774_v49 }
 0x362   :  { %v2416_v41 = vpop.f32.mrb[14].mxu1 }
 0x363   :  { %v2776_v25 = vadd.f32 %v2416_v41, %v1476_v9  ;;  %v2418_v54 = vpop.f32.mrb[15].mxu1 }
 0x365   :  { %2427 = vst.msk [vmem:[%s4386_s5 + $0x38] sm:$0xff] %vm56_vm0, %v2776_v25 }

// kernel: arm_mixer_forward.5
= control target key start
LH: loop header
LB: loop body
LE: loop exit
PB: predicated region body
PF: predicated region fallthrough
CT: control target
= control target key end

     0   :  { %s2207_s0 = inlined_call_operand.vmem [shape: f32[2,32,8,8], index: 0, kind: input, shape index: {}]   ;;  %s2208_s1 = inlined_call_operand.vmem [shape: f32[98], index: 1, kind: input, shape index: {}]   ;;  %s2209_s2 = inlined_call_operand.<no memory space> [shape: f32[1], index: 2, kind: input, shape index: {}]   ;;  %s2210_s3 = inlined_call_operand.vmem [shape: f32[2,32,8,8], index: 3, kind: output, shape index: {}]  }
   0x1   :  { %8 = sst [smem:[#allocation3]] %s2209_s2 }
   0x2   :  { %9 = vsyncpa [#allocation5], 0  ;;  %s1481_s14 = smov 0  }
   0x3 LB: > { %s1487_s15 = sadd.s32 4294967295, %s1447_s14   ;;  %p1249_p0 = scmp.ge.s32.totalorder %s1447_s14, 1  ;;  %s1447_s14 = sphi %s1481_s14, %s15_s14  }
   0x4   : > { %p114_p1 = scmp.lt.s32.totalorder %s1447_s14, 3  ;;  %s127_s2 = sshll.u32 %s2208_s1, 4  ;;  %s128_s2 = int_to_ptr.vmem [resolvable:$true] %s127_s2 }
   0x5   : > { %p1367_p3 = scmp.eq.s32.totalorder %s1487_s15, 0  ;;  %s1422_s19 = scalar_lea.vmem %s128_s2, 16 }
   0x6   : > { %p1494_p2 = pnand %p1249_p0, %p114_p1  ;;  %p1423_p6 = scmp.ne.s32.totalorder %s128_s2, %s1422_s19 }
   0x7   : > { %p1430_p10 = scmp.lt.s32.totalorder %s128_s2, %s128_s2  ;;  %p1431_p11 = scmp.lt.s32.totalorder %s1422_s19, %s1422_s19 }
   0x8   : > { %p1363_p4 = pneg %p1494_p2 }
   0x9   : > { %p1432_p12 = por %p1431_p11, %p1430_p10 }
   0xa   : > { %p1364_p5 = pnand %p1367_p3, %p1363_p4 }
   0xc   : > { %p1424_p7 = pneg %p1364_p5 }
   0xe   : > { %p1425_p8 = pnand %p1424_p7, %p1423_p6 }
  0x10   : > { %p1426_p9 = pneg %p1425_p8 }
  0x12   : > { %p1433_p13 = pnand %p1432_p12, %p1426_p9 }
  0x14   : > { %1436 = shalt.err (!%p1433_p13)
}
  0x15   : > { %s1449_s20 = smov [#allocation4]   ;;  %151 = sbr.rel (%p1494_p2) target bundleno = 590 (0x24e), region = 32 }
  0x16   : > { %1366 = dma.vmem_to_smem (!%p1364_p5), %s128_s2, 16, %s1449_s20, [#allocation5]  }
  0x1c   : > { %1442 = dma.done.wait (%p1367_p3), [#allocation5], 16  }
  0x1d   : > { %1444 = vsyncadd (%p1367_p3), [#allocation5], 4294967280 }
  0x1e   : > { %157 = sfence }
  0x1f   : > { %p176_p0 = scmp.lt.s32.totalorder %s1487_s15, 1  ;;  %vm347_vm0 = vcmask 113664   ;;  %vm349_vm1 = vcmask 111616   ;;  %v1450_v0 = vmov 0.0   ;;  %vm218_vm2 = vcmask 64512   ;;  %s1451_s25 = smov 3  }
  0x20   : > { %348 = vst.msk [vmem:[#allocation2] sm:$0xff] %vm347_vm0, %v1450_v0  ;;  %351 = vst.msk [vmem:[#allocation2 + $0x10] sm:$0xff] %vm347_vm0, %v1450_v0  ;;  %vm357_vm3 = vcmask 89112   ;;  %s1259_s26 = sld [smem:[#allocation4 + $0x2]]  ;;  %s1258_s27 = sld [smem:[#allocation4 + $0x1]] }
  0x21   : > { %350 = vst.msk [vmem:[#allocation2 + $0x8] sm:$0x3f] %vm349_vm1, %v1450_v0  ;;  %352 = vst.msk [vmem:[#allocation2 + $0x18] sm:$0x3f] %vm349_vm1, %v1450_v0  ;;  %s2213_s15 = smov (!%p176_p0, %s1487_s15), 1  ;;  %s1260_s28 = sld [smem:[#allocation4 + $0x3]] }
  0x22   : > { %s1357_s21 = sshll.u32 %s2213_s15, 8  ;;  %s1261_s29 = sld [smem:[#allocation4 + $0x4]] }
  0x23   : > { %s1519_s24 = scalar_lea.vmem %s2207_s0, %s1357_s21  ;;  %s1262_s30 = sld [smem:[#allocation4 + $0x5]] }
  0x24   : > { %v1522_v1 = vld [vmem:[%s1519_s24] sm:$0xff]  ;;  %v1525_v2 = vld [vmem:[%s1519_s24 + $0x8] sm:$0xff]  ;;  %v1528_v3 = vld [vmem:[%s1519_s24 + $0x10] sm:$0xff]  ;;  %s1263_s4 = sld [smem:[#allocation4 + $0x6]]  ;;  %s1743_s5 = sld [smem:[#allocation4 + $0x8]] }
  0x25   : > { %v1531_v4 = vld [vmem:[%s1519_s24 + $0x18] sm:$0xff]  ;;  %v1534_v5 = vld [vmem:[%s1519_s24 + $0x20] sm:$0xff]  ;;  %v1537_v6 = vld [vmem:[%s1519_s24 + $0x28] sm:$0xff]  ;;  %v219_v7 = vsel %vm218_vm2, %v1522_v1, -inf  ;;  %v220_v8 = vsel %vm218_vm2, %v1525_v2, -inf  ;;  %v221_v9 = vsel %vm218_vm2, %v1528_v3, -inf }
  0x26   : > { %v1546_v10 = vld [vmem:[%s1519_s24 + $0x30] sm:$0xff]  ;;  %v1549_v11 = vld [vmem:[%s1519_s24 + $0x38] sm:$0xff]  ;;  %v1552_v12 = vld [vmem:[%s1519_s24 + $0x40] sm:$0xff]  ;;  %v222_v13 = vsel %vm218_vm2, %v1531_v4, -inf  ;;  %v223_v14 = vsel %vm218_vm2, %v1534_v5, -inf  ;;  %v225_v15 = vsel %vm218_vm2, %v1537_v6, -inf }
  0x27   : > { %v1561_v16 = vld [vmem:[%s1519_s24 + $0x48] sm:$0xff]  ;;  %v1564_v17 = vld [vmem:[%s1519_s24 + $0x50] sm:$0xff]  ;;  %v1567_v18 = vld [vmem:[%s1519_s24 + $0x58] sm:$0xff]  ;;  %v224_v19 = vmax.f32 %v219_v7, %v223_v14  ;;  %v226_v20 = vmax.f32 %v220_v8, %v225_v15  ;;  %v227_v21 = vsel %vm218_vm2, %v1546_v10, -inf  ;;  %v229_v22 = vsel %vm218_vm2, %v1549_v11, -inf  ;;  %s1452_s6 = smov 126  }
  0x28   : > { %v1574_v23 = vld [vmem:[%s1519_s24 + $0x60] sm:$0xff]  ;;  %v1577_v24 = vld [vmem:[%s1519_s24 + $0x68] sm:$0xff]  ;;  %v1580_v25 = vld [vmem:[%s1519_s24 + $0x70] sm:$0xff]  ;;  %v228_v26 = vmax.f32 %v221_v9, %v227_v21  ;;  %v230_v27 = vmax.f32 %v222_v13, %v229_v22  ;;  %v231_v28 = vsel %vm218_vm2, %v1552_v12, -inf  ;;  %v233_v29 = vsel %vm218_vm2, %v1561_v16, -inf  ;;  %s1746_s7 = sld [smem:[#allocation4 + $0x9]] }
  0x29   : > { %v1587_v30 = vld [vmem:[%s1519_s24 + $0x78] sm:$0xff]  ;;  %v1590_v31 = vld [vmem:[%s1519_s24 + $0x80] sm:$0xff]  ;;  %v1593_v32 = vld [vmem:[%s1519_s24 + $0x88] sm:$0xff]  ;;  %v232_v33 = vmax.f32 %v224_v19, %v231_v28  ;;  %v234_v34 = vmax.f32 %v226_v20, %v233_v29  ;;  %v235_v35 = vsel %vm218_vm2, %v1564_v17, -inf  ;;  %v237_v36 = vsel %vm218_vm2, %v1567_v18, -inf  ;;  %s1453_s8 = smov 127  }
  0x2a   : > { %v1600_v37 = vld [vmem:[%s1519_s24 + $0x90] sm:$0xff]  ;;  %v1603_v38 = vld [vmem:[%s1519_s24 + $0x98] sm:$0xff]  ;;  %v236_v39 = vmax.f32 %v228_v26, %v235_v35  ;;  %v238_v40 = vmax.f32 %v230_v27, %v237_v36  ;;  %v239_v41 = vsel %vm218_vm2, %v1574_v23, -inf  ;;  %v241_v42 = vsel %vm218_vm2, %v1577_v24, -inf  ;;  %v1610_v43 = vld [vmem:[%s1519_s24 + $0xa0] sm:$0xff]  ;;  %s1267_s9 = sld [smem:[#allocation4 + $0xa]] }
  0x2b   : > { %v1613_v44 = vld [vmem:[%s1519_s24 + $0xa8] sm:$0xff]  ;;  %v240_v45 = vmax.f32 %v232_v33, %v239_v41  ;;  %v242_v46 = vmax.f32 %v234_v34, %v241_v42  ;;  %v243_v47 = vsel %vm218_vm2, %v1580_v25, -inf  ;;  %v245_v48 = vsel %vm218_vm2, %v1587_v30, -inf  ;;  %v1620_v49 = vld [vmem:[%s1519_s24 + $0xb0] sm:$0xff]  ;;  %v1623_v50 = vld [vmem:[%s1519_s24 + $0xb8] sm:$0xff]  ;;  %s1454_s10 = smov 125  }
  0x2c   : > { %v244_v51 = vmax.f32 %v236_v39, %v243_v47  ;;  %v246_v52 = vmax.f32 %v238_v40, %v245_v48  ;;  %v247_v53 = vsel %vm218_vm2, %v1590_v31, -inf  ;;  %v249_v54 = vsel %vm218_vm2, %v1593_v32, -inf  ;;  %v1630_v55 = vld [vmem:[%s1519_s24 + $0xc0] sm:$0xff]  ;;  %v1633_v56 = vld [vmem:[%s1519_s24 + $0xc8] sm:$0xff]  ;;  %v1640_v61 = vld [vmem:[%s1519_s24 + $0xd0] sm:$0xff]  ;;  %s1268_s11 = sld [smem:[#allocation4 + $0xb]] }
  0x2d   : > { %v248_v57 = vmax.f32 %v240_v45, %v247_v53  ;;  %v250_v58 = vmax.f32 %v242_v46, %v249_v54  ;;  %v251_v59 = vsel %vm218_vm2, %v1600_v37, -inf  ;;  %v253_v60 = vsel %vm218_vm2, %v1603_v38, -inf  ;;  %v1643_v62 = vld [vmem:[%s1519_s24 + $0xd8] sm:$0xff]  ;;  %v1650_v9 = vld [vmem:[%s1519_s24 + $0xe0] sm:$0xff]  ;;  %v1653_v13 = vld [vmem:[%s1519_s24 + $0xe8] sm:$0xff]  ;;  %s1455_s12 = smov 124  }
  0x2e   : > { %v252_v63 = vmax.f32 %v244_v51, %v251_v59  ;;  %v254_v0 = vmax.f32 %v246_v52, %v253_v60  ;;  %v255_v7 = vsel %vm218_vm2, %v1610_v43, -inf  ;;  %v257_v8 = vsel %vm218_vm2, %v1613_v44, -inf  ;;  %v1660_v21 = vld [vmem:[%s1519_s24 + $0xf0] sm:$0xff]  ;;  %v1663_v22 = vld [vmem:[%s1519_s24 + $0xf8] sm:$0xff]  ;;  %s1269_s13 = sld [smem:[#allocation4 + $0xc]]  ;;  %s1456_s16 = smov 123  }
  0x2f   : > { %v256_v14 = vmax.f32 %v248_v57, %v255_v7  ;;  %v258_v15 = vmax.f32 %v250_v58, %v257_v8  ;;  %v259_v19 = vsel %vm218_vm2, %v1620_v49, -inf  ;;  %v261_v20 = vsel %vm218_vm2, %v1623_v50, -inf  ;;  %s1270_s17 = sld [smem:[#allocation4 + $0xd]]  ;;  %s1457_s2 = smov 122  }
  0x30   : > { %v260_v26 = vmax.f32 %v252_v63, %v259_v19  ;;  %v262_v27 = vmax.f32 %v254_v0, %v261_v20  ;;  %v263_v28 = vsel %vm218_vm2, %v1630_v55, -inf  ;;  %v265_v29 = vsel %vm218_vm2, %v1633_v56, -inf  ;;  %s1272_s18 = sld [smem:[#allocation4 + $0xf]]  ;;  %s1273_s19 = sld [smem:[#allocation4 + $0x10]] }
  0x31   : > { %v264_v33 = vmax.f32 %v256_v14, %v263_v28  ;;  %v266_v34 = vmax.f32 %v258_v15, %v265_v29  ;;  %v267_v35 = vsel %vm218_vm2, %v1640_v61, -inf  ;;  %v269_v36 = vsel %vm218_vm2, %v1643_v62, -inf  ;;  %s1274_s20 = sld [smem:[#allocation4 + $0x11]]  ;;  %s1275_s22 = sld [smem:[#allocation4 + $0x12]] }
  0x32   : > { %v268_v39 = vmax.f32 %v260_v26, %v267_v35  ;;  %v270_v40 = vmax.f32 %v262_v27, %v269_v36  ;;  %v271_v41 = vsel %vm218_vm2, %v1650_v9, -inf  ;;  %v273_v42 = vsel %vm218_vm2, %v1653_v13, -inf  ;;  %s1276_s23 = sld [smem:[#allocation4 + $0x13]] }
  0x33   : > { %v272_v45 = vmax.f32 %v264_v33, %v271_v41  ;;  %v274_v46 = vmax.f32 %v266_v34, %v273_v42  ;;  %v275_v47 = vsel %vm218_vm2, %v1660_v21, -inf  ;;  %v277_v48 = vsel %vm218_vm2, %v1663_v22, -inf }
  0x34   : > { %v276_v51 = vmax.f32 %v268_v39, %v275_v47  ;;  %v278_v52 = vmax.f32 %v270_v40, %v277_v48  ;;  %v282_v58 = vsel %vm218_vm2, %v1522_v1, 0.0  ;;  %v283_v59 = vsel %vm218_vm2, %v1525_v2, 0.0 }
  0x35   : > { %v279_v53 = vmax.f32 %v272_v45, %v274_v46  ;;  %v284_v60 = vadd.f32 %v283_v59, %v282_v58  ;;  %v285_v63 = vsel %vm218_vm2, %v1528_v3, 0.0  ;;  %v287_v7 = vsel %vm218_vm2, %v1531_v4, 0.0 }
  0x36   : > { %v280_v54 = vmax.f32 %v276_v51, %v278_v52  ;;  %v289_v14 = vsel %vm218_vm2, %v1534_v5, 0.0  ;;  %v291_v19 = vsel %vm218_vm2, %v1537_v6, 0.0  ;;  %v293_v2 = vsel %vm218_vm2, %v1546_v10, 0.0 }
  0x37   : > { %v286_v0 = vadd.f32 %v285_v63, %v284_v60  ;;  %v295_v3 = vsel %vm218_vm2, %v1549_v11, 0.0  ;;  %v297_v4 = vsel %vm218_vm2, %v1552_v12, 0.0  ;;  %v299_v5 = vsel %vm218_vm2, %v1561_v16, 0.0 }
  0x38   : > { %v281_v57 = vmax.f32 %v279_v53, %v280_v54  ;;  %v301_v6 = vsel %vm218_vm2, %v1564_v17, 0.0  ;;  %v303_v10 = vsel %vm218_vm2, %v1567_v18, 0.0  ;;  %v305_v11 = vsel %vm218_vm2, %v1574_v23, 0.0 }
  0x39   : > { %v288_v8 = vadd.f32 %v287_v7, %v286_v0  ;;  %v307_v12 = vsel %vm218_vm2, %v1577_v24, 0.0  ;;  %v309_v16 = vsel %vm218_vm2, %v1580_v25, 0.0  ;;  %v311_v17 = vsel %vm218_vm2, %v1587_v30, 0.0 }
  0x3a   : > { %354 = vrot.lane.b32.xlu0 %v281_v57, %s1451_s25  ;;  %v313_v18 = vsel %vm218_vm2, %v1590_v31, 0.0  ;;  %v315_v23 = vsel %vm218_vm2, %v1593_v32, 0.0  ;;  %v317_v24 = vsel %vm218_vm2, %v1600_v37, 0.0  ;;  %v319_v25 = vsel %vm218_vm2, %v1603_v38, 0.0 }
  0x3b   : > { %v290_v15 = vadd.f32 %v289_v14, %v288_v8  ;;  %v321_v30 = vsel %vm218_vm2, %v1610_v43, 0.0  ;;  %v323_v31 = vsel %vm218_vm2, %v1613_v44, 0.0  ;;  %v325_v32 = vsel %vm218_vm2, %v1620_v49, 0.0 }
  0x3c   : > { %v327_v37 = vsel %vm218_vm2, %v1623_v50, 0.0  ;;  %v329_v38 = vsel %vm218_vm2, %v1630_v55, 0.0  ;;  %v331_v44 = vsel %vm218_vm2, %v1633_v56, 0.0  ;;  %v333_v50 = vsel %vm218_vm2, %v1640_v61, 0.0 }
  0x3d   : > { %v292_v1 = vadd.f32 %v291_v19, %v290_v15  ;;  %v382_v53 = vstv %s1259_s26  ;;  %v374_v54 = vstv %s1258_s27  ;;  %v335_v58 = vsel %vm218_vm2, %v1643_v62, 0.0  ;;  %s1277_s26 = sld [smem:[#allocation4 + $0x14]]  ;;  %s1279_s27 = sld [smem:[#allocation4 + $0x16]] }
  0x3e   : > { %v390_v60 = vstv %s1260_s28  ;;  %v398_v61 = vstv %s1261_s29  ;;  %v337_v62 = vsel %vm218_vm2, %v1650_v9, 0.0  ;;  %v406_v8 = vstv %s1262_s30  ;;  %s1280_s28 = sld [smem:[#allocation4 + $0x17]]  ;;  %s1281_s29 = sld [smem:[#allocation4 + $0x18]] }
  0x3f   : > { %v294_v20 = vadd.f32 %v293_v2, %v292_v1  ;;  %v414_v14 = vstv %s1263_s4  ;;  %v339_v9 = vsel %vm218_vm2, %v1653_v13, 0.0  ;;  %v341_v13 = vsel %vm218_vm2, %v1660_v21, 0.0  ;;  %s1282_s30 = sld [smem:[#allocation4 + $0x19]]  ;;  %s1284_s4 = sld [smem:[#allocation4 + $0x1b]] }
  0x40   : > { %v467_v21 = vstv %s1270_s17  ;;  %s1291_s17 = sld [smem:[#allocation4 + $0x22]] }
  0x41   : > { %v296_v26 = vadd.f32 %v295_v3, %v294_v20  ;;  %v427_v20 = vstv %s1743_s5  ;;  %v435_v3 = vstv %s1746_s7  ;;  %s1286_s5 = sld [smem:[#allocation4 + $0x1d]]  ;;  %s1287_s7 = sld [smem:[#allocation4 + $0x1e]] }
  0x43   : > { %v298_v27 = vadd.f32 %v297_v4, %v296_v26 }
  0x45   : > { %v300_v28 = vadd.f32 %v299_v5, %v298_v27  ;;  %v443_v5 = vstv %s1267_s9  ;;  %s1288_s9 = sld [smem:[#allocation4 + $0x1f]] }
  0x47   : > { %v302_v29 = vadd.f32 %v301_v6, %v300_v28  ;;  %v451_v28 = vstv %s1268_s11  ;;  %s1289_s11 = sld [smem:[#allocation4 + $0x20]] }
  0x49   : > { %v304_v33 = vadd.f32 %v303_v10, %v302_v29  ;;  %v343_v10 = vsel %vm218_vm2, %v1663_v22, 0.0 }
  0x4b   : > { %v306_v34 = vadd.f32 %v305_v11, %v304_v33  ;;  %v459_v11 = vstv %s1269_s13  ;;  %s1290_s13 = sld [smem:[#allocation4 + $0x21]] }
  0x4d   : > { %v308_v35 = vadd.f32 %v307_v12, %v306_v34 }
  0x4f   : > { %v310_v36 = vadd.f32 %v309_v16, %v308_v35 }
  0x51   : > { %v312_v39 = vadd.f32 %v311_v17, %v310_v36  ;;  %v480_v36 = vstv %s1272_s18  ;;  %s1293_s18 = sld [smem:[#allocation4 + $0x24]] }
  0x53   : > { %v314_v40 = vadd.f32 %v313_v18, %v312_v39  ;;  %v488_v39 = vstv %s1273_s19  ;;  %v496_v18 = vstv %s1274_s20  ;;  %s1294_s19 = sld [smem:[#allocation4 + $0x25]]  ;;  %s1295_s20 = sld [smem:[#allocation4 + $0x26]] }
  0x55   : > { %v316_v41 = vadd.f32 %v315_v23, %v314_v40 }
  0x57   : > { %v318_v42 = vadd.f32 %v317_v24, %v316_v41  ;;  %v504_v41 = vstv %s1275_s22  ;;  %v512_v24 = vstv %s1276_s23  ;;  %s1296_s22 = sld [smem:[#allocation4 + $0x27]]  ;;  %s1297_s23 = sld [smem:[#allocation4 + $0x28]] }
  0x59   : > { %v320_v45 = vadd.f32 %v319_v25, %v318_v42 }
  0x5b   : > { %v322_v46 = vadd.f32 %v321_v30, %v320_v45  ;;  %v520_v45 = vstv %s1277_s26  ;;  %s1298_s26 = sld [smem:[#allocation4 + $0x29]] }
  0x5d   : > { %v324_v47 = vadd.f32 %v323_v31, %v322_v46  ;;  %v533_v46 = vstv %s1279_s27  ;;  %s1300_s27 = sld [smem:[#allocation4 + $0x2b]] }
  0x5f   : > { %v326_v48 = vadd.f32 %v325_v32, %v324_v47  ;;  %v541_v32 = vstv %s1280_s28  ;;  %s1301_s28 = sld [smem:[#allocation4 + $0x2c]] }
  0x61   : > { %v328_v51 = vadd.f32 %v327_v37, %v326_v48  ;;  %v549_v48 = vstv %s1281_s29  ;;  %s1302_s29 = sld [smem:[#allocation4 + $0x2d]] }
  0x63   : > { %v330_v43 = vadd.f32 %v329_v38, %v328_v51  ;;  %v557_v38 = vstv %s1282_s30  ;;  %s1303_s30 = sld [smem:[#allocation4 + $0x2e]] }
  0x65   : > { %v332_v49 = vadd.f32 %v331_v44, %v330_v43 }
  0x67   : > { %v334_v55 = vadd.f32 %v333_v50, %v332_v49  ;;  %v573_v49 = vstv %s1284_s4  ;;  %s1305_s4 = sld [smem:[#allocation4 + $0x30]] }
  0x69   : > { %v336_v63 = vadd.f32 %v335_v58, %v334_v55  ;;  %v594_v58 = vstv %s1287_s7  ;;  %s365_s7 = sld [smem:[#allocation3]] }
  0x6b   : > { %v338_v15 = vadd.f32 %v337_v62, %v336_v63  ;;  %v618_v63 = vstv %s1290_s13  ;;  %s1308_s13 = sld [smem:[#allocation4 + $0x33]] }
  0x6d   : > { %v340_v26 = vadd.f32 %v339_v9, %v338_v15  ;;  %v647_v9 = vstv %s1294_s19  ;;  %s1309_s19 = sld [smem:[#allocation4 + $0x34]] }
  0x6f   : > { %v342_v6 = vadd.f32 %v341_v13, %v340_v26  ;;  %v663_v26 = vstv %s1296_s22  ;;  %s1856_s22 = sld [smem:[#allocation4 + $0x37]] }
  0x71   : > { %v344_v34 = vadd.f32 %v343_v10, %v342_v6  ;;  %v692_v6 = vstv %s1300_s27  ;;  %s1866_s27 = sld [smem:[#allocation4 + $0x39]] }
  0x73   : > { %v346_v22 = vmul.f32 0.03125, %v344_v34 }
  0xac   : > { %v355_v52 = vpop.permute.xlu0 %354 }
  0xad   : > { %358 = vst.msk [vmem:[#allocation2 + $0x3] sm:$0xff] %vm357_vm3, %v355_v52 }
  0xb4   : > { %v1737_v57 = vld [vmem:[#allocation2] sm:$0xff] }
  0xb5   : > { %v383_v56 = vmul.f32 %v382_v53, %v1737_v57  ;;  %v375_v59 = vmul.f32 %v374_v54, %v1737_v57  ;;  %v391_v0 = vmul.f32 %v390_v60, %v1737_v57  ;;  %v399_v7 = vmul.f32 %v398_v61, %v1737_v57  ;;  %v1758_v1 = vld [vmem:[#allocation2 + $0x1] sm:$0xff] }
  0xb6   : > { %v407_v19 = vmul.f32 %v406_v8, %v1737_v57  ;;  %v415_v2 = vmul.f32 %v414_v14, %v1737_v57  ;;  %v428_v4 = vmul.f32 %v427_v20, %v1758_v1  ;;  %v436_v27 = vmul.f32 %v435_v3, %v1758_v1  ;;  %v1778_v35 = vld [vmem:[#allocation2 + $0x2] sm:$0xff] }
  0xb7   : > { %385 = vrot.lane.b32.xlu1 %v383_v56, %s1452_s6  ;;  %377 = vrot.lane.b32.xlu0 %v375_v59, %s1453_s8  ;;  %v444_v29 = vmul.f32 %v443_v5, %v1758_v1  ;;  %v452_v33 = vmul.f32 %v451_v28, %v1758_v1  ;;  %v460_v12 = vmul.f32 %v459_v11, %v1758_v1  ;;  %v1793_v30 = vld [vmem:[#allocation2 + $0x3] sm:$0xff]  ;;  %v586_v53 = vstv %s1286_s5  ;;  %s368_s5 = sld [smem:[#allocation4]] }
  0xb8   : > { %v468_v16 = vmul.f32 %v467_v21, %v1758_v1  ;;  %v481_v17 = vmul.f32 %v480_v36, %v1778_v35  ;;  %v489_v40 = vmul.f32 %v488_v39, %v1778_v35  ;;  %v497_v23 = vmul.f32 %v496_v18, %v1778_v35  ;;  %v1807_v50 = vld [vmem:[#allocation2 + $0x4] sm:$0xff] }
  0xb9   : > { %v505_v42 = vmul.f32 %v504_v41, %v1778_v35  ;;  %v513_v25 = vmul.f32 %v512_v24, %v1778_v35  ;;  %v521_v31 = vmul.f32 %v520_v45, %v1778_v35  ;;  %v534_v47 = vmul.f32 %v533_v46, %v1793_v30  ;;  %v1821_v8 = vld [vmem:[#allocation2 + $0x5] sm:$0xff] }
  0xba   : > { %v542_v37 = vmul.f32 %v541_v32, %v1793_v30  ;;  %v550_v51 = vmul.f32 %v549_v48, %v1793_v30  ;;  %v558_v52 = vmul.f32 %v557_v38, %v1793_v30  ;;  %v574_v54 = vmul.f32 %v573_v49, %v1793_v30  ;;  %v1835_v28 = vld [vmem:[#allocation2 + $0x6] sm:$0xff] }
  0xbb   : > { %393 = vrot.lane.b32.xlu1 %v391_v0, %s1454_s10  ;;  %401 = vrot.lane.b32.xlu0 %v399_v7, %s1455_s12  ;;  %v587_v55 = vmul.f32 %v586_v53, %v1807_v50  ;;  %v602_v56 = vstv %s1288_s9  ;;  %v595_v59 = vmul.f32 %v594_v58, %v1807_v50  ;;  %v610_v61 = vstv %s1289_s11  ;;  %s1264_s9 = sld [smem:[#allocation4 + $0x7]]  ;;  %s1271_s11 = sld [smem:[#allocation4 + $0xe]] }
  0xbc   : > { %v603_v60 = vmul.f32 %v602_v56, %v1807_v50  ;;  %v611_v62 = vmul.f32 %v610_v61, %v1807_v50  ;;  %v619_v0 = vmul.f32 %v618_v63, %v1807_v50  ;;  %v626_v7 = vstv %s1291_s17  ;;  %s1307_s17 = sld [smem:[#allocation4 + $0x32]] }
  0xbd   : > { %v639_v14 = vstv %s1293_s18  ;;  %v627_v15 = vmul.f32 %v626_v7, %v1807_v50  ;;  %v648_v20 = vmul.f32 %v647_v9, %v1821_v8  ;;  %v664_v13 = vmul.f32 %v663_v26, %v1821_v8  ;;  %s1310_s18 = sld [smem:[#allocation4 + $0x35]] }
  0xbe   : > { %v679_v5 = vstv %s1298_s26  ;;  %v693_v10 = vmul.f32 %v692_v6, %v1835_v28  ;;  %v708_v11 = vstv %s1302_s29  ;;  %v370_v18 = vstv %s368_s5  ;;  %s1864_s26 = sld [smem:[#allocation4 + $0x3a]]  ;;  %s1876_s29 = sld [smem:[#allocation4 + $0x3b]] }
  0xbf   : > { %409 = vrot.lane.b32.xlu1 %v407_v19, %s1456_s16  ;;  %417 = vrot.lane.b32.xlu0 %v415_v2, %s1457_s2  ;;  %v640_v19 = vmul.f32 %v639_v14, %v1821_v8  ;;  %v655_v2 = vstv %s1295_s20  ;;  %v709_v34 = vmul.f32 %v708_v11, %v1835_v28  ;;  %s1278_s20 = sld [smem:[#allocation4 + $0x15]]  ;;  %s1899_s5 = sld [smem:[#allocation4 + $0x41]] }
  0xc0   : > { %v656_v3 = vmul.f32 %v655_v2, %v1821_v8 }
  0xc1   : > { %v476_v63 = vstv %s1271_s11  ;;  %s1912_s11 = sld [smem:[#allocation4 + $0x42]] }
  0xc3   : > { %430 = vrot.lane.b32.xlu1 %v428_v4, %s1453_s8  ;;  %438 = vrot.lane.b32.xlu0 %v436_v27, %s1452_s6  ;;  %v671_v4 = vstv %s1297_s23  ;;  %s1858_s23 = sld [smem:[#allocation4 + $0x36]] }
  0xc4   : > { %v672_v27 = vmul.f32 %v671_v4, %v1821_v8 }
  0xc7   : > { %446 = vrot.lane.b32.xlu1 %v444_v29, %s1454_s10  ;;  %454 = vrot.lane.b32.xlu0 %v452_v33, %s1455_s12  ;;  %v680_v29 = vmul.f32 %v679_v5, %v1821_v8  ;;  %v700_v33 = vstv %s1301_s28  ;;  %s1874_s28 = sld [smem:[#allocation4 + $0x3c]] }
  0xc8   : > { %v701_v21 = vmul.f32 %v700_v33, %v1835_v28 }
  0xcb   : > { %462 = vrot.lane.b32.xlu1 %v460_v12, %s1456_s16  ;;  %470 = vrot.lane.b32.xlu0 %v468_v16, %s1457_s2  ;;  %v716_v12 = vstv %s1303_s30  ;;  %s1883_s30 = sld [smem:[#allocation4 + $0x1c]] }
  0xcc   : > { %v717_v36 = vmul.f32 %v716_v12, %v1835_v28 }
  0xcf   : > { %483 = vrot.lane.b32.xlu1 %v481_v17, %s1453_s8  ;;  %360 = vrot.lane.b32.xlu0 %v346_v22, %s1451_s25  ;;  %s1283_s25 = sld [smem:[#allocation4 + $0x1a]]  ;;  %v732_v17 = vstv %s1305_s4  ;;  %s1891_s4 = sld [smem:[#allocation4 + $0x3d]] }
  0xd0   : > { %v733_v39 = vmul.f32 %v732_v17, %v1835_v28  ;;  %v777_v17 = vstv %s1858_s23  ;;  %s1947_s23 = sld [smem:[#allocation4 + $0x49]] }
  0xd3   : > { %491 = vrot.lane.b32.xlu1 %v489_v40, %s1452_s6  ;;  %499 = vrot.lane.b32.xlu0 %v497_v23, %s1454_s10  ;;  %v371_v40 = vmul.f32 %v370_v18, %v1737_v57  ;;  %v366_v23 = vstv %s365_s7  ;;  %s1901_s7 = sld [smem:[#allocation4 + $0x40]] }
  0xd5   : > { %v565_v43 = vstv %s1283_s25  ;;  %s1304_s25 = sld [smem:[#allocation4 + $0x2f]]  ;;  %v372_v41 = vadd.f32 %v371_v40, %v366_v23 }
  0xd6   : > { %v566_v44 = vmul.f32 %v565_v43, %v1793_v30 }
  0xd7   : > { %507 = vrot.lane.b32.xlu1 %v505_v42, %s1455_s12  ;;  %515 = vrot.lane.b32.xlu0 %v513_v25, %s1456_s16 }
  0xdb   : > { %523 = vrot.lane.b32.xlu1 %v521_v31, %s1457_s2  ;;  %536 = vrot.lane.b32.xlu0 %v534_v47, %s1453_s8  ;;  %v724_v16 = vstv %s1304_s25  ;;  %s1889_s25 = sld [smem:[#allocation4 + $0x3e]] }
  0xdc   : > { %v725_v22 = vmul.f32 %v724_v16, %v1835_v28 }
  0xdf   : > { %544 = vrot.lane.b32.xlu1 %v542_v37, %s1452_s6  ;;  %552 = vrot.lane.b32.xlu0 %v550_v51, %s1454_s10  ;;  %v423_v37 = vstv %s1264_s9  ;;  %s1910_s9 = sld [smem:[#allocation4 + $0x43]] }
  0xe0   : > { %v424_v43 = vmul.f32 %v423_v37, %v1758_v1  ;;  %v477_v1 = vmul.f32 %v476_v63, %v1778_v35 }
  0xe3   : > { %560 = vrot.lane.b32.xlu1 %v558_v52, %s1455_s12  ;;  %568 = vrot.lane.b32.xlu0 %v566_v44, %s1456_s16 }
  0xe7   : > { %576 = vrot.lane.b32.xlu1 %v574_v54, %s1457_s2  ;;  %589 = vrot.lane.b32.xlu0 %v587_v55, %s1453_s8 }
  0xeb   : > { %597 = vrot.lane.b32.xlu1 %v595_v59, %s1452_s6  ;;  %605 = vrot.lane.b32.xlu0 %v603_v60, %s1454_s10 }
  0xef   : > { %613 = vrot.lane.b32.xlu1 %v611_v62, %s1455_s12  ;;  %621 = vrot.lane.b32.xlu0 %v619_v0, %s1456_s16 }
  0xf3   : > { %629 = vrot.lane.b32.xlu1 %v627_v15, %s1457_s2  ;;  %642 = vrot.lane.b32.xlu0 %v640_v19, %s1453_s8 }
  0xf7   : > { %650 = vrot.lane.b32.xlu1 %v648_v20, %s1452_s6  ;;  %658 = vrot.lane.b32.xlu0 %v656_v3, %s1454_s10  ;;  %v753_v20 = vstv %s1308_s13  ;;  %v745_v3 = vstv %s1307_s17  ;;  %s1923_s13 = sld [smem:[#allocation4 + $0x45]]  ;;  %s1925_s17 = sld [smem:[#allocation4 + $0x44]] }
  0xfb   : > { %666 = vrot.lane.b32.xlu1 %v664_v13, %s1455_s12  ;;  %674 = vrot.lane.b32.xlu0 %v672_v27, %s1456_s16 }
  0xff   : > { %682 = vrot.lane.b32.xlu1 %v680_v29, %s1457_s2  ;;  %695 = vrot.lane.b32.xlu0 %v693_v10, %s1453_s8  ;;  %v769_v29 = vstv %s1310_s18  ;;  %v761_v10 = vstv %s1309_s19  ;;  %s1929_s18 = sld [smem:[#allocation4 + $0x23]]  ;;  %s1935_s19 = sld [smem:[#allocation4 + $0x48]] }
 0x103   : > { %703 = vrot.lane.b32.xlu1 %v701_v21, %s1452_s6  ;;  %711 = vrot.lane.b32.xlu0 %v709_v34, %s1454_s10  ;;  %v529_v21 = vstv %s1278_s20  ;;  %s1937_s20 = sld [smem:[#allocation4 + $0x47]] }
 0x107   : > { %719 = vrot.lane.b32.xlu1 %v717_v36, %s1455_s12  ;;  %727 = vrot.lane.b32.xlu0 %v725_v22, %s1456_s16  ;;  %v785_v22 = vstv %s1856_s22  ;;  %s1945_s22 = sld [smem:[#allocation4 + $0x4a]] }
 0x10b   : > { %735 = vrot.lane.b32.xlu1 %v733_v39, %s1457_s2  ;;  %v530_v39 = vmul.f32 %v529_v21, %v1793_v30  ;;  %v798_v30 = vstv %s1866_s27  ;;  %v635_v21 = vstv %s1929_s18  ;;  %s1960_s27 = sld [smem:[#allocation4 + $0x4b]]  ;;  %s2019_s18 = sld [smem:[#allocation4 + $0x57]] }
 0x129   : > { %v386_v24 = vpop.permute.xlu1 %385  ;;  %v378_v42 = vpop.permute.xlu0 %377 }
 0x12a   : > { %v380_v25 = vadd.f32 %v378_v42, %v372_v41 }
 0x12c   : > { %v388_v45 = vadd.f32 %v386_v24, %v380_v25 }
 0x12d   : > { %v394_v46 = vpop.permute.xlu1 %393  ;;  %v402_v31 = vpop.permute.xlu0 %401 }
 0x12e   : > { %v396_v47 = vadd.f32 %v394_v46, %v388_v45  ;;  %v806_v45 = vstv %s1864_s26  ;;  %s1958_s26 = sld [smem:[#allocation4 + $0x4c]] }
 0x130   : > { %v404_v32 = vadd.f32 %v402_v31, %v396_v47 }
 0x131   : > { %v410_v48 = vpop.permute.xlu1 %409  ;;  %v418_v51 = vpop.permute.xlu0 %417 }
 0x132   : > { %v412_v38 = vadd.f32 %v410_v48, %v404_v32 }
 0x134   : > { %v420_v52 = vadd.f32 %v418_v51, %v412_v38  ;;  %v822_v51 = vstv %s1874_s28  ;;  %v814_v38 = vstv %s1876_s29  ;;  %s1967_s28 = sld [smem:[#allocation4 + $0x2a]]  ;;  %s1971_s29 = sld [smem:[#allocation4 + $0x4f]] }
 0x135   : > { %v431_v44 = vpop.permute.xlu1 %430  ;;  %v439_v57 = vpop.permute.xlu0 %438 }
 0x136   : > { %v425_v49 = vadd.f32 %v424_v43, %v420_v52 }
 0x138   : > { %v433_v53 = vadd.f32 %v431_v44, %v425_v49 }
 0x139   : > { %v447_v54 = vpop.permute.xlu1 %446  ;;  %v455_v55 = vpop.permute.xlu0 %454 }
 0x13a   : > { %v441_v58 = vadd.f32 %v439_v57, %v433_v53 }
 0x13c   : > { %v449_v56 = vadd.f32 %v447_v54, %v441_v58  ;;  %v582_v54 = vstv %s1883_s30  ;;  %v830_v58 = vstv %s1891_s4  ;;  %s1973_s30 = sld [smem:[#allocation4 + $0x4e]]  ;;  %s1983_s4 = sld [smem:[#allocation4 + $0x50]] }
 0x13d   : > { %v463_v59 = vpop.permute.xlu1 %462  ;;  %v471_v60 = vpop.permute.xlu0 %470 }
 0x13e   : > { %v457_v61 = vadd.f32 %v455_v55, %v449_v56  ;;  %v838_v55 = vstv %s1889_s25  ;;  %s1981_s25 = sld [smem:[#allocation4 + $0x51]] }
 0x140   : > { %v465_v62 = vadd.f32 %v463_v59, %v457_v61  ;;  %v583_v61 = vmul.f32 %v582_v54, %v1807_v50  ;;  %v965_v54 = vstv %s1971_s29  ;;  %s1353_s29 = sld [smem:[#allocation4 + $0x60]] }
 0x141   : > { %v484_v0 = vpop.permute.xlu1 %483  ;;  %v361_v7 = vpop.permute.xlu0 %360 }
 0x142   : > { %v473_v14 = vadd.f32 %v471_v60, %v465_v62  ;;  %364 = vst.msk [vmem:[#allocation2 + $0x13] sm:$0xff] %vm357_vm3, %v361_v7 }
 0x144   : > { %v478_v15 = vadd.f32 %v477_v1, %v473_v14  ;;  %v859_v1 = vstv %s1899_s5  ;;  %v851_v14 = vstv %s1901_s7  ;;  %s1994_s5 = sld [smem:[#allocation4 + $0x53]]  ;;  %s1996_s7 = sld [smem:[#allocation4 + $0x52]] }
 0x145   : > { %v492_v19 = vpop.permute.xlu1 %491  ;;  %v500_v9 = vpop.permute.xlu0 %499 }
 0x146   : > { %v486_v2 = vadd.f32 %v484_v0, %v478_v15 }
 0x148   : > { %v494_v26 = vadd.f32 %v492_v19, %v486_v2 }
 0x149   : > { %v508_v4 = vpop.permute.xlu1 %507  ;;  %v516_v13 = vpop.permute.xlu0 %515  ;;  %v1860_v35 = vld [vmem:[#allocation2 + $0x10] sm:$0xff] }
 0x14a   : > { %v502_v27 = vadd.f32 %v500_v9, %v494_v26  ;;  %v754_v5 = vmul.f32 %v753_v20, %v1860_v35  ;;  %v746_v6 = vmul.f32 %v745_v3, %v1860_v35  ;;  %v770_v16 = vmul.f32 %v769_v29, %v1860_v35  ;;  %v1885_v25 = vld [vmem:[#allocation2 + $0x11] sm:$0xff] }
 0x14b   : > { %v762_v36 = vmul.f32 %v761_v10, %v1860_v35  ;;  %v786_v24 = vmul.f32 %v785_v22, %v1860_v35  ;;  %v778_v42 = vmul.f32 %v777_v17, %v1860_v35  ;;  %v807_v48 = vmul.f32 %v806_v45, %v1885_v25  ;;  %v1919_v7 = vld [vmem:[#allocation2 + $0x12] sm:$0xff] }
 0x14c   : > { %v510_v33 = vadd.f32 %v508_v4, %v502_v27  ;;  %756 = vrot.lane.b32.xlu1 %v754_v5, %s1452_s6  ;;  %748 = vrot.lane.b32.xlu0 %v746_v6, %s1453_s8  ;;  %v799_v37 = vmul.f32 %v798_v30, %v1885_v25  ;;  %v823_v49 = vmul.f32 %v822_v51, %v1885_v25  ;;  %v875_v3 = vstv %s1910_s9  ;;  %v1954_v22 = vld [vmem:[#allocation2 + $0x13] sm:$0xff]  ;;  %s2005_s9 = sld [smem:[#allocation4 + $0x56]] }
 0x14d   : > { %v524_v11 = vpop.permute.xlu1 %523  ;;  %v537_v34 = vpop.permute.xlu0 %536  ;;  %v815_v53 = vmul.f32 %v814_v38, %v1885_v25  ;;  %v839_v62 = vmul.f32 %v838_v55, %v1885_v25  ;;  %v831_v0 = vmul.f32 %v830_v58, %v1885_v25  ;;  %v860_v2 = vmul.f32 %v859_v1, %v1919_v7 }
 0x14e   : > { %v518_v12 = vadd.f32 %v516_v13, %v510_v33  ;;  %v852_v20 = vmul.f32 %v851_v14, %v1919_v7  ;;  %v867_v26 = vstv %s1912_s11  ;;  %v876_v5 = vmul.f32 %v875_v3, %v1919_v7  ;;  %s2007_s11 = sld [smem:[#allocation4 + $0x55]] }
 0x14f   : > { %v868_v6 = vmul.f32 %v867_v26, %v1919_v7  ;;  %v891_v10 = vstv %s1923_s13  ;;  %v883_v33 = vstv %s1925_s17  ;;  %v912_v17 = vstv %s1935_s19  ;;  %s2011_s13 = sld [smem:[#allocation4 + $0x31]]  ;;  %s2017_s17 = sld [smem:[#allocation4 + $0x58]] }
 0x150   : > { %v526_v18 = vadd.f32 %v524_v11, %v518_v12  ;;  %772 = vrot.lane.b32.xlu1 %v770_v16, %s1455_s12  ;;  %764 = vrot.lane.b32.xlu0 %v762_v36, %s1454_s10  ;;  %v892_v16 = vmul.f32 %v891_v10, %v1919_v7  ;;  %v884_v36 = vmul.f32 %v883_v33, %v1919_v7  ;;  %v928_v30 = vstv %s1945_s22  ;;  %s1347_s19 = sld [smem:[#allocation4 + $0x5a]]  ;;  %s1350_s22 = sld [smem:[#allocation4 + $0x5d]] }
 0x151   : > { %v545_v40 = vpop.permute.xlu1 %544  ;;  %v553_v23 = vpop.permute.xlu0 %552  ;;  %v936_v51 = vstv %s1960_s27  ;;  %v957_v55 = vstv %s1973_s30  ;;  %v973_v1 = vstv %s1983_s4  ;;  %s1351_s27 = sld [smem:[#allocation4 + $0x5e]]  ;;  %s2074_s4 = scalar_lea.vmem %s2210_s3, %s1357_s21 }
 0x152   : > { %v531_v41 = vadd.f32 %v530_v39, %v526_v18  ;;  %v904_v39 = vstv %s1937_s20  ;;  %v636_v18 = vmul.f32 %v635_v21, %v1821_v8  ;;  %s1346_s20 = sld [smem:[#allocation4 + $0x59]] }
 0x154   : > { %v539_v46 = vadd.f32 %v537_v34, %v531_v41  ;;  %788 = vrot.lane.b32.xlu1 %v786_v24, %s1457_s2  ;;  %780 = vrot.lane.b32.xlu0 %v778_v42, %s1456_s16  ;;  %v913_v24 = vmul.f32 %v912_v17, %v1954_v22  ;;  %v905_v42 = vmul.f32 %v904_v39, %v1954_v22 }
 0x155   : > { %v561_v31 = vpop.permute.xlu1 %560  ;;  %v569_v47 = vpop.permute.xlu0 %568  ;;  %v741_v33 = vstv %s2011_s13 }
 0x156   : > { %v547_v32 = vadd.f32 %v545_v40, %v539_v46  ;;  %v920_v46 = vstv %s1947_s23  ;;  %s1349_s23 = sld [smem:[#allocation4 + $0x5c]]  ;;  %v742_v39 = vmul.f32 %v741_v33, %v1860_v35  ;;  %v1071_v35 = vstv %s1350_s22 }
 0x158   : > { %v555_v43 = vadd.f32 %v553_v23, %v547_v32  ;;  %809 = vrot.lane.b32.xlu1 %v807_v48, %s1452_s6  ;;  %801 = vrot.lane.b32.xlu0 %v799_v37, %s1453_s8  ;;  %v921_v32 = vmul.f32 %v920_v46, %v1954_v22  ;;  %v944_v37 = vstv %s1958_s26  ;;  %s1352_s26 = sld [smem:[#allocation4 + $0x5f]] }
 0x159   : > { %v577_v52 = vpop.permute.xlu1 %576  ;;  %v590_v44 = vpop.permute.xlu0 %589 }
 0x15a   : > { %v563_v57 = vadd.f32 %v561_v31, %v555_v43 }
 0x15c   : > { %v571_v56 = vadd.f32 %v569_v47, %v563_v57  ;;  %825 = vrot.lane.b32.xlu1 %v823_v49, %s1455_s12  ;;  %817 = vrot.lane.b32.xlu0 %v815_v53, %s1454_s10  ;;  %v929_v47 = vmul.f32 %v928_v30, %v1954_v22  ;;  %v937_v57 = vmul.f32 %v936_v51, %v1954_v22  ;;  %v688_v49 = vstv %s1967_s28  ;;  %v1990_v53 = vld [vmem:[#allocation2 + $0x14] sm:$0xff]  ;;  %s1354_s28 = sld [smem:[#allocation4 + $0x61]] }
 0x15d   : > { %v598_v59 = vpop.permute.xlu1 %597  ;;  %v606_v60 = vpop.permute.xlu0 %605  ;;  %v2045_v30 = vld [vmem:[#allocation2 + $0x16] sm:$0xff]  ;;  %v1063_v46 = vstv %s1349_s23 }
 0x15e   : > { %v579_v63 = vadd.f32 %v577_v52, %v571_v56 }
 0x160   : > { %v584_v15 = vadd.f32 %v583_v61, %v579_v63  ;;  %841 = vrot.lane.b32.xlu1 %v839_v62, %s1457_s2  ;;  %833 = vrot.lane.b32.xlu0 %v831_v0, %s1456_s16  ;;  %v966_v61 = vmul.f32 %v965_v54, %v1990_v53  ;;  %v958_v63 = vmul.f32 %v957_v55, %v1990_v53  ;;  %v981_v0 = vstv %s1981_s25 }
 0x161   : > { %v614_v50 = vpop.permute.xlu1 %613  ;;  %v622_v19 = vpop.permute.xlu0 %621 }
 0x162   : > { %v592_v9 = vadd.f32 %v590_v44, %v584_v15  ;;  %v945_v44 = vmul.f32 %v944_v37, %v1954_v22  ;;  %v982_v15 = vmul.f32 %v981_v0, %v1990_v53  ;;  %v1103_v51 = vstv %s1354_s28 }
 0x164   : > { %v600_v4 = vadd.f32 %v598_v59, %v592_v9  ;;  %862 = vrot.lane.b32.xlu1 %v860_v2, %s1452_s6  ;;  %854 = vrot.lane.b32.xlu0 %v852_v20, %s1453_s8  ;;  %v997_v9 = vstv %s1994_s5  ;;  %v989_v2 = vstv %s1996_s7 }
 0x165   : > { %v630_v13 = vpop.permute.xlu1 %629  ;;  %v643_v29 = vpop.permute.xlu0 %642 }
 0x166   : > { %v608_v27 = vadd.f32 %v606_v60, %v600_v4  ;;  %v689_v60 = vmul.f32 %v688_v49, %v1835_v28  ;;  %v998_v4 = vmul.f32 %v997_v9, %v1990_v53 }
 0x168   : > { %v616_v11 = vadd.f32 %v614_v50, %v608_v27  ;;  %878 = vrot.lane.b32.xlu1 %v876_v5, %s1455_s12  ;;  %870 = vrot.lane.b32.xlu0 %v868_v6, %s1454_s10  ;;  %v974_v50 = vmul.f32 %v973_v1, %v1990_v53  ;;  %v2025_v27 = vld [vmem:[#allocation2 + $0x15] sm:$0xff]  ;;  %v1018_v5 = vstv %s2005_s9  ;;  %v1010_v6 = vstv %s2007_s11 }
 0x169   : > { %v651_v34 = vpop.permute.xlu1 %650  ;;  %v659_v23 = vpop.permute.xlu0 %658  ;;  %v1019_v21 = vmul.f32 %v1018_v5, %v2025_v27 }
 0x16a   : > { %v624_v12 = vadd.f32 %v622_v19, %v616_v11 }
 0x16c   : > { %v632_v40 = vadd.f32 %v630_v13, %v624_v12  ;;  %894 = vrot.lane.b32.xlu1 %v892_v16, %s1457_s2  ;;  %886 = vrot.lane.b32.xlu0 %v884_v36, %s1456_s16  ;;  %v990_v13 = vmul.f32 %v989_v2, %v1990_v53  ;;  %v1034_v16 = vstv %s2017_s17  ;;  %v1026_v36 = vstv %s2019_s18 }
 0x16d   : > { %v667_v45 = vpop.permute.xlu1 %666  ;;  %v675_v48 = vpop.permute.xlu0 %674 }
 0x16e   : > { %v637_v41 = vadd.f32 %v636_v18, %v632_v40  ;;  %v1035_v18 = vmul.f32 %v1034_v16, %v2025_v27  ;;  %v1027_v40 = vmul.f32 %v1026_v36, %v2025_v27 }
 0x170   : > { %v645_v8 = vadd.f32 %v643_v29, %v637_v41  ;;  %915 = vrot.lane.b32.xlu1 %v913_v24, %s1452_s6  ;;  %907 = vrot.lane.b32.xlu0 %v905_v42, %s1453_s8  ;;  %v1050_v41 = vstv %s1347_s19  ;;  %v1042_v24 = vstv %s1346_s20 }
 0x171   : > { %v683_v43 = vpop.permute.xlu1 %682  ;;  %v696_v56 = vpop.permute.xlu0 %695  ;;  %v1051_v42 = vmul.f32 %v1050_v41, %v2025_v27 }
 0x172   : > { %v653_v31 = vadd.f32 %v651_v34, %v645_v8  ;;  %v1011_v34 = vmul.f32 %v1010_v6, %v2025_v27  ;;  %v1072_v8 = vmul.f32 %v1071_v35, %v2045_v30 }
 0x174   : > { %v661_v38 = vadd.f32 %v659_v23, %v653_v31  ;;  %931 = vrot.lane.b32.xlu1 %v929_v47, %s1455_s12  ;;  %923 = vrot.lane.b32.xlu0 %v921_v32, %s1454_s10  ;;  %v1064_v31 = vmul.f32 %v1063_v46, %v2045_v30  ;;  %v1087_v47 = vstv %s1352_s26  ;;  %v1079_v32 = vstv %s1351_s27 }
 0x175   : > { %v704_v62 = vpop.permute.xlu1 %703  ;;  %v712_v19 = vpop.permute.xlu0 %711  ;;  %v1080_v37 = vmul.f32 %v1079_v32, %v2045_v30 }
 0x176   : > { %v669_v52 = vadd.f32 %v667_v45, %v661_v38  ;;  %v1043_v45 = vmul.f32 %v1042_v24, %v2025_v27  ;;  %v1095_v38 = vstv %s1353_s29 }
 0x178   : > { %v677_v58 = vadd.f32 %v675_v48, %v669_v52  ;;  %947 = vrot.lane.b32.xlu1 %v945_v44, %s1457_s2  ;;  %939 = vrot.lane.b32.xlu0 %v937_v57, %s1456_s16  ;;  %v1088_v48 = vmul.f32 %v1087_v47, %v2045_v30  ;;  %v1096_v52 = vmul.f32 %v1095_v38, %v2045_v30 }
 0x179   : > { %v720_v3 = vpop.permute.xlu1 %719  ;;  %v728_v10 = vpop.permute.xlu0 %727 }
 0x17a   : > { %v685_v59 = vadd.f32 %v683_v43, %v677_v58  ;;  %v1104_v43 = vmul.f32 %v1103_v51, %v2045_v30 }
 0x17c   : > { %v690_v14 = vadd.f32 %v689_v60, %v685_v59  ;;  %968 = vrot.lane.b32.xlu1 %v966_v61, %s1452_s6  ;;  %960 = vrot.lane.b32.xlu0 %v958_v63, %s1453_s8 }
 0x17d   : > { %v736_v12 = vpop.permute.xlu1 %735 }
 0x17e   : > { %v698_v28 = vadd.f32 %v696_v56, %v690_v14 }
 0x180   : > { %v706_v20 = vadd.f32 %v704_v62, %v698_v28  ;;  %984 = vrot.lane.b32.xlu1 %v982_v15, %s1455_s12  ;;  %976 = vrot.lane.b32.xlu0 %v974_v50, %s1454_s10 }
 0x182   : > { %v714_v26 = vadd.f32 %v712_v19, %v706_v20 }
 0x184   : > { %v722_v29 = vadd.f32 %v720_v3, %v714_v26  ;;  %1000 = vrot.lane.b32.xlu1 %v998_v4, %s1457_s2  ;;  %992 = vrot.lane.b32.xlu0 %v990_v13, %s1456_s16 }
 0x186   : > { %v730_v11 = vadd.f32 %v728_v10, %v722_v29 }
 0x188   : > { %v738_v17 = vadd.f32 %v736_v12, %v730_v11  ;;  %1021 = vrot.lane.b32.xlu1 %v1019_v21, %s1452_s6  ;;  %1013 = vrot.lane.b32.xlu0 %v1011_v34, %s1453_s8 }
 0x18a   : > { %v743_v23 = vadd.f32 %v742_v39, %v738_v17 }
 0x18c   : > { %1037 = vrot.lane.b32.xlu1 %v1035_v18, %s1455_s12  ;;  %1029 = vrot.lane.b32.xlu0 %v1027_v40, %s1454_s10 }
 0x190   : > { %1053 = vrot.lane.b32.xlu1 %v1051_v42, %s1457_s2  ;;  %1045 = vrot.lane.b32.xlu0 %v1043_v45, %s1456_s16 }
 0x194   : > { %1074 = vrot.lane.b32.xlu1 %v1072_v8, %s1452_s6  ;;  %1066 = vrot.lane.b32.xlu0 %v1064_v31, %s1453_s8  ;;  %s1313_s6 = sld [smem:[#allocation4 + $0x38]]  ;;  %s1320_s8 = sld [smem:[#allocation4 + $0x3f]] }
 0x198   : > { %1090 = vrot.lane.b32.xlu1 %v1088_v48, %s1455_s12  ;;  %1082 = vrot.lane.b32.xlu0 %v1080_v37, %s1454_s10  ;;  %s1327_s10 = sld [smem:[#allocation4 + $0x46]]  ;;  %s1334_s12 = sld [smem:[#allocation4 + $0x4d]] }
 0x19a   : > { %v794_v63 = vstv %s1313_s6  ;;  %v847_v13 = vstv %s1320_s8 }
 0x19b   : > { %v795_v1 = vmul.f32 %v794_v63, %v1885_v25  ;;  %v848_v33 = vmul.f32 %v847_v13, %v1919_v7 }
 0x19c   : > { %1106 = vrot.lane.b32.xlu1 %v1104_v43, %s1457_s2  ;;  %1098 = vrot.lane.b32.xlu0 %v1096_v52, %s1456_s16  ;;  %s1341_s16 = sld [smem:[#allocation4 + $0x54]]  ;;  %s1348_s2 = sld [smem:[#allocation4 + $0x5b]] }
 0x19e   : > { %v900_v40 = vstv %s1327_s10  ;;  %v953_v38 = vstv %s1334_s12 }
 0x19f   : > { %v901_v42 = vmul.f32 %v900_v40, %v1954_v22 }
 0x1be   : > { %v757_v44 = vpop.permute.xlu1 %756  ;;  %v749_v57 = vpop.permute.xlu0 %748 }
 0x1bf   : > { %v751_v49 = vadd.f32 %v749_v57, %v743_v23 }
 0x1c1   : > { %v759_v54 = vadd.f32 %v757_v44, %v751_v49  ;;  %v954_v49 = vmul.f32 %v953_v38, %v1990_v53  ;;  %v1397_v38 = vld [vmem:[%s1519_s24 + $0x38] sm:$0xff] }
 0x1c2   : > { %v773_v55 = vpop.permute.xlu1 %772  ;;  %v765_v58 = vpop.permute.xlu0 %764 }
 0x1c3   : > { %v767_v56 = vadd.f32 %v765_v58, %v759_v54 }
 0x1c5   : > { %v775_v59 = vadd.f32 %v773_v55, %v767_v56 }
 0x1c6   : > { %v789_v60 = vpop.permute.xlu1 %788  ;;  %v781_v61 = vpop.permute.xlu0 %780 }
 0x1c7   : > { %v783_v62 = vadd.f32 %v781_v61, %v775_v59 }
 0x1c9   : > { %v791_v0 = vadd.f32 %v789_v60, %v783_v62  ;;  %v1006_v62 = vstv %s1341_s16 }
 0x1ca   : > { %v810_v14 = vpop.permute.xlu1 %809  ;;  %v802_v28 = vpop.permute.xlu0 %801 }
 0x1cb   : > { %v796_v15 = vadd.f32 %v795_v1, %v791_v0 }
 0x1cd   : > { %v804_v50 = vadd.f32 %v802_v28, %v796_v15 }
 0x1ce   : > { %v826_v19 = vpop.permute.xlu1 %825  ;;  %v818_v9 = vpop.permute.xlu0 %817 }
 0x1cf   : > { %v812_v2 = vadd.f32 %v810_v14, %v804_v50  ;;  %v1007_v14 = vmul.f32 %v1006_v62, %v2025_v27 }
 0x1d1   : > { %v820_v20 = vadd.f32 %v818_v9, %v812_v2 }
 0x1d2   : > { %v842_v3 = vpop.permute.xlu1 %841  ;;  %v834_v26 = vpop.permute.xlu0 %833 }
 0x1d3   : > { %v828_v4 = vadd.f32 %v826_v19, %v820_v20 }
 0x1d5   : > { %v836_v5 = vadd.f32 %v834_v26, %v828_v4  ;;  %v1059_v26 = vstv %s1348_s2 }
 0x1d6   : > { %v863_v6 = vpop.permute.xlu1 %862  ;;  %v855_v29 = vpop.permute.xlu0 %854 }
 0x1d7   : > { %v844_v10 = vadd.f32 %v842_v3, %v836_v5 }
 0x1d9   : > { %v849_v25 = vadd.f32 %v848_v33, %v844_v10 }
 0x1da   : > { %v879_v11 = vpop.permute.xlu1 %878  ;;  %v871_v21 = vpop.permute.xlu0 %870 }
 0x1db   : > { %v857_v34 = vadd.f32 %v855_v29, %v849_v25 }
 0x1dd   : > { %v865_v12 = vadd.f32 %v863_v6, %v857_v34  ;;  %v1060_v6 = vmul.f32 %v1059_v26, %v2045_v30  ;;  %v1411_v26 = vld [vmem:[%s1519_s24 + $0xa8] sm:$0xff] }
 0x1de   : > { %v895_v16 = vpop.permute.xlu1 %894  ;;  %v887_v36 = vpop.permute.xlu0 %886 }
 0x1df   : > { %v873_v17 = vadd.f32 %v871_v21, %v865_v12 }
 0x1e1   : > { %v881_v39 = vadd.f32 %v879_v11, %v873_v17 }
 0x1e2   : > { %v916_v18 = vpop.permute.xlu1 %915  ;;  %v908_v23 = vpop.permute.xlu0 %907 }
 0x1e3   : > { %v889_v41 = vadd.f32 %v887_v36, %v881_v39 }
 0x1e5   : > { %v897_v24 = vadd.f32 %v895_v16, %v889_v41  ;;  %v1390_v41 = vld [vmem:[%s1519_s24] sm:$0xff] }
 0x1e6   : > { %v932_v45 = vpop.permute.xlu1 %931  ;;  %v924_v35 = vpop.permute.xlu0 %923 }
 0x1e7   : > { %v902_v7 = vadd.f32 %v901_v42, %v897_v24  ;;  %v1391_v42 = vld [vmem:[%s1519_s24 + $0x8] sm:$0xff] }
 0x1e9   : > { %v910_v46 = vadd.f32 %v908_v23, %v902_v7 }
 0x1ea   : > { %v948_v8 = vpop.permute.xlu1 %947  ;;  %v940_v31 = vpop.permute.xlu0 %939 }
 0x1eb   : > { %v918_v47 = vadd.f32 %v916_v18, %v910_v46  ;;  %v1393_v46 = vld [vmem:[%s1519_s24 + $0x18] sm:$0xff] }
 0x1ed   : > { %v926_v32 = vadd.f32 %v924_v35, %v918_v47  ;;  %v1392_v35 = vld [vmem:[%s1519_s24 + $0x10] sm:$0xff] }
 0x1ee   : > { %v969_v48 = vpop.permute.xlu1 %968  ;;  %v961_v37 = vpop.permute.xlu0 %960 }
 0x1ef   : > { %v934_v51 = vadd.f32 %v932_v45, %v926_v32  ;;  %v1395_v32 = vld [vmem:[%s1519_s24 + $0x28] sm:$0xff] }
 0x1f1   : > { %v942_v43 = vadd.f32 %v940_v31, %v934_v51  ;;  %v1394_v31 = vld [vmem:[%s1519_s24 + $0x20] sm:$0xff] }
 0x1f2   : > { %v985_v52 = vpop.permute.xlu1 %984  ;;  %v977_v44 = vpop.permute.xlu0 %976 }
 0x1f3   : > { %v950_v57 = vadd.f32 %v948_v8, %v942_v43 }
 0x1f5   : > { %v955_v22 = vadd.f32 %v954_v49, %v950_v57  ;;  %v1399_v57 = vld [vmem:[%s1519_s24 + $0x48] sm:$0xff] }
 0x1f6   : > { %v993_v54 = vpop.permute.xlu0 %992  ;;  %v1001_v58 = vpop.permute.xlu1 %1000 }
 0x1f7   : > { %v963_v55 = vadd.f32 %v961_v37, %v955_v22  ;;  %v1396_v37 = vld [vmem:[%s1519_s24 + $0x30] sm:$0xff] }
 0x1f8   : > { %v1400_v22 = vld [vmem:[%s1519_s24 + $0x50] sm:$0xff] }
 0x1f9   : > { %v971_v56 = vadd.f32 %v969_v48, %v963_v55  ;;  %v1401_v55 = vld [vmem:[%s1519_s24 + $0x58] sm:$0xff] }
 0x1fa   : > { %v1014_v60 = vpop.permute.xlu0 %1013  ;;  %v1022_v63 = vpop.permute.xlu1 %1021 }
 0x1fb   : > { %v979_v59 = vadd.f32 %v977_v44, %v971_v56  ;;  %v1402_v56 = vld [vmem:[%s1519_s24 + $0x60] sm:$0xff] }
 0x1fd   : > { %v987_v61 = vadd.f32 %v985_v52, %v979_v59  ;;  %v1398_v52 = vld [vmem:[%s1519_s24 + $0x40] sm:$0xff] }
 0x1fe   : > { %v1030_v28 = vpop.permute.xlu0 %1029  ;;  %v1038_v50 = vpop.permute.xlu1 %1037 }
 0x1ff   : > { %v995_v0 = vadd.f32 %v993_v54, %v987_v61 }
 0x201   : > { %v1003_v1 = vadd.f32 %v1001_v58, %v995_v0  ;;  %v1405_v0 = vld [vmem:[%s1519_s24 + $0x78] sm:$0xff] }
 0x202   : > { %v1046_v9 = vpop.permute.xlu0 %1045  ;;  %v1054_v20 = vpop.permute.xlu1 %1053 }
 0x203   : > { %v1008_v15 = vadd.f32 %v1007_v14, %v1003_v1  ;;  %v1406_v14 = vld [vmem:[%s1519_s24 + $0x80] sm:$0xff] }
 0x205   : > { %v1016_v53 = vadd.f32 %v1014_v60, %v1008_v15  ;;  %v1403_v60 = vld [vmem:[%s1519_s24 + $0x68] sm:$0xff] }
 0x206   : > { %v1067_v13 = vpop.permute.xlu0 %1066  ;;  %v1075_v29 = vpop.permute.xlu1 %1074  ;;  %v1407_v15 = vld [vmem:[%s1519_s24 + $0x88] sm:$0xff] }
 0x207   : > { %v1024_v19 = vadd.f32 %v1022_v63, %v1016_v53  ;;  %v1404_v63 = vld [vmem:[%s1519_s24 + $0x70] sm:$0xff] }
 0x208   : > { %v1408_v53 = vld [vmem:[%s1519_s24 + $0x90] sm:$0xff] }
 0x209   : > { %v1032_v2 = vadd.f32 %v1030_v28, %v1024_v19 }
 0x20a   : > { %v1083_v27 = vpop.permute.xlu0 %1082  ;;  %v1091_v11 = vpop.permute.xlu1 %1090 }
 0x20b   : > { %v1040_v3 = vadd.f32 %v1038_v50, %v1032_v2 }
 0x20d   : > { %v1048_v4 = vadd.f32 %v1046_v9, %v1040_v3  ;;  %v1409_v9 = vld [vmem:[%s1519_s24 + $0x98] sm:$0xff] }
 0x20e   : > { %v1099_v12 = vpop.permute.xlu0 %1098  ;;  %v1107_v36 = vpop.permute.xlu1 %1106 }
 0x20f   : > { %v1056_v5 = vadd.f32 %v1054_v20, %v1048_v4  ;;  %v1410_v20 = vld [vmem:[%s1519_s24 + $0xa0] sm:$0xff] }
 0x211   : > { %v1061_v10 = vadd.f32 %v1060_v6, %v1056_v5  ;;  %v1413_v6 = vld [vmem:[%s1519_s24 + $0xb8] sm:$0xff] }
 0x213   : > { %v1069_v33 = vadd.f32 %v1067_v13, %v1061_v10  ;;  %v1412_v13 = vld [vmem:[%s1519_s24 + $0xb0] sm:$0xff]  ;;  %v1414_v10 = vld [vmem:[%s1519_s24 + $0xc0] sm:$0xff] }
 0x215   : > { %v1077_v25 = vadd.f32 %v1075_v29, %v1069_v33 }
 0x217   : > { %v1085_v21 = vadd.f32 %v1083_v27, %v1077_v25  ;;  %v1415_v27 = vld [vmem:[%s1519_s24 + $0xc8] sm:$0xff] }
 0x219   : > { %v1093_v34 = vadd.f32 %v1091_v11, %v1085_v21  ;;  %v1416_v11 = vld [vmem:[%s1519_s24 + $0xd0] sm:$0xff] }
 0x21b   : > { %v1101_v16 = vadd.f32 %v1099_v12, %v1093_v34  ;;  %v1417_v34 = vld [vmem:[%s1519_s24 + $0xd8] sm:$0xff] }
 0x21d   : > { %v1109_v17 = vadd.f32 %v1107_v36, %v1101_v16  ;;  %v1418_v16 = vld [vmem:[%s1519_s24 + $0xe0] sm:$0xff] }
 0x21f   : > { %v1110_v39 = vsub.f32 0.0, %v1109_v17  ;;  %v1419_v17 = vld [vmem:[%s1519_s24 + $0xe8] sm:$0xff] }
 0x221   : > { %v1111_v30 = vmul.f32 1.442695, %v1110_v39 }
 0x223   : > { %1386 = vpow2.f32 %v1111_v30  ;;  %v1420_v30 = vld [vmem:[%s1519_s24 + $0xf0] sm:$0xff] }
 0x22d   : > { %v1387_v18 = vpop.eup %1386 }
 0x22e   : > { %v1113_v40 = vadd.f32 1.0, %v1387_v18 }
 0x230   : > { %1388 = vrcp.f32 %v1113_v40  ;;  %v1421_v40 = vld [vmem:[%s1519_s24 + $0xf8] sm:$0xff] }
 0x23a   : > { %v2067_v23 = vpop.eup %1388 }
 0x23b   : > { %v1116_v24 = vmul.f32 %v1390_v41, %v2067_v23  ;;  %v1117_v45 = vmul.f32 %v1391_v42, %v2067_v23  ;;  %v1118_v7 = vmul.f32 %v1392_v35, %v2067_v23  ;;  %v1119_v8 = vmul.f32 %v1393_v46, %v2067_v23 }
 0x23c   : > { %v1120_v47 = vmul.f32 %v1394_v31, %v2067_v23  ;;  %v1121_v48 = vmul.f32 %v1395_v32, %v2067_v23  ;;  %v1122_v51 = vmul.f32 %v1396_v37, %v2067_v23  ;;  %v1123_v43 = vmul.f32 %v1397_v38, %v2067_v23 }
 0x23d   : > { %v1124_v44 = vmul.f32 %v1398_v52, %v2067_v23  ;;  %v1125_v49 = vmul.f32 %v1399_v57, %v2067_v23  ;;  %v1126_v54 = vmul.f32 %v1400_v22, %v2067_v23  ;;  %v1127_v58 = vmul.f32 %v1401_v55, %v2067_v23  ;;  %1148 = vst.msk [vmem:[%s2074_s4] sm:$0xff] %vm218_vm2, %v1116_v24 }
 0x23e   : > { %1149 = vst.msk [vmem:[%s2074_s4 + $0x8] sm:$0xff] %vm218_vm2, %v1117_v45  ;;  %1150 = vst.msk [vmem:[%s2074_s4 + $0x10] sm:$0xff] %vm218_vm2, %v1118_v7  ;;  %v1128_v59 = vmul.f32 %v1402_v56, %v2067_v23  ;;  %v1129_v61 = vmul.f32 %v1403_v60, %v2067_v23  ;;  %v1130_v62 = vmul.f32 %v1404_v63, %v2067_v23 }
 0x23f   : > { %1151 = vst.msk [vmem:[%s2074_s4 + $0x18] sm:$0xff] %vm218_vm2, %v1119_v8  ;;  %v1131_v1 = vmul.f32 %v1405_v0, %v2067_v23  ;;  %1152 = vst.msk [vmem:[%s2074_s4 + $0x20] sm:$0xff] %vm218_vm2, %v1120_v47  ;;  %v1132_v28 = vmul.f32 %v1406_v14, %v2067_v23  ;;  %v1133_v50 = vmul.f32 %v1407_v15, %v2067_v23 }
 0x240   : > { %1153 = vst.msk [vmem:[%s2074_s4 + $0x28] sm:$0xff] %vm218_vm2, %v1121_v48  ;;  %1154 = vst.msk [vmem:[%s2074_s4 + $0x30] sm:$0xff] %vm218_vm2, %v1122_v51  ;;  %v1134_v19 = vmul.f32 %v1408_v53, %v2067_v23  ;;  %v1135_v2 = vmul.f32 %v1409_v9, %v2067_v23  ;;  %v1136_v3 = vmul.f32 %v1410_v20, %v2067_v23 }
 0x241   : > { %1155 = vst.msk [vmem:[%s2074_s4 + $0x38] sm:$0xff] %vm218_vm2, %v1123_v43  ;;  %1156 = vst.msk [vmem:[%s2074_s4 + $0x40] sm:$0xff] %vm218_vm2, %v1124_v44  ;;  %v1137_v4 = vmul.f32 %v1411_v26, %v2067_v23  ;;  %v1138_v5 = vmul.f32 %v1412_v13, %v2067_v23  ;;  %v1139_v29 = vmul.f32 %v1413_v6, %v2067_v23 }
 0x242   : > { %1157 = vst.msk [vmem:[%s2074_s4 + $0x48] sm:$0xff] %vm218_vm2, %v1125_v49  ;;  %1158 = vst.msk [vmem:[%s2074_s4 + $0x50] sm:$0xff] %vm218_vm2, %v1126_v54  ;;  %v1140_v33 = vmul.f32 %v1414_v10, %v2067_v23  ;;  %v1141_v25 = vmul.f32 %v1415_v27, %v2067_v23  ;;  %v1142_v21 = vmul.f32 %v1416_v11, %v2067_v23 }
 0x243   : > { %1159 = vst.msk [vmem:[%s2074_s4 + $0x58] sm:$0xff] %vm218_vm2, %v1127_v58  ;;  %1160 = vst.msk [vmem:[%s2074_s4 + $0x60] sm:$0xff] %vm218_vm2, %v1128_v59  ;;  %v1143_v12 = vmul.f32 %v1417_v34, %v2067_v23  ;;  %v1144_v36 = vmul.f32 %v1418_v16, %v2067_v23  ;;  %v1145_v39 = vmul.f32 %v1419_v17, %v2067_v23 }
 0x244   : > { %1161 = vst.msk [vmem:[%s2074_s4 + $0x68] sm:$0xff] %vm218_vm2, %v1129_v61  ;;  %1162 = vst.msk [vmem:[%s2074_s4 + $0x70] sm:$0xff] %vm218_vm2, %v1130_v62  ;;  %v1146_v18 = vmul.f32 %v1420_v30, %v2067_v23  ;;  %v1147_v41 = vmul.f32 %v1421_v40, %v2067_v23 }
 0x245   : > { %1163 = vst.msk [vmem:[%s2074_s4 + $0x78] sm:$0xff] %vm218_vm2, %v1131_v1  ;;  %1164 = vst.msk [vmem:[%s2074_s4 + $0x80] sm:$0xff] %vm218_vm2, %v1132_v28 }
 0x246   : > { %1165 = vst.msk [vmem:[%s2074_s4 + $0x88] sm:$0xff] %vm218_vm2, %v1133_v50  ;;  %1166 = vst.msk [vmem:[%s2074_s4 + $0x90] sm:$0xff] %vm218_vm2, %v1134_v19 }
 0x247   : > { %1167 = vst.msk [vmem:[%s2074_s4 + $0x98] sm:$0xff] %vm218_vm2, %v1135_v2  ;;  %1168 = vst.msk [vmem:[%s2074_s4 + $0xa0] sm:$0xff] %vm218_vm2, %v1136_v3 }
 0x248   : > { %1169 = vst.msk [vmem:[%s2074_s4 + $0xa8] sm:$0xff] %vm218_vm2, %v1137_v4  ;;  %1170 = vst.msk [vmem:[%s2074_s4 + $0xb0] sm:$0xff] %vm218_vm2, %v1138_v5 }
 0x249   : > { %1171 = vst.msk [vmem:[%s2074_s4 + $0xb8] sm:$0xff] %vm218_vm2, %v1139_v29  ;;  %1172 = vst.msk [vmem:[%s2074_s4 + $0xc0] sm:$0xff] %vm218_vm2, %v1140_v33 }
 0x24a   : > { %1173 = vst.msk [vmem:[%s2074_s4 + $0xc8] sm:$0xff] %vm218_vm2, %v1141_v25  ;;  %1174 = vst.msk [vmem:[%s2074_s4 + $0xd0] sm:$0xff] %vm218_vm2, %v1142_v21 }
 0x24b   : > { %1175 = vst.msk [vmem:[%s2074_s4 + $0xd8] sm:$0xff] %vm218_vm2, %v1143_v12  ;;  %1176 = vst.msk [vmem:[%s2074_s4 + $0xe0] sm:$0xff] %vm218_vm2, %v1144_v36 }
 0x24c   : > { %1177 = vst.msk [vmem:[%s2074_s4 + $0xe8] sm:$0xff] %vm218_vm2, %v1145_v39  ;;  %1178 = vst.msk [vmem:[%s2074_s4 + $0xf0] sm:$0xff] %vm218_vm2, %v1146_v18 }
 0x24d   : > { %1179 = vst.msk [vmem:[%s2074_s4 + $0xf8] sm:$0xff] %vm218_vm2, %v1147_v41 }
 0x24e PF: > { %s15_s14 = sadd.s32 1, %s1447_s14  }
 0x24f   : > { %p12_p1 = scmp.ge.s32.totalorder %s15_s14, 4  }
 0x251   :  { %14 = sbr.rel (!%p12_p1) target bundleno = 3 (0x3), region = 68 }
 0x258   :  { %1201 = vsyncpa [#allocation5], 1 }
 0x259   :  { %1203 = vsyncpa [#allocation5 + $0x1], 1 }

// kernel: arm_mixer_forward.9
= control target key start
LH: loop header
LB: loop body
LE: loop exit
PB: predicated region body
PF: predicated region fallthrough
CT: control target
= control target key end

     0   :  { %vm47_vm0 = vcmask 261120   ;;  %vm1389_vm1 = vcmask 785408   ;;  %s4944_s1 = inlined_call_operand.vmem [shape: f32[32,96], index: 1, kind: input, shape index: {}]   ;;  %s4945_s0 = inlined_call_operand.vmem [shape: f32[128,32], index: 0, kind: input, shape index: {}]   ;;  %s4946_s3 = inlined_call_operand.vmem [shape: f32[96,32], index: 3, kind: input, shape index: {}]   ;;  %s4947_s2 = inlined_call_operand.vmem [shape: f32[1,96], index: 2, kind: input, shape index: {}]   ;;  %s4948_s4 = inlined_call_operand.vmem [shape: f32[1,32], index: 4, kind: input, shape index: {}]   ;;  %s4949_s5 = inlined_call_operand.vmem [shape: f32[128,32], index: 5, kind: output, shape index: {}]  }
   0x1   :  { %v36_v0 = vld [vmem:[%s4944_s1] sm:$0xff]  ;;  %v37_v1 = vld [vmem:[%s4944_s1 + $0x8] sm:$0xff]  ;;  %v3929_v2 = vld [vmem:[%s4944_s1 + $0x10] sm:$0xff] }
   0x2   :  { %v97_v3 = vand.u32 4294901760, %v36_v0  ;;  %v100_v4 = vand.u32 4294901760, %v37_v1  ;;  %v3934_v5 = vld [vmem:[%s4944_s1 + $0x18] sm:$0xff]  ;;  %v103_v6 = vand.u32 4294901760, %v3929_v2  ;;  %v20_v7 = vld [vmem:[%s4945_s0] sm:$0xff]  ;;  %v21_v8 = vld [vmem:[%s4945_s0 + $0x8] sm:$0xff] }
   0x3   :  { %v106_v9 = vand.u32 4294901760, %v3934_v5  ;;  %v49_v10 = vsel %vm47_vm0, %v20_v7, 0  ;;  %v52_v11 = vsel %vm47_vm0, %v21_v8, 0  ;;  %v22_v12 = vld [vmem:[%s4945_s0 + $0x10] sm:$0xff]  ;;  %v23_v13 = vld [vmem:[%s4945_s0 + $0x18] sm:$0xff]  ;;  %v24_v18 = vld [vmem:[%s4945_s0 + $0x20] sm:$0xff] }
   0x4   :  { %v3952_v14 = vpack.c.bf16 %v100_v4, %v97_v3  ;;  %v3954_v15 = vand.u32 4294901760, %v49_v10  ;;  %v3956_v16 = vand.u32 4294901760, %v52_v11  ;;  %v3958_v17 = vsub.f32 %v36_v0, %v97_v3  ;;  %v25_v19 = vld [vmem:[%s4945_s0 + $0x28] sm:$0xff]  ;;  %v26_v40 = vld [vmem:[%s4945_s0 + $0x30] sm:$0xff]  ;;  %v27_v49 = vld [vmem:[%s4945_s0 + $0x38] sm:$0xff] }
   0x5   :  { %v3970_v20 = vpack.c.bf16 %v106_v9, %v103_v6  ;;  %v3972_v21 = vsub.f32 %v37_v1, %v100_v4  ;;  %v55_v22 = vsel %vm47_vm0, %v22_v12, 0  ;;  %v58_v23 = vsel %vm47_vm0, %v23_v13, 0  ;;  %v28_v50 = vld [vmem:[%s4945_s0 + $0x40] sm:$0xff]  ;;  %v29_v59 = vld [vmem:[%s4945_s0 + $0x48] sm:$0xff]  ;;  %v30_v12 = vld [vmem:[%s4945_s0 + $0x50] sm:$0xff] }
   0x6   :  { %3463 = vmatprep.subr.bf16.mxu0 %v3952_v14  ;;  %v3978_v24 = vsub.f32 %v49_v10, %v3954_v15  ;;  %v3981_v25 = vsub.f32 %v52_v11, %v3956_v16  ;;  %v328_v26 = vand.u32 4294901760, %v3958_v17  ;;  %v3984_v27 = vand.u32 4294901760, %v55_v22  ;;  %v31_v13 = vld [vmem:[%s4945_s0 + $0x58] sm:$0xff] }
   0x7   :  { %3465 = vmatpush3.bf16.msra.mxu0 %v3952_v14  ;;  %v335_v28 = vand.u32 4294901760, %v3972_v21  ;;  %v3988_v29 = vand.u32 4294901760, %v58_v23  ;;  %v61_v30 = vsel %vm47_vm0, %v24_v18, 0  ;;  %v64_v31 = vsel %vm47_vm0, %v25_v19, 0 }
   0x8   :  { %3467 = vmatprep.subr.bf16.mxu0 %v3970_v20  ;;  %v167_v32 = vand.u32 4294901760, %v3978_v24  ;;  %v177_v33 = vand.u32 4294901760, %v3981_v25  ;;  %v329_v34 = vsub.f32 %v3958_v17, %v328_v26  ;;  %v3999_v35 = vsub.f32 %v55_v22, %v3984_v27 }
   0x9   :  { %v336_v36 = vsub.f32 %v3972_v21, %v335_v28  ;;  %v4005_v37 = vsub.f32 %v58_v23, %v3988_v29  ;;  %v4007_v38 = vand.u32 4294901760, %v61_v30  ;;  %v4009_v39 = vand.u32 4294901760, %v64_v31 }
   0xa   :  { %v168_v41 = vsub.f32 %v3978_v24, %v167_v32  ;;  %v178_v42 = vsub.f32 %v3981_v25, %v177_v33  ;;  %v330_v43 = vand.u32 4294901760, %v329_v34  ;;  %v187_v44 = vand.u32 4294901760, %v3999_v35 }
   0xb   :  { %3469 = vmatpush3.bf16.msra.mxu0 %v3970_v20  ;;  %v337_v45 = vand.u32 4294901760, %v336_v36  ;;  %v197_v46 = vand.u32 4294901760, %v4005_v37  ;;  %v4024_v47 = vsub.f32 %v61_v30, %v4007_v38  ;;  %v4027_v48 = vsub.f32 %v64_v31, %v4009_v39 }
   0xc   :  { %v169_v51 = vand.u32 4294901760, %v168_v41  ;;  %v179_v52 = vand.u32 4294901760, %v178_v42  ;;  %v188_v53 = vsub.f32 %v3999_v35, %v187_v44  ;;  %v67_v54 = vsel %vm47_vm0, %v26_v40, 0 }
   0xd   :  { %v3470_v55 = vpack.c.bf16 %v337_v45, %v330_v43  ;;  %v198_v56 = vsub.f32 %v4005_v37, %v197_v46  ;;  %v207_v57 = vand.u32 4294901760, %v4024_v47  ;;  %v217_v58 = vand.u32 4294901760, %v4027_v48 }
   0xe   :  { %2990 = vmatprep.mubr.f32.mxu0 %v169_v51  ;;  %v189_v60 = vand.u32 4294901760, %v188_v53  ;;  %v4047_v61 = vand.u32 4294901760, %v67_v54  ;;  %v70_v62 = vsel %vm47_vm0, %v27_v49, 0  ;;  %v73_v63 = vsel %vm47_vm0, %v28_v50, 0  ;;  %v33_v53 = vld [vmem:[%s4945_s0 + $0x68] sm:$0xff] }
   0xf   :  { %2991 = vmatmul.mubr.f32.vlgmr.msra.gmra.mrb[0].mxu0 %v179_v52  ;;  %3471 = vmatprep.subr.bf16.mxu0 %v3470_v55  ;;  %v199_v0 = vand.u32 4294901760, %v198_v56  ;;  %v208_v1 = vsub.f32 %v4024_v47, %v207_v57  ;;  %v218_v3 = vsub.f32 %v4027_v48, %v217_v58  ;;  %v4057_v4 = vand.u32 4294901760, %v70_v62  ;;  %v32_v52 = vld [vmem:[%s4945_s0 + $0x60] sm:$0xff] }
  0x10   :  { %3473 = vmatpush3.bf16.msra.mxu0 %v3470_v55  ;;  %2993 = vmatprep.mubr.f32.mxu0 %v189_v60  ;;  %v4060_v7 = vsub.f32 %v67_v54, %v4047_v61  ;;  %v4062_v8 = vand.u32 4294901760, %v73_v63  ;;  %v76_v10 = vsel %vm47_vm0, %v29_v59, 0  ;;  %v4068_v11 = vsub.f32 %v3929_v2, %v103_v6 }
  0x11   :  { %v209_v18 = vand.u32 4294901760, %v208_v1  ;;  %v219_v19 = vand.u32 4294901760, %v218_v3  ;;  %v4077_v22 = vsub.f32 %v70_v62, %v4057_v4  ;;  %v4079_v23 = vand.u32 4294901760, %v76_v10  ;;  %v34_v1 = vld [vmem:[%s4945_s0 + $0x70] sm:$0xff]  ;;  %v35_v3 = vld [vmem:[%s4945_s0 + $0x78] sm:$0xff] }
  0x12   :  { %v227_v30 = vand.u32 4294901760, %v4060_v7  ;;  %v4083_v2 = vsub.f32 %v73_v63, %v4062_v8  ;;  %v342_v6 = vand.u32 4294901760, %v4068_v11  ;;  %v4089_v31 = vsub.f32 %v3934_v5, %v106_v9 }
  0x13   :  { %2994 = vmatmul.mubr.f32.gmra.mrb[2].mxu0 %v199_v0  ;;  %v237_v34 = vand.u32 4294901760, %v4077_v22  ;;  %v4093_v36 = vsub.f32 %v76_v10, %v4079_v23  ;;  %v79_v40 = vsel %vm47_vm0, %v30_v12, 0  ;;  %v82_v41 = vsel %vm47_vm0, %v31_v13, 0 }
  0x14   :  { %2996 = vmatprep.mubr.f32.mxu0 %v209_v18  ;;  %v228_v42 = vsub.f32 %v4060_v7, %v227_v30  ;;  %v247_v43 = vand.u32 4294901760, %v4083_v2  ;;  %v343_v5 = vsub.f32 %v4068_v11, %v342_v6  ;;  %v349_v9 = vand.u32 4294901760, %v4089_v31 }
  0x15   :  { %v238_v45 = vsub.f32 %v4077_v22, %v237_v34  ;;  %v4950_v49 = vand.u32 4294901760, %v4093_v36  ;;  %v4107_v50 = vand.u32 4294901760, %v79_v40  ;;  %v4109_v51 = vand.u32 4294901760, %v82_v41 }
  0x16   :  { %v229_v54 = vand.u32 4294901760, %v228_v42  ;;  %v248_v55 = vsub.f32 %v4083_v2, %v247_v43  ;;  %v344_v56 = vand.u32 4294901760, %v343_v5  ;;  %v350_v59 = vsub.f32 %v4089_v31, %v349_v9 }
  0x17   :  { %2997 = vmatmul.mubr.f32.gmra.mrb[4].mxu0 %v219_v19  ;;  %v239_v60 = vand.u32 4294901760, %v238_v45  ;;  %v258_v62 = vsub.f32 %v4093_v36, %v4950_v49  ;;  %v4125_v63 = vsub.f32 %v79_v40, %v4107_v50  ;;  %v4128_v0 = vsub.f32 %v82_v41, %v4109_v51 }
  0x18   :  { %2999 = vmatprep.mubr.f32.mxu0 %v229_v54  ;;  %v249_v10 = vand.u32 4294901760, %v248_v55  ;;  %v351_v12 = vand.u32 4294901760, %v350_v59  ;;  %v85_v13 = vsel %vm47_vm0, %v32_v52, 0  ;;  %v88_v18 = vsel %vm47_vm0, %v33_v53, 0 }
  0x19   :  { %v259_v19 = vand.u32 4294901760, %v258_v62  ;;  %v4952_v40 = vand.u32 4294901760, %v4125_v63  ;;  %v4951_v41 = vand.u32 4294901760, %v4128_v0  ;;  %v4140_v42 = vand.u32 4294901760, %v85_v13 }
  0x1a   :  { %v3474_v5 = vpack.c.bf16 %v351_v12, %v344_v56  ;;  %v4142_v45 = vand.u32 4294901760, %v88_v18  ;;  %v91_v49 = vsel %vm47_vm0, %v34_v1, 0  ;;  %v94_v54 = vsel %vm47_vm0, %v35_v3, 0 }
  0x1b   :  { %3000 = vmatmul.mubr.f32.gmra.mrb[6].mxu0 %v239_v60  ;;  %v268_v52 = vsub.f32 %v4125_v63, %v4952_v40  ;;  %v278_v53 = vsub.f32 %v4128_v0, %v4951_v41  ;;  %v4153_v55 = vsub.f32 %v85_v13, %v4140_v42  ;;  %v4155_v59 = vand.u32 4294901760, %v91_v49 }
  0x1c   :  { %3002 = vmatprep.mubr.f32.mxu0 %v249_v10  ;;  %3475 = vmatprep.subr.bf16.mxu0 %v3474_v5  ;;  %v4158_v56 = vsub.f32 %v88_v18, %v4142_v45  ;;  %v4160_v62 = vand.u32 4294901760, %v94_v54  ;;  %v3478_v60 = vpack.c.bf16 %v3972_v21, %v3958_v17  ;;  %v3494_v18 = vpack.c.bf16 %v335_v28, %v328_v26 }
  0x1d   :  { %3477 = vmatpush3.bf16.msra.mxu0 %v3474_v5  ;;  %v269_v1 = vand.u32 4294901760, %v268_v52  ;;  %v287_v3 = vand.u32 4294901760, %v4153_v55  ;;  %v4166_v12 = vsub.f32 %v91_v49, %v4155_v59  ;;  %v4176_v41 = vpack.c.bf16 %v349_v9, %v342_v6 }
  0x1e   :  { %v297_v13 = vand.u32 4294901760, %v4158_v56  ;;  %v4170_v10 = vsub.f32 %v94_v54, %v4160_v62  ;;  %3479 = vmatprep.subr.bf16.mxu0 %v3478_v60  ;;  %v279_v5 = vand.u32 4294901760, %v278_v53 }
  0x1f   :  { %3003 = vmatmul.mubr.f32.gmra.mrb[8].mxu0 %v259_v19  ;;  %v288_v49 = vsub.f32 %v4153_v55, %v287_v3  ;;  %v307_v52 = vand.u32 4294901760, %v4166_v12  ;;  %v3482_v19 = vpack.c.bf16 %v4089_v31, %v4068_v11  ;;  %v1379_v11 = vld [vmem:[%s4946_s3 + $0x48] sm:$0xff]  ;;  %v1381_v31 = vld [vmem:[%s4946_s3 + $0x58] sm:$0xff] }
  0x20   :  { %3005 = vmatprep.mubr.f32.mxu0 %v269_v1  ;;  %v298_v54 = vsub.f32 %v4158_v56, %v297_v13  ;;  %v317_v17 = vand.u32 4294901760, %v4170_v10 }
  0x21   :  { %v289_v40 = vand.u32 4294901760, %v288_v49  ;;  %v308_v21 = vsub.f32 %v4166_v12, %v307_v52 }
  0x22   :  { %v299_v26 = vand.u32 4294901760, %v298_v54  ;;  %v318_v28 = vsub.f32 %v4170_v10, %v317_v17 }
  0x23   :  { %3006 = vmatmul.mubr.f32.gmra.mrb[10].mxu0 %v279_v5  ;;  %v309_v6 = vand.u32 4294901760, %v308_v21 }
  0x24   :  { %3008 = vmatprep.mubr.f32.mxu0 %v289_v40  ;;  %v319_v9 = vand.u32 4294901760, %v318_v28 }
  0x27   :  { %3009 = vmatmul.mubr.f32.gmra.mrb[12].mxu0 %v299_v26 }
  0x28   :  { %3011 = vmatprep.mubr.f32.mxu0 %v309_v6 }
  0x2b   :  { %3012 = vmatmul.mubr.f32.gmra.mrb[14].mxu0 %v319_v9 }
  0x2c   :  { %3022 = vmatprep.mubr.f32.mxu0 %v3954_v15 }
  0x2f   :  { %3023 = vmatmul.mubr.f32.vlgmr.msra.gmra.mrb[0].mxu0 %v3956_v16 }
  0x30   :  { %3481 = vmatpush3.bf16.msra.mxu0 %v3478_v60  ;;  %3025 = vmatprep.mubr.f32.mxu0 %v3984_v27 }
  0x31   :  { %3483 = vmatprep.subr.bf16.mxu0 %v3482_v19 }
  0x33   :  { %3026 = vmatmul.mubr.f32.gmra.mrb[2].mxu0 %v3988_v29 }
  0x34   :  { %3028 = vmatprep.mubr.f32.mxu0 %v4007_v38  ;;  %3485 = vmatpush3.bf16.msra.mxu0 %v3482_v19 }
  0x35   :  { %3487 = vmatprep.subr.bf16.mxu0 %v3952_v14 }
  0x37   :  { %3029 = vmatmul.mubr.f32.gmra.mrb[4].mxu0 %v4009_v39 }
  0x38   :  { %3031 = vmatprep.mubr.f32.mxu0 %v4047_v61 }
  0x3b   :  { %3032 = vmatmul.mubr.f32.gmra.mrb[6].mxu0 %v4057_v4 }
  0x3c   :  { %3034 = vmatprep.mubr.f32.mxu0 %v4062_v8 }
  0x3f   :  { %3035 = vmatmul.mubr.f32.gmra.mrb[8].mxu0 %v4079_v23 }
  0x40   :  { %3037 = vmatprep.mubr.f32.mxu0 %v4107_v50 }
  0x43   :  { %3038 = vmatmul.mubr.f32.gmra.mrb[10].mxu0 %v4109_v51 }
  0x44   :  { %3040 = vmatprep.mubr.f32.mxu0 %v4140_v42 }
  0x47   :  { %3041 = vmatmul.mubr.f32.gmra.mrb[12].mxu0 %v4142_v45 }
  0x48   :  { %3043 = vmatprep.mubr.f32.mxu0 %v4155_v59 }
  0x4b   :  { %3044 = vmatmul.mubr.f32.gmra.mrb[14].mxu0 %v4160_v62 }
  0x4c   :  { %3054 = vmatprep.mubr.f32.mxu0 %v3978_v24  ;;  %v4983_v24 = vand.u32 4294901760, %v4093_v36 }
  0x4f   :  { %3055 = vmatmul.mubr.f32.vlgmr.msra.gmra.mrb[0].mxu0 %v3981_v25  ;;  %v4984_v25 = vand.u32 4294901760, %v4125_v63 }
  0x50   :  { %3489 = vmatpush3.bf16.msra.mxu0 %v3952_v14  ;;  %3057 = vmatprep.mubr.f32.mxu0 %v3999_v35 }
  0x51   :  { %3491 = vmatprep.subr.bf16.mxu0 %v3970_v20 }
  0x53   :  { %3058 = vmatmul.mubr.f32.gmra.mrb[2].mxu0 %v4005_v37 }
  0x54   :  { %3060 = vmatprep.mubr.f32.mxu0 %v4024_v47  ;;  %3493 = vmatpush3.bf16.msra.mxu0 %v3970_v20 }
  0x55   :  { %3495 = vmatprep.subr.bf16.mxu0 %v3494_v18 }
  0x57   :  { %3061 = vmatmul.mubr.f32.gmra.mrb[4].mxu0 %v4027_v48 }
  0x58   :  { %3063 = vmatprep.mubr.f32.mxu0 %v4060_v7 }
  0x5b   :  { %3064 = vmatmul.mubr.f32.gmra.mrb[6].mxu0 %v4077_v22 }
  0x5c   :  { %3066 = vmatprep.mubr.f32.mxu0 %v4083_v2  ;;  %v1380_v2 = vld [vmem:[%s4946_s3 + $0x50] sm:$0xff] }
  0x5f   :  { %3067 = vmatmul.mubr.f32.gmra.mrb[8].mxu0 %v4093_v36  ;;  %v1472_v36 = vand.u32 4294901760, %v1381_v31 }
  0x60   :  { %3069 = vmatprep.mubr.f32.mxu0 %v4125_v63 }
  0x63   :  { %3070 = vmatmul.mubr.f32.gmra.mrb[10].mxu0 %v4128_v0 }
  0x64   :  { %3072 = vmatprep.mubr.f32.mxu0 %v4153_v55 }
  0x67   :  { %3073 = vmatmul.mubr.f32.gmra.mrb[12].mxu0 %v4158_v56 }
  0x68   :  { %3075 = vmatprep.mubr.f32.mxu0 %v4166_v12 }
  0x6b   :  { %3076 = vmatmul.mubr.f32.gmra.mrb[14].mxu0 %v4170_v10 }
  0x6c   :  { %3086 = vmatprep.mubr.f32.mxu0 %v167_v32  ;;  %v4985_v32 = vand.u32 4294901760, %v4128_v0 }
  0x6f   :  { %3087 = vmatmul.mubr.f32.vlgmr.msra.gmra.mrb[0].mxu0 %v177_v33  ;;  %v1373_v33 = vld [vmem:[%s4946_s3 + $0x18] sm:$0xff] }
  0x70   :  { %3497 = vmatpush3.bf16.msra.mxu0 %v3494_v18  ;;  %3089 = vmatprep.mubr.f32.mxu0 %v187_v44  ;;  %v1448_v37 = vand.u32 4294901760, %v1373_v33  ;;  %v1375_v44 = vld [vmem:[%s4946_s3 + $0x28] sm:$0xff] }
  0x71   :  { %3499 = vmatprep.subr.bf16.mxu0 %v4176_v41  ;;  %v1454_v47 = vand.u32 4294901760, %v1375_v44 }
  0x73   :  { %3090 = vmatmul.mubr.f32.gmra.mrb[2].mxu0 %v197_v46  ;;  %v4400_v12 = vsub.f32 %v1375_v44, %v1454_v47  ;;  %v4443_v44 = vsub.f32 %v1381_v31, %v1472_v36 }
  0x74   :  { %3092 = vmatprep.mubr.f32.mxu0 %v207_v57  ;;  %3501 = vmatpush3.bf16.msra.mxu0 %v4176_v41  ;;  %v1376_v57 = vld [vmem:[%s4946_s3 + $0x30] sm:$0xff] }
  0x75   :  { %3503 = vmatprep.subr.bf16.mxu0 %v3952_v14  ;;  %4990 = vst [vmem:[#allocation6_spill] sm:$0xff] %v4400_v12  ;;  %v4959_v5 = vand.u32 4294901760, %v4400_v12  ;;  %4996 = vst [vmem:[#allocation12_spill] sm:$0xff] %v4443_v44 }
  0x77   :  { %3093 = vmatmul.mubr.f32.gmra.mrb[4].mxu0 %v217_v58  ;;  %v1377_v58 = vld [vmem:[%s4946_s3 + $0x38] sm:$0xff]  ;;  %v1714_v21 = vsub.f32 %v4400_v12, %v4959_v5 }
  0x78   :  { %3095 = vmatprep.mubr.f32.mxu0 %v227_v30 }
  0x79   :  { %v1715_v9 = vand.u32 4294901760, %v1714_v21 }
  0x7b   :  { %3096 = vmatmul.mubr.f32.gmra.mrb[6].mxu0 %v237_v34  ;;  %v1469_v34 = vand.u32 4294901760, %v1380_v2 }
  0x7c   :  { %3098 = vmatprep.mubr.f32.mxu0 %v247_v43 }
  0x7d   :  { %v4366_v43 = vpack.c.bf16 %v1472_v36, %v1469_v34 }
  0x7f   :  { %3099 = vmatmul.mubr.f32.gmra.mrb[8].mxu0 %v4983_v24 }
  0x80   :  { %3101 = vmatprep.mubr.f32.mxu0 %v4984_v25 }
  0x83   :  { %3102 = vmatmul.mubr.f32.gmra.mrb[10].mxu0 %v4985_v32 }
  0x84   :  { %3104 = vmatprep.mubr.f32.mxu0 %v287_v3 }
  0x87   :  { %3105 = vmatmul.mubr.f32.gmra.mrb[12].mxu0 %v297_v13 }
  0x88   :  { %3107 = vmatprep.mubr.f32.mxu0 %v307_v52 }
  0x8b   :  { %3108 = vmatmul.mubr.f32.gmra.mrb[14].mxu0 %v317_v17 }
  0x8c   :  { %3118 = vmatprep.mubr.f32.mxu0 %v3954_v15 }
  0x8f   :  { %3119 = vmatmul.mubr.f32.vlgmr.msra.gmra.mrb[0].mxu0 %v3956_v16 }
  0x90   :  { %3505 = vmatpush3.bf16.msra.mxu0 %v3952_v14  ;;  %3121 = vmatprep.mubr.f32.mxu0 %v3984_v27  ;;  %v1370_v14 = vld [vmem:[%s4946_s3] sm:$0xff] }
  0x91   :  { %3507 = vmatprep.subr.bf16.mxu0 %v3970_v20 }
  0x93   :  { %3122 = vmatmul.mubr.f32.gmra.mrb[2].mxu0 %v3988_v29 }
  0x94   :  { %3124 = vmatprep.mubr.f32.mxu0 %v4007_v38  ;;  %3509 = vmatpush3.bf16.msra.mxu0 %v3970_v20 }
  0x97   :  { %3125 = vmatmul.mubr.f32.gmra.mrb[4].mxu0 %v4009_v39 }
  0x98   :  { %3127 = vmatprep.mubr.f32.mxu0 %v4047_v61 }
  0x9b   :  { %3128 = vmatmul.mubr.f32.gmra.mrb[6].mxu0 %v4057_v4 }
  0x9c   :  { %3130 = vmatprep.mubr.f32.mxu0 %v4062_v8 }
  0x9f   :  { %3131 = vmatmul.mubr.f32.gmra.mrb[8].mxu0 %v4079_v23 }
  0xa0   :  { %3133 = vmatprep.mubr.f32.mxu0 %v4107_v50 }
  0xa3   :  { %3134 = vmatmul.mubr.f32.gmra.mrb[10].mxu0 %v4109_v51 }
  0xa4   :  { %3136 = vmatprep.mubr.f32.mxu0 %v4140_v42 }
  0xa7   :  { %3137 = vmatmul.mubr.f32.gmra.mrb[12].mxu0 %v4142_v45 }
  0xa8   :  { %3139 = vmatprep.mubr.f32.mxu0 %v4155_v59 }
  0xab   :  { %3140 = vmatmul.mubr.f32.gmra.mrb[14].mxu0 %v4160_v62 }
  0xac   :  { %3150 = vmatprep.mubr.f32.mxu0 %v3954_v15  ;;  %v1371_v15 = vld [vmem:[%s4946_s3 + $0x8] sm:$0xff] }
  0xad   :  { %v1442_v20 = vand.u32 4294901760, %v1371_v15 }
  0xaf   :  { %3151 = vmatmul.mubr.f32.vlgmr.msra.gmra.mrb[0].mxu0 %v3956_v16  ;;  %v1439_v16 = vand.u32 4294901760, %v1370_v14 }
  0xb0   :  { %3153 = vmatprep.mubr.f32.mxu0 %v3984_v27 }
  0xb1   :  { %v4306_v27 = vpack.c.bf16 %v1442_v20, %v1439_v16 }
  0xb3   :  { %3154 = vmatmul.mubr.f32.gmra.mrb[2].mxu0 %v3988_v29  ;;  %3511 = vmatprep.subr.bf16.mxu0 %v4306_v27  ;;  %v1372_v29 = vld [vmem:[%s4946_s3 + $0x10] sm:$0xff] }
  0xb4   :  { %3156 = vmatprep.mubr.f32.mxu0 %v4007_v38  ;;  %3654 = vmatprep.subr.bf16.mxu1 %v4306_v27  ;;  %v1445_v35 = vand.u32 4294901760, %v1372_v29 }
  0xb5   :  { %3513 = vmatpush3.bf16.msra.mxu0 %v4306_v27  ;;  %3660 = vmatpush3.bf16.msra.mxu1 %v4306_v27 }
  0xb6   :  { %v4318_v38 = vpack.c.bf16 %v1448_v37, %v1445_v35 }
  0xb7   :  { %3157 = vmatmul.mubr.f32.gmra.mrb[4].mxu0 %v4009_v39  ;;  %v1374_v39 = vld [vmem:[%s4946_s3 + $0x20] sm:$0xff] }
  0xb8   :  { %3159 = vmatprep.mubr.f32.mxu0 %v4047_v61  ;;  %3515 = vmatprep.subr.bf16.mxu0 %v4318_v38  ;;  %v1451_v46 = vand.u32 4294901760, %v1374_v39  ;;  %v1457_v61 = vand.u32 4294901760, %v1376_v57 }
  0xb9   :  { %3655 = vmatprep.subr.bf16.mxu1 %v4318_v38  ;;  %3517 = vmatpush3.bf16.msra.mxu0 %v4318_v38 }
  0xba   :  { %3661 = vmatpush3.bf16.msra.mxu1 %v4318_v38  ;;  %v4330_v48 = vpack.c.bf16 %v1454_v47, %v1451_v46  ;;  %v4398_v3 = vsub.f32 %v1374_v39, %v1451_v46  ;;  %v4410_v54 = vsub.f32 %v1376_v57, %v1457_v61  ;;  %v4441_v39 = vsub.f32 %v1380_v2, %v1469_v34 }
  0xbb   :  { %3160 = vmatmul.mubr.f32.gmra.mrb[6].mxu0 %v4057_v4  ;;  %v1460_v4 = vand.u32 4294901760, %v1377_v58 }
  0xbc   :  { %3162 = vmatprep.mubr.f32.mxu0 %v4062_v8  ;;  %3519 = vmatprep.subr.bf16.mxu0 %v4330_v48  ;;  %v1378_v8 = vld [vmem:[%s4946_s3 + $0x40] sm:$0xff]  ;;  %4989 = vst [vmem:[#allocation5_spill] sm:$0xff] %v4398_v3  ;;  %v4960_v18 = vand.u32 4294901760, %v4398_v3  ;;  %4991 = vst [vmem:[#allocation7_spill] sm:$0xff] %v4410_v54  ;;  %v4958_v28 = vand.u32 4294901760, %v4410_v54  ;;  %v4954_v57 = vand.u32 4294901760, %v4441_v39  ;;  %v4467_v34 = vpack.c.bf16 %v4400_v12, %v4398_v3 }
  0xbd   :  { %3656 = vmatprep.subr.bf16.mxu1 %v4330_v48  ;;  %3521 = vmatpush3.bf16.msra.mxu0 %v4330_v48  ;;  %v4342_v7 = vpack.c.bf16 %v1460_v4, %v1457_v61  ;;  %v1463_v22 = vand.u32 4294901760, %v1378_v8  ;;  %v4412_v17 = vsub.f32 %v1377_v58, %v1460_v4  ;;  %4995 = vst [vmem:[#allocation11_spill] sm:$0xff] %v4441_v39  ;;  %v4953_v58 = vand.u32 4294901760, %v4443_v44 }
  0xbe   :  { %3662 = vmatpush3.bf16.msra.mxu1 %v4330_v48  ;;  %v1707_v52 = vsub.f32 %v4398_v3, %v4960_v18  ;;  %v1721_v19 = vsub.f32 %v4410_v54, %v4958_v28  ;;  %v1749_v4 = vsub.f32 %v4441_v39, %v4954_v57 }
  0xbf   :  { %3163 = vmatmul.mubr.f32.gmra.mrb[8].mxu0 %v4079_v23  ;;  %3523 = vmatprep.subr.bf16.mxu0 %v4342_v7  ;;  %v1466_v23 = vand.u32 4294901760, %v1379_v11  ;;  %4992 = vst [vmem:[#allocation8_spill] sm:$0xff] %v4412_v17  ;;  %v4957_v6 = vand.u32 4294901760, %v4412_v17  ;;  %v4425_v25 = vsub.f32 %v1378_v8, %v1463_v22  ;;  %v1756_v8 = vsub.f32 %v4443_v44, %v4953_v58 }
  0xc0   :  { %3165 = vmatprep.mubr.f32.mxu0 %v4107_v50  ;;  %3657 = vmatprep.subr.bf16.mxu1 %v4342_v7  ;;  %v4372_v50 = vsub.f32 %v1370_v14, %v1439_v16  ;;  %v1708_v26 = vand.u32 4294901760, %v1707_v52  ;;  %v4471_v36 = vpack.c.bf16 %v4412_v17, %v4410_v54 }
  0xc1   :  { %3525 = vmatpush3.bf16.msra.mxu0 %v4342_v7  ;;  %v4354_v30 = vpack.c.bf16 %v1466_v23, %v1463_v22  ;;  %v1728_v24 = vsub.f32 %v4412_v17, %v4957_v6  ;;  %4993 = vst [vmem:[#allocation9_spill] sm:$0xff] %v4425_v25  ;;  %v4427_v32 = vsub.f32 %v1379_v11, %v1466_v23  ;;  %v1750_v11 = vand.u32 4294901760, %v1749_v4 }
  0xc2   :  { %3663 = vmatpush3.bf16.msra.mxu1 %v4342_v7  ;;  %v4964_v63 = vand.u32 4294901760, %v4372_v50  ;;  %v4429_v14 = vpack.c.bf16 %v1715_v9, %v1708_v26  ;;  %v1757_v22 = vand.u32 4294901760, %v1756_v8 }
  0xc3   :  { %3166 = vmatmul.mubr.f32.gmra.mrb[10].mxu0 %v4109_v51  ;;  %3527 = vmatprep.subr.bf16.mxu0 %v4354_v30  ;;  %v4374_v51 = vsub.f32 %v1371_v15, %v1442_v20  ;;  %4994 = vst [vmem:[#allocation10_spill] sm:$0xff] %v4427_v32  ;;  %v1722_v15 = vand.u32 4294901760, %v1721_v19  ;;  %v1729_v16 = vand.u32 4294901760, %v1728_v24  ;;  %v4956_v20 = vand.u32 4294901760, %v4425_v25 }
  0xc4   :  { %3168 = vmatprep.mubr.f32.mxu0 %v4140_v42  ;;  %3658 = vmatprep.subr.bf16.mxu1 %v4354_v30  ;;  %v1679_v40 = vsub.f32 %v4372_v50, %v4964_v63  ;;  %v4384_v42 = vsub.f32 %v1372_v29, %v1445_v35  ;;  %v4955_v29 = vand.u32 4294901760, %v4427_v32  ;;  %v4455_v23 = vpack.c.bf16 %v1757_v22, %v1750_v11 }
  0xc5   :  { %3529 = vmatpush3.bf16.msra.mxu0 %v4354_v30  ;;  %4986 = vst [vmem:[#allocation2_spill] sm:$0xff] %v4374_v51  ;;  %v4963_v0 = vand.u32 4294901760, %v4374_v51  ;;  %v1735_v35 = vsub.f32 %v4425_v25, %v4956_v20  ;;  %v4459_v2 = vpack.c.bf16 %v4374_v51, %v4372_v50 }
  0xc6   :  { %3664 = vmatpush3.bf16.msra.mxu1 %v4354_v30  ;;  %3531 = vmatprep.subr.bf16.mxu0 %v4366_v43  ;;  %4987 = vst [vmem:[#allocation3_spill] sm:$0xff] %v4384_v42  ;;  %v1680_v53 = vand.u32 4294901760, %v1679_v40  ;;  %v4475_v40 = vpack.c.bf16 %v4427_v32, %v4425_v25 }
  0xc7   :  { %3169 = vmatmul.mubr.f32.gmra.mrb[12].mxu0 %v4142_v45  ;;  %3659 = vmatprep.subr.bf16.mxu1 %v4366_v43  ;;  %v1686_v41 = vsub.f32 %v4374_v51, %v4963_v0  ;;  %v4386_v45 = vsub.f32 %v1373_v33, %v1448_v37  ;;  %v4433_v33 = vpack.c.bf16 %v1729_v16, %v1722_v15  ;;  %v1736_v46 = vand.u32 4294901760, %v1735_v35 }
  0xc8   :  { %3171 = vmatprep.mubr.f32.mxu0 %v4155_v59  ;;  %v4962_v59 = vand.u32 4294901760, %v4384_v42  ;;  %v1742_v37 = vsub.f32 %v4427_v32, %v4955_v29 }
  0xc9   :  { %3533 = vmatpush3.bf16.msra.mxu0 %v4366_v43  ;;  %4988 = vst [vmem:[#allocation4_spill] sm:$0xff] %v4386_v45  ;;  %v1687_v55 = vand.u32 4294901760, %v1686_v41  ;;  %v4961_v56 = vand.u32 4294901760, %v4386_v45  ;;  %v4463_v31 = vpack.c.bf16 %v4386_v45, %v4384_v42  ;;  %v4479_v41 = vpack.c.bf16 %v4443_v44, %v4441_v39 }
  0xca   :  { %3665 = vmatpush3.bf16.msra.mxu1 %v4366_v43  ;;  %v1693_v60 = vsub.f32 %v4384_v42, %v4962_v59  ;;  %v1743_v47 = vand.u32 4294901760, %v1742_v37 }
  0xcb   :  { %3172 = vmatmul.mubr.f32.gmra.mrb[14].mxu0 %v4160_v62  ;;  %v4390_v62 = vpack.c.bf16 %v1687_v55, %v1680_v53  ;;  %v1700_v1 = vsub.f32 %v4386_v45, %v4961_v56  ;;  %v4484_v53 = vld [vmem:[%s4947_s2] ss:$0 sm:$0xff] }
  0xcc   :  { %v1694_v13 = vand.u32 4294901760, %v1693_v60  ;;  %v4447_v61 = vpack.c.bf16 %v1743_v47, %v1736_v46 }
  0xcd   :  { %3535 = vmatprep.subr.bf16.mxu1 %v4390_v62  ;;  %v1701_v10 = vand.u32 4294901760, %v1700_v1 }
  0xcf   :  { %v4405_v49 = vpack.c.bf16 %v1701_v10, %v1694_v13 }
 0x182   :  { %v3152_v55 = vpop.f32.mrb[0].mxu0 }
 0x183   :  { %v3666_v60 = vadd.f32 %v3152_v55, %v4484_v53  ;;  %v1132_v1 = vpop.f32.mrb[1].mxu0 }
 0x184   :  { %v3667_v13 = vadd.f32 %v4484_v53, %v1132_v1 }
 0x185   :  { %v1243_v10 = vmul.f32 0.044715, %v3666_v60  ;;  %v4490_v37 = vmul.f32 0.5, %v3666_v60 }
 0x186   :  { %v1242_v52 = vmul.f32 0.044715, %v3667_v13  ;;  %v3155_v21 = vpop.f32.mrb[2].mxu0  ;;  %v4492_v46 = vmul.f32 0.5, %v3667_v13 }
 0x187   :  { %v1259_v26 = vmul.f32 %v3666_v60, %v1243_v10  ;;  %v3668_v9 = vadd.f32 %v3155_v21, %v4484_v53  ;;  %v1144_v19 = vpop.f32.mrb[3].mxu0 }
 0x188   :  { %v1258_v24 = vmul.f32 %v3667_v13, %v1242_v52  ;;  %v3669_v15 = vadd.f32 %v4484_v53, %v1144_v19 }
 0x189   :  { %v1275_v16 = vmul.f32 %v3666_v60, %v1259_v26  ;;  %v1245_v35 = vmul.f32 0.044715, %v3668_v9  ;;  %v4494_v22 = vmul.f32 0.5, %v3668_v9 }
 0x18a   :  { %v1274_v47 = vmul.f32 %v3667_v13, %v1258_v24  ;;  %v1244_v4 = vmul.f32 0.044715, %v3669_v15  ;;  %v3158_v8 = vpop.f32.mrb[4].mxu0  ;;  %v4497_v52 = vmul.f32 0.5, %v3669_v15 }
 0x18b   :  { %v1291_v11 = vadd.f32 %v3666_v60, %v1275_v16  ;;  %v1261_v55 = vmul.f32 %v3668_v9, %v1245_v35  ;;  %v3670_v1 = vadd.f32 %v3158_v8, %v4484_v53  ;;  %v1156_v10 = vpop.f32.mrb[5].mxu0 }
 0x18c   :  { %v1290_v21 = vadd.f32 %v3667_v13, %v1274_v47  ;;  %v1260_v19 = vmul.f32 %v3669_v15, %v1244_v4  ;;  %v3671_v26 = vadd.f32 %v4484_v53, %v1156_v10 }
 0x18d   :  { %v1307_v58 = vmul.f32 0.7978846, %v1291_v11  ;;  %v1277_v57 = vmul.f32 %v3668_v9, %v1261_v55  ;;  %v4500_v29 = vmul.f32 0.5, %v3670_v1  ;;  %v1247_v24 = vmul.f32 0.044715, %v3670_v1 }
 0x18e   :  { %v1306_v20 = vmul.f32 0.7978846, %v1290_v21  ;;  %v1276_v6 = vmul.f32 %v3669_v15, %v1260_v19  ;;  %v1246_v60 = vmul.f32 0.044715, %v3671_v26  ;;  %v3161_v16 = vpop.f32.mrb[6].mxu0  ;;  %v4502_v28 = vmul.f32 0.5, %v3671_v26 }
 0x18f   :  { %3858 = vtanh.f32 %v1307_v58  ;;  %v1293_v35 = vadd.f32 %v3668_v9, %v1277_v57  ;;  %v1263_v8 = vmul.f32 %v3670_v1, %v1247_v24  ;;  %v3672_v13 = vadd.f32 %v3161_v16, %v4484_v53  ;;  %v1168_v47 = vpop.f32.mrb[7].mxu0 }
 0x190   :  { %3860 = vtanh.f32 %v1306_v20  ;;  %v1292_v4 = vadd.f32 %v3669_v15, %v1276_v6  ;;  %v1262_v10 = vmul.f32 %v3671_v26, %v1246_v60  ;;  %v3673_v11 = vadd.f32 %v4484_v53, %v1168_v47 }
 0x191   :  { %v1309_v55 = vmul.f32 0.7978846, %v1293_v35  ;;  %v1279_v5 = vmul.f32 %v3670_v1, %v1263_v8  ;;  %v4506_v18 = vmul.f32 0.5, %v3672_v13  ;;  %v1249_v21 = vmul.f32 0.044715, %v3672_v13 }
 0x192   :  { %v1308_v19 = vmul.f32 0.7978846, %v1292_v4  ;;  %v1278_v56 = vmul.f32 %v3671_v26, %v1262_v10  ;;  %v4508_v59 = vmul.f32 0.5, %v3673_v11  ;;  %v1248_v58 = vmul.f32 0.044715, %v3673_v11  ;;  %v3164_v57 = vpop.f32.mrb[8].mxu0 }
 0x193   :  { %3862 = vtanh.f32 %v1309_v55  ;;  %v1295_v9 = vadd.f32 %v3670_v1, %v1279_v5  ;;  %v1265_v24 = vmul.f32 %v3672_v13, %v1249_v21  ;;  %v3674_v6 = vadd.f32 %v3164_v57, %v4484_v53  ;;  %v1180_v20 = vpop.f32.mrb[9].mxu0 }
 0x194   :  { %3864 = vtanh.f32 %v1308_v19  ;;  %v1294_v15 = vadd.f32 %v3671_v26, %v1278_v56  ;;  %v1264_v60 = vmul.f32 %v3673_v11, %v1248_v58  ;;  %v3675_v16 = vadd.f32 %v4484_v53, %v1180_v20 }
 0x195   :  { %v1311_v35 = vmul.f32 0.7978846, %v1295_v9  ;;  %v1281_v8 = vmul.f32 %v3672_v13, %v1265_v24  ;;  %v4512_v47 = vmul.f32 0.5, %v3674_v6  ;;  %v1251_v4 = vmul.f32 0.044715, %v3674_v6 }
 0x196   :  { %v1280_v10 = vmul.f32 %v3673_v11, %v1264_v60  ;;  %v4514_v0 = vmul.f32 0.5, %v3675_v16  ;;  %v1250_v63 = vmul.f32 0.044715, %v3675_v16  ;;  %v3167_v55 = vpop.f32.mrb[10].mxu0  ;;  %v1310_v5 = vmul.f32 0.7978846, %v1294_v15 }
 0x197   :  { %3866 = vtanh.f32 %v1311_v35  ;;  %v1297_v1 = vadd.f32 %v3672_v13, %v1281_v8  ;;  %v1267_v21 = vmul.f32 %v3674_v6, %v1251_v4  ;;  %v3676_v19 = vadd.f32 %v3167_v55, %v4484_v53  ;;  %v1192_v56 = vpop.f32.mrb[11].mxu0 }
 0x198   :  { %v1296_v26 = vadd.f32 %v3673_v11, %v1280_v10  ;;  %v1266_v58 = vmul.f32 %v3675_v16, %v1250_v63  ;;  %v3677_v57 = vadd.f32 %v4484_v53, %v1192_v56  ;;  %3868 = vtanh.f32 %v1310_v5 }
 0x199   :  { %v3859_v9 = vpop.eup %3858  ;;  %v1313_v24 = vmul.f32 0.7978846, %v1297_v1  ;;  %v1283_v20 = vmul.f32 %v3674_v6, %v1267_v21  ;;  %v4518_v60 = vmul.f32 0.5, %v3676_v19  ;;  %v1253_v44 = vmul.f32 0.044715, %v3676_v19 }
 0x19a   :  { %v3861_v39 = vpop.eup %3860  ;;  %v1339_v32 = vadd.f32 1.0, %v3859_v9  ;;  %v1312_v15 = vmul.f32 0.7978846, %v1296_v26  ;;  %v1282_v35 = vmul.f32 %v3675_v16, %v1266_v58  ;;  %v4520_v13 = vmul.f32 0.5, %v3677_v57  ;;  %v3170_v8 = vpop.f32.mrb[12].mxu0 }
 0x19b   :  { %3870 = vtanh.f32 %v1313_v24  ;;  %v1299_v4 = vadd.f32 %v3674_v6, %v1283_v20  ;;  %v1269_v11 = vmul.f32 %v3676_v19, %v1253_v44  ;;  %v1252_v63 = vmul.f32 0.044715, %v3677_v57  ;;  %v1204_v10 = vpop.f32.mrb[13].mxu0 }
 0x19c   :  { %v1355_v55 = vmul.f32 %v1339_v32, %v4490_v37  ;;  %3872 = vtanh.f32 %v1312_v15  ;;  %v1298_v5 = vadd.f32 %v3675_v16, %v1282_v35  ;;  %v3678_v1 = vadd.f32 %v3170_v8, %v4484_v53 }
 0x19d   :  { %v3863_v21 = vpop.eup %3862  ;;  %v1315_v56 = vmul.f32 0.7978846, %v1299_v4  ;;  %v1285_v25 = vmul.f32 %v3676_v19, %v1269_v11  ;;  %v1268_v9 = vmul.f32 %v3677_v57, %v1252_v63  ;;  %v3679_v26 = vadd.f32 %v4484_v53, %v1204_v10 }
 0x19e   :  { %v3865_v58 = vpop.eup %3864  ;;  %v1394_v17 = vsel %vm1389_vm1, %v1355_v55, 0  ;;  %v1314_v24 = vmul.f32 0.7978846, %v1298_v5  ;;  %v4526_v6 = vmul.f32 0.5, %v3678_v1  ;;  %v1255_v44 = vmul.f32 0.044715, %v3678_v1 }
 0x19f   :  { %v4528_v20 = vand.u32 4294901760, %v1394_v17  ;;  %3874 = vtanh.f32 %v1315_v56  ;;  %v1301_v32 = vadd.f32 %v3676_v19, %v1285_v25  ;;  %v1284_v37 = vmul.f32 %v3677_v57, %v1268_v9  ;;  %v3173_v16 = vpop.f32.mrb[14].mxu0 }
 0x1a0   :  { %3876 = vtanh.f32 %v1314_v24  ;;  %v1271_v15 = vmul.f32 %v3678_v1, %v1255_v44  ;;  %v4530_v35 = vmul.f32 0.5, %v3679_v26  ;;  %v1254_v8 = vmul.f32 0.044715, %v3679_v26  ;;  %v1216_v4 = vpop.f32.mrb[15].mxu0 }
 0x1a1   :  { %v3867_v11 = vpop.eup %3866  ;;  %v1317_v63 = vmul.f32 0.7978846, %v1301_v32  ;;  %v1300_v10 = vadd.f32 %v3677_v57, %v1284_v37  ;;  %v3680_v55 = vadd.f32 %v3173_v16, %v4484_v53  ;;  %v3681_v5 = vadd.f32 %v4484_v53, %v1216_v4 }
 0x1a2   :  { %v3869_v54 = vpop.eup %3868  ;;  %v1287_v12 = vmul.f32 %v3678_v1, %v1271_v15  ;;  %v1270_v3 = vmul.f32 %v3679_v26, %v1254_v8  ;;  %v1338_v56 = vadd.f32 1.0, %v3861_v39  ;;  %v4535_v25 = vsub.f32 %v1394_v17, %v4528_v20 }
 0x1a3   :  { %3878 = vtanh.f32 %v1317_v63  ;;  %v1316_v19 = vmul.f32 0.7978846, %v1300_v10  ;;  %v4537_v9 = vmul.f32 0.5, %v3680_v55  ;;  %v1257_v24 = vmul.f32 0.044715, %v3680_v55 }
 0x1a4   :  { %v1303_v44 = vadd.f32 %v3678_v1, %v1287_v12  ;;  %v1286_v45 = vmul.f32 %v3679_v26, %v1270_v3  ;;  %v4539_v32 = vmul.f32 0.5, %v3681_v5  ;;  %v1256_v57 = vmul.f32 0.044715, %v3681_v5 }
 0x1a5   :  { %v3871_v37 = vpop.eup %3870  ;;  %3880 = vtanh.f32 %v1316_v19  ;;  %v1273_v53 = vmul.f32 %v3680_v55, %v1257_v24  ;;  %v1354_v16 = vmul.f32 %v1338_v56, %v4492_v46  ;;  %v4980_v39 = vand.u32 4294901760, %v4535_v25 }
 0x1a6   :  { %v3873_v15 = vpop.eup %3872  ;;  %v1319_v17 = vmul.f32 0.7978846, %v1303_v44  ;;  %v1302_v8 = vadd.f32 %v3679_v26, %v1286_v45  ;;  %v1272_v4 = vmul.f32 %v3681_v5, %v1256_v57  ;;  %v1340_v63 = vadd.f32 1.0, %v3865_v58 }
 0x1a7   :  { %v1289_v10 = vmul.f32 %v3680_v55, %v1273_v53  ;;  %v1391_v42 = vsel %vm1389_vm1, %v1354_v16, 0  ;;  %v1528_v3 = vsub.f32 %v4535_v25, %v4980_v39  ;;  %v1341_v12 = vadd.f32 1.0, %v3863_v21 }
 0x1a8   :  { %3882 = vtanh.f32 %v1319_v17  ;;  %v1318_v1 = vmul.f32 0.7978846, %v1302_v8  ;;  %v1288_v19 = vmul.f32 %v3681_v5, %v1272_v4  ;;  %v4547_v24 = vand.u32 4294901760, %v1391_v42 }
 0x1a9   :  { %v3875_v46 = vpop.eup %3874  ;;  %v1305_v56 = vadd.f32 %v3680_v55, %v1289_v10  ;;  %v1529_v51 = vand.u32 4294901760, %v1528_v3  ;;  %v1356_v45 = vmul.f32 %v1340_v63, %v4497_v52  ;;  %v1357_v26 = vmul.f32 %v1341_v12, %v4494_v22 }
 0x1aa   :  { %v3877_v58 = vpop.eup %3876  ;;  %3884 = vtanh.f32 %v1318_v1  ;;  %v1304_v44 = vadd.f32 %v3681_v5, %v1288_v19  ;;  %v4552_v57 = vsub.f32 %v1391_v42, %v4547_v24  ;;  %v1342_v53 = vadd.f32 1.0, %v3869_v54 }
 0x1ab   :  { %v1321_v21 = vmul.f32 0.7978846, %v1305_v56  ;;  %v1397_v16 = vsel %vm1389_vm1, %v1356_v45, 0  ;;  %v1400_v17 = vsel %vm1389_vm1, %v1357_v26, 0  ;;  %v1343_v8 = vadd.f32 1.0, %v3867_v11 }
 0x1ac   :  { %v1320_v4 = vmul.f32 0.7978846, %v1304_v44  ;;  %v4982_v55 = vand.u32 4294901760, %v4552_v57  ;;  %v4557_v10 = vand.u32 4294901760, %v1397_v16  ;;  %v4559_v52 = vand.u32 4294901760, %v1400_v17 }
 0x1ad   :  { %v3879_v22 = vpop.eup %3878  ;;  %3886 = vtanh.f32 %v1321_v21  ;;  %v1358_v5 = vmul.f32 %v1342_v53, %v4502_v28  ;;  %v1359_v42 = vmul.f32 %v1343_v8, %v4500_v29  ;;  %v1344_v54 = vadd.f32 1.0, %v3873_v15 }
 0x1ae   :  { %3888 = vtanh.f32 %v1320_v4  ;;  %v1518_v63 = vsub.f32 %v4552_v57, %v4982_v55  ;;  %v4567_v11 = vsub.f32 %v1397_v16, %v4557_v10  ;;  %v4570_v3 = vsub.f32 %v1400_v17, %v4559_v52 }
 0x1af   :  { %v3881_v12 = vpop.eup %3880  ;;  %v1403_v1 = vsel %vm1389_vm1, %v1358_v5, 0  ;;  %v1406_v19 = vsel %vm1389_vm1, %v1359_v42, 0  ;;  %v1360_v28 = vmul.f32 %v1344_v54, %v4508_v59  ;;  %v1345_v29 = vadd.f32 1.0, %v3871_v37 }
 0x1b0   :  { %v1519_v15 = vand.u32 4294901760, %v1518_v63  ;;  %v4978_v56 = vand.u32 4294901760, %v4567_v11  ;;  %v4976_v45 = vand.u32 4294901760, %v4570_v3  ;;  %v4577_v26 = vand.u32 4294901760, %v1403_v1 }
 0x1b1   :  { %v4579_v44 = vand.u32 4294901760, %v1406_v19  ;;  %v1409_v53 = vsel %vm1389_vm1, %v1360_v28, 0  ;;  %v1361_v21 = vmul.f32 %v1345_v29, %v4506_v18  ;;  %v1346_v16 = vadd.f32 1.0, %v3877_v58 }
 0x1b2   :  { %v3883_v17 = vpop.eup %3882  ;;  %3198 = vmatprep.mubr.f32.mxu0 %v1519_v15  ;;  %v1538_v59 = vsub.f32 %v4567_v11, %v4978_v56  ;;  %v1548_v37 = vsub.f32 %v4570_v3, %v4976_v45  ;;  %v4590_v8 = vsub.f32 %v1403_v1, %v4577_v26  ;;  %v4592_v4 = vand.u32 4294901760, %v1409_v53 }
 0x1b3   :  { %3199 = vmatmul.mubr.f32.vlgmr.msra.gmra.mrb[16].mxu0 %v1529_v51  ;;  %v4595_v5 = vsub.f32 %v1406_v19, %v4579_v44  ;;  %v1412_v18 = vsel %vm1389_vm1, %v1361_v21, 0  ;;  %v1362_v58 = vmul.f32 %v1346_v16, %v4514_v0  ;;  %v1347_v42 = vadd.f32 1.0, %v3875_v46 }
 0x1b4   :  { %v3885_v54 = vpop.eup %3884  ;;  %v1539_v63 = vand.u32 4294901760, %v1538_v59  ;;  %v1549_v28 = vand.u32 4294901760, %v1548_v37  ;;  %v4977_v29 = vand.u32 4294901760, %v4590_v8  ;;  %v4601_v15 = vsub.f32 %v1409_v53, %v4592_v4 }
 0x1b5   :  { %v4979_v1 = vand.u32 4294901760, %v4595_v5  ;;  %v4604_v45 = vand.u32 4294901760, %v1412_v18  ;;  %v1415_v51 = vsel %vm1389_vm1, %v1362_v58, 0  ;;  %v1363_v19 = vmul.f32 %v1347_v42, %v4512_v47 }
 0x1b6   :  { %3201 = vmatprep.mubr.f32.mxu0 %v1539_v63  ;;  %v1558_v0 = vsub.f32 %v4590_v8, %v4977_v29  ;;  %v4981_v46 = vand.u32 4294901760, %v4601_v15  ;;  %v4612_v21 = vand.u32 4294901760, %v1415_v51  ;;  %v1348_v16 = vadd.f32 1.0, %v3881_v12 }
 0x1b7   :  { %v3887_v53 = vpop.eup %3886  ;;  %3202 = vmatmul.mubr.f32.gmra.mrb[18].mxu0 %v1549_v28  ;;  %v1568_v59 = vsub.f32 %v4595_v5, %v4979_v1  ;;  %v4618_v37 = vsub.f32 %v1412_v18, %v4604_v45  ;;  %v1418_v47 = vsel %vm1389_vm1, %v1363_v19, 0  ;;  %v1349_v58 = vadd.f32 1.0, %v3879_v22 }
 0x1b8   :  { %v3889_v42 = vpop.eup %3888  ;;  %v1559_v63 = vand.u32 4294901760, %v1558_v0  ;;  %v1578_v29 = vsub.f32 %v4601_v15, %v4981_v46  ;;  %v4625_v12 = vsub.f32 %v1415_v51, %v4612_v21  ;;  %v4627_v28 = vand.u32 4294901760, %v1418_v47 }
 0x1b9   :  { %v1569_v56 = vand.u32 4294901760, %v1568_v59  ;;  %v1587_v1 = vand.u32 4294901760, %v4618_v37  ;;  %v1364_v18 = vmul.f32 %v1348_v16, %v4520_v13  ;;  %v1365_v39 = vmul.f32 %v1349_v58, %v4518_v60 }
 0x1ba   :  { %3204 = vmatprep.mubr.f32.mxu1 %v1559_v63  ;;  %v1579_v22 = vand.u32 4294901760, %v1578_v29  ;;  %v1597_v19 = vand.u32 4294901760, %v4625_v12  ;;  %v4634_v0 = vsub.f32 %v1418_v47, %v4627_v28  ;;  %v1350_v46 = vadd.f32 1.0, %v3885_v54 }
 0x1bb   :  { %3205 = vmatmul.mubr.f32.vlgmr.msra.gmra.mrb[0].mxu1 %v1569_v56  ;;  %v1588_v51 = vsub.f32 %v4618_v37, %v1587_v1  ;;  %v1421_v59 = vsel %vm1389_vm1, %v1364_v18, 0  ;;  %v1424_v55 = vsel %vm1389_vm1, %v1365_v39, 0  ;;  %v1351_v13 = vadd.f32 1.0, %v3883_v17 }
 0x1bc   :  { %3537 = vmatpush3.bf16.msra.mxu1 %v4390_v62  ;;  %3207 = vmatprep.mubr.f32.mxu1 %v1579_v22  ;;  %v1598_v60 = vsub.f32 %v4625_v12, %v1597_v19  ;;  %v1607_v29 = vand.u32 4294901760, %v4634_v0  ;;  %v4646_v54 = vand.u32 4294901760, %v1421_v59  ;;  %v4648_v56 = vand.u32 4294901760, %v1424_v55 }
 0x1bd   :  { %v1589_v16 = vand.u32 4294901760, %v1588_v51  ;;  %3539 = vmatprep.subr.bf16.mxu1 %v4405_v49  ;;  %v1366_v47 = vmul.f32 %v1350_v46, %v4530_v35  ;;  %v1367_v39 = vmul.f32 %v1351_v13, %v4526_v6  ;;  %v1352_v17 = vadd.f32 1.0, %v3889_v42 }
 0x1be   :  { %v1599_v62 = vand.u32 4294901760, %v1598_v60  ;;  %v1608_v58 = vsub.f32 %v4634_v0, %v1607_v29  ;;  %v4657_v63 = vsub.f32 %v1421_v59, %v4646_v54  ;;  %v4660_v18 = vsub.f32 %v1424_v55, %v4648_v56 }
 0x1bf   :  { %3208 = vmatmul.mubr.f32.gmra.mrb[2].mxu1 %v1589_v16  ;;  %v1427_v22 = vsel %vm1389_vm1, %v1366_v47, 0  ;;  %v1430_v51 = vsel %vm1389_vm1, %v1367_v39, 0  ;;  %v1368_v35 = vmul.f32 %v1352_v17, %v4539_v32  ;;  %v1353_v6 = vadd.f32 1.0, %v3887_v53 }
 0x1c0   :  { %3541 = vmatpush3.bf16.msra.mxu1 %v4405_v49  ;;  %3210 = vmatprep.mubr.f32.mxu1 %v1599_v62  ;;  %v1617_v46 = vand.u32 4294901760, %v4657_v63  ;;  %v1627_v42 = vand.u32 4294901760, %v4660_v18  ;;  %v4668_v59 = vand.u32 4294901760, %v1427_v22  ;;  %v1609_v13 = vand.u32 4294901760, %v1608_v58 }
 0x1c1   :  { %3543 = vmatprep.subr.bf16.mxu1 %v4429_v14  ;;  %v4671_v55 = vand.u32 4294901760, %v1430_v51  ;;  %v1433_v60 = vsel %vm1389_vm1, %v1368_v35, 0  ;;  %v1369_v16 = vmul.f32 %v1353_v6, %v4537_v9 }
 0x1c2   :  { %v1618_v49 = vsub.f32 %v4657_v63, %v1617_v46  ;;  %v1628_v32 = vsub.f32 %v4660_v18, %v1627_v42  ;;  %v4682_v53 = vsub.f32 %v1427_v22, %v4668_v59  ;;  %v4684_v47 = vand.u32 4294901760, %v1433_v60 }
 0x1c3   :  { %3211 = vmatmul.mubr.f32.gmra.mrb[4].mxu1 %v1609_v13  ;;  %v4687_v39 = vsub.f32 %v1430_v51, %v4671_v55  ;;  %v1436_v17 = vsel %vm1389_vm1, %v1369_v16, 0 }
 0x1c4   :  { %3545 = vmatpush3.bf16.msra.mxu1 %v4429_v14  ;;  %v1619_v9 = vand.u32 4294901760, %v1618_v49  ;;  %v1637_v62 = vand.u32 4294901760, %v4682_v53  ;;  %v4693_v58 = vsub.f32 %v1433_v60, %v4684_v47  ;;  %v1629_v35 = vand.u32 4294901760, %v1628_v32 }
 0x1c5   :  { %3547 = vmatprep.subr.bf16.mxu1 %v4433_v33  ;;  %v1647_v22 = vand.u32 4294901760, %v4687_v39  ;;  %v4697_v6 = vand.u32 4294901760, %v1436_v17 }
 0x1c6   :  { %3213 = vmatprep.mubr.f32.mxu1 %v1619_v9  ;;  %v1638_v51 = vsub.f32 %v4682_v53, %v1637_v62  ;;  %v1657_v14 = vand.u32 4294901760, %v4693_v58 }
 0x1c7   :  { %3214 = vmatmul.mubr.f32.gmra.mrb[6].mxu1 %v1629_v35  ;;  %v1648_v13 = vsub.f32 %v4687_v39, %v1647_v22  ;;  %v4707_v60 = vsub.f32 %v1436_v17, %v4697_v6 }
 0x1c8   :  { %3549 = vmatpush3.bf16.msra.mxu1 %v4433_v33  ;;  %v1639_v16 = vand.u32 4294901760, %v1638_v51  ;;  %v1658_v49 = vsub.f32 %v4693_v58, %v1657_v14 }
 0x1c9   :  { %v1649_v32 = vand.u32 4294901760, %v1648_v13  ;;  %3551 = vmatprep.subr.bf16.mxu1 %v4447_v61  ;;  %v1667_v9 = vand.u32 4294901760, %v4707_v60  ;;  %v5005_v13 = vand.u32 4294901760, %v4535_v25 }
 0x1ca   :  { %3216 = vmatprep.mubr.f32.mxu1 %v1639_v16  ;;  %v1659_v35 = vand.u32 4294901760, %v1658_v49  ;;  %v5006_v16 = vand.u32 4294901760, %v4567_v11  ;;  %v5007_v49 = vld [vmem:[#allocation5_spill] sm:$0xff] }
 0x1cb   :  { %3217 = vmatmul.mubr.f32.gmra.mrb[8].mxu1 %v1649_v32  ;;  %v1668_v17 = vsub.f32 %v4707_v60, %v1667_v9  ;;  %v5008_v32 = vand.u32 4294901760, %v5007_v49 }
 0x1cc   :  { %3553 = vmatpush3.bf16.msra.mxu1 %v4447_v61  ;;  %3219 = vmatprep.mubr.f32.mxu1 %v1659_v35  ;;  %v4997_v61 = vand.u32 4294901760, %v4372_v50  ;;  %v5001_v50 = vld [vmem:[#allocation3_spill] sm:$0xff]  ;;  %v5009_v35 = vld [vmem:[#allocation6_spill] sm:$0xff] }
 0x1cd   :  { %v1669_v33 = vand.u32 4294901760, %v1668_v17  ;;  %3555 = vmatprep.subr.bf16.mxu1 %v4455_v23  ;;  %v5010_v17 = vand.u32 4294901760, %v5009_v35 }
 0x1cf   :  { %3220 = vmatmul.mubr.f32.gmra.mrb[10].mxu1 %v1669_v33  ;;  %v3614_v33 = vpack.c.bf16 %v5010_v17, %v5008_v32 }
 0x1d0   :  { %3557 = vmatpush3.bf16.msra.mxu1 %v4455_v23  ;;  %3246 = vmatprep.mubr.f32.mxu1 %v4547_v24  ;;  %v4998_v23 = vld [vmem:[#allocation2_spill] sm:$0xff] }
 0x1d1   :  { %3559 = vmatprep.subr.bf16.mxu1 %v4459_v2 }
 0x1d3   :  { %3247 = vmatmul.mubr.f32.vlgmr.msra.gmra.mrb[12].mxu1 %v4528_v20 }
 0x1d4   :  { %3249 = vmatprep.mubr.f32.mxu1 %v4557_v10  ;;  %3561 = vmatpush3.bf16.msra.mxu1 %v4459_v2  ;;  %v4999_v2 = vand.u32 4294901760, %v4998_v23 }
 0x1d5   :  { %3563 = vmatprep.subr.bf16.mxu1 %v4463_v31 }
 0x1d7   :  { %3250 = vmatmul.mubr.f32.gmra.mrb[14].mxu1 %v4559_v52 }
 0x1d8   :  { %3252 = vmatprep.mubr.f32.mxu1 %v4577_v26  ;;  %3565 = vmatpush3.bf16.msra.mxu1 %v4463_v31  ;;  %v3606_v31 = vpack.c.bf16 %v4999_v2, %v4997_v61  ;;  %v5012_v61 = vand.u32 4294901760, %v4590_v8  ;;  %v5015_v2 = vld [vmem:[#allocation8_spill] sm:$0xff] }
 0x1d9   :  { %3567 = vmatprep.subr.bf16.mxu1 %v4467_v34 }
 0x1db   :  { %3253 = vmatmul.mubr.f32.gmra.mrb[0].mxu1 %v4579_v44 }
 0x1dc   :  { %3255 = vmatprep.mubr.f32.mxu1 %v4592_v4  ;;  %3569 = vmatpush3.bf16.msra.mxu1 %v4467_v34  ;;  %v5000_v34 = vand.u32 4294901760, %v4552_v57 }
 0x1dd   :  { %3571 = vmatprep.subr.bf16.mxu1 %v4471_v36 }
 0x1df   :  { %3256 = vmatmul.mubr.f32.gmra.mrb[2].mxu1 %v4604_v45 }
 0x1e0   :  { %3258 = vmatprep.mubr.f32.mxu1 %v4612_v21  ;;  %3573 = vmatpush3.bf16.msra.mxu1 %v4471_v36  ;;  %v5002_v36 = vand.u32 4294901760, %v5001_v50  ;;  %v5018_v50 = vand.u32 4294901760, %v4601_v15 }
 0x1e1   :  { %3575 = vmatprep.subr.bf16.mxu1 %v4475_v40 }
 0x1e3   :  { %3259 = vmatmul.mubr.f32.gmra.mrb[4].mxu1 %v4627_v28 }
 0x1e4   :  { %3261 = vmatprep.mubr.f32.mxu1 %v4646_v54  ;;  %3577 = vmatpush3.bf16.msra.mxu1 %v4475_v40  ;;  %v5003_v40 = vld [vmem:[#allocation4_spill] sm:$0xff] }
 0x1e5   :  { %3579 = vmatprep.subr.bf16.mxu1 %v4479_v41 }
 0x1e7   :  { %3262 = vmatmul.mubr.f32.gmra.mrb[6].mxu1 %v4648_v56 }
 0x1e8   :  { %3264 = vmatprep.mubr.f32.mxu1 %v4668_v59  ;;  %3581 = vmatpush3.bf16.msra.mxu1 %v4479_v41  ;;  %v5004_v41 = vand.u32 4294901760, %v5003_v40  ;;  %v5021_v40 = vld [vmem:[#allocation10_spill] sm:$0xff] }
 0x1e9   :  { %3583 = vmatprep.subr.bf16.mxu1 %v4306_v27 }
 0x1ea   :  { %v3610_v51 = vpack.c.bf16 %v5004_v41, %v5002_v36 }
 0x1eb   :  { %3265 = vmatmul.mubr.f32.gmra.mrb[8].mxu1 %v4671_v55 }
 0x1ec   :  { %3267 = vmatprep.mubr.f32.mxu1 %v4684_v47 }
 0x1ef   :  { %3268 = vmatmul.mubr.f32.gmra.mrb[10].mxu1 %v4697_v6 }
 0x1f0   :  { %3294 = vmatprep.mubr.f32.mxu1 %v4552_v57  ;;  %v5011_v57 = vand.u32 4294901760, %v4570_v3 }
 0x1f3   :  { %3295 = vmatmul.mubr.f32.vlgmr.msra.gmra.mrb[12].mxu1 %v4535_v25  ;;  %v5013_v25 = vld [vmem:[#allocation7_spill] sm:$0xff] }
 0x1f4   :  { %3297 = vmatprep.mubr.f32.mxu1 %v4567_v11  ;;  %3585 = vmatpush3.bf16.msra.mxu1 %v4306_v27  ;;  %v5014_v23 = vand.u32 4294901760, %v5013_v25  ;;  %v5016_v11 = vand.u32 4294901760, %v5015_v2 }
 0x1f5   :  { %3587 = vmatprep.subr.bf16.mxu1 %v4318_v38 }
 0x1f7   :  { %3298 = vmatmul.mubr.f32.gmra.mrb[14].mxu1 %v4570_v3  ;;  %v5019_v3 = vld [vmem:[#allocation9_spill] sm:$0xff] }
 0x1f8   :  { %3300 = vmatprep.mubr.f32.mxu1 %v4590_v8  ;;  %3589 = vmatpush3.bf16.msra.mxu1 %v4318_v38  ;;  %v5020_v36 = vand.u32 4294901760, %v5019_v3  ;;  %v5022_v8 = vand.u32 4294901760, %v5021_v40 }
 0x1f9   :  { %3591 = vmatprep.subr.bf16.mxu1 %v4330_v48 }
 0x1fa   :  { %v3622_v41 = vpack.c.bf16 %v5022_v8, %v5020_v36 }
 0x1fb   :  { %3301 = vmatmul.mubr.f32.gmra.mrb[0].mxu1 %v4595_v5 }
 0x1fc   :  { %3303 = vmatprep.mubr.f32.mxu1 %v4601_v15  ;;  %3593 = vmatpush3.bf16.msra.mxu1 %v4330_v48 }
 0x1fd   :  { %3595 = vmatprep.subr.bf16.mxu1 %v4342_v7 }
 0x1ff   :  { %3304 = vmatmul.mubr.f32.gmra.mrb[2].mxu1 %v4618_v37 }
 0x200   :  { %3306 = vmatprep.mubr.f32.mxu1 %v4625_v12  ;;  %3597 = vmatpush3.bf16.msra.mxu1 %v4342_v7 }
 0x201   :  { %3599 = vmatprep.subr.bf16.mxu1 %v4354_v30 }
 0x203   :  { %3307 = vmatmul.mubr.f32.gmra.mrb[4].mxu1 %v4634_v0 }
 0x204   :  { %3309 = vmatprep.mubr.f32.mxu1 %v4657_v63  ;;  %3601 = vmatpush3.bf16.msra.mxu1 %v4354_v30 }
 0x205   :  { %3603 = vmatprep.subr.bf16.mxu1 %v4366_v43 }
 0x207   :  { %3310 = vmatmul.mubr.f32.gmra.mrb[6].mxu1 %v4660_v18 }
 0x208   :  { %3312 = vmatprep.mubr.f32.mxu1 %v4682_v53  ;;  %3605 = vmatpush3.bf16.msra.mxu1 %v4366_v43 }
 0x209   :  { %3607 = vmatprep.subr.bf16.mxu1 %v3606_v31 }
 0x20b   :  { %3313 = vmatmul.mubr.f32.gmra.mrb[8].mxu1 %v4687_v39 }
 0x20c   :  { %3315 = vmatprep.mubr.f32.mxu1 %v4693_v58 }
 0x20f   :  { %3316 = vmatmul.mubr.f32.gmra.mrb[10].mxu1 %v4707_v60 }
 0x210   :  { %3342 = vmatprep.mubr.f32.mxu1 %v5000_v34  ;;  %v3618_v34 = vpack.c.bf16 %v5016_v11, %v5014_v23 }
 0x213   :  { %3343 = vmatmul.mubr.f32.vlgmr.msra.gmra.mrb[12].mxu1 %v5005_v13  ;;  %v5025_v13 = vld [vmem:[#allocation12_spill] sm:$0xff] }
 0x214   :  { %3345 = vmatprep.mubr.f32.mxu1 %v5006_v16  ;;  %3609 = vmatpush3.bf16.msra.mxu1 %v3606_v31  ;;  %v5017_v31 = vand.u32 4294901760, %v4595_v5  ;;  %v5023_v5 = vld [vmem:[#allocation11_spill] sm:$0xff]  ;;  %v5026_v15 = vand.u32 4294901760, %v5025_v13 }
 0x215   :  { %3611 = vmatprep.subr.bf16.mxu1 %v3610_v51 }
 0x217   :  { %3346 = vmatmul.mubr.f32.gmra.mrb[14].mxu1 %v5011_v57 }
 0x218   :  { %3348 = vmatprep.mubr.f32.mxu1 %v5012_v61  ;;  %3613 = vmatpush3.bf16.msra.mxu1 %v3610_v51  ;;  %v5024_v51 = vand.u32 4294901760, %v5023_v5 }
 0x219   :  { %3615 = vmatprep.subr.bf16.mxu1 %v3614_v33 }
 0x21a   :  { %v3626_v16 = vpack.c.bf16 %v5026_v15, %v5024_v51 }
 0x21b   :  { %3349 = vmatmul.mubr.f32.gmra.mrb[0].mxu1 %v5017_v31 }
 0x21c   :  { %3351 = vmatprep.mubr.f32.mxu1 %v5018_v50  ;;  %3617 = vmatpush3.bf16.msra.mxu1 %v3614_v33 }
 0x21d   :  { %3619 = vmatprep.subr.bf16.mxu1 %v3618_v34 }
 0x21f   :  { %3352 = vmatmul.mubr.f32.gmra.mrb[2].mxu1 %v1587_v1 }
 0x220   :  { %3354 = vmatprep.mubr.f32.mxu1 %v1597_v19  ;;  %3621 = vmatpush3.bf16.msra.mxu1 %v3618_v34 }
 0x221   :  { %3623 = vmatprep.subr.bf16.mxu1 %v3622_v41 }
 0x223   :  { %3355 = vmatmul.mubr.f32.gmra.mrb[4].mxu1 %v1607_v29 }
 0x224   :  { %3357 = vmatprep.mubr.f32.mxu1 %v1617_v46  ;;  %3625 = vmatpush3.bf16.msra.mxu1 %v3622_v41 }
 0x225   :  { %3627 = vmatprep.subr.bf16.mxu1 %v3626_v16 }
 0x227   :  { %3358 = vmatmul.mubr.f32.gmra.mrb[6].mxu1 %v1627_v42 }
 0x228   :  { %3360 = vmatprep.mubr.f32.mxu1 %v1637_v62  ;;  %3629 = vmatpush3.bf16.msra.mxu1 %v3626_v16 }
 0x229   :  { %3631 = vmatprep.subr.bf16.mxu1 %v4306_v27 }
 0x22b   :  { %3361 = vmatmul.mubr.f32.gmra.mrb[8].mxu1 %v1647_v22 }
 0x22c   :  { %3363 = vmatprep.mubr.f32.mxu1 %v1657_v14 }
 0x22f   :  { %3364 = vmatmul.mubr.f32.gmra.mrb[10].mxu1 %v1667_v9 }
 0x230   :  { %3390 = vmatprep.mubr.f32.mxu1 %v4547_v24 }
 0x233   :  { %3391 = vmatmul.mubr.f32.vlgmr.msra.gmra.mrb[12].mxu1 %v4528_v20 }
 0x234   :  { %3393 = vmatprep.mubr.f32.mxu1 %v4557_v10  ;;  %3633 = vmatpush3.bf16.msra.mxu1 %v4306_v27 }
 0x235   :  { %3635 = vmatprep.subr.bf16.mxu1 %v4318_v38 }
 0x237   :  { %3394 = vmatmul.mubr.f32.gmra.mrb[14].mxu1 %v4559_v52 }
 0x238   :  { %3396 = vmatprep.mubr.f32.mxu1 %v4577_v26  ;;  %3637 = vmatpush3.bf16.msra.mxu1 %v4318_v38 }
 0x239   :  { %3639 = vmatprep.subr.bf16.mxu1 %v4330_v48 }
 0x23b   :  { %3397 = vmatmul.mubr.f32.gmra.mrb[0].mxu1 %v4579_v44 }
 0x23c   :  { %3399 = vmatprep.mubr.f32.mxu1 %v4592_v4  ;;  %3641 = vmatpush3.bf16.msra.mxu1 %v4330_v48 }
 0x23d   :  { %3643 = vmatprep.subr.bf16.mxu1 %v4342_v7 }
 0x23f   :  { %3400 = vmatmul.mubr.f32.gmra.mrb[2].mxu1 %v4604_v45 }
 0x240   :  { %3402 = vmatprep.mubr.f32.mxu1 %v4612_v21  ;;  %3645 = vmatpush3.bf16.msra.mxu1 %v4342_v7 }
 0x241   :  { %3647 = vmatprep.subr.bf16.mxu1 %v4354_v30 }
 0x243   :  { %3403 = vmatmul.mubr.f32.gmra.mrb[4].mxu1 %v4627_v28 }
 0x244   :  { %3405 = vmatprep.mubr.f32.mxu1 %v4646_v54  ;;  %3649 = vmatpush3.bf16.msra.mxu1 %v4354_v30  ;;  %v2693_v30 = vld [vmem:[%s4948_s4] ss:$0 sm:$0xff] }
 0x245   :  { %3651 = vmatprep.subr.bf16.mxu1 %v4366_v43 }
 0x247   :  { %3406 = vmatmul.mubr.f32.gmra.mrb[6].mxu1 %v4648_v56 }
 0x248   :  { %3408 = vmatprep.mubr.f32.mxu1 %v4668_v59  ;;  %3653 = vmatpush3.bf16.msra.mxu1 %v4366_v43 }
 0x24b   :  { %3409 = vmatmul.mubr.f32.gmra.mrb[8].mxu1 %v4671_v55 }
 0x24c   :  { %3411 = vmatprep.mubr.f32.mxu1 %v4684_v47 }
 0x24f   :  { %3412 = vmatmul.mubr.f32.gmra.mrb[10].mxu1 %v4697_v6 }
 0x250   :  { %3438 = vmatprep.mubr.f32.mxu1 %v4547_v24 }
 0x253   :  { %3439 = vmatmul.mubr.f32.vlgmr.msra.gmra.mrb[12].mxu1 %v4528_v20 }
 0x254   :  { %3441 = vmatprep.mubr.f32.mxu1 %v4557_v10 }
 0x257   :  { %3442 = vmatmul.mubr.f32.gmra.mrb[14].mxu1 %v4559_v52 }
 0x258   :  { %3444 = vmatprep.mubr.f32.mxu1 %v4577_v26 }
 0x25b   :  { %3445 = vmatmul.mubr.f32.gmra.mrb[0].mxu1 %v4579_v44 }
 0x25c   :  { %3447 = vmatprep.mubr.f32.mxu1 %v4592_v4 }
 0x25f   :  { %3448 = vmatmul.mubr.f32.gmra.mrb[2].mxu1 %v4604_v45 }
 0x260   :  { %3450 = vmatprep.mubr.f32.mxu1 %v4612_v21 }
 0x263   :  { %3451 = vmatmul.mubr.f32.gmra.mrb[4].mxu1 %v4627_v28 }
 0x264   :  { %3453 = vmatprep.mubr.f32.mxu1 %v4646_v54 }
 0x267   :  { %3454 = vmatmul.mubr.f32.gmra.mrb[6].mxu1 %v4648_v56 }
 0x268   :  { %3456 = vmatprep.mubr.f32.mxu1 %v4668_v59 }
 0x26b   :  { %3457 = vmatmul.mubr.f32.gmra.mrb[8].mxu1 %v4671_v55 }
 0x26c   :  { %3459 = vmatprep.mubr.f32.mxu1 %v4684_v47 }
 0x26f   :  { %3460 = vmatmul.mubr.f32.gmra.mrb[10].mxu1 %v4697_v6 }
 0x286   :  { %v3200_v27 = vpop.f32.mrb[16].mxu0 }
 0x287   :  { %v1521_v38 = vpop.f32.mrb[17].mxu0  ;;  %v1532_v43 = vadd.f32 %v3200_v27, %v2693_v30 }
 0x288   :  { %v1522_v20 = vadd.f32 %v2693_v30, %v1521_v38 }
 0x28a   :  { %v3203_v48 = vpop.f32.mrb[18].mxu0 }
 0x28b   :  { %v1541_v7 = vpop.f32.mrb[19].mxu0  ;;  %v1552_v26 = vadd.f32 %v3203_v48, %v2693_v30 }
 0x28c   :  { %v1542_v44 = vadd.f32 %v2693_v30, %v1541_v7 }
 0x326   :  { %v3440_v24 = vpop.f32.mrb[12].mxu1 }
 0x327   :  { %v3683_v10 = vadd.f32 %v3440_v24, %v1532_v43  ;;  %v2578_v52 = vpop.f32.mrb[13].mxu1 }
 0x328   :  { %v3685_v45 = vadd.f32 %v2578_v52, %v1522_v20 }
 0x329   :  { %2673 = vst.msk [vmem:[%s4949_s5 + $0x8] sm:$0xff] %vm47_vm0, %v3683_v10 }
 0x32a   :  { %2672 = vst.msk [vmem:[%s4949_s5] sm:$0xff] %vm47_vm0, %v3685_v45  ;;  %v3443_v4 = vpop.f32.mrb[14].mxu1 }
 0x32b   :  { %v3687_v1 = vadd.f32 %v3443_v4, %v1552_v26  ;;  %v2590_v21 = vpop.f32.mrb[15].mxu1 }
 0x32c   :  { %v3689_v37 = vadd.f32 %v2590_v21, %v1542_v44 }
 0x32d   :  { %2675 = vst.msk [vmem:[%s4949_s5 + $0x18] sm:$0xff] %vm47_vm0, %v3687_v1 }
 0x32e   :  { %2674 = vst.msk [vmem:[%s4949_s5 + $0x10] sm:$0xff] %vm47_vm0, %v3689_v37  ;;  %v3446_v12 = vpop.f32.mrb[0].mxu1 }
 0x32f   :  { %v3690_v28 = vadd.f32 %v3446_v12, %v2693_v30  ;;  %v2602_v19 = vpop.f32.mrb[1].mxu1 }
 0x330   :  { %v3691_v0 = vadd.f32 %v2693_v30, %v2602_v19 }
 0x331   :  { %2677 = vst.msk [vmem:[%s4949_s5 + $0x28] sm:$0xff] %vm47_vm0, %v3690_v28 }
 0x332   :  { %2676 = vst.msk [vmem:[%s4949_s5 + $0x20] sm:$0xff] %vm47_vm0, %v3691_v0  ;;  %v3449_v29 = vpop.f32.mrb[2].mxu1 }
 0x333   :  { %v3692_v54 = vadd.f32 %v3449_v29, %v2693_v30  ;;  %v2614_v56 = vpop.f32.mrb[3].mxu1 }
 0x334   :  { %v3693_v63 = vadd.f32 %v2693_v30, %v2614_v56 }
 0x335   :  { %2679 = vst.msk [vmem:[%s4949_s5 + $0x38] sm:$0xff] %vm47_vm0, %v3692_v54 }
 0x336   :  { %2678 = vst.msk [vmem:[%s4949_s5 + $0x30] sm:$0xff] %vm47_vm0, %v3693_v63  ;;  %v3452_v18 = vpop.f32.mrb[4].mxu1 }
 0x337   :  { %v3694_v46 = vadd.f32 %v3452_v18, %v2693_v30  ;;  %v2626_v42 = vpop.f32.mrb[5].mxu1 }
 0x338   :  { %v3695_v59 = vadd.f32 %v2693_v30, %v2626_v42 }
 0x339   :  { %2681 = vst.msk [vmem:[%s4949_s5 + $0x48] sm:$0xff] %vm47_vm0, %v3694_v46 }
 0x33a   :  { %2680 = vst.msk [vmem:[%s4949_s5 + $0x40] sm:$0xff] %vm47_vm0, %v3695_v59  ;;  %v3455_v55 = vpop.f32.mrb[6].mxu1 }
 0x33b   :  { %v3696_v53 = vadd.f32 %v3455_v55, %v2693_v30  ;;  %v2638_v47 = vpop.f32.mrb[7].mxu1 }
 0x33c   :  { %v3697_v39 = vadd.f32 %v2693_v30, %v2638_v47 }
 0x33d   :  { %2683 = vst.msk [vmem:[%s4949_s5 + $0x58] sm:$0xff] %vm47_vm0, %v3696_v53 }
 0x33e   :  { %2682 = vst.msk [vmem:[%s4949_s5 + $0x50] sm:$0xff] %vm47_vm0, %v3697_v39  ;;  %v3458_v62 = vpop.f32.mrb[8].mxu1 }
 0x33f   :  { %v3698_v58 = vadd.f32 %v3458_v62, %v2693_v30  ;;  %v2650_v22 = vpop.f32.mrb[9].mxu1 }
 0x340   :  { %v3699_v6 = vadd.f32 %v2693_v30, %v2650_v22 }
 0x341   :  { %2685 = vst.msk [vmem:[%s4949_s5 + $0x68] sm:$0xff] %vm47_vm0, %v3698_v58 }
 0x342   :  { %2684 = vst.msk [vmem:[%s4949_s5 + $0x60] sm:$0xff] %vm47_vm0, %v3699_v6  ;;  %v3461_v14 = vpop.f32.mrb[10].mxu1 }
 0x343   :  { %v3700_v60 = vadd.f32 %v3461_v14, %v2693_v30  ;;  %v2662_v9 = vpop.f32.mrb[11].mxu1 }
 0x344   :  { %v3701_v49 = vadd.f32 %v2693_v30, %v2662_v9 }
 0x345   :  { %2687 = vst.msk [vmem:[%s4949_s5 + $0x78] sm:$0xff] %vm47_vm0, %v3700_v60 }
 0x346   :  { %2686 = vst.msk [vmem:[%s4949_s5 + $0x70] sm:$0xff] %vm47_vm0, %v3701_v49 }

</bundles_post_ra>
